<compile_context>
chip_gen: v7x
topology: tpu7x:2x2x1
jax: 0.10.0
libtpu: 0.0.40
codegen_flags: <defaults>
</compile_context>

<pallas_src>
import functools

import jax
import jax.numpy as jnp
from jax import lax
from jax.experimental import pallas as pl
from jax.experimental.pallas import tpu as pltpu


def _gru_kernel(n_layers, T, Hp, Tc, unroll, *refs):
    """Multi-layer GRU recurrence + output projection for one batch block.

    refs layout:
      gi0                      (T, TB, 3Hp)  layer-0 input projections (biases folded), f32
      [w_hh_l (Hp,3Hp) cdt, b_hn_l (1,Hp) f32]      for l in 0..n_layers-1
      [w_ih_l (Hp,3Hp) cdt, b_i_l (1,3Hp) f32]      for l in 1..n_layers-1
      w_out (Hp, C) f32, b_out (1, C) f32
      out   (TB, C) f32
      [seq_buf (T,TB,Hp) f32, gi_buf (Tc,TB,3Hp) f32]   scratch, only if n_layers > 1
    """
    idx = 0
    gi0_ref = refs[idx]; idx += 1
    hh = []
    for _ in range(n_layers):
        hh.append((refs[idx], refs[idx + 1])); idx += 2
    ih = [None]
    for _ in range(1, n_layers):
        ih.append((refs[idx], refs[idx + 1])); idx += 2
    w_out_ref = refs[idx]; b_out_ref = refs[idx + 1]; idx += 2
    out_ref = refs[idx]; idx += 1
    if n_layers > 1:
        seq_buf, gi_buf = refs[idx], refs[idx + 1]
    else:
        seq_buf = gi_buf = None

    TB = out_ref.shape[0]
    cdt = hh[0][0].dtype       # MXU input dtype (bf16 by default, f32 optional)

    def make_step(gi_read, w_hh, b_hn_b, write_seq):
        def step(t, h_prev):
            gi = gi_read(t)                                   # (TB, 3Hp) f32
            # Single fused hidden-to-hidden matmul per step; bf16 in, f32 acc.
            gh = jnp.dot(h_prev.astype(cdt), w_hh,
                         preferred_element_type=jnp.float32)  # (TB, 3Hp)
            rz = jax.nn.sigmoid(gi[:, :2 * Hp] + gh[:, :2 * Hp])
            r = rz[:, :Hp]
            z = rz[:, Hp:]
            n = jnp.tanh(gi[:, 2 * Hp:] + r * (gh[:, 2 * Hp:] + b_hn_b))
            h = n + z * (h_prev - n)        # == (1-z)*n + z*h_prev
            if write_seq:
                seq_buf[t] = h              # lane-aligned unmasked store
            return h
        return step

    # ---- layer 0: GI precomputed in the wrapper ----
    w_hh0 = hh[0][0][...]
    b_hn0 = jnp.broadcast_to(hh[0][1][...], (TB, Hp))   # hoisted out of the loop
    step0 = make_step(lambda t: gi0_ref[t], w_hh0, b_hn0, n_layers > 1)
    h_last = lax.fori_loop(0, T, step0, jnp.zeros((TB, Hp), jnp.float32),
                           unroll=unroll)

    # ---- layers >= 1: chunked whole-sequence GI matmul + recurrence ----
    for l in range(1, n_layers):
        w_ih = ih[l][0][...]
        b_i = ih[l][1][...]
        w_hh = hh[l][0][...]
        b_hn_b = jnp.broadcast_to(hh[l][1][...], (TB, Hp))
        write_seq = l < n_layers - 1

        h_last = jnp.zeros((TB, Hp), jnp.float32)
        for c0 in range(0, T, Tc):
            tc = min(Tc, T - c0)
            # One MXU matmul per chunk, off the serial step critical path.
            seq_chunk = seq_buf[c0:c0 + tc].reshape(tc * TB, Hp)
            gi = jnp.dot(seq_chunk.astype(cdt), w_ih,
                         preferred_element_type=jnp.float32) + b_i
            gi_buf[0:tc] = gi.reshape(tc, TB, 3 * Hp)
            # seq_buf[c0:c0+tc] fully consumed into gi_buf -> in-place
            # overwrite by this layer's step outputs below is safe.
            step = make_step(lambda t, _c0=c0: gi_buf[t - _c0],
                             w_hh, b_hn_b, write_seq)
            h_last = lax.fori_loop(c0, c0 + tc, step, h_last, unroll=unroll)

    # Final classifier head (kept f32; C is tiny so cost is negligible).
    out_ref[...] = (jnp.dot(h_last, w_out_ref[...],
                            preferred_element_type=jnp.float32)
                    + b_out_ref[...])


def basic_gru_forward(tokens, params, n_layers, hidden_dim, block_b=None,
                      use_bf16=True):
    embed = params["embed"]
    B, T = tokens.shape
    E = embed.shape[1]
    H = hidden_dim
    C = params["w_out"].shape[1]
    Hp = 128 * ((H + 127) // 128)           # lane-aligned gate strip width
    cdt = jnp.bfloat16 if use_bf16 else jnp.float32

    # TB selection: keep one block (grid=(1,)) on v5e/v6e (single TC -- extra
    # grid steps are pure overhead).  On v7x pass block_b=B//2 once B >= 16 so
    # the "parallel" grid axis shards the batch across both TensorCores.
    TB = B if block_b is None else block_b
    assert B % TB == 0 and (TB == B or TB % 8 == 0)

    # ---- wrapper-side packing / padding / bias folding (XLA glue) ----
    def pack_layer(l):
        w_ih = params[f"w_ih_{l}"]            # (3, in, H)
        w_hh = params[f"w_hh_{l}"]            # (3, H, H)
        b_ih = params[f"b_ih_{l}"]            # (3, 1, H)
        b_hh = params[f"b_hh_{l}"]            # (3, 1, H)

        def cat_pad_cols(ws):                 # each (rows, H) -> (rows, 3Hp)
            return jnp.concatenate(
                [jnp.pad(w, ((0, 0), (0, Hp - H))) for w in ws], axis=1)

        def pad_rows(w):                      # (H, cols) -> (Hp, cols), zeros
            return jnp.pad(w, ((0, Hp - w.shape[0]), (0, 0)))

        w_ih_cat = cat_pad_cols([w_ih[0], w_ih[1], w_ih[2]])   # (in, 3Hp)
        if l > 0:
            w_ih_cat = pad_rows(w_ih_cat)                      # (Hp, 3Hp)
        w_hh_cat = pad_rows(cat_pad_cols([w_hh[0], w_hh[1], w_hh[2]]))  # (Hp,3Hp)
        # r/z hidden biases folded into the input-side bias; b_in kept there too.
        b_i_cat = cat_pad_cols([b_ih[0] + b_hh[0], b_ih[1] + b_hh[1], b_ih[2]])
        b_hn = jnp.pad(b_hh[2], ((0, 0), (0, Hp - H)))         # (1, Hp)
        return w_ih_cat, w_hh_cat, b_i_cat, b_hn

    packed = [pack_layer(l) for l in range(n_layers)]
    w_out_p = jnp.pad(params["w_out"], ((0, Hp - H), (0, 0)))  # (Hp, C)

    # Embedding gather is glue and stays in plain JAX.
    x = embed[tokens].astype(jnp.float32)                      # (B, T, E)

    # Time-major transpose of x BEFORE the layer-0 projection (E << 3Hp bytes),
    # then one (T*B, E) @ (E, 3Hp) matmul with the biases folded in.
    w_i0, _, b_i0, _ = packed[0]
    x_tm = jnp.transpose(x, (1, 0, 2)).reshape(T * B, E)       # (T*B, E)
    if use_bf16:
        gi0 = jnp.dot(x_tm.astype(jnp.bfloat16), w_i0.astype(jnp.bfloat16),
                      preferred_element_type=jnp.float32)
    else:
        gi0 = jnp.dot(x_tm, w_i0, precision=jax.lax.Precision.HIGHEST)
    gi0 = (gi0 + b_i0).reshape(T, B, 3 * Hp)                   # (T, B, 3Hp) f32

    args = [gi0]
    for l in range(n_layers):
        args += [packed[l][1].astype(cdt), packed[l][3]]       # w_hh (cdt), b_hn
    for l in range(1, n_layers):
        args += [packed[l][0].astype(cdt), packed[l][2]]       # w_ih (cdt), b_i
    args += [w_out_p, params["b_out"]]

    # GI chunk size for layers >= 1 (bounds gi_buf VMEM; Tc == T at toy sizes).
    gi_step_bytes = TB * 3 * Hp * 4
    Tc = max(1, min(T, (4 * 1024 * 1024) // gi_step_bytes))
    # Full unroll only while the per-step intermediates are a few vregs.
    unroll = True if gi_step_bytes <= 64 * 1024 else 2

    scratch_shapes = []
    if n_layers > 1:
        scratch_shapes = [pltpu.VMEM((T, TB, Hp), jnp.float32),
                          pltpu.VMEM((Tc, TB, 3 * Hp), jnp.float32)]

    # Explicit VMEM limit (v5e scoped default is only 16 MiB; v7x physical 64).
    weight_bytes = sum(int(a.size) * a.dtype.itemsize for a in args[1:])
    scratch_bytes = (T * TB * Hp + Tc * TB * 3 * Hp) * 4 if n_layers > 1 else 0
    est = 2 * T * TB * 3 * Hp * 4 + 2 * weight_bytes + scratch_bytes + (1 << 20)
    vmem_limit = int(min(max(2 * est, 16 * 1024 * 1024), 64 * 1024 * 1024))
    # TODO(synk): for very long sequences also chunk gi0 over T via a second
    # grid axis instead of streaming the whole (T, TB, 3Hp) block at once.

    kernel = functools.partial(_gru_kernel, n_layers, T, Hp, Tc, unroll)

    def _call(single_buffer_weights):
        def const_spec(a):
            nd = a.ndim
            idx_map = lambda b, _nd=nd: (0,) * _nd
            if single_buffer_weights:
                # Constant index_map -> a second pipeline buffer is pure VMEM waste.
                return pl.BlockSpec(a.shape, idx_map, pipeline_mode=pl.Buffered(1))
            return pl.BlockSpec(a.shape, idx_map)

        in_specs = [pl.BlockSpec((T, TB, 3 * Hp), lambda b: (0, b, 0))]
        in_specs += [const_spec(a) for a in args[1:]]
        out_specs = pl.BlockSpec((TB, C), lambda b: (b, 0))

        return pl.pallas_call(
            kernel,
            out_shape=jax.ShapeDtypeStruct((B, C), jnp.float32),
            grid_spec=pltpu.PrefetchScalarGridSpec(
                num_scalar_prefetch=0,
                grid=(B // TB,),
                in_specs=in_specs,
                out_specs=out_specs,
                scratch_shapes=scratch_shapes),
            compiler_params=pltpu.CompilerParams(
                dimension_semantics=("parallel",),
                vmem_limit_bytes=vmem_limit),
        )(*args)

    try:
        return _call(True)
    except Exception:
        # pl.Buffered(1) not accepted by this jax version -> default buffering.
        return _call(False)


def init_params(key, n_layers, hidden_dim, n_vocab, embed_dim, n_classes):
    H = hidden_dim
    scale = 1.0 / (H ** 0.5)
    ks = list(jax.random.split(key, 3 + 4 * n_layers))
    params = {"embed": jax.random.normal(ks[0], (n_vocab, embed_dim),
                                         jnp.float32)}
    idx = 1
    for l in range(n_layers):
        in_dim = embed_dim if l == 0 else H
        params[f"w_ih_{l}"] = jax.random.uniform(
            ks[idx], (3, in_dim, H), jnp.float32, -scale, scale); idx += 1
        params[f"w_hh_{l}"] = jax.random.uniform(
            ks[idx], (3, H, H), jnp.float32, -scale, scale); idx += 1
        params[f"b_ih_{l}"] = jax.random.uniform(
            ks[idx], (3, 1, H), jnp.float32, -scale, scale); idx += 1
        params[f"b_hh_{l}"] = jax.random.uniform(
            ks[idx], (3, 1, H), jnp.float32, -scale, scale); idx += 1
    params["w_out"] = jax.random.uniform(
        ks[idx], (H, n_classes), jnp.float32, -scale, scale); idx += 1
    params["b_out"] = jax.random.uniform(
        ks[idx], (1, n_classes), jnp.float32, -scale, scale)
    return params


def ref_forward(tokens, params, n_layers, hidden_dim):
    """Pure-JAX reference matching torch f32 semantics (eval-mode dropout = id)."""
    hi = jax.lax.Precision.HIGHEST
    mm = lambda a, b: jnp.dot(a, b, precision=hi)
    x = params["embed"][tokens].astype(jnp.float32)   # (B, T, E)
    B, T, _ = x.shape
    H = hidden_dim
    for l in range(n_layers):
        w_ih = params[f"w_ih_{l}"]; w_hh = params[f"w_hh_{l}"]
        b_ih = params[f"b_ih_{l}"]; b_hh = params[f"b_hh_{l}"]
        h = jnp.zeros((B, H), jnp.float32)
        outs = []
        for t in range(T):
            x_t = x[:, t, :]
            r = jax.nn.sigmoid(mm(x_t, w_ih[0]) + b_ih[0] + mm(h, w_hh[0]) + b_hh[0])
            z = jax.nn.sigmoid(mm(x_t, w_ih[1]) + b_ih[1] + mm(h, w_hh[1]) + b_hh[1])
            n = jnp.tanh(mm(x_t, w_ih[2]) + b_ih[2] + r * (mm(h, w_hh[2]) + b_hh[2]))
            h = (1.0 - z) * n + z * h
            outs.append(h)
        x = jnp.stack(outs, axis=1)
    h_t = x[:, -1, :]
    return mm(h_t, params["w_out"]) + params["b_out"][0]


if __name__ == "__main__":
    n_layers = 2
    hidden_dim = 32
    n_vocab = 50
    embed_dim = 16
    n_classes = 2
    B, T = 8, 8

    key = jax.random.PRNGKey(0)
    k_tok, k_par = jax.random.split(key)
    params = init_params(k_par, n_layers, hidden_dim, n_vocab, embed_dim,
                         n_classes)
    tokens = jax.random.randint(k_tok, (B, T), 0, n_vocab, dtype=jnp.int32)

    ref = ref_forward(tokens, params, n_layers, hidden_dim)

    # Default path: bf16 MXU inputs, f32 accumulation / gate math.
    logits = basic_gru_forward(tokens, params, n_layers, hidden_dim)
    jax.block_until_ready(logits)
    assert logits.shape == (B, n_classes), logits.shape
    assert jnp.allclose(logits, ref, atol=2e-2, rtol=2e-2), (
        jnp.max(jnp.abs(logits - ref)))

    # Strict f32 path keeps 1e-3 parity with the f32 torch semantics.
    logits_f32 = basic_gru_forward(tokens, params, n_layers, hidden_dim,
                                   use_bf16=False)
    jax.block_until_ready(logits_f32)
    assert jnp.allclose(logits_f32, ref, atol=1e-3, rtol=1e-3), (
        jnp.max(jnp.abs(logits_f32 - ref)))

    print("KERNEL_OK")
</pallas_src>

<mosaic_0001>
module attributes {stable_mosaic.version = 11 : i64} {
  func.func @_gru_kernel(%arg0: i32, %arg1: memref<8x8x384xf32, #tpu.memory_space<vmem>>, %arg2: memref<128x384xbf16, #tpu.memory_space<vmem>>, %arg3: memref<1x128xf32, #tpu.memory_space<vmem>>, %arg4: memref<128x384xbf16, #tpu.memory_space<vmem>>, %arg5: memref<1x128xf32, #tpu.memory_space<vmem>>, %arg6: memref<128x384xbf16, #tpu.memory_space<vmem>>, %arg7: memref<1x384xf32, #tpu.memory_space<vmem>>, %arg8: memref<128x2xf32, #tpu.memory_space<vmem>>, %arg9: memref<1x2xf32, #tpu.memory_space<vmem>>, %arg10: memref<8x2xf32, #tpu.memory_space<vmem>>, %arg11: memref<8x8x128xf32, #tpu.memory_space<vmem>>, %arg12: memref<8x8x384xf32, #tpu.memory_space<vmem>>) attributes {dimension_semantics = [#tpu.dimension_semantics<parallel>], iteration_bounds = array<i64: 1>, scalar_prefetch = 0 : i64, scratch_operands = 2 : i64, tpu.core_type = #tpu.core_type<tc>, window_params = [{transform_indices = @transform_0, window_bounds = array<i64: 8, 8, 384>}, {pipeline_mode = #tpu.pipeline_mode<synchronous>, transform_indices = @transform_1, window_bounds = array<i64: 128, 384>}, {pipeline_mode = #tpu.pipeline_mode<synchronous>, transform_indices = @transform_2, window_bounds = array<i64: 1, 128>}, {pipeline_mode = #tpu.pipeline_mode<synchronous>, transform_indices = @transform_3, window_bounds = array<i64: 128, 384>}, {pipeline_mode = #tpu.pipeline_mode<synchronous>, transform_indices = @transform_4, window_bounds = array<i64: 1, 128>}, {pipeline_mode = #tpu.pipeline_mode<synchronous>, transform_indices = @transform_5, window_bounds = array<i64: 128, 384>}, {pipeline_mode = #tpu.pipeline_mode<synchronous>, transform_indices = @transform_6, window_bounds = array<i64: 1, 384>}, {pipeline_mode = #tpu.pipeline_mode<synchronous>, transform_indices = @transform_7, window_bounds = array<i64: 128, 2>}, {pipeline_mode = #tpu.pipeline_mode<synchronous>, transform_indices = @transform_8, window_bounds = array<i64: 1, 2>}, {transform_indices = @transform_9, window_bounds = array<i64: 8, 2>}]} {
    %c0 = arith.constant 0 : index
    %c0_0 = arith.constant 0 : index
    %0 = vector.load %arg2[%c0, %c0_0] : memref<128x384xbf16, #tpu.memory_space<vmem>>, vector<128x384xbf16>
    %c0_1 = arith.constant 0 : index
    %c0_2 = arith.constant 0 : index
    %1 = vector.load %arg3[%c0_1, %c0_2] : memref<1x128xf32, #tpu.memory_space<vmem>>, vector<1x128xf32>
    %2 = vector.shape_cast %1 : vector<1x128xf32> to vector<1x128xf32>
    %3 = vector.broadcast %2 : vector<1x128xf32> to vector<8x128xf32>
    %cst = arith.constant 0.000000e+00 : f32
    %4 = vector.broadcast %cst : f32 to vector<8x128xf32>
    %c0_i32 = arith.constant 0 : i32
    %5 = arith.index_cast %c0_i32 : i32 to index
    %c0_3 = arith.constant 0 : index
    %c0_4 = arith.constant 0 : index
    %6 = vector.load %arg1[%5, %c0_3, %c0_4] : memref<8x8x384xf32, #tpu.memory_space<vmem>>, vector<1x8x384xf32>
    %7 = vector.shape_cast %6 : vector<1x8x384xf32> to vector<8x384xf32>
    %8 = arith.truncf %4 : vector<8x128xf32> to vector<8x128xbf16>
    %cst_5 = arith.constant dense<0.000000e+00> : vector<8x384xf32>
    %9 = tpu.matmul %8, %0, %cst_5 {dimension_numbers = #tpu.dot_dimension_numbers<[1], [0], [0], [1], [0, 0, 1, 1], [], []>} : vector<8x128xbf16>, vector<128x384xbf16>, vector<8x384xf32> -> vector<8x384xf32>
    %10 = vector.extract_strided_slice %7 {offsets = [0, 0], sizes = [8, 256], strides = [1, 1]} : vector<8x384xf32> to vector<8x256xf32>
    %11 = vector.extract_strided_slice %9 {offsets = [0, 0], sizes = [8, 256], strides = [1, 1]} : vector<8x384xf32> to vector<8x256xf32>
    %12 = arith.addf %10, %11 : vector<8x256xf32>
    %13 = arith.negf %12 : vector<8x256xf32>
    %14 = math.exp %13 : vector<8x256xf32>
    %cst_6 = arith.constant 1.000000e+00 : f32
    %15 = vector.broadcast %cst_6 : f32 to vector<8x256xf32>
    %16 = arith.addf %15, %14 : vector<8x256xf32>
    %17 = arith.divf %15, %16 : vector<8x256xf32>
    %18 = vector.extract_strided_slice %17 {offsets = [0, 0], sizes = [8, 128], strides = [1, 1]} : vector<8x256xf32> to vector<8x128xf32>
    %19 = vector.extract_strided_slice %17 {offsets = [0, 128], sizes = [8, 128], strides = [1, 1]} : vector<8x256xf32> to vector<8x128xf32>
    %20 = vector.extract_strided_slice %7 {offsets = [0, 256], sizes = [8, 128], strides = [1, 1]} : vector<8x384xf32> to vector<8x128xf32>
    %21 = vector.extract_strided_slice %9 {offsets = [0, 256], sizes = [8, 128], strides = [1, 1]} : vector<8x384xf32> to vector<8x128xf32>
    %22 = arith.addf %21, %3 : vector<8x128xf32>
    %23 = arith.mulf %18, %22 : vector<8x128xf32>
    %24 = arith.addf %20, %23 : vector<8x128xf32>
    %25 = math.tanh %24 : vector<8x128xf32>
    %26 = arith.subf %4, %25 : vector<8x128xf32>
    %27 = arith.mulf %19, %26 : vector<8x128xf32>
    %28 = arith.addf %25, %27 : vector<8x128xf32>
    %29 = arith.index_cast %c0_i32 : i32 to index
    %c0_7 = arith.constant 0 : index
    %c0_8 = arith.constant 0 : index
    %30 = vector.load %arg11[%29, %c0_7, %c0_8] : memref<8x8x128xf32, #tpu.memory_space<vmem>>, vector<1x8x128xf32>
    %31 = vector.shape_cast %30 : vector<1x8x128xf32> to vector<8x128xf32>
    %32 = vector.shape_cast %28 : vector<8x128xf32> to vector<1x8x128xf32>
    tpu.vector_store %arg11[%29, %c0_7, %c0_8], %32 {strides = array<i32>} : memref<8x8x128xf32, #tpu.memory_space<vmem>>, vector<1x8x128xf32>,
    %c1_i32 = arith.constant 1 : i32
    %33 = arith.index_cast %c1_i32 : i32 to index
    %c0_9 = arith.constant 0 : index
    %c0_10 = arith.constant 0 : index
    %34 = vector.load %arg1[%33, %c0_9, %c0_10] : memref<8x8x384xf32, #tpu.memory_space<vmem>>, vector<1x8x384xf32>
    %35 = vector.shape_cast %34 : vector<1x8x384xf32> to vector<8x384xf32>
    %36 = arith.truncf %28 : vector<8x128xf32> to vector<8x128xbf16>
    %cst_11 = arith.constant dense<0.000000e+00> : vector<8x384xf32>
    %37 = tpu.matmul %36, %0, %cst_11 {dimension_numbers = #tpu.dot_dimension_numbers<[1], [0], [0], [1], [0, 0, 1, 1], [], []>} : vector<8x128xbf16>, vector<128x384xbf16>, vector<8x384xf32> -> vector<8x384xf32>
    %38 = vector.extract_strided_slice %35 {offsets = [0, 0], sizes = [8, 256], strides = [1, 1]} : vector<8x384xf32> to vector<8x256xf32>
    %39 = vector.extract_strided_slice %37 {offsets = [0, 0], sizes = [8, 256], strides = [1, 1]} : vector<8x384xf32> to vector<8x256xf32>
    %40 = arith.addf %38, %39 : vector<8x256xf32>
    %41 = arith.negf %40 : vector<8x256xf32>
    %42 = math.exp %41 : vector<8x256xf32>
    %cst_12 = arith.constant 1.000000e+00 : f32
    %43 = vector.broadcast %cst_12 : f32 to vector<8x256xf32>
    %44 = arith.addf %43, %42 : vector<8x256xf32>
    %45 = arith.divf %43, %44 : vector<8x256xf32>
    %46 = vector.extract_strided_slice %45 {offsets = [0, 0], sizes = [8, 128], strides = [1, 1]} : vector<8x256xf32> to vector<8x128xf32>
    %47 = vector.extract_strided_slice %45 {offsets = [0, 128], sizes = [8, 128], strides = [1, 1]} : vector<8x256xf32> to vector<8x128xf32>
    %48 = vector.extract_strided_slice %35 {offsets = [0, 256], sizes = [8, 128], strides = [1, 1]} : vector<8x384xf32> to vector<8x128xf32>
    %49 = vector.extract_strided_slice %37 {offsets = [0, 256], sizes = [8, 128], strides = [1, 1]} : vector<8x384xf32> to vector<8x128xf32>
    %50 = arith.addf %49, %3 : vector<8x128xf32>
    %51 = arith.mulf %46, %50 : vector<8x128xf32>
    %52 = arith.addf %48, %51 : vector<8x128xf32>
    %53 = math.tanh %52 : vector<8x128xf32>
    %54 = arith.subf %28, %53 : vector<8x128xf32>
    %55 = arith.mulf %47, %54 : vector<8x128xf32>
    %56 = arith.addf %53, %55 : vector<8x128xf32>
    %57 = arith.index_cast %c1_i32 : i32 to index
    %c0_13 = arith.constant 0 : index
    %c0_14 = arith.constant 0 : index
    %58 = vector.load %arg11[%57, %c0_13, %c0_14] : memref<8x8x128xf32, #tpu.memory_space<vmem>>, vector<1x8x128xf32>
    %59 = vector.shape_cast %58 : vector<1x8x128xf32> to vector<8x128xf32>
    %60 = vector.shape_cast %56 : vector<8x128xf32> to vector<1x8x128xf32>
    tpu.vector_store %arg11[%57, %c0_13, %c0_14], %60 {strides = array<i32>} : memref<8x8x128xf32, #tpu.memory_space<vmem>>, vector<1x8x128xf32>,
    %c2_i32 = arith.constant 2 : i32
    %61 = arith.index_cast %c2_i32 : i32 to index
    %c0_15 = arith.constant 0 : index
    %c0_16 = arith.constant 0 : index
    %62 = vector.load %arg1[%61, %c0_15, %c0_16] : memref<8x8x384xf32, #tpu.memory_space<vmem>>, vector<1x8x384xf32>
    %63 = vector.shape_cast %62 : vector<1x8x384xf32> to vector<8x384xf32>
    %64 = arith.truncf %56 : vector<8x128xf32> to vector<8x128xbf16>
    %cst_17 = arith.constant dense<0.000000e+00> : vector<8x384xf32>
    %65 = tpu.matmul %64, %0, %cst_17 {dimension_numbers = #tpu.dot_dimension_numbers<[1], [0], [0], [1], [0, 0, 1, 1], [], []>} : vector<8x128xbf16>, vector<128x384xbf16>, vector<8x384xf32> -> vector<8x384xf32>
    %66 = vector.extract_strided_slice %63 {offsets = [0, 0], sizes = [8, 256], strides = [1, 1]} : vector<8x384xf32> to vector<8x256xf32>
    %67 = vector.extract_strided_slice %65 {offsets = [0, 0], sizes = [8, 256], strides = [1, 1]} : vector<8x384xf32> to vector<8x256xf32>
    %68 = arith.addf %66, %67 : vector<8x256xf32>
    %69 = arith.negf %68 : vector<8x256xf32>
    %70 = math.exp %69 : vector<8x256xf32>
    %cst_18 = arith.constant 1.000000e+00 : f32
    %71 = vector.broadcast %cst_18 : f32 to vector<8x256xf32>
    %72 = arith.addf %71, %70 : vector<8x256xf32>
    %73 = arith.divf %71, %72 : vector<8x256xf32>
    %74 = vector.extract_strided_slice %73 {offsets = [0, 0], sizes = [8, 128], strides = [1, 1]} : vector<8x256xf32> to vector<8x128xf32>
    %75 = vector.extract_strided_slice %73 {offsets = [0, 128], sizes = [8, 128], strides = [1, 1]} : vector<8x256xf32> to vector<8x128xf32>
    %76 = vector.extract_strided_slice %63 {offsets = [0, 256], sizes = [8, 128], strides = [1, 1]} : vector<8x384xf32> to vector<8x128xf32>
    %77 = vector.extract_strided_slice %65 {offsets = [0, 256], sizes = [8, 128], strides = [1, 1]} : vector<8x384xf32> to vector<8x128xf32>
    %78 = arith.addf %77, %3 : vector<8x128xf32>
    %79 = arith.mulf %74, %78 : vector<8x128xf32>
    %80 = arith.addf %76, %79 : vector<8x128xf32>
    %81 = math.tanh %80 : vector<8x128xf32>
    %82 = arith.subf %56, %81 : vector<8x128xf32>
    %83 = arith.mulf %75, %82 : vector<8x128xf32>
    %84 = arith.addf %81, %83 : vector<8x128xf32>
    %85 = arith.index_cast %c2_i32 : i32 to index
    %c0_19 = arith.constant 0 : index
    %c0_20 = arith.constant 0 : index
    %86 = vector.load %arg11[%85, %c0_19, %c0_20] : memref<8x8x128xf32, #tpu.memory_space<vmem>>, vector<1x8x128xf32>
    %87 = vector.shape_cast %86 : vector<1x8x128xf32> to vector<8x128xf32>
    %88 = vector.shape_cast %84 : vector<8x128xf32> to vector<1x8x128xf32>
    tpu.vector_store %arg11[%85, %c0_19, %c0_20], %88 {strides = array<i32>} : memref<8x8x128xf32, #tpu.memory_space<vmem>>, vector<1x8x128xf32>,
    %c3_i32 = arith.constant 3 : i32
    %89 = arith.index_cast %c3_i32 : i32 to index
    %c0_21 = arith.constant 0 : index
    %c0_22 = arith.constant 0 : index
    %90 = vector.load %arg1[%89, %c0_21, %c0_22] : memref<8x8x384xf32, #tpu.memory_space<vmem>>, vector<1x8x384xf32>
    %91 = vector.shape_cast %90 : vector<1x8x384xf32> to vector<8x384xf32>
    %92 = arith.truncf %84 : vector<8x128xf32> to vector<8x128xbf16>
    %cst_23 = arith.constant dense<0.000000e+00> : vector<8x384xf32>
    %93 = tpu.matmul %92, %0, %cst_23 {dimension_numbers = #tpu.dot_dimension_numbers<[1], [0], [0], [1], [0, 0, 1, 1], [], []>} : vector<8x128xbf16>, vector<128x384xbf16>, vector<8x384xf32> -> vector<8x384xf32>
    %94 = vector.extract_strided_slice %91 {offsets = [0, 0], sizes = [8, 256], strides = [1, 1]} : vector<8x384xf32> to vector<8x256xf32>
    %95 = vector.extract_strided_slice %93 {offsets = [0, 0], sizes = [8, 256], strides = [1, 1]} : vector<8x384xf32> to vector<8x256xf32>
    %96 = arith.addf %94, %95 : vector<8x256xf32>
    %97 = arith.negf %96 : vector<8x256xf32>
    %98 = math.exp %97 : vector<8x256xf32>
    %cst_24 = arith.constant 1.000000e+00 : f32
    %99 = vector.broadcast %cst_24 : f32 to vector<8x256xf32>
    %100 = arith.addf %99, %98 : vector<8x256xf32>
    %101 = arith.divf %99, %100 : vector<8x256xf32>
    %102 = vector.extract_strided_slice %101 {offsets = [0, 0], sizes = [8, 128], strides = [1, 1]} : vector<8x256xf32> to vector<8x128xf32>
    %103 = vector.extract_strided_slice %101 {offsets = [0, 128], sizes = [8, 128], strides = [1, 1]} : vector<8x256xf32> to vector<8x128xf32>
    %104 = vector.extract_strided_slice %91 {offsets = [0, 256], sizes = [8, 128], strides = [1, 1]} : vector<8x384xf32> to vector<8x128xf32>
    %105 = vector.extract_strided_slice %93 {offsets = [0, 256], sizes = [8, 128], strides = [1, 1]} : vector<8x384xf32> to vector<8x128xf32>
    %106 = arith.addf %105, %3 : vector<8x128xf32>
    %107 = arith.mulf %102, %106 : vector<8x128xf32>
    %108 = arith.addf %104, %107 : vector<8x128xf32>
    %109 = math.tanh %108 : vector<8x128xf32>
    %110 = arith.subf %84, %109 : vector<8x128xf32>
    %111 = arith.mulf %103, %110 : vector<8x128xf32>
    %112 = arith.addf %109, %111 : vector<8x128xf32>
    %113 = arith.index_cast %c3_i32 : i32 to index
    %c0_25 = arith.constant 0 : index
    %c0_26 = arith.constant 0 : index
    %114 = vector.load %arg11[%113, %c0_25, %c0_26] : memref<8x8x128xf32, #tpu.memory_space<vmem>>, vector<1x8x128xf32>
    %115 = vector.shape_cast %114 : vector<1x8x128xf32> to vector<8x128xf32>
    %116 = vector.shape_cast %112 : vector<8x128xf32> to vector<1x8x128xf32>
    tpu.vector_store %arg11[%113, %c0_25, %c0_26], %116 {strides = array<i32>} : memref<8x8x128xf32, #tpu.memory_space<vmem>>, vector<1x8x128xf32>,
    %c4_i32 = arith.constant 4 : i32
    %117 = arith.index_cast %c4_i32 : i32 to index
    %c0_27 = arith.constant 0 : index
    %c0_28 = arith.constant 0 : index
    %118 = vector.load %arg1[%117, %c0_27, %c0_28] : memref<8x8x384xf32, #tpu.memory_space<vmem>>, vector<1x8x384xf32>
    %119 = vector.shape_cast %118 : vector<1x8x384xf32> to vector<8x384xf32>
    %120 = arith.truncf %112 : vector<8x128xf32> to vector<8x128xbf16>
    %cst_29 = arith.constant dense<0.000000e+00> : vector<8x384xf32>
    %121 = tpu.matmul %120, %0, %cst_29 {dimension_numbers = #tpu.dot_dimension_numbers<[1], [0], [0], [1], [0, 0, 1, 1], [], []>} : vector<8x128xbf16>, vector<128x384xbf16>, vector<8x384xf32> -> vector<8x384xf32>
    %122 = vector.extract_strided_slice %119 {offsets = [0, 0], sizes = [8, 256], strides = [1, 1]} : vector<8x384xf32> to vector<8x256xf32>
    %123 = vector.extract_strided_slice %121 {offsets = [0, 0], sizes = [8, 256], strides = [1, 1]} : vector<8x384xf32> to vector<8x256xf32>
    %124 = arith.addf %122, %123 : vector<8x256xf32>
    %125 = arith.negf %124 : vector<8x256xf32>
    %126 = math.exp %125 : vector<8x256xf32>
    %cst_30 = arith.constant 1.000000e+00 : f32
    %127 = vector.broadcast %cst_30 : f32 to vector<8x256xf32>
    %128 = arith.addf %127, %126 : vector<8x256xf32>
    %129 = arith.divf %127, %128 : vector<8x256xf32>
    %130 = vector.extract_strided_slice %129 {offsets = [0, 0], sizes = [8, 128], strides = [1, 1]} : vector<8x256xf32> to vector<8x128xf32>
    %131 = vector.extract_strided_slice %129 {offsets = [0, 128], sizes = [8, 128], strides = [1, 1]} : vector<8x256xf32> to vector<8x128xf32>
    %132 = vector.extract_strided_slice %119 {offsets = [0, 256], sizes = [8, 128], strides = [1, 1]} : vector<8x384xf32> to vector<8x128xf32>
    %133 = vector.extract_strided_slice %121 {offsets = [0, 256], sizes = [8, 128], strides = [1, 1]} : vector<8x384xf32> to vector<8x128xf32>
    %134 = arith.addf %133, %3 : vector<8x128xf32>
    %135 = arith.mulf %130, %134 : vector<8x128xf32>
    %136 = arith.addf %132, %135 : vector<8x128xf32>
    %137 = math.tanh %136 : vector<8x128xf32>
    %138 = arith.subf %112, %137 : vector<8x128xf32>
    %139 = arith.mulf %131, %138 : vector<8x128xf32>
    %140 = arith.addf %137, %139 : vector<8x128xf32>
    %141 = arith.index_cast %c4_i32 : i32 to index
    %c0_31 = arith.constant 0 : index
    %c0_32 = arith.constant 0 : index
    %142 = vector.load %arg11[%141, %c0_31, %c0_32] : memref<8x8x128xf32, #tpu.memory_space<vmem>>, vector<1x8x128xf32>
    %143 = vector.shape_cast %142 : vector<1x8x128xf32> to vector<8x128xf32>
    %144 = vector.shape_cast %140 : vector<8x128xf32> to vector<1x8x128xf32>
    tpu.vector_store %arg11[%141, %c0_31, %c0_32], %144 {strides = array<i32>} : memref<8x8x128xf32, #tpu.memory_space<vmem>>, vector<1x8x128xf32>,
    %c5_i32 = arith.constant 5 : i32
    %145 = arith.index_cast %c5_i32 : i32 to index
    %c0_33 = arith.constant 0 : index
    %c0_34 = arith.constant 0 : index
    %146 = vector.load %arg1[%145, %c0_33, %c0_34] : memref<8x8x384xf32, #tpu.memory_space<vmem>>, vector<1x8x384xf32>
    %147 = vector.shape_cast %146 : vector<1x8x384xf32> to vector<8x384xf32>
    %148 = arith.truncf %140 : vector<8x128xf32> to vector<8x128xbf16>
    %cst_35 = arith.constant dense<0.000000e+00> : vector<8x384xf32>
    %149 = tpu.matmul %148, %0, %cst_35 {dimension_numbers = #tpu.dot_dimension_numbers<[1], [0], [0], [1], [0, 0, 1, 1], [], []>} : vector<8x128xbf16>, vector<128x384xbf16>, vector<8x384xf32> -> vector<8x384xf32>
    %150 = vector.extract_strided_slice %147 {offsets = [0, 0], sizes = [8, 256], strides = [1, 1]} : vector<8x384xf32> to vector<8x256xf32>
    %151 = vector.extract_strided_slice %149 {offsets = [0, 0], sizes = [8, 256], strides = [1, 1]} : vector<8x384xf32> to vector<8x256xf32>
    %152 = arith.addf %150, %151 : vector<8x256xf32>
    %153 = arith.negf %152 : vector<8x256xf32>
    %154 = math.exp %153 : vector<8x256xf32>
    %cst_36 = arith.constant 1.000000e+00 : f32
    %155 = vector.broadcast %cst_36 : f32 to vector<8x256xf32>
    %156 = arith.addf %155, %154 : vector<8x256xf32>
    %157 = arith.divf %155, %156 : vector<8x256xf32>
    %158 = vector.extract_strided_slice %157 {offsets = [0, 0], sizes = [8, 128], strides = [1, 1]} : vector<8x256xf32> to vector<8x128xf32>
    %159 = vector.extract_strided_slice %157 {offsets = [0, 128], sizes = [8, 128], strides = [1, 1]} : vector<8x256xf32> to vector<8x128xf32>
    %160 = vector.extract_strided_slice %147 {offsets = [0, 256], sizes = [8, 128], strides = [1, 1]} : vector<8x384xf32> to vector<8x128xf32>
    %161 = vector.extract_strided_slice %149 {offsets = [0, 256], sizes = [8, 128], strides = [1, 1]} : vector<8x384xf32> to vector<8x128xf32>
    %162 = arith.addf %161, %3 : vector<8x128xf32>
    %163 = arith.mulf %158, %162 : vector<8x128xf32>
    %164 = arith.addf %160, %163 : vector<8x128xf32>
    %165 = math.tanh %164 : vector<8x128xf32>
    %166 = arith.subf %140, %165 : vector<8x128xf32>
    %167 = arith.mulf %159, %166 : vector<8x128xf32>
    %168 = arith.addf %165, %167 : vector<8x128xf32>
    %169 = arith.index_cast %c5_i32 : i32 to index
    %c0_37 = arith.constant 0 : index
    %c0_38 = arith.constant 0 : index
    %170 = vector.load %arg11[%169, %c0_37, %c0_38] : memref<8x8x128xf32, #tpu.memory_space<vmem>>, vector<1x8x128xf32>
    %171 = vector.shape_cast %170 : vector<1x8x128xf32> to vector<8x128xf32>
    %172 = vector.shape_cast %168 : vector<8x128xf32> to vector<1x8x128xf32>
    tpu.vector_store %arg11[%169, %c0_37, %c0_38], %172 {strides = array<i32>} : memref<8x8x128xf32, #tpu.memory_space<vmem>>, vector<1x8x128xf32>,
    %c6_i32 = arith.constant 6 : i32
    %173 = arith.index_cast %c6_i32 : i32 to index
    %c0_39 = arith.constant 0 : index
    %c0_40 = arith.constant 0 : index
    %174 = vector.load %arg1[%173, %c0_39, %c0_40] : memref<8x8x384xf32, #tpu.memory_space<vmem>>, vector<1x8x384xf32>
    %175 = vector.shape_cast %174 : vector<1x8x384xf32> to vector<8x384xf32>
    %176 = arith.truncf %168 : vector<8x128xf32> to vector<8x128xbf16>
    %cst_41 = arith.constant dense<0.000000e+00> : vector<8x384xf32>
    %177 = tpu.matmul %176, %0, %cst_41 {dimension_numbers = #tpu.dot_dimension_numbers<[1], [0], [0], [1], [0, 0, 1, 1], [], []>} : vector<8x128xbf16>, vector<128x384xbf16>, vector<8x384xf32> -> vector<8x384xf32>
    %178 = vector.extract_strided_slice %175 {offsets = [0, 0], sizes = [8, 256], strides = [1, 1]} : vector<8x384xf32> to vector<8x256xf32>
    %179 = vector.extract_strided_slice %177 {offsets = [0, 0], sizes = [8, 256], strides = [1, 1]} : vector<8x384xf32> to vector<8x256xf32>
    %180 = arith.addf %178, %179 : vector<8x256xf32>
    %181 = arith.negf %180 : vector<8x256xf32>
    %182 = math.exp %181 : vector<8x256xf32>
    %cst_42 = arith.constant 1.000000e+00 : f32
    %183 = vector.broadcast %cst_42 : f32 to vector<8x256xf32>
    %184 = arith.addf %183, %182 : vector<8x256xf32>
    %185 = arith.divf %183, %184 : vector<8x256xf32>
    %186 = vector.extract_strided_slice %185 {offsets = [0, 0], sizes = [8, 128], strides = [1, 1]} : vector<8x256xf32> to vector<8x128xf32>
    %187 = vector.extract_strided_slice %185 {offsets = [0, 128], sizes = [8, 128], strides = [1, 1]} : vector<8x256xf32> to vector<8x128xf32>
    %188 = vector.extract_strided_slice %175 {offsets = [0, 256], sizes = [8, 128], strides = [1, 1]} : vector<8x384xf32> to vector<8x128xf32>
    %189 = vector.extract_strided_slice %177 {offsets = [0, 256], sizes = [8, 128], strides = [1, 1]} : vector<8x384xf32> to vector<8x128xf32>
    %190 = arith.addf %189, %3 : vector<8x128xf32>
    %191 = arith.mulf %186, %190 : vector<8x128xf32>
    %192 = arith.addf %188, %191 : vector<8x128xf32>
    %193 = math.tanh %192 : vector<8x128xf32>
    %194 = arith.subf %168, %193 : vector<8x128xf32>
    %195 = arith.mulf %187, %194 : vector<8x128xf32>
    %196 = arith.addf %193, %195 : vector<8x128xf32>
    %197 = arith.index_cast %c6_i32 : i32 to index
    %c0_43 = arith.constant 0 : index
    %c0_44 = arith.constant 0 : index
    %198 = vector.load %arg11[%197, %c0_43, %c0_44] : memref<8x8x128xf32, #tpu.memory_space<vmem>>, vector<1x8x128xf32>
    %199 = vector.shape_cast %198 : vector<1x8x128xf32> to vector<8x128xf32>
    %200 = vector.shape_cast %196 : vector<8x128xf32> to vector<1x8x128xf32>
    tpu.vector_store %arg11[%197, %c0_43, %c0_44], %200 {strides = array<i32>} : memref<8x8x128xf32, #tpu.memory_space<vmem>>, vector<1x8x128xf32>,
    %c7_i32 = arith.constant 7 : i32
    %201 = arith.index_cast %c7_i32 : i32 to index
    %c0_45 = arith.constant 0 : index
    %c0_46 = arith.constant 0 : index
    %202 = vector.load %arg1[%201, %c0_45, %c0_46] : memref<8x8x384xf32, #tpu.memory_space<vmem>>, vector<1x8x384xf32>
    %203 = vector.shape_cast %202 : vector<1x8x384xf32> to vector<8x384xf32>
    %204 = arith.truncf %196 : vector<8x128xf32> to vector<8x128xbf16>
    %cst_47 = arith.constant dense<0.000000e+00> : vector<8x384xf32>
    %205 = tpu.matmul %204, %0, %cst_47 {dimension_numbers = #tpu.dot_dimension_numbers<[1], [0], [0], [1], [0, 0, 1, 1], [], []>} : vector<8x128xbf16>, vector<128x384xbf16>, vector<8x384xf32> -> vector<8x384xf32>
    %206 = vector.extract_strided_slice %203 {offsets = [0, 0], sizes = [8, 256], strides = [1, 1]} : vector<8x384xf32> to vector<8x256xf32>
    %207 = vector.extract_strided_slice %205 {offsets = [0, 0], sizes = [8, 256], strides = [1, 1]} : vector<8x384xf32> to vector<8x256xf32>
    %208 = arith.addf %206, %207 : vector<8x256xf32>
    %209 = arith.negf %208 : vector<8x256xf32>
    %210 = math.exp %209 : vector<8x256xf32>
    %cst_48 = arith.constant 1.000000e+00 : f32
    %211 = vector.broadcast %cst_48 : f32 to vector<8x256xf32>
    %212 = arith.addf %211, %210 : vector<8x256xf32>
    %213 = arith.divf %211, %212 : vector<8x256xf32>
    %214 = vector.extract_strided_slice %213 {offsets = [0, 0], sizes = [8, 128], strides = [1, 1]} : vector<8x256xf32> to vector<8x128xf32>
    %215 = vector.extract_strided_slice %213 {offsets = [0, 128], sizes = [8, 128], strides = [1, 1]} : vector<8x256xf32> to vector<8x128xf32>
    %216 = vector.extract_strided_slice %203 {offsets = [0, 256], sizes = [8, 128], strides = [1, 1]} : vector<8x384xf32> to vector<8x128xf32>
    %217 = vector.extract_strided_slice %205 {offsets = [0, 256], sizes = [8, 128], strides = [1, 1]} : vector<8x384xf32> to vector<8x128xf32>
    %218 = arith.addf %217, %3 : vector<8x128xf32>
    %219 = arith.mulf %214, %218 : vector<8x128xf32>
    %220 = arith.addf %216, %219 : vector<8x128xf32>
    %221 = math.tanh %220 : vector<8x128xf32>
    %222 = arith.subf %196, %221 : vector<8x128xf32>
    %223 = arith.mulf %215, %222 : vector<8x128xf32>
    %224 = arith.addf %221, %223 : vector<8x128xf32>
    %225 = arith.index_cast %c7_i32 : i32 to index
    %c0_49 = arith.constant 0 : index
    %c0_50 = arith.constant 0 : index
    %226 = vector.load %arg11[%225, %c0_49, %c0_50] : memref<8x8x128xf32, #tpu.memory_space<vmem>>, vector<1x8x128xf32>
    %227 = vector.shape_cast %226 : vector<1x8x128xf32> to vector<8x128xf32>
    %228 = vector.shape_cast %224 : vector<8x128xf32> to vector<1x8x128xf32>
    tpu.vector_store %arg11[%225, %c0_49, %c0_50], %228 {strides = array<i32>} : memref<8x8x128xf32, #tpu.memory_space<vmem>>, vector<1x8x128xf32>,
    %c8_i32 = arith.constant 8 : i32
    %c0_51 = arith.constant 0 : index
    %c0_52 = arith.constant 0 : index
    %229 = vector.load %arg6[%c0_51, %c0_52] : memref<128x384xbf16, #tpu.memory_space<vmem>>, vector<128x384xbf16>
    %c0_53 = arith.constant 0 : index
    %c0_54 = arith.constant 0 : index
    %230 = vector.load %arg7[%c0_53, %c0_54] : memref<1x384xf32, #tpu.memory_space<vmem>>, vector<1x384xf32>
    %c0_55 = arith.constant 0 : index
    %c0_56 = arith.constant 0 : index
    %231 = vector.load %arg4[%c0_55, %c0_56] : memref<128x384xbf16, #tpu.memory_space<vmem>>, vector<128x384xbf16>
    %c0_57 = arith.constant 0 : index
    %c0_58 = arith.constant 0 : index
    %232 = vector.load %arg5[%c0_57, %c0_58] : memref<1x128xf32, #tpu.memory_space<vmem>>, vector<1x128xf32>
    %233 = vector.shape_cast %232 : vector<1x128xf32> to vector<1x128xf32>
    %234 = vector.broadcast %233 : vector<1x128xf32> to vector<8x128xf32>
    %cst_59 = arith.constant 0.000000e+00 : f32
    %235 = vector.broadcast %cst_59 : f32 to vector<8x128xf32>
    %c0_60 = arith.constant 0 : index
    %c0_61 = arith.constant 0 : index
    %c0_62 = arith.constant 0 : index
    %236 = vector.load %arg11[%c0_60, %c0_61, %c0_62] : memref<8x8x128xf32, #tpu.memory_space<vmem>>, vector<8x8x128xf32>
    %237 = vector.shape_cast %236 : vector<8x8x128xf32> to vector<64x128xf32>
    %238 = arith.truncf %237 : vector<64x128xf32> to vector<64x128xbf16>
    %cst_63 = arith.constant dense<0.000000e+00> : vector<64x384xf32>
    %239 = tpu.matmul %238, %229, %cst_63 {dimension_numbers = #tpu.dot_dimension_numbers<[1], [0], [0], [1], [0, 0, 1, 1], [], []>} : vector<64x128xbf16>, vector<128x384xbf16>, vector<64x384xf32> -> vector<64x384xf32>
    %240 = vector.broadcast %230 : vector<1x384xf32> to vector<64x384xf32>
    %241 = arith.addf %239, %240 : vector<64x384xf32>
    %242 = vector.shape_cast %241 : vector<64x384xf32> to vector<8x8x384xf32>
    %c0_64 = arith.constant 0 : index
    %c0_65 = arith.constant 0 : index
    %c0_66 = arith.constant 0 : index
    %243 = vector.load %arg12[%c0_64, %c0_65, %c0_66] : memref<8x8x384xf32, #tpu.memory_space<vmem>>, vector<8x8x384xf32>
    tpu.vector_store %arg12[%c0_64, %c0_65, %c0_66], %242 {strides = array<i32>} : memref<8x8x384xf32, #tpu.memory_space<vmem>>, vector<8x8x384xf32>,
    %c0_i32_67 = arith.constant 0 : i32
    %c0_i32_68 = arith.constant 0 : i32
    %244 = arith.subi %c0_i32_67, %c0_i32_68 : i32
    %245 = arith.index_cast %244 : i32 to index
    %c0_69 = arith.constant 0 : index
    %c0_70 = arith.constant 0 : index
    %246 = vector.load %arg12[%245, %c0_69, %c0_70] : memref<8x8x384xf32, #tpu.memory_space<vmem>>, vector<1x8x384xf32>
    %247 = vector.shape_cast %246 : vector<1x8x384xf32> to vector<8x384xf32>
    %248 = arith.truncf %235 : vector<8x128xf32> to vector<8x128xbf16>
    %cst_71 = arith.constant dense<0.000000e+00> : vector<8x384xf32>
    %249 = tpu.matmul %248, %231, %cst_71 {dimension_numbers = #tpu.dot_dimension_numbers<[1], [0], [0], [1], [0, 0, 1, 1], [], []>} : vector<8x128xbf16>, vector<128x384xbf16>, vector<8x384xf32> -> vector<8x384xf32>
    %250 = vector.extract_strided_slice %247 {offsets = [0, 0], sizes = [8, 256], strides = [1, 1]} : vector<8x384xf32> to vector<8x256xf32>
    %251 = vector.extract_strided_slice %249 {offsets = [0, 0], sizes = [8, 256], strides = [1, 1]} : vector<8x384xf32> to vector<8x256xf32>
    %252 = arith.addf %250, %251 : vector<8x256xf32>
    %253 = arith.negf %252 : vector<8x256xf32>
    %254 = math.exp %253 : vector<8x256xf32>
    %cst_72 = arith.constant 1.000000e+00 : f32
    %255 = vector.broadcast %cst_72 : f32 to vector<8x256xf32>
    %256 = arith.addf %255, %254 : vector<8x256xf32>
    %257 = arith.divf %255, %256 : vector<8x256xf32>
    %258 = vector.extract_strided_slice %257 {offsets = [0, 0], sizes = [8, 128], strides = [1, 1]} : vector<8x256xf32> to vector<8x128xf32>
    %259 = vector.extract_strided_slice %257 {offsets = [0, 128], sizes = [8, 128], strides = [1, 1]} : vector<8x256xf32> to vector<8x128xf32>
    %260 = vector.extract_strided_slice %247 {offsets = [0, 256], sizes = [8, 128], strides = [1, 1]} : vector<8x384xf32> to vector<8x128xf32>
    %261 = vector.extract_strided_slice %249 {offsets = [0, 256], sizes = [8, 128], strides = [1, 1]} : vector<8x384xf32> to vector<8x128xf32>
    %262 = arith.addf %261, %234 : vector<8x128xf32>
    %263 = arith.mulf %258, %262 : vector<8x128xf32>
    %264 = arith.addf %260, %263 : vector<8x128xf32>
    %265 = math.tanh %264 : vector<8x128xf32>
    %266 = arith.subf %235, %265 : vector<8x128xf32>
    %267 = arith.mulf %259, %266 : vector<8x128xf32>
    %268 = arith.addf %265, %267 : vector<8x128xf32>
    %c1_i32_73 = arith.constant 1 : i32
    %c0_i32_74 = arith.constant 0 : i32
    %269 = arith.subi %c1_i32_73, %c0_i32_74 : i32
    %270 = arith.index_cast %269 : i32 to index
    %c0_75 = arith.constant 0 : index
    %c0_76 = arith.constant 0 : index
    %271 = vector.load %arg12[%270, %c0_75, %c0_76] : memref<8x8x384xf32, #tpu.memory_space<vmem>>, vector<1x8x384xf32>
    %272 = vector.shape_cast %271 : vector<1x8x384xf32> to vector<8x384xf32>
    %273 = arith.truncf %268 : vector<8x128xf32> to vector<8x128xbf16>
    %cst_77 = arith.constant dense<0.000000e+00> : vector<8x384xf32>
    %274 = tpu.matmul %273, %231, %cst_77 {dimension_numbers = #tpu.dot_dimension_numbers<[1], [0], [0], [1], [0, 0, 1, 1], [], []>} : vector<8x128xbf16>, vector<128x384xbf16>, vector<8x384xf32> -> vector<8x384xf32>
    %275 = vector.extract_strided_slice %272 {offsets = [0, 0], sizes = [8, 256], strides = [1, 1]} : vector<8x384xf32> to vector<8x256xf32>
    %276 = vector.extract_strided_slice %274 {offsets = [0, 0], sizes = [8, 256], strides = [1, 1]} : vector<8x384xf32> to vector<8x256xf32>
    %277 = arith.addf %275, %276 : vector<8x256xf32>
    %278 = arith.negf %277 : vector<8x256xf32>
    %279 = math.exp %278 : vector<8x256xf32>
    %cst_78 = arith.constant 1.000000e+00 : f32
    %280 = vector.broadcast %cst_78 : f32 to vector<8x256xf32>
    %281 = arith.addf %280, %279 : vector<8x256xf32>
    %282 = arith.divf %280, %281 : vector<8x256xf32>
    %283 = vector.extract_strided_slice %282 {offsets = [0, 0], sizes = [8, 128], strides = [1, 1]} : vector<8x256xf32> to vector<8x128xf32>
    %284 = vector.extract_strided_slice %282 {offsets = [0, 128], sizes = [8, 128], strides = [1, 1]} : vector<8x256xf32> to vector<8x128xf32>
    %285 = vector.extract_strided_slice %272 {offsets = [0, 256], sizes = [8, 128], strides = [1, 1]} : vector<8x384xf32> to vector<8x128xf32>
    %286 = vector.extract_strided_slice %274 {offsets = [0, 256], sizes = [8, 128], strides = [1, 1]} : vector<8x384xf32> to vector<8x128xf32>
    %287 = arith.addf %286, %234 : vector<8x128xf32>
    %288 = arith.mulf %283, %287 : vector<8x128xf32>
    %289 = arith.addf %285, %288 : vector<8x128xf32>
    %290 = math.tanh %289 : vector<8x128xf32>
    %291 = arith.subf %268, %290 : vector<8x128xf32>
    %292 = arith.mulf %284, %291 : vector<8x128xf32>
    %293 = arith.addf %290, %292 : vector<8x128xf32>
    %c2_i32_79 = arith.constant 2 : i32
    %c0_i32_80 = arith.constant 0 : i32
    %294 = arith.subi %c2_i32_79, %c0_i32_80 : i32
    %295 = arith.index_cast %294 : i32 to index
    %c0_81 = arith.constant 0 : index
    %c0_82 = arith.constant 0 : index
    %296 = vector.load %arg12[%295, %c0_81, %c0_82] : memref<8x8x384xf32, #tpu.memory_space<vmem>>, vector<1x8x384xf32>
    %297 = vector.shape_cast %296 : vector<1x8x384xf32> to vector<8x384xf32>
    %298 = arith.truncf %293 : vector<8x128xf32> to vector<8x128xbf16>
    %cst_83 = arith.constant dense<0.000000e+00> : vector<8x384xf32>
    %299 = tpu.matmul %298, %231, %cst_83 {dimension_numbers = #tpu.dot_dimension_numbers<[1], [0], [0], [1], [0, 0, 1, 1], [], []>} : vector<8x128xbf16>, vector<128x384xbf16>, vector<8x384xf32> -> vector<8x384xf32>
    %300 = vector.extract_strided_slice %297 {offsets = [0, 0], sizes = [8, 256], strides = [1, 1]} : vector<8x384xf32> to vector<8x256xf32>
    %301 = vector.extract_strided_slice %299 {offsets = [0, 0], sizes = [8, 256], strides = [1, 1]} : vector<8x384xf32> to vector<8x256xf32>
    %302 = arith.addf %300, %301 : vector<8x256xf32>
    %303 = arith.negf %302 : vector<8x256xf32>
    %304 = math.exp %303 : vector<8x256xf32>
    %cst_84 = arith.constant 1.000000e+00 : f32
    %305 = vector.broadcast %cst_84 : f32 to vector<8x256xf32>
    %306 = arith.addf %305, %304 : vector<8x256xf32>
    %307 = arith.divf %305, %306 : vector<8x256xf32>
    %308 = vector.extract_strided_slice %307 {offsets = [0, 0], sizes = [8, 128], strides = [1, 1]} : vector<8x256xf32> to vector<8x128xf32>
    %309 = vector.extract_strided_slice %307 {offsets = [0, 128], sizes = [8, 128], strides = [1, 1]} : vector<8x256xf32> to vector<8x128xf32>
    %310 = vector.extract_strided_slice %297 {offsets = [0, 256], sizes = [8, 128], strides = [1, 1]} : vector<8x384xf32> to vector<8x128xf32>
    %311 = vector.extract_strided_slice %299 {offsets = [0, 256], sizes = [8, 128], strides = [1, 1]} : vector<8x384xf32> to vector<8x128xf32>
    %312 = arith.addf %311, %234 : vector<8x128xf32>
    %313 = arith.mulf %308, %312 : vector<8x128xf32>
    %314 = arith.addf %310, %313 : vector<8x128xf32>
    %315 = math.tanh %314 : vector<8x128xf32>
    %316 = arith.subf %293, %315 : vector<8x128xf32>
    %317 = arith.mulf %309, %316 : vector<8x128xf32>
    %318 = arith.addf %315, %317 : vector<8x128xf32>
    %c3_i32_85 = arith.constant 3 : i32
    %c0_i32_86 = arith.constant 0 : i32
    %319 = arith.subi %c3_i32_85, %c0_i32_86 : i32
    %320 = arith.index_cast %319 : i32 to index
    %c0_87 = arith.constant 0 : index
    %c0_88 = arith.constant 0 : index
    %321 = vector.load %arg12[%320, %c0_87, %c0_88] : memref<8x8x384xf32, #tpu.memory_space<vmem>>, vector<1x8x384xf32>
    %322 = vector.shape_cast %321 : vector<1x8x384xf32> to vector<8x384xf32>
    %323 = arith.truncf %318 : vector<8x128xf32> to vector<8x128xbf16>
    %cst_89 = arith.constant dense<0.000000e+00> : vector<8x384xf32>
    %324 = tpu.matmul %323, %231, %cst_89 {dimension_numbers = #tpu.dot_dimension_numbers<[1], [0], [0], [1], [0, 0, 1, 1], [], []>} : vector<8x128xbf16>, vector<128x384xbf16>, vector<8x384xf32> -> vector<8x384xf32>
    %325 = vector.extract_strided_slice %322 {offsets = [0, 0], sizes = [8, 256], strides = [1, 1]} : vector<8x384xf32> to vector<8x256xf32>
    %326 = vector.extract_strided_slice %324 {offsets = [0, 0], sizes = [8, 256], strides = [1, 1]} : vector<8x384xf32> to vector<8x256xf32>
    %327 = arith.addf %325, %326 : vector<8x256xf32>
    %328 = arith.negf %327 : vector<8x256xf32>
    %329 = math.exp %328 : vector<8x256xf32>
    %cst_90 = arith.constant 1.000000e+00 : f32
    %330 = vector.broadcast %cst_90 : f32 to vector<8x256xf32>
    %331 = arith.addf %330, %329 : vector<8x256xf32>
    %332 = arith.divf %330, %331 : vector<8x256xf32>
    %333 = vector.extract_strided_slice %332 {offsets = [0, 0], sizes = [8, 128], strides = [1, 1]} : vector<8x256xf32> to vector<8x128xf32>
    %334 = vector.extract_strided_slice %332 {offsets = [0, 128], sizes = [8, 128], strides = [1, 1]} : vector<8x256xf32> to vector<8x128xf32>
    %335 = vector.extract_strided_slice %322 {offsets = [0, 256], sizes = [8, 128], strides = [1, 1]} : vector<8x384xf32> to vector<8x128xf32>
    %336 = vector.extract_strided_slice %324 {offsets = [0, 256], sizes = [8, 128], strides = [1, 1]} : vector<8x384xf32> to vector<8x128xf32>
    %337 = arith.addf %336, %234 : vector<8x128xf32>
    %338 = arith.mulf %333, %337 : vector<8x128xf32>
    %339 = arith.addf %335, %338 : vector<8x128xf32>
    %340 = math.tanh %339 : vector<8x128xf32>
    %341 = arith.subf %318, %340 : vector<8x128xf32>
    %342 = arith.mulf %334, %341 : vector<8x128xf32>
    %343 = arith.addf %340, %342 : vector<8x128xf32>
    %c4_i32_91 = arith.constant 4 : i32
    %c0_i32_92 = arith.constant 0 : i32
    %344 = arith.subi %c4_i32_91, %c0_i32_92 : i32
    %345 = arith.index_cast %344 : i32 to index
    %c0_93 = arith.constant 0 : index
    %c0_94 = arith.constant 0 : index
    %346 = vector.load %arg12[%345, %c0_93, %c0_94] : memref<8x8x384xf32, #tpu.memory_space<vmem>>, vector<1x8x384xf32>
    %347 = vector.shape_cast %346 : vector<1x8x384xf32> to vector<8x384xf32>
    %348 = arith.truncf %343 : vector<8x128xf32> to vector<8x128xbf16>
    %cst_95 = arith.constant dense<0.000000e+00> : vector<8x384xf32>
    %349 = tpu.matmul %348, %231, %cst_95 {dimension_numbers = #tpu.dot_dimension_numbers<[1], [0], [0], [1], [0, 0, 1, 1], [], []>} : vector<8x128xbf16>, vector<128x384xbf16>, vector<8x384xf32> -> vector<8x384xf32>
    %350 = vector.extract_strided_slice %347 {offsets = [0, 0], sizes = [8, 256], strides = [1, 1]} : vector<8x384xf32> to vector<8x256xf32>
    %351 = vector.extract_strided_slice %349 {offsets = [0, 0], sizes = [8, 256], strides = [1, 1]} : vector<8x384xf32> to vector<8x256xf32>
    %352 = arith.addf %350, %351 : vector<8x256xf32>
    %353 = arith.negf %352 : vector<8x256xf32>
    %354 = math.exp %353 : vector<8x256xf32>
    %cst_96 = arith.constant 1.000000e+00 : f32
    %355 = vector.broadcast %cst_96 : f32 to vector<8x256xf32>
    %356 = arith.addf %355, %354 : vector<8x256xf32>
    %357 = arith.divf %355, %356 : vector<8x256xf32>
    %358 = vector.extract_strided_slice %357 {offsets = [0, 0], sizes = [8, 128], strides = [1, 1]} : vector<8x256xf32> to vector<8x128xf32>
    %359 = vector.extract_strided_slice %357 {offsets = [0, 128], sizes = [8, 128], strides = [1, 1]} : vector<8x256xf32> to vector<8x128xf32>
    %360 = vector.extract_strided_slice %347 {offsets = [0, 256], sizes = [8, 128], strides = [1, 1]} : vector<8x384xf32> to vector<8x128xf32>
    %361 = vector.extract_strided_slice %349 {offsets = [0, 256], sizes = [8, 128], strides = [1, 1]} : vector<8x384xf32> to vector<8x128xf32>
    %362 = arith.addf %361, %234 : vector<8x128xf32>
    %363 = arith.mulf %358, %362 : vector<8x128xf32>
    %364 = arith.addf %360, %363 : vector<8x128xf32>
    %365 = math.tanh %364 : vector<8x128xf32>
    %366 = arith.subf %343, %365 : vector<8x128xf32>
    %367 = arith.mulf %359, %366 : vector<8x128xf32>
    %368 = arith.addf %365, %367 : vector<8x128xf32>
    %c5_i32_97 = arith.constant 5 : i32
    %c0_i32_98 = arith.constant 0 : i32
    %369 = arith.subi %c5_i32_97, %c0_i32_98 : i32
    %370 = arith.index_cast %369 : i32 to index
    %c0_99 = arith.constant 0 : index
    %c0_100 = arith.constant 0 : index
    %371 = vector.load %arg12[%370, %c0_99, %c0_100] : memref<8x8x384xf32, #tpu.memory_space<vmem>>, vector<1x8x384xf32>
    %372 = vector.shape_cast %371 : vector<1x8x384xf32> to vector<8x384xf32>
    %373 = arith.truncf %368 : vector<8x128xf32> to vector<8x128xbf16>
    %cst_101 = arith.constant dense<0.000000e+00> : vector<8x384xf32>
    %374 = tpu.matmul %373, %231, %cst_101 {dimension_numbers = #tpu.dot_dimension_numbers<[1], [0], [0], [1], [0, 0, 1, 1], [], []>} : vector<8x128xbf16>, vector<128x384xbf16>, vector<8x384xf32> -> vector<8x384xf32>
    %375 = vector.extract_strided_slice %372 {offsets = [0, 0], sizes = [8, 256], strides = [1, 1]} : vector<8x384xf32> to vector<8x256xf32>
    %376 = vector.extract_strided_slice %374 {offsets = [0, 0], sizes = [8, 256], strides = [1, 1]} : vector<8x384xf32> to vector<8x256xf32>
    %377 = arith.addf %375, %376 : vector<8x256xf32>
    %378 = arith.negf %377 : vector<8x256xf32>
    %379 = math.exp %378 : vector<8x256xf32>
    %cst_102 = arith.constant 1.000000e+00 : f32
    %380 = vector.broadcast %cst_102 : f32 to vector<8x256xf32>
    %381 = arith.addf %380, %379 : vector<8x256xf32>
    %382 = arith.divf %380, %381 : vector<8x256xf32>
    %383 = vector.extract_strided_slice %382 {offsets = [0, 0], sizes = [8, 128], strides = [1, 1]} : vector<8x256xf32> to vector<8x128xf32>
    %384 = vector.extract_strided_slice %382 {offsets = [0, 128], sizes = [8, 128], strides = [1, 1]} : vector<8x256xf32> to vector<8x128xf32>
    %385 = vector.extract_strided_slice %372 {offsets = [0, 256], sizes = [8, 128], strides = [1, 1]} : vector<8x384xf32> to vector<8x128xf32>
    %386 = vector.extract_strided_slice %374 {offsets = [0, 256], sizes = [8, 128], strides = [1, 1]} : vector<8x384xf32> to vector<8x128xf32>
    %387 = arith.addf %386, %234 : vector<8x128xf32>
    %388 = arith.mulf %383, %387 : vector<8x128xf32>
    %389 = arith.addf %385, %388 : vector<8x128xf32>
    %390 = math.tanh %389 : vector<8x128xf32>
    %391 = arith.subf %368, %390 : vector<8x128xf32>
    %392 = arith.mulf %384, %391 : vector<8x128xf32>
    %393 = arith.addf %390, %392 : vector<8x128xf32>
    %c6_i32_103 = arith.constant 6 : i32
    %c0_i32_104 = arith.constant 0 : i32
    %394 = arith.subi %c6_i32_103, %c0_i32_104 : i32
    %395 = arith.index_cast %394 : i32 to index
    %c0_105 = arith.constant 0 : index
    %c0_106 = arith.constant 0 : index
    %396 = vector.load %arg12[%395, %c0_105, %c0_106] : memref<8x8x384xf32, #tpu.memory_space<vmem>>, vector<1x8x384xf32>
    %397 = vector.shape_cast %396 : vector<1x8x384xf32> to vector<8x384xf32>
    %398 = arith.truncf %393 : vector<8x128xf32> to vector<8x128xbf16>
    %cst_107 = arith.constant dense<0.000000e+00> : vector<8x384xf32>
    %399 = tpu.matmul %398, %231, %cst_107 {dimension_numbers = #tpu.dot_dimension_numbers<[1], [0], [0], [1], [0, 0, 1, 1], [], []>} : vector<8x128xbf16>, vector<128x384xbf16>, vector<8x384xf32> -> vector<8x384xf32>
    %400 = vector.extract_strided_slice %397 {offsets = [0, 0], sizes = [8, 256], strides = [1, 1]} : vector<8x384xf32> to vector<8x256xf32>
    %401 = vector.extract_strided_slice %399 {offsets = [0, 0], sizes = [8, 256], strides = [1, 1]} : vector<8x384xf32> to vector<8x256xf32>
    %402 = arith.addf %400, %401 : vector<8x256xf32>
    %403 = arith.negf %402 : vector<8x256xf32>
    %404 = math.exp %403 : vector<8x256xf32>
    %cst_108 = arith.constant 1.000000e+00 : f32
    %405 = vector.broadcast %cst_108 : f32 to vector<8x256xf32>
    %406 = arith.addf %405, %404 : vector<8x256xf32>
    %407 = arith.divf %405, %406 : vector<8x256xf32>
    %408 = vector.extract_strided_slice %407 {offsets = [0, 0], sizes = [8, 128], strides = [1, 1]} : vector<8x256xf32> to vector<8x128xf32>
    %409 = vector.extract_strided_slice %407 {offsets = [0, 128], sizes = [8, 128], strides = [1, 1]} : vector<8x256xf32> to vector<8x128xf32>
    %410 = vector.extract_strided_slice %397 {offsets = [0, 256], sizes = [8, 128], strides = [1, 1]} : vector<8x384xf32> to vector<8x128xf32>
    %411 = vector.extract_strided_slice %399 {offsets = [0, 256], sizes = [8, 128], strides = [1, 1]} : vector<8x384xf32> to vector<8x128xf32>
    %412 = arith.addf %411, %234 : vector<8x128xf32>
    %413 = arith.mulf %408, %412 : vector<8x128xf32>
    %414 = arith.addf %410, %413 : vector<8x128xf32>
    %415 = math.tanh %414 : vector<8x128xf32>
    %416 = arith.subf %393, %415 : vector<8x128xf32>
    %417 = arith.mulf %409, %416 : vector<8x128xf32>
    %418 = arith.addf %415, %417 : vector<8x128xf32>
    %c7_i32_109 = arith.constant 7 : i32
    %c0_i32_110 = arith.constant 0 : i32
    %419 = arith.subi %c7_i32_109, %c0_i32_110 : i32
    %420 = arith.index_cast %419 : i32 to index
    %c0_111 = arith.constant 0 : index
    %c0_112 = arith.constant 0 : index
    %421 = vector.load %arg12[%420, %c0_111, %c0_112] : memref<8x8x384xf32, #tpu.memory_space<vmem>>, vector<1x8x384xf32>
    %422 = vector.shape_cast %421 : vector<1x8x384xf32> to vector<8x384xf32>
    %423 = arith.truncf %418 : vector<8x128xf32> to vector<8x128xbf16>
    %cst_113 = arith.constant dense<0.000000e+00> : vector<8x384xf32>
    %424 = tpu.matmul %423, %231, %cst_113 {dimension_numbers = #tpu.dot_dimension_numbers<[1], [0], [0], [1], [0, 0, 1, 1], [], []>} : vector<8x128xbf16>, vector<128x384xbf16>, vector<8x384xf32> -> vector<8x384xf32>
    %425 = vector.extract_strided_slice %422 {offsets = [0, 0], sizes = [8, 256], strides = [1, 1]} : vector<8x384xf32> to vector<8x256xf32>
    %426 = vector.extract_strided_slice %424 {offsets = [0, 0], sizes = [8, 256], strides = [1, 1]} : vector<8x384xf32> to vector<8x256xf32>
    %427 = arith.addf %425, %426 : vector<8x256xf32>
    %428 = arith.negf %427 : vector<8x256xf32>
    %429 = math.exp %428 : vector<8x256xf32>
    %cst_114 = arith.constant 1.000000e+00 : f32
    %430 = vector.broadcast %cst_114 : f32 to vector<8x256xf32>
    %431 = arith.addf %430, %429 : vector<8x256xf32>
    %432 = arith.divf %430, %431 : vector<8x256xf32>
    %433 = vector.extract_strided_slice %432 {offsets = [0, 0], sizes = [8, 128], strides = [1, 1]} : vector<8x256xf32> to vector<8x128xf32>
    %434 = vector.extract_strided_slice %432 {offsets = [0, 128], sizes = [8, 128], strides = [1, 1]} : vector<8x256xf32> to vector<8x128xf32>
    %435 = vector.extract_strided_slice %422 {offsets = [0, 256], sizes = [8, 128], strides = [1, 1]} : vector<8x384xf32> to vector<8x128xf32>
    %436 = vector.extract_strided_slice %424 {offsets = [0, 256], sizes = [8, 128], strides = [1, 1]} : vector<8x384xf32> to vector<8x128xf32>
    %437 = arith.addf %436, %234 : vector<8x128xf32>
    %438 = arith.mulf %433, %437 : vector<8x128xf32>
    %439 = arith.addf %435, %438 : vector<8x128xf32>
    %440 = math.tanh %439 : vector<8x128xf32>
    %441 = arith.subf %418, %440 : vector<8x128xf32>
    %442 = arith.mulf %434, %441 : vector<8x128xf32>
    %443 = arith.addf %440, %442 : vector<8x128xf32>
    %c8_i32_115 = arith.constant 8 : i32
    %c0_116 = arith.constant 0 : index
    %c0_117 = arith.constant 0 : index
    %444 = vector.load %arg8[%c0_116, %c0_117] : memref<128x2xf32, #tpu.memory_space<vmem>>, vector<128x2xf32>
    %cst_118 = arith.constant dense<0.000000e+00> : vector<8x2xf32>
    %445 = tpu.matmul %443, %444, %cst_118 {dimension_numbers = #tpu.dot_dimension_numbers<[1], [0], [0], [1], [0, 0, 1, 1], [], []>} : vector<8x128xf32>, vector<128x2xf32>, vector<8x2xf32> -> vector<8x2xf32>
    %c0_119 = arith.constant 0 : index
    %c0_120 = arith.constant 0 : index
    %446 = vector.load %arg9[%c0_119, %c0_120] : memref<1x2xf32, #tpu.memory_space<vmem>>, vector<1x2xf32>
    %447 = vector.broadcast %446 : vector<1x2xf32> to vector<8x2xf32>
    %448 = arith.addf %445, %447 : vector<8x2xf32>
    %c0_121 = arith.constant 0 : index
    %c0_122 = arith.constant 0 : index
    %449 = vector.load %arg10[%c0_121, %c0_122] : memref<8x2xf32, #tpu.memory_space<vmem>>, vector<8x2xf32>
    tpu.vector_store %arg10[%c0_121, %c0_122], %448 {strides = array<i32>} : memref<8x2xf32, #tpu.memory_space<vmem>>, vector<8x2xf32>,
    return
  }
  func.func @transform_0(%arg0: i32) -> (i32, i32, i32) {
    %c0_i32 = arith.constant 0 : i32
    %c0_i32_0 = arith.constant 0 : i32
    %c0_i32_1 = arith.constant 0 : i32
    return %c0_i32, %arg0, %c0_i32_0 : i32, i32, i32
  }
  func.func @transform_1(%arg0: i32) -> (i32, i32) {
    %c0_i32 = arith.constant 0 : i32
    %c0_i32_0 = arith.constant 0 : i32
    %c0_i32_1 = arith.constant 0 : i32
    return %c0_i32, %c0_i32_0 : i32, i32
  }
  func.func @transform_2(%arg0: i32) -> (i32, i32) {
    %c0_i32 = arith.constant 0 : i32
    %c0_i32_0 = arith.constant 0 : i32
    %c0_i32_1 = arith.constant 0 : i32
    return %c0_i32, %c0_i32_0 : i32, i32
  }
  func.func @transform_3(%arg0: i32) -> (i32, i32) {
    %c0_i32 = arith.constant 0 : i32
    %c0_i32_0 = arith.constant 0 : i32
    %c0_i32_1 = arith.constant 0 : i32
    return %c0_i32, %c0_i32_0 : i32, i32
  }
  func.func @transform_4(%arg0: i32) -> (i32, i32) {
    %c0_i32 = arith.constant 0 : i32
    %c0_i32_0 = arith.constant 0 : i32
    %c0_i32_1 = arith.constant 0 : i32
    return %c0_i32, %c0_i32_0 : i32, i32
  }
  func.func @transform_5(%arg0: i32) -> (i32, i32) {
    %c0_i32 = arith.constant 0 : i32
    %c0_i32_0 = arith.constant 0 : i32
    %c0_i32_1 = arith.constant 0 : i32
    return %c0_i32, %c0_i32_0 : i32, i32
  }
  func.func @transform_6(%arg0: i32) -> (i32, i32) {
    %c0_i32 = arith.constant 0 : i32
    %c0_i32_0 = arith.constant 0 : i32
    %c0_i32_1 = arith.constant 0 : i32
    return %c0_i32, %c0_i32_0 : i32, i32
  }
  func.func @transform_7(%arg0: i32) -> (i32, i32) {
    %c0_i32 = arith.constant 0 : i32
    %c0_i32_0 = arith.constant 0 : i32
    %c0_i32_1 = arith.constant 0 : i32
    return %c0_i32, %c0_i32_0 : i32, i32
  }
  func.func @transform_8(%arg0: i32) -> (i32, i32) {
    %c0_i32 = arith.constant 0 : i32
    %c0_i32_0 = arith.constant 0 : i32
    %c0_i32_1 = arith.constant 0 : i32
    return %c0_i32, %c0_i32_0 : i32, i32
  }
  func.func @transform_9(%arg0: i32) -> (i32, i32) {
    %c0_i32 = arith.constant 0 : i32
    %c0_i32_0 = arith.constant 0 : i32
    return %arg0, %c0_i32 : i32, i32
  }
}

module attributes {stable_mosaic.version = 11 : i64} {
  func.func @_gru_kernel(%arg0: i32, %arg1: memref<8x8x384xf32, #tpu.memory_space<vmem>>, %arg2: memref<128x384xbf16, #tpu.memory_space<vmem>>, %arg3: memref<1x128xf32, #tpu.memory_space<vmem>>, %arg4: memref<128x384xbf16, #tpu.memory_space<vmem>>, %arg5: memref<1x128xf32, #tpu.memory_space<vmem>>, %arg6: memref<128x384xbf16, #tpu.memory_space<vmem>>, %arg7: memref<1x384xf32, #tpu.memory_space<vmem>>, %arg8: memref<128x2xf32, #tpu.memory_space<vmem>>, %arg9: memref<1x2xf32, #tpu.memory_space<vmem>>, %arg10: memref<8x2xf32, #tpu.memory_space<vmem>>, %arg11: memref<8x8x128xf32, #tpu.memory_space<vmem>>, %arg12: memref<8x8x384xf32, #tpu.memory_space<vmem>>) attributes {dimension_semantics = [#tpu.dimension_semantics<parallel>], iteration_bounds = array<i64: 1>, scalar_prefetch = 0 : i64, scratch_operands = 2 : i64, tpu.core_type = #tpu.core_type<tc>, window_params = [{transform_indices = @transform_0, window_bounds = array<i64: 8, 8, 384>}, {pipeline_mode = #tpu.pipeline_mode<synchronous>, transform_indices = @transform_1, window_bounds = array<i64: 128, 384>}, {pipeline_mode = #tpu.pipeline_mode<synchronous>, transform_indices = @transform_2, window_bounds = array<i64: 1, 128>}, {pipeline_mode = #tpu.pipeline_mode<synchronous>, transform_indices = @transform_3, window_bounds = array<i64: 128, 384>}, {pipeline_mode = #tpu.pipeline_mode<synchronous>, transform_indices = @transform_4, window_bounds = array<i64: 1, 128>}, {pipeline_mode = #tpu.pipeline_mode<synchronous>, transform_indices = @transform_5, window_bounds = array<i64: 128, 384>}, {pipeline_mode = #tpu.pipeline_mode<synchronous>, transform_indices = @transform_6, window_bounds = array<i64: 1, 384>}, {pipeline_mode = #tpu.pipeline_mode<synchronous>, transform_indices = @transform_7, window_bounds = array<i64: 128, 2>}, {pipeline_mode = #tpu.pipeline_mode<synchronous>, transform_indices = @transform_8, window_bounds = array<i64: 1, 2>}, {transform_indices = @transform_9, window_bounds = array<i64: 8, 2>}]} {
    %c0 = arith.constant 0 : index
    %c0_0 = arith.constant 0 : index
    %0 = vector.load %arg2[%c0, %c0_0] : memref<128x384xbf16, #tpu.memory_space<vmem>>, vector<128x384xbf16>
    %c0_1 = arith.constant 0 : index
    %c0_2 = arith.constant 0 : index
    %1 = vector.load %arg3[%c0_1, %c0_2] : memref<1x128xf32, #tpu.memory_space<vmem>>, vector<1x128xf32>
    %2 = vector.shape_cast %1 : vector<1x128xf32> to vector<1x128xf32>
    %3 = vector.broadcast %2 : vector<1x128xf32> to vector<8x128xf32>
    %cst = arith.constant 0.000000e+00 : f32
    %4 = vector.broadcast %cst : f32 to vector<8x128xf32>
    %c0_i32 = arith.constant 0 : i32
    %5 = arith.index_cast %c0_i32 : i32 to index
    %c0_3 = arith.constant 0 : index
    %c0_4 = arith.constant 0 : index
    %6 = vector.load %arg1[%5, %c0_3, %c0_4] : memref<8x8x384xf32, #tpu.memory_space<vmem>>, vector<1x8x384xf32>
    %7 = vector.shape_cast %6 : vector<1x8x384xf32> to vector<8x384xf32>
    %8 = arith.truncf %4 : vector<8x128xf32> to vector<8x128xbf16>
    %cst_5 = arith.constant dense<0.000000e+00> : vector<8x384xf32>
    %9 = tpu.matmul %8, %0, %cst_5 {dimension_numbers = #tpu.dot_dimension_numbers<[1], [0], [0], [1], [0, 0, 1, 1], [], []>} : vector<8x128xbf16>, vector<128x384xbf16>, vector<8x384xf32> -> vector<8x384xf32>
    %10 = vector.extract_strided_slice %7 {offsets = [0, 0], sizes = [8, 256], strides = [1, 1]} : vector<8x384xf32> to vector<8x256xf32>
    %11 = vector.extract_strided_slice %9 {offsets = [0, 0], sizes = [8, 256], strides = [1, 1]} : vector<8x384xf32> to vector<8x256xf32>
    %12 = arith.addf %10, %11 : vector<8x256xf32>
    %13 = arith.negf %12 : vector<8x256xf32>
    %14 = math.exp %13 : vector<8x256xf32>
    %cst_6 = arith.constant 1.000000e+00 : f32
    %15 = vector.broadcast %cst_6 : f32 to vector<8x256xf32>
    %16 = arith.addf %15, %14 : vector<8x256xf32>
    %17 = arith.divf %15, %16 : vector<8x256xf32>
    %18 = vector.extract_strided_slice %17 {offsets = [0, 0], sizes = [8, 128], strides = [1, 1]} : vector<8x256xf32> to vector<8x128xf32>
    %19 = vector.extract_strided_slice %17 {offsets = [0, 128], sizes = [8, 128], strides = [1, 1]} : vector<8x256xf32> to vector<8x128xf32>
    %20 = vector.extract_strided_slice %7 {offsets = [0, 256], sizes = [8, 128], strides = [1, 1]} : vector<8x384xf32> to vector<8x128xf32>
    %21 = vector.extract_strided_slice %9 {offsets = [0, 256], sizes = [8, 128], strides = [1, 1]} : vector<8x384xf32> to vector<8x128xf32>
    %22 = arith.addf %21, %3 : vector<8x128xf32>
    %23 = arith.mulf %18, %22 : vector<8x128xf32>
    %24 = arith.addf %20, %23 : vector<8x128xf32>
    %25 = math.tanh %24 : vector<8x128xf32>
    %26 = arith.subf %4, %25 : vector<8x128xf32>
    %27 = arith.mulf %19, %26 : vector<8x128xf32>
    %28 = arith.addf %25, %27 : vector<8x128xf32>
    %29 = arith.index_cast %c0_i32 : i32 to index
    %c0_7 = arith.constant 0 : index
    %c0_8 = arith.constant 0 : index
    %30 = vector.load %arg11[%29, %c0_7, %c0_8] : memref<8x8x128xf32, #tpu.memory_space<vmem>>, vector<1x8x128xf32>
    %31 = vector.shape_cast %30 : vector<1x8x128xf32> to vector<8x128xf32>
    %32 = vector.shape_cast %28 : vector<8x128xf32> to vector<1x8x128xf32>
    tpu.vector_store %arg11[%29, %c0_7, %c0_8], %32 {strides = array<i32>} : memref<8x8x128xf32, #tpu.memory_space<vmem>>, vector<1x8x128xf32>,
    %c1_i32 = arith.constant 1 : i32
    %33 = arith.index_cast %c1_i32 : i32 to index
    %c0_9 = arith.constant 0 : index
    %c0_10 = arith.constant 0 : index
    %34 = vector.load %arg1[%33, %c0_9, %c0_10] : memref<8x8x384xf32, #tpu.memory_space<vmem>>, vector<1x8x384xf32>
    %35 = vector.shape_cast %34 : vector<1x8x384xf32> to vector<8x384xf32>
    %36 = arith.truncf %28 : vector<8x128xf32> to vector<8x128xbf16>
    %cst_11 = arith.constant dense<0.000000e+00> : vector<8x384xf32>
    %37 = tpu.matmul %36, %0, %cst_11 {dimension_numbers = #tpu.dot_dimension_numbers<[1], [0], [0], [1], [0, 0, 1, 1], [], []>} : vector<8x128xbf16>, vector<128x384xbf16>, vector<8x384xf32> -> vector<8x384xf32>
    %38 = vector.extract_strided_slice %35 {offsets = [0, 0], sizes = [8, 256], strides = [1, 1]} : vector<8x384xf32> to vector<8x256xf32>
    %39 = vector.extract_strided_slice %37 {offsets = [0, 0], sizes = [8, 256], strides = [1, 1]} : vector<8x384xf32> to vector<8x256xf32>
    %40 = arith.addf %38, %39 : vector<8x256xf32>
    %41 = arith.negf %40 : vector<8x256xf32>
    %42 = math.exp %41 : vector<8x256xf32>
    %cst_12 = arith.constant 1.000000e+00 : f32
    %43 = vector.broadcast %cst_12 : f32 to vector<8x256xf32>
    %44 = arith.addf %43, %42 : vector<8x256xf32>
    %45 = arith.divf %43, %44 : vector<8x256xf32>
    %46 = vector.extract_strided_slice %45 {offsets = [0, 0], sizes = [8, 128], strides = [1, 1]} : vector<8x256xf32> to vector<8x128xf32>
    %47 = vector.extract_strided_slice %45 {offsets = [0, 128], sizes = [8, 128], strides = [1, 1]} : vector<8x256xf32> to vector<8x128xf32>
    %48 = vector.extract_strided_slice %35 {offsets = [0, 256], sizes = [8, 128], strides = [1, 1]} : vector<8x384xf32> to vector<8x128xf32>
    %49 = vector.extract_strided_slice %37 {offsets = [0, 256], sizes = [8, 128], strides = [1, 1]} : vector<8x384xf32> to vector<8x128xf32>
    %50 = arith.addf %49, %3 : vector<8x128xf32>
    %51 = arith.mulf %46, %50 : vector<8x128xf32>
    %52 = arith.addf %48, %51 : vector<8x128xf32>
    %53 = math.tanh %52 : vector<8x128xf32>
    %54 = arith.subf %28, %53 : vector<8x128xf32>
    %55 = arith.mulf %47, %54 : vector<8x128xf32>
    %56 = arith.addf %53, %55 : vector<8x128xf32>
    %57 = arith.index_cast %c1_i32 : i32 to index
    %c0_13 = arith.constant 0 : index
    %c0_14 = arith.constant 0 : index
    %58 = vector.load %arg11[%57, %c0_13, %c0_14] : memref<8x8x128xf32, #tpu.memory_space<vmem>>, vector<1x8x128xf32>
    %59 = vector.shape_cast %58 : vector<1x8x128xf32> to vector<8x128xf32>
    %60 = vector.shape_cast %56 : vector<8x128xf32> to vector<1x8x128xf32>
    tpu.vector_store %arg11[%57, %c0_13, %c0_14], %60 {strides = array<i32>} : memref<8x8x128xf32, #tpu.memory_space<vmem>>, vector<1x8x128xf32>,
    %c2_i32 = arith.constant 2 : i32
    %61 = arith.index_cast %c2_i32 : i32 to index
    %c0_15 = arith.constant 0 : index
    %c0_16 = arith.constant 0 : index
    %62 = vector.load %arg1[%61, %c0_15, %c0_16] : memref<8x8x384xf32, #tpu.memory_space<vmem>>, vector<1x8x384xf32>
    %63 = vector.shape_cast %62 : vector<1x8x384xf32> to vector<8x384xf32>
    %64 = arith.truncf %56 : vector<8x128xf32> to vector<8x128xbf16>
    %cst_17 = arith.constant dense<0.000000e+00> : vector<8x384xf32>
    %65 = tpu.matmul %64, %0, %cst_17 {dimension_numbers = #tpu.dot_dimension_numbers<[1], [0], [0], [1], [0, 0, 1, 1], [], []>} : vector<8x128xbf16>, vector<128x384xbf16>, vector<8x384xf32> -> vector<8x384xf32>
    %66 = vector.extract_strided_slice %63 {offsets = [0, 0], sizes = [8, 256], strides = [1, 1]} : vector<8x384xf32> to vector<8x256xf32>
    %67 = vector.extract_strided_slice %65 {offsets = [0, 0], sizes = [8, 256], strides = [1, 1]} : vector<8x384xf32> to vector<8x256xf32>
    %68 = arith.addf %66, %67 : vector<8x256xf32>
    %69 = arith.negf %68 : vector<8x256xf32>
    %70 = math.exp %69 : vector<8x256xf32>
    %cst_18 = arith.constant 1.000000e+00 : f32
    %71 = vector.broadcast %cst_18 : f32 to vector<8x256xf32>
    %72 = arith.addf %71, %70 : vector<8x256xf32>
    %73 = arith.divf %71, %72 : vector<8x256xf32>
    %74 = vector.extract_strided_slice %73 {offsets = [0, 0], sizes = [8, 128], strides = [1, 1]} : vector<8x256xf32> to vector<8x128xf32>
    %75 = vector.extract_strided_slice %73 {offsets = [0, 128], sizes = [8, 128], strides = [1, 1]} : vector<8x256xf32> to vector<8x128xf32>
    %76 = vector.extract_strided_slice %63 {offsets = [0, 256], sizes = [8, 128], strides = [1, 1]} : vector<8x384xf32> to vector<8x128xf32>
    %77 = vector.extract_strided_slice %65 {offsets = [0, 256], sizes = [8, 128], strides = [1, 1]} : vector<8x384xf32> to vector<8x128xf32>
    %78 = arith.addf %77, %3 : vector<8x128xf32>
    %79 = arith.mulf %74, %78 : vector<8x128xf32>
    %80 = arith.addf %76, %79 : vector<8x128xf32>
    %81 = math.tanh %80 : vector<8x128xf32>
    %82 = arith.subf %56, %81 : vector<8x128xf32>
    %83 = arith.mulf %75, %82 : vector<8x128xf32>
    %84 = arith.addf %81, %83 : vector<8x128xf32>
    %85 = arith.index_cast %c2_i32 : i32 to index
    %c0_19 = arith.constant 0 : index
    %c0_20 = arith.constant 0 : index
    %86 = vector.load %arg11[%85, %c0_19, %c0_20] : memref<8x8x128xf32, #tpu.memory_space<vmem>>, vector<1x8x128xf32>
    %87 = vector.shape_cast %86 : vector<1x8x128xf32> to vector<8x128xf32>
    %88 = vector.shape_cast %84 : vector<8x128xf32> to vector<1x8x128xf32>
    tpu.vector_store %arg11[%85, %c0_19, %c0_20], %88 {strides = array<i32>} : memref<8x8x128xf32, #tpu.memory_space<vmem>>, vector<1x8x128xf32>,
    %c3_i32 = arith.constant 3 : i32
    %89 = arith.index_cast %c3_i32 : i32 to index
    %c0_21 = arith.constant 0 : index
    %c0_22 = arith.constant 0 : index
    %90 = vector.load %arg1[%89, %c0_21, %c0_22] : memref<8x8x384xf32, #tpu.memory_space<vmem>>, vector<1x8x384xf32>
    %91 = vector.shape_cast %90 : vector<1x8x384xf32> to vector<8x384xf32>
    %92 = arith.truncf %84 : vector<8x128xf32> to vector<8x128xbf16>
    %cst_23 = arith.constant dense<0.000000e+00> : vector<8x384xf32>
    %93 = tpu.matmul %92, %0, %cst_23 {dimension_numbers = #tpu.dot_dimension_numbers<[1], [0], [0], [1], [0, 0, 1, 1], [], []>} : vector<8x128xbf16>, vector<128x384xbf16>, vector<8x384xf32> -> vector<8x384xf32>
    %94 = vector.extract_strided_slice %91 {offsets = [0, 0], sizes = [8, 256], strides = [1, 1]} : vector<8x384xf32> to vector<8x256xf32>
    %95 = vector.extract_strided_slice %93 {offsets = [0, 0], sizes = [8, 256], strides = [1, 1]} : vector<8x384xf32> to vector<8x256xf32>
    %96 = arith.addf %94, %95 : vector<8x256xf32>
    %97 = arith.negf %96 : vector<8x256xf32>
    %98 = math.exp %97 : vector<8x256xf32>
    %cst_24 = arith.constant 1.000000e+00 : f32
    %99 = vector.broadcast %cst_24 : f32 to vector<8x256xf32>
    %100 = arith.addf %99, %98 : vector<8x256xf32>
    %101 = arith.divf %99, %100 : vector<8x256xf32>
    %102 = vector.extract_strided_slice %101 {offsets = [0, 0], sizes = [8, 128], strides = [1, 1]} : vector<8x256xf32> to vector<8x128xf32>
    %103 = vector.extract_strided_slice %101 {offsets = [0, 128], sizes = [8, 128], strides = [1, 1]} : vector<8x256xf32> to vector<8x128xf32>
    %104 = vector.extract_strided_slice %91 {offsets = [0, 256], sizes = [8, 128], strides = [1, 1]} : vector<8x384xf32> to vector<8x128xf32>
    %105 = vector.extract_strided_slice %93 {offsets = [0, 256], sizes = [8, 128], strides = [1, 1]} : vector<8x384xf32> to vector<8x128xf32>
    %106 = arith.addf %105, %3 : vector<8x128xf32>
    %107 = arith.mulf %102, %106 : vector<8x128xf32>
    %108 = arith.addf %104, %107 : vector<8x128xf32>
    %109 = math.tanh %108 : vector<8x128xf32>
    %110 = arith.subf %84, %109 : vector<8x128xf32>
    %111 = arith.mulf %103, %110 : vector<8x128xf32>
    %112 = arith.addf %109, %111 : vector<8x128xf32>
    %113 = arith.index_cast %c3_i32 : i32 to index
    %c0_25 = arith.constant 0 : index
    %c0_26 = arith.constant 0 : index
    %114 = vector.load %arg11[%113, %c0_25, %c0_26] : memref<8x8x128xf32, #tpu.memory_space<vmem>>, vector<1x8x128xf32>
    %115 = vector.shape_cast %114 : vector<1x8x128xf32> to vector<8x128xf32>
    %116 = vector.shape_cast %112 : vector<8x128xf32> to vector<1x8x128xf32>
    tpu.vector_store %arg11[%113, %c0_25, %c0_26], %116 {strides = array<i32>} : memref<8x8x128xf32, #tpu.memory_space<vmem>>, vector<1x8x128xf32>,
    %c4_i32 = arith.constant 4 : i32
    %117 = arith.index_cast %c4_i32 : i32 to index
    %c0_27 = arith.constant 0 : index
    %c0_28 = arith.constant 0 : index
    %118 = vector.load %arg1[%117, %c0_27, %c0_28] : memref<8x8x384xf32, #tpu.memory_space<vmem>>, vector<1x8x384xf32>
    %119 = vector.shape_cast %118 : vector<1x8x384xf32> to vector<8x384xf32>
    %120 = arith.truncf %112 : vector<8x128xf32> to vector<8x128xbf16>
    %cst_29 = arith.constant dense<0.000000e+00> : vector<8x384xf32>
    %121 = tpu.matmul %120, %0, %cst_29 {dimension_numbers = #tpu.dot_dimension_numbers<[1], [0], [0], [1], [0, 0, 1, 1], [], []>} : vector<8x128xbf16>, vector<128x384xbf16>, vector<8x384xf32> -> vector<8x384xf32>
    %122 = vector.extract_strided_slice %119 {offsets = [0, 0], sizes = [8, 256], strides = [1, 1]} : vector<8x384xf32> to vector<8x256xf32>
    %123 = vector.extract_strided_slice %121 {offsets = [0, 0], sizes = [8, 256], strides = [1, 1]} : vector<8x384xf32> to vector<8x256xf32>
    %124 = arith.addf %122, %123 : vector<8x256xf32>
    %125 = arith.negf %124 : vector<8x256xf32>
    %126 = math.exp %125 : vector<8x256xf32>
    %cst_30 = arith.constant 1.000000e+00 : f32
    %127 = vector.broadcast %cst_30 : f32 to vector<8x256xf32>
    %128 = arith.addf %127, %126 : vector<8x256xf32>
    %129 = arith.divf %127, %128 : vector<8x256xf32>
    %130 = vector.extract_strided_slice %129 {offsets = [0, 0], sizes = [8, 128], strides = [1, 1]} : vector<8x256xf32> to vector<8x128xf32>
    %131 = vector.extract_strided_slice %129 {offsets = [0, 128], sizes = [8, 128], strides = [1, 1]} : vector<8x256xf32> to vector<8x128xf32>
    %132 = vector.extract_strided_slice %119 {offsets = [0, 256], sizes = [8, 128], strides = [1, 1]} : vector<8x384xf32> to vector<8x128xf32>
    %133 = vector.extract_strided_slice %121 {offsets = [0, 256], sizes = [8, 128], strides = [1, 1]} : vector<8x384xf32> to vector<8x128xf32>
    %134 = arith.addf %133, %3 : vector<8x128xf32>
    %135 = arith.mulf %130, %134 : vector<8x128xf32>
    %136 = arith.addf %132, %135 : vector<8x128xf32>
    %137 = math.tanh %136 : vector<8x128xf32>
    %138 = arith.subf %112, %137 : vector<8x128xf32>
    %139 = arith.mulf %131, %138 : vector<8x128xf32>
    %140 = arith.addf %137, %139 : vector<8x128xf32>
    %141 = arith.index_cast %c4_i32 : i32 to index
    %c0_31 = arith.constant 0 : index
    %c0_32 = arith.constant 0 : index
    %142 = vector.load %arg11[%141, %c0_31, %c0_32] : memref<8x8x128xf32, #tpu.memory_space<vmem>>, vector<1x8x128xf32>
    %143 = vector.shape_cast %142 : vector<1x8x128xf32> to vector<8x128xf32>
    %144 = vector.shape_cast %140 : vector<8x128xf32> to vector<1x8x128xf32>
    tpu.vector_store %arg11[%141, %c0_31, %c0_32], %144 {strides = array<i32>} : memref<8x8x128xf32, #tpu.memory_space<vmem>>, vector<1x8x128xf32>,
    %c5_i32 = arith.constant 5 : i32
    %145 = arith.index_cast %c5_i32 : i32 to index
    %c0_33 = arith.constant 0 : index
    %c0_34 = arith.constant 0 : index
    %146 = vector.load %arg1[%145, %c0_33, %c0_34] : memref<8x8x384xf32, #tpu.memory_space<vmem>>, vector<1x8x384xf32>
    %147 = vector.shape_cast %146 : vector<1x8x384xf32> to vector<8x384xf32>
    %148 = arith.truncf %140 : vector<8x128xf32> to vector<8x128xbf16>
    %cst_35 = arith.constant dense<0.000000e+00> : vector<8x384xf32>
    %149 = tpu.matmul %148, %0, %cst_35 {dimension_numbers = #tpu.dot_dimension_numbers<[1], [0], [0], [1], [0, 0, 1, 1], [], []>} : vector<8x128xbf16>, vector<128x384xbf16>, vector<8x384xf32> -> vector<8x384xf32>
    %150 = vector.extract_strided_slice %147 {offsets = [0, 0], sizes = [8, 256], strides = [1, 1]} : vector<8x384xf32> to vector<8x256xf32>
    %151 = vector.extract_strided_slice %149 {offsets = [0, 0], sizes = [8, 256], strides = [1, 1]} : vector<8x384xf32> to vector<8x256xf32>
    %152 = arith.addf %150, %151 : vector<8x256xf32>
    %153 = arith.negf %152 : vector<8x256xf32>
    %154 = math.exp %153 : vector<8x256xf32>
    %cst_36 = arith.constant 1.000000e+00 : f32
    %155 = vector.broadcast %cst_36 : f32 to vector<8x256xf32>
    %156 = arith.addf %155, %154 : vector<8x256xf32>
    %157 = arith.divf %155, %156 : vector<8x256xf32>
    %158 = vector.extract_strided_slice %157 {offsets = [0, 0], sizes = [8, 128], strides = [1, 1]} : vector<8x256xf32> to vector<8x128xf32>
    %159 = vector.extract_strided_slice %157 {offsets = [0, 128], sizes = [8, 128], strides = [1, 1]} : vector<8x256xf32> to vector<8x128xf32>
    %160 = vector.extract_strided_slice %147 {offsets = [0, 256], sizes = [8, 128], strides = [1, 1]} : vector<8x384xf32> to vector<8x128xf32>
    %161 = vector.extract_strided_slice %149 {offsets = [0, 256], sizes = [8, 128], strides = [1, 1]} : vector<8x384xf32> to vector<8x128xf32>
    %162 = arith.addf %161, %3 : vector<8x128xf32>
    %163 = arith.mulf %158, %162 : vector<8x128xf32>
    %164 = arith.addf %160, %163 : vector<8x128xf32>
    %165 = math.tanh %164 : vector<8x128xf32>
    %166 = arith.subf %140, %165 : vector<8x128xf32>
    %167 = arith.mulf %159, %166 : vector<8x128xf32>
    %168 = arith.addf %165, %167 : vector<8x128xf32>
    %169 = arith.index_cast %c5_i32 : i32 to index
    %c0_37 = arith.constant 0 : index
    %c0_38 = arith.constant 0 : index
    %170 = vector.load %arg11[%169, %c0_37, %c0_38] : memref<8x8x128xf32, #tpu.memory_space<vmem>>, vector<1x8x128xf32>
    %171 = vector.shape_cast %170 : vector<1x8x128xf32> to vector<8x128xf32>
    %172 = vector.shape_cast %168 : vector<8x128xf32> to vector<1x8x128xf32>
    tpu.vector_store %arg11[%169, %c0_37, %c0_38], %172 {strides = array<i32>} : memref<8x8x128xf32, #tpu.memory_space<vmem>>, vector<1x8x128xf32>,
    %c6_i32 = arith.constant 6 : i32
    %173 = arith.index_cast %c6_i32 : i32 to index
    %c0_39 = arith.constant 0 : index
    %c0_40 = arith.constant 0 : index
    %174 = vector.load %arg1[%173, %c0_39, %c0_40] : memref<8x8x384xf32, #tpu.memory_space<vmem>>, vector<1x8x384xf32>
    %175 = vector.shape_cast %174 : vector<1x8x384xf32> to vector<8x384xf32>
    %176 = arith.truncf %168 : vector<8x128xf32> to vector<8x128xbf16>
    %cst_41 = arith.constant dense<0.000000e+00> : vector<8x384xf32>
    %177 = tpu.matmul %176, %0, %cst_41 {dimension_numbers = #tpu.dot_dimension_numbers<[1], [0], [0], [1], [0, 0, 1, 1], [], []>} : vector<8x128xbf16>, vector<128x384xbf16>, vector<8x384xf32> -> vector<8x384xf32>
    %178 = vector.extract_strided_slice %175 {offsets = [0, 0], sizes = [8, 256], strides = [1, 1]} : vector<8x384xf32> to vector<8x256xf32>
    %179 = vector.extract_strided_slice %177 {offsets = [0, 0], sizes = [8, 256], strides = [1, 1]} : vector<8x384xf32> to vector<8x256xf32>
    %180 = arith.addf %178, %179 : vector<8x256xf32>
    %181 = arith.negf %180 : vector<8x256xf32>
    %182 = math.exp %181 : vector<8x256xf32>
    %cst_42 = arith.constant 1.000000e+00 : f32
    %183 = vector.broadcast %cst_42 : f32 to vector<8x256xf32>
    %184 = arith.addf %183, %182 : vector<8x256xf32>
    %185 = arith.divf %183, %184 : vector<8x256xf32>
    %186 = vector.extract_strided_slice %185 {offsets = [0, 0], sizes = [8, 128], strides = [1, 1]} : vector<8x256xf32> to vector<8x128xf32>
    %187 = vector.extract_strided_slice %185 {offsets = [0, 128], sizes = [8, 128], strides = [1, 1]} : vector<8x256xf32> to vector<8x128xf32>
    %188 = vector.extract_strided_slice %175 {offsets = [0, 256], sizes = [8, 128], strides = [1, 1]} : vector<8x384xf32> to vector<8x128xf32>
    %189 = vector.extract_strided_slice %177 {offsets = [0, 256], sizes = [8, 128], strides = [1, 1]} : vector<8x384xf32> to vector<8x128xf32>
    %190 = arith.addf %189, %3 : vector<8x128xf32>
    %191 = arith.mulf %186, %190 : vector<8x128xf32>
    %192 = arith.addf %188, %191 : vector<8x128xf32>
    %193 = math.tanh %192 : vector<8x128xf32>
    %194 = arith.subf %168, %193 : vector<8x128xf32>
    %195 = arith.mulf %187, %194 : vector<8x128xf32>
    %196 = arith.addf %193, %195 : vector<8x128xf32>
    %197 = arith.index_cast %c6_i32 : i32 to index
    %c0_43 = arith.constant 0 : index
    %c0_44 = arith.constant 0 : index
    %198 = vector.load %arg11[%197, %c0_43, %c0_44] : memref<8x8x128xf32, #tpu.memory_space<vmem>>, vector<1x8x128xf32>
    %199 = vector.shape_cast %198 : vector<1x8x128xf32> to vector<8x128xf32>
    %200 = vector.shape_cast %196 : vector<8x128xf32> to vector<1x8x128xf32>
    tpu.vector_store %arg11[%197, %c0_43, %c0_44], %200 {strides = array<i32>} : memref<8x8x128xf32, #tpu.memory_space<vmem>>, vector<1x8x128xf32>,
    %c7_i32 = arith.constant 7 : i32
    %201 = arith.index_cast %c7_i32 : i32 to index
    %c0_45 = arith.constant 0 : index
    %c0_46 = arith.constant 0 : index
    %202 = vector.load %arg1[%201, %c0_45, %c0_46] : memref<8x8x384xf32, #tpu.memory_space<vmem>>, vector<1x8x384xf32>
    %203 = vector.shape_cast %202 : vector<1x8x384xf32> to vector<8x384xf32>
    %204 = arith.truncf %196 : vector<8x128xf32> to vector<8x128xbf16>
    %cst_47 = arith.constant dense<0.000000e+00> : vector<8x384xf32>
    %205 = tpu.matmul %204, %0, %cst_47 {dimension_numbers = #tpu.dot_dimension_numbers<[1], [0], [0], [1], [0, 0, 1, 1], [], []>} : vector<8x128xbf16>, vector<128x384xbf16>, vector<8x384xf32> -> vector<8x384xf32>
    %206 = vector.extract_strided_slice %203 {offsets = [0, 0], sizes = [8, 256], strides = [1, 1]} : vector<8x384xf32> to vector<8x256xf32>
    %207 = vector.extract_strided_slice %205 {offsets = [0, 0], sizes = [8, 256], strides = [1, 1]} : vector<8x384xf32> to vector<8x256xf32>
    %208 = arith.addf %206, %207 : vector<8x256xf32>
    %209 = arith.negf %208 : vector<8x256xf32>
    %210 = math.exp %209 : vector<8x256xf32>
    %cst_48 = arith.constant 1.000000e+00 : f32
    %211 = vector.broadcast %cst_48 : f32 to vector<8x256xf32>
    %212 = arith.addf %211, %210 : vector<8x256xf32>
    %213 = arith.divf %211, %212 : vector<8x256xf32>
    %214 = vector.extract_strided_slice %213 {offsets = [0, 0], sizes = [8, 128], strides = [1, 1]} : vector<8x256xf32> to vector<8x128xf32>
    %215 = vector.extract_strided_slice %213 {offsets = [0, 128], sizes = [8, 128], strides = [1, 1]} : vector<8x256xf32> to vector<8x128xf32>
    %216 = vector.extract_strided_slice %203 {offsets = [0, 256], sizes = [8, 128], strides = [1, 1]} : vector<8x384xf32> to vector<8x128xf32>
    %217 = vector.extract_strided_slice %205 {offsets = [0, 256], sizes = [8, 128], strides = [1, 1]} : vector<8x384xf32> to vector<8x128xf32>
    %218 = arith.addf %217, %3 : vector<8x128xf32>
    %219 = arith.mulf %214, %218 : vector<8x128xf32>
    %220 = arith.addf %216, %219 : vector<8x128xf32>
    %221 = math.tanh %220 : vector<8x128xf32>
    %222 = arith.subf %196, %221 : vector<8x128xf32>
    %223 = arith.mulf %215, %222 : vector<8x128xf32>
    %224 = arith.addf %221, %223 : vector<8x128xf32>
    %225 = arith.index_cast %c7_i32 : i32 to index
    %c0_49 = arith.constant 0 : index
    %c0_50 = arith.constant 0 : index
    %226 = vector.load %arg11[%225, %c0_49, %c0_50] : memref<8x8x128xf32, #tpu.memory_space<vmem>>, vector<1x8x128xf32>
    %227 = vector.shape_cast %226 : vector<1x8x128xf32> to vector<8x128xf32>
    %228 = vector.shape_cast %224 : vector<8x128xf32> to vector<1x8x128xf32>
    tpu.vector_store %arg11[%225, %c0_49, %c0_50], %228 {strides = array<i32>} : memref<8x8x128xf32, #tpu.memory_space<vmem>>, vector<1x8x128xf32>,
    %c8_i32 = arith.constant 8 : i32
    %c0_51 = arith.constant 0 : index
    %c0_52 = arith.constant 0 : index
    %229 = vector.load %arg6[%c0_51, %c0_52] : memref<128x384xbf16, #tpu.memory_space<vmem>>, vector<128x384xbf16>
    %c0_53 = arith.constant 0 : index
    %c0_54 = arith.constant 0 : index
    %230 = vector.load %arg7[%c0_53, %c0_54] : memref<1x384xf32, #tpu.memory_space<vmem>>, vector<1x384xf32>
    %c0_55 = arith.constant 0 : index
    %c0_56 = arith.constant 0 : index
    %231 = vector.load %arg4[%c0_55, %c0_56] : memref<128x384xbf16, #tpu.memory_space<vmem>>, vector<128x384xbf16>
    %c0_57 = arith.constant 0 : index
    %c0_58 = arith.constant 0 : index
    %232 = vector.load %arg5[%c0_57, %c0_58] : memref<1x128xf32, #tpu.memory_space<vmem>>, vector<1x128xf32>
    %233 = vector.shape_cast %232 : vector<1x128xf32> to vector<1x128xf32>
    %234 = vector.broadcast %233 : vector<1x128xf32> to vector<8x128xf32>
    %cst_59 = arith.constant 0.000000e+00 : f32
    %235 = vector.broadcast %cst_59 : f32 to vector<8x128xf32>
    %c0_60 = arith.constant 0 : index
    %c0_61 = arith.constant 0 : index
    %c0_62 = arith.constant 0 : index
    %236 = vector.load %arg11[%c0_60, %c0_61, %c0_62] : memref<8x8x128xf32, #tpu.memory_space<vmem>>, vector<8x8x128xf32>
    %237 = vector.shape_cast %236 : vector<8x8x128xf32> to vector<64x128xf32>
    %238 = arith.truncf %237 : vector<64x128xf32> to vector<64x128xbf16>
    %cst_63 = arith.constant dense<0.000000e+00> : vector<64x384xf32>
    %239 = tpu.matmul %238, %229, %cst_63 {dimension_numbers = #tpu.dot_dimension_numbers<[1], [0], [0], [1], [0, 0, 1, 1], [], []>} : vector<64x128xbf16>, vector<128x384xbf16>, vector<64x384xf32> -> vector<64x384xf32>
    %240 = vector.broadcast %230 : vector<1x384xf32> to vector<64x384xf32>
    %241 = arith.addf %239, %240 : vector<64x384xf32>
    %242 = vector.shape_cast %241 : vector<64x384xf32> to vector<8x8x384xf32>
    %c0_64 = arith.constant 0 : index
    %c0_65 = arith.constant 0 : index
    %c0_66 = arith.constant 0 : index
    %243 = vector.load %arg12[%c0_64, %c0_65, %c0_66] : memref<8x8x384xf32, #tpu.memory_space<vmem>>, vector<8x8x384xf32>
    tpu.vector_store %arg12[%c0_64, %c0_65, %c0_66], %242 {strides = array<i32>} : memref<8x8x384xf32, #tpu.memory_space<vmem>>, vector<8x8x384xf32>,
    %c0_i32_67 = arith.constant 0 : i32
    %c0_i32_68 = arith.constant 0 : i32
    %244 = arith.subi %c0_i32_67, %c0_i32_68 : i32
    %245 = arith.index_cast %244 : i32 to index
    %c0_69 = arith.constant 0 : index
    %c0_70 = arith.constant 0 : index
    %246 = vector.load %arg12[%245, %c0_69, %c0_70] : memref<8x8x384xf32, #tpu.memory_space<vmem>>, vector<1x8x384xf32>
    %247 = vector.shape_cast %246 : vector<1x8x384xf32> to vector<8x384xf32>
    %248 = arith.truncf %235 : vector<8x128xf32> to vector<8x128xbf16>
    %cst_71 = arith.constant dense<0.000000e+00> : vector<8x384xf32>
    %249 = tpu.matmul %248, %231, %cst_71 {dimension_numbers = #tpu.dot_dimension_numbers<[1], [0], [0], [1], [0, 0, 1, 1], [], []>} : vector<8x128xbf16>, vector<128x384xbf16>, vector<8x384xf32> -> vector<8x384xf32>
    %250 = vector.extract_strided_slice %247 {offsets = [0, 0], sizes = [8, 256], strides = [1, 1]} : vector<8x384xf32> to vector<8x256xf32>
    %251 = vector.extract_strided_slice %249 {offsets = [0, 0], sizes = [8, 256], strides = [1, 1]} : vector<8x384xf32> to vector<8x256xf32>
    %252 = arith.addf %250, %251 : vector<8x256xf32>
    %253 = arith.negf %252 : vector<8x256xf32>
    %254 = math.exp %253 : vector<8x256xf32>
    %cst_72 = arith.constant 1.000000e+00 : f32
    %255 = vector.broadcast %cst_72 : f32 to vector<8x256xf32>
    %256 = arith.addf %255, %254 : vector<8x256xf32>
    %257 = arith.divf %255, %256 : vector<8x256xf32>
    %258 = vector.extract_strided_slice %257 {offsets = [0, 0], sizes = [8, 128], strides = [1, 1]} : vector<8x256xf32> to vector<8x128xf32>
    %259 = vector.extract_strided_slice %257 {offsets = [0, 128], sizes = [8, 128], strides = [1, 1]} : vector<8x256xf32> to vector<8x128xf32>
    %260 = vector.extract_strided_slice %247 {offsets = [0, 256], sizes = [8, 128], strides = [1, 1]} : vector<8x384xf32> to vector<8x128xf32>
    %261 = vector.extract_strided_slice %249 {offsets = [0, 256], sizes = [8, 128], strides = [1, 1]} : vector<8x384xf32> to vector<8x128xf32>
    %262 = arith.addf %261, %234 : vector<8x128xf32>
    %263 = arith.mulf %258, %262 : vector<8x128xf32>
    %264 = arith.addf %260, %263 : vector<8x128xf32>
    %265 = math.tanh %264 : vector<8x128xf32>
    %266 = arith.subf %235, %265 : vector<8x128xf32>
    %267 = arith.mulf %259, %266 : vector<8x128xf32>
    %268 = arith.addf %265, %267 : vector<8x128xf32>
    %c1_i32_73 = arith.constant 1 : i32
    %c0_i32_74 = arith.constant 0 : i32
    %269 = arith.subi %c1_i32_73, %c0_i32_74 : i32
    %270 = arith.index_cast %269 : i32 to index
    %c0_75 = arith.constant 0 : index
    %c0_76 = arith.constant 0 : index
    %271 = vector.load %arg12[%270, %c0_75, %c0_76] : memref<8x8x384xf32, #tpu.memory_space<vmem>>, vector<1x8x384xf32>
    %272 = vector.shape_cast %271 : vector<1x8x384xf32> to vector<8x384xf32>
    %273 = arith.truncf %268 : vector<8x128xf32> to vector<8x128xbf16>
    %cst_77 = arith.constant dense<0.000000e+00> : vector<8x384xf32>
    %274 = tpu.matmul %273, %231, %cst_77 {dimension_numbers = #tpu.dot_dimension_numbers<[1], [0], [0], [1], [0, 0, 1, 1], [], []>} : vector<8x128xbf16>, vector<128x384xbf16>, vector<8x384xf32> -> vector<8x384xf32>
    %275 = vector.extract_strided_slice %272 {offsets = [0, 0], sizes = [8, 256], strides = [1, 1]} : vector<8x384xf32> to vector<8x256xf32>
    %276 = vector.extract_strided_slice %274 {offsets = [0, 0], sizes = [8, 256], strides = [1, 1]} : vector<8x384xf32> to vector<8x256xf32>
    %277 = arith.addf %275, %276 : vector<8x256xf32>
    %278 = arith.negf %277 : vector<8x256xf32>
    %279 = math.exp %278 : vector<8x256xf32>
    %cst_78 = arith.constant 1.000000e+00 : f32
    %280 = vector.broadcast %cst_78 : f32 to vector<8x256xf32>
    %281 = arith.addf %280, %279 : vector<8x256xf32>
    %282 = arith.divf %280, %281 : vector<8x256xf32>
    %283 = vector.extract_strided_slice %282 {offsets = [0, 0], sizes = [8, 128], strides = [1, 1]} : vector<8x256xf32> to vector<8x128xf32>
    %284 = vector.extract_strided_slice %282 {offsets = [0, 128], sizes = [8, 128], strides = [1, 1]} : vector<8x256xf32> to vector<8x128xf32>
    %285 = vector.extract_strided_slice %272 {offsets = [0, 256], sizes = [8, 128], strides = [1, 1]} : vector<8x384xf32> to vector<8x128xf32>
    %286 = vector.extract_strided_slice %274 {offsets = [0, 256], sizes = [8, 128], strides = [1, 1]} : vector<8x384xf32> to vector<8x128xf32>
    %287 = arith.addf %286, %234 : vector<8x128xf32>
    %288 = arith.mulf %283, %287 : vector<8x128xf32>
    %289 = arith.addf %285, %288 : vector<8x128xf32>
    %290 = math.tanh %289 : vector<8x128xf32>
    %291 = arith.subf %268, %290 : vector<8x128xf32>
    %292 = arith.mulf %284, %291 : vector<8x128xf32>
    %293 = arith.addf %290, %292 : vector<8x128xf32>
    %c2_i32_79 = arith.constant 2 : i32
    %c0_i32_80 = arith.constant 0 : i32
    %294 = arith.subi %c2_i32_79, %c0_i32_80 : i32
    %295 = arith.index_cast %294 : i32 to index
    %c0_81 = arith.constant 0 : index
    %c0_82 = arith.constant 0 : index
    %296 = vector.load %arg12[%295, %c0_81, %c0_82] : memref<8x8x384xf32, #tpu.memory_space<vmem>>, vector<1x8x384xf32>
    %297 = vector.shape_cast %296 : vector<1x8x384xf32> to vector<8x384xf32>
    %298 = arith.truncf %293 : vector<8x128xf32> to vector<8x128xbf16>
    %cst_83 = arith.constant dense<0.000000e+00> : vector<8x384xf32>
    %299 = tpu.matmul %298, %231, %cst_83 {dimension_numbers = #tpu.dot_dimension_numbers<[1], [0], [0], [1], [0, 0, 1, 1], [], []>} : vector<8x128xbf16>, vector<128x384xbf16>, vector<8x384xf32> -> vector<8x384xf32>
    %300 = vector.extract_strided_slice %297 {offsets = [0, 0], sizes = [8, 256], strides = [1, 1]} : vector<8x384xf32> to vector<8x256xf32>
    %301 = vector.extract_strided_slice %299 {offsets = [0, 0], sizes = [8, 256], strides = [1, 1]} : vector<8x384xf32> to vector<8x256xf32>
    %302 = arith.addf %300, %301 : vector<8x256xf32>
    %303 = arith.negf %302 : vector<8x256xf32>
    %304 = math.exp %303 : vector<8x256xf32>
    %cst_84 = arith.constant 1.000000e+00 : f32
    %305 = vector.broadcast %cst_84 : f32 to vector<8x256xf32>
    %306 = arith.addf %305, %304 : vector<8x256xf32>
    %307 = arith.divf %305, %306 : vector<8x256xf32>
    %308 = vector.extract_strided_slice %307 {offsets = [0, 0], sizes = [8, 128], strides = [1, 1]} : vector<8x256xf32> to vector<8x128xf32>
    %309 = vector.extract_strided_slice %307 {offsets = [0, 128], sizes = [8, 128], strides = [1, 1]} : vector<8x256xf32> to vector<8x128xf32>
    %310 = vector.extract_strided_slice %297 {offsets = [0, 256], sizes = [8, 128], strides = [1, 1]} : vector<8x384xf32> to vector<8x128xf32>
    %311 = vector.extract_strided_slice %299 {offsets = [0, 256], sizes = [8, 128], strides = [1, 1]} : vector<8x384xf32> to vector<8x128xf32>
    %312 = arith.addf %311, %234 : vector<8x128xf32>
    %313 = arith.mulf %308, %312 : vector<8x128xf32>
    %314 = arith.addf %310, %313 : vector<8x128xf32>
    %315 = math.tanh %314 : vector<8x128xf32>
    %316 = arith.subf %293, %315 : vector<8x128xf32>
    %317 = arith.mulf %309, %316 : vector<8x128xf32>
    %318 = arith.addf %315, %317 : vector<8x128xf32>
    %c3_i32_85 = arith.constant 3 : i32
    %c0_i32_86 = arith.constant 0 : i32
    %319 = arith.subi %c3_i32_85, %c0_i32_86 : i32
    %320 = arith.index_cast %319 : i32 to index
    %c0_87 = arith.constant 0 : index
    %c0_88 = arith.constant 0 : index
    %321 = vector.load %arg12[%320, %c0_87, %c0_88] : memref<8x8x384xf32, #tpu.memory_space<vmem>>, vector<1x8x384xf32>
    %322 = vector.shape_cast %321 : vector<1x8x384xf32> to vector<8x384xf32>
    %323 = arith.truncf %318 : vector<8x128xf32> to vector<8x128xbf16>
    %cst_89 = arith.constant dense<0.000000e+00> : vector<8x384xf32>
    %324 = tpu.matmul %323, %231, %cst_89 {dimension_numbers = #tpu.dot_dimension_numbers<[1], [0], [0], [1], [0, 0, 1, 1], [], []>} : vector<8x128xbf16>, vector<128x384xbf16>, vector<8x384xf32> -> vector<8x384xf32>
    %325 = vector.extract_strided_slice %322 {offsets = [0, 0], sizes = [8, 256], strides = [1, 1]} : vector<8x384xf32> to vector<8x256xf32>
    %326 = vector.extract_strided_slice %324 {offsets = [0, 0], sizes = [8, 256], strides = [1, 1]} : vector<8x384xf32> to vector<8x256xf32>
    %327 = arith.addf %325, %326 : vector<8x256xf32>
    %328 = arith.negf %327 : vector<8x256xf32>
    %329 = math.exp %328 : vector<8x256xf32>
    %cst_90 = arith.constant 1.000000e+00 : f32
    %330 = vector.broadcast %cst_90 : f32 to vector<8x256xf32>
    %331 = arith.addf %330, %329 : vector<8x256xf32>
    %332 = arith.divf %330, %331 : vector<8x256xf32>
    %333 = vector.extract_strided_slice %332 {offsets = [0, 0], sizes = [8, 128], strides = [1, 1]} : vector<8x256xf32> to vector<8x128xf32>
    %334 = vector.extract_strided_slice %332 {offsets = [0, 128], sizes = [8, 128], strides = [1, 1]} : vector<8x256xf32> to vector<8x128xf32>
    %335 = vector.extract_strided_slice %322 {offsets = [0, 256], sizes = [8, 128], strides = [1, 1]} : vector<8x384xf32> to vector<8x128xf32>
    %336 = vector.extract_strided_slice %324 {offsets = [0, 256], sizes = [8, 128], strides = [1, 1]} : vector<8x384xf32> to vector<8x128xf32>
    %337 = arith.addf %336, %234 : vector<8x128xf32>
    %338 = arith.mulf %333, %337 : vector<8x128xf32>
    %339 = arith.addf %335, %338 : vector<8x128xf32>
    %340 = math.tanh %339 : vector<8x128xf32>
    %341 = arith.subf %318, %340 : vector<8x128xf32>
    %342 = arith.mulf %334, %341 : vector<8x128xf32>
    %343 = arith.addf %340, %342 : vector<8x128xf32>
    %c4_i32_91 = arith.constant 4 : i32
    %c0_i32_92 = arith.constant 0 : i32
    %344 = arith.subi %c4_i32_91, %c0_i32_92 : i32
    %345 = arith.index_cast %344 : i32 to index
    %c0_93 = arith.constant 0 : index
    %c0_94 = arith.constant 0 : index
    %346 = vector.load %arg12[%345, %c0_93, %c0_94] : memref<8x8x384xf32, #tpu.memory_space<vmem>>, vector<1x8x384xf32>
    %347 = vector.shape_cast %346 : vector<1x8x384xf32> to vector<8x384xf32>
    %348 = arith.truncf %343 : vector<8x128xf32> to vector<8x128xbf16>
    %cst_95 = arith.constant dense<0.000000e+00> : vector<8x384xf32>
    %349 = tpu.matmul %348, %231, %cst_95 {dimension_numbers = #tpu.dot_dimension_numbers<[1], [0], [0], [1], [0, 0, 1, 1], [], []>} : vector<8x128xbf16>, vector<128x384xbf16>, vector<8x384xf32> -> vector<8x384xf32>
    %350 = vector.extract_strided_slice %347 {offsets = [0, 0], sizes = [8, 256], strides = [1, 1]} : vector<8x384xf32> to vector<8x256xf32>
    %351 = vector.extract_strided_slice %349 {offsets = [0, 0], sizes = [8, 256], strides = [1, 1]} : vector<8x384xf32> to vector<8x256xf32>
    %352 = arith.addf %350, %351 : vector<8x256xf32>
    %353 = arith.negf %352 : vector<8x256xf32>
    %354 = math.exp %353 : vector<8x256xf32>
    %cst_96 = arith.constant 1.000000e+00 : f32
    %355 = vector.broadcast %cst_96 : f32 to vector<8x256xf32>
    %356 = arith.addf %355, %354 : vector<8x256xf32>
    %357 = arith.divf %355, %356 : vector<8x256xf32>
    %358 = vector.extract_strided_slice %357 {offsets = [0, 0], sizes = [8, 128], strides = [1, 1]} : vector<8x256xf32> to vector<8x128xf32>
    %359 = vector.extract_strided_slice %357 {offsets = [0, 128], sizes = [8, 128], strides = [1, 1]} : vector<8x256xf32> to vector<8x128xf32>
    %360 = vector.extract_strided_slice %347 {offsets = [0, 256], sizes = [8, 128], strides = [1, 1]} : vector<8x384xf32> to vector<8x128xf32>
    %361 = vector.extract_strided_slice %349 {offsets = [0, 256], sizes = [8, 128], strides = [1, 1]} : vector<8x384xf32> to vector<8x128xf32>
    %362 = arith.addf %361, %234 : vector<8x128xf32>
    %363 = arith.mulf %358, %362 : vector<8x128xf32>
    %364 = arith.addf %360, %363 : vector<8x128xf32>
    %365 = math.tanh %364 : vector<8x128xf32>
    %366 = arith.subf %343, %365 : vector<8x128xf32>
    %367 = arith.mulf %359, %366 : vector<8x128xf32>
    %368 = arith.addf %365, %367 : vector<8x128xf32>
    %c5_i32_97 = arith.constant 5 : i32
    %c0_i32_98 = arith.constant 0 : i32
    %369 = arith.subi %c5_i32_97, %c0_i32_98 : i32
    %370 = arith.index_cast %369 : i32 to index
    %c0_99 = arith.constant 0 : index
    %c0_100 = arith.constant 0 : index
    %371 = vector.load %arg12[%370, %c0_99, %c0_100] : memref<8x8x384xf32, #tpu.memory_space<vmem>>, vector<1x8x384xf32>
    %372 = vector.shape_cast %371 : vector<1x8x384xf32> to vector<8x384xf32>
    %373 = arith.truncf %368 : vector<8x128xf32> to vector<8x128xbf16>
    %cst_101 = arith.constant dense<0.000000e+00> : vector<8x384xf32>
    %374 = tpu.matmul %373, %231, %cst_101 {dimension_numbers = #tpu.dot_dimension_numbers<[1], [0], [0], [1], [0, 0, 1, 1], [], []>} : vector<8x128xbf16>, vector<128x384xbf16>, vector<8x384xf32> -> vector<8x384xf32>
    %375 = vector.extract_strided_slice %372 {offsets = [0, 0], sizes = [8, 256], strides = [1, 1]} : vector<8x384xf32> to vector<8x256xf32>
    %376 = vector.extract_strided_slice %374 {offsets = [0, 0], sizes = [8, 256], strides = [1, 1]} : vector<8x384xf32> to vector<8x256xf32>
    %377 = arith.addf %375, %376 : vector<8x256xf32>
    %378 = arith.negf %377 : vector<8x256xf32>
    %379 = math.exp %378 : vector<8x256xf32>
    %cst_102 = arith.constant 1.000000e+00 : f32
    %380 = vector.broadcast %cst_102 : f32 to vector<8x256xf32>
    %381 = arith.addf %380, %379 : vector<8x256xf32>
    %382 = arith.divf %380, %381 : vector<8x256xf32>
    %383 = vector.extract_strided_slice %382 {offsets = [0, 0], sizes = [8, 128], strides = [1, 1]} : vector<8x256xf32> to vector<8x128xf32>
    %384 = vector.extract_strided_slice %382 {offsets = [0, 128], sizes = [8, 128], strides = [1, 1]} : vector<8x256xf32> to vector<8x128xf32>
    %385 = vector.extract_strided_slice %372 {offsets = [0, 256], sizes = [8, 128], strides = [1, 1]} : vector<8x384xf32> to vector<8x128xf32>
    %386 = vector.extract_strided_slice %374 {offsets = [0, 256], sizes = [8, 128], strides = [1, 1]} : vector<8x384xf32> to vector<8x128xf32>
    %387 = arith.addf %386, %234 : vector<8x128xf32>
    %388 = arith.mulf %383, %387 : vector<8x128xf32>
    %389 = arith.addf %385, %388 : vector<8x128xf32>
    %390 = math.tanh %389 : vector<8x128xf32>
    %391 = arith.subf %368, %390 : vector<8x128xf32>
    %392 = arith.mulf %384, %391 : vector<8x128xf32>
    %393 = arith.addf %390, %392 : vector<8x128xf32>
    %c6_i32_103 = arith.constant 6 : i32
    %c0_i32_104 = arith.constant 0 : i32
    %394 = arith.subi %c6_i32_103, %c0_i32_104 : i32
    %395 = arith.index_cast %394 : i32 to index
    %c0_105 = arith.constant 0 : index
    %c0_106 = arith.constant 0 : index
    %396 = vector.load %arg12[%395, %c0_105, %c0_106] : memref<8x8x384xf32, #tpu.memory_space<vmem>>, vector<1x8x384xf32>
    %397 = vector.shape_cast %396 : vector<1x8x384xf32> to vector<8x384xf32>
    %398 = arith.truncf %393 : vector<8x128xf32> to vector<8x128xbf16>
    %cst_107 = arith.constant dense<0.000000e+00> : vector<8x384xf32>
    %399 = tpu.matmul %398, %231, %cst_107 {dimension_numbers = #tpu.dot_dimension_numbers<[1], [0], [0], [1], [0, 0, 1, 1], [], []>} : vector<8x128xbf16>, vector<128x384xbf16>, vector<8x384xf32> -> vector<8x384xf32>
    %400 = vector.extract_strided_slice %397 {offsets = [0, 0], sizes = [8, 256], strides = [1, 1]} : vector<8x384xf32> to vector<8x256xf32>
    %401 = vector.extract_strided_slice %399 {offsets = [0, 0], sizes = [8, 256], strides = [1, 1]} : vector<8x384xf32> to vector<8x256xf32>
    %402 = arith.addf %400, %401 : vector<8x256xf32>
    %403 = arith.negf %402 : vector<8x256xf32>
    %404 = math.exp %403 : vector<8x256xf32>
    %cst_108 = arith.constant 1.000000e+00 : f32
    %405 = vector.broadcast %cst_108 : f32 to vector<8x256xf32>
    %406 = arith.addf %405, %404 : vector<8x256xf32>
    %407 = arith.divf %405, %406 : vector<8x256xf32>
    %408 = vector.extract_strided_slice %407 {offsets = [0, 0], sizes = [8, 128], strides = [1, 1]} : vector<8x256xf32> to vector<8x128xf32>
    %409 = vector.extract_strided_slice %407 {offsets = [0, 128], sizes = [8, 128], strides = [1, 1]} : vector<8x256xf32> to vector<8x128xf32>
    %410 = vector.extract_strided_slice %397 {offsets = [0, 256], sizes = [8, 128], strides = [1, 1]} : vector<8x384xf32> to vector<8x128xf32>
    %411 = vector.extract_strided_slice %399 {offsets = [0, 256], sizes = [8, 128], strides = [1, 1]} : vector<8x384xf32> to vector<8x128xf32>
    %412 = arith.addf %411, %234 : vector<8x128xf32>
    %413 = arith.mulf %408, %412 : vector<8x128xf32>
    %414 = arith.addf %410, %413 : vector<8x128xf32>
    %415 = math.tanh %414 : vector<8x128xf32>
    %416 = arith.subf %393, %415 : vector<8x128xf32>
    %417 = arith.mulf %409, %416 : vector<8x128xf32>
    %418 = arith.addf %415, %417 : vector<8x128xf32>
    %c7_i32_109 = arith.constant 7 : i32
    %c0_i32_110 = arith.constant 0 : i32
    %419 = arith.subi %c7_i32_109, %c0_i32_110 : i32
    %420 = arith.index_cast %419 : i32 to index
    %c0_111 = arith.constant 0 : index
    %c0_112 = arith.constant 0 : index
    %421 = vector.load %arg12[%420, %c0_111, %c0_112] : memref<8x8x384xf32, #tpu.memory_space<vmem>>, vector<1x8x384xf32>
    %422 = vector.shape_cast %421 : vector<1x8x384xf32> to vector<8x384xf32>
    %423 = arith.truncf %418 : vector<8x128xf32> to vector<8x128xbf16>
    %cst_113 = arith.constant dense<0.000000e+00> : vector<8x384xf32>
    %424 = tpu.matmul %423, %231, %cst_113 {dimension_numbers = #tpu.dot_dimension_numbers<[1], [0], [0], [1], [0, 0, 1, 1], [], []>} : vector<8x128xbf16>, vector<128x384xbf16>, vector<8x384xf32> -> vector<8x384xf32>
    %425 = vector.extract_strided_slice %422 {offsets = [0, 0], sizes = [8, 256], strides = [1, 1]} : vector<8x384xf32> to vector<8x256xf32>
    %426 = vector.extract_strided_slice %424 {offsets = [0, 0], sizes = [8, 256], strides = [1, 1]} : vector<8x384xf32> to vector<8x256xf32>
    %427 = arith.addf %425, %426 : vector<8x256xf32>
    %428 = arith.negf %427 : vector<8x256xf32>
    %429 = math.exp %428 : vector<8x256xf32>
    %cst_114 = arith.constant 1.000000e+00 : f32
    %430 = vector.broadcast %cst_114 : f32 to vector<8x256xf32>
    %431 = arith.addf %430, %429 : vector<8x256xf32>
    %432 = arith.divf %430, %431 : vector<8x256xf32>
    %433 = vector.extract_strided_slice %432 {offsets = [0, 0], sizes = [8, 128], strides = [1, 1]} : vector<8x256xf32> to vector<8x128xf32>
    %434 = vector.extract_strided_slice %432 {offsets = [0, 128], sizes = [8, 128], strides = [1, 1]} : vector<8x256xf32> to vector<8x128xf32>
    %435 = vector.extract_strided_slice %422 {offsets = [0, 256], sizes = [8, 128], strides = [1, 1]} : vector<8x384xf32> to vector<8x128xf32>
    %436 = vector.extract_strided_slice %424 {offsets = [0, 256], sizes = [8, 128], strides = [1, 1]} : vector<8x384xf32> to vector<8x128xf32>
    %437 = arith.addf %436, %234 : vector<8x128xf32>
    %438 = arith.mulf %433, %437 : vector<8x128xf32>
    %439 = arith.addf %435, %438 : vector<8x128xf32>
    %440 = math.tanh %439 : vector<8x128xf32>
    %441 = arith.subf %418, %440 : vector<8x128xf32>
    %442 = arith.mulf %434, %441 : vector<8x128xf32>
    %443 = arith.addf %440, %442 : vector<8x128xf32>
    %c8_i32_115 = arith.constant 8 : i32
    %c0_116 = arith.constant 0 : index
    %c0_117 = arith.constant 0 : index
    %444 = vector.load %arg8[%c0_116, %c0_117] : memref<128x2xf32, #tpu.memory_space<vmem>>, vector<128x2xf32>
    %cst_118 = arith.constant dense<0.000000e+00> : vector<8x2xf32>
    %445 = tpu.matmul %443, %444, %cst_118 {dimension_numbers = #tpu.dot_dimension_numbers<[1], [0], [0], [1], [0, 0, 1, 1], [], []>} : vector<8x128xf32>, vector<128x2xf32>, vector<8x2xf32> -> vector<8x2xf32>
    %c0_119 = arith.constant 0 : index
    %c0_120 = arith.constant 0 : index
    %446 = vector.load %arg9[%c0_119, %c0_120] : memref<1x2xf32, #tpu.memory_space<vmem>>, vector<1x2xf32>
    %447 = vector.broadcast %446 : vector<1x2xf32> to vector<8x2xf32>
    %448 = arith.addf %445, %447 : vector<8x2xf32>
    %c0_121 = arith.constant 0 : index
    %c0_122 = arith.constant 0 : index
    %449 = vector.load %arg10[%c0_121, %c0_122] : memref<8x2xf32, #tpu.memory_space<vmem>>, vector<8x2xf32>
    tpu.vector_store %arg10[%c0_121, %c0_122], %448 {strides = array<i32>} : memref<8x2xf32, #tpu.memory_space<vmem>>, vector<8x2xf32>,
    return
  }
  func.func @transform_0(%arg0: i32) -> (i32, i32, i32) {
    %c0_i32 = arith.constant 0 : i32
    %c0_i32_0 = arith.constant 0 : i32
    %c0_i32_1 = arith.constant 0 : i32
    return %c0_i32, %arg0, %c0_i32_0 : i32, i32, i32
  }
  func.func @transform_1(%arg0: i32) -> (i32, i32) {
    %c0_i32 = arith.constant 0 : i32
    %c0_i32_0 = arith.constant 0 : i32
    %c0_i32_1 = arith.constant 0 : i32
    return %c0_i32, %c0_i32_0 : i32, i32
  }
  func.func @transform_2(%arg0: i32) -> (i32, i32) {
    %c0_i32 = arith.constant 0 : i32
    %c0_i32_0 = arith.constant 0 : i32
    %c0_i32_1 = arith.constant 0 : i32
    return %c0_i32, %c0_i32_0 : i32, i32
  }
  func.func @transform_3(%arg0: i32) -> (i32, i32) {
    %c0_i32 = arith.constant 0 : i32
    %c0_i32_0 = arith.constant 0 : i32
    %c0_i32_1 = arith.constant 0 : i32
    return %c0_i32, %c0_i32_0 : i32, i32
  }
  func.func @transform_4(%arg0: i32) -> (i32, i32) {
    %c0_i32 = arith.constant 0 : i32
    %c0_i32_0 = arith.constant 0 : i32
    %c0_i32_1 = arith.constant 0 : i32
    return %c0_i32, %c0_i32_0 : i32, i32
  }
  func.func @transform_5(%arg0: i32) -> (i32, i32) {
    %c0_i32 = arith.constant 0 : i32
    %c0_i32_0 = arith.constant 0 : i32
    %c0_i32_1 = arith.constant 0 : i32
    return %c0_i32, %c0_i32_0 : i32, i32
  }
  func.func @transform_6(%arg0: i32) -> (i32, i32) {
    %c0_i32 = arith.constant 0 : i32
    %c0_i32_0 = arith.constant 0 : i32
    %c0_i32_1 = arith.constant 0 : i32
    return %c0_i32, %c0_i32_0 : i32, i32
  }
  func.func @transform_7(%arg0: i32) -> (i32, i32) {
    %c0_i32 = arith.constant 0 : i32
    %c0_i32_0 = arith.constant 0 : i32
    %c0_i32_1 = arith.constant 0 : i32
    return %c0_i32, %c0_i32_0 : i32, i32
  }
  func.func @transform_8(%arg0: i32) -> (i32, i32) {
    %c0_i32 = arith.constant 0 : i32
    %c0_i32_0 = arith.constant 0 : i32
    %c0_i32_1 = arith.constant 0 : i32
    return %c0_i32, %c0_i32_0 : i32, i32
  }
  func.func @transform_9(%arg0: i32) -> (i32, i32) {
    %c0_i32 = arith.constant 0 : i32
    %c0_i32_0 = arith.constant 0 : i32
    return %arg0, %c0_i32 : i32, i32
  }
}

</mosaic_0001>

<bundles_post_ra>
// kernel: tpu_custom_call.1
= control target key start
LH: loop header
LB: loop body
LE: loop exit
PB: predicated region body
PF: predicated region fallthrough
CT: control target
= control target key end

     0   :  { %14 = vsyncpa [#allocation5], 0  ;;  %s4700_s0 = inlined_call_operand.hbm [shape: f32[8,8,384], index: 0, kind: input, shape index: {}]   ;;  %s4701_s1 = inlined_call_operand.hbm [shape: bf16[128,384], index: 1, kind: input, shape index: {}]   ;;  %s4702_s2 = inlined_call_operand.vmem [shape: f32[1,128], index: 2, kind: input, shape index: {}]   ;;  %s4703_s3 = inlined_call_operand.hbm [shape: bf16[128,384], index: 3, kind: input, shape index: {}]   ;;  %s4704_s4 = inlined_call_operand.vmem [shape: f32[1,128], index: 4, kind: input, shape index: {}]   ;;  %s4705_s5 = inlined_call_operand.hbm [shape: bf16[128,384], index: 5, kind: input, shape index: {}]   ;;  %s4706_s6 = inlined_call_operand.vmem [shape: f32[1,384], index: 6, kind: input, shape index: {}]   ;;  %s4707_s7 = inlined_call_operand.vmem [shape: f32[128,2], index: 7, kind: input, shape index: {}]   ;;  %s4708_s8 = inlined_call_operand.vmem [shape: f32[1,2], index: 8, kind: input, shape index: {}]   ;;  %s4709_s9 = inlined_call_operand.vmem [shape: f32[8,2], index: 9, kind: output, shape index: {}]  }
   0x1   :  { %15 = vsyncpa [#allocation7], 0 }
   0x2   :  { %16 = vsyncpa [#allocation10], 0  ;;  %s3689_s30 = smov [#allocation6]   ;;  %s3595_s13 = scalar_lea.hbm %s4701_s1, 3072 }
   0x3   :  { %s34_s10 = sshll.u32 %s3689_s30, 4  ;;  %p3596_p0 = scmp.ne.s32.totalorder %s4701_s1, %s3595_s13  ;;  %s35_s10 = int_to_ptr.vmem [resolvable:$true] %s34_s10 }
   0x4   :  { %p3599_p1 = scmp.lt.u32.totalorder %s3595_s13, %s4701_s1 }
   0x6   :  { %p3601_p2 = pnand %p3599_p1, %p3596_p0 }
   0x8   :  { %3604 = shalt.err (!%p3601_p2)
}
   0x9   :  { %s3605_s18 = scalar_lea.vmem %s35_s10, 3072  ;;  %p3610_p4 = scmp.lt.s32.totalorder %s35_s10, %s35_s10 }
   0xa   :  { %p3606_p3 = scmp.ne.s32.totalorder %s35_s10, %s3605_s18  ;;  %p3611_p5 = scmp.lt.s32.totalorder %s3605_s18, %s3605_s18 }
   0xc   :  { %p3612_p6 = por %p3611_p5, %p3610_p4 }
   0xe   :  { %p3613_p7 = pnand %p3612_p6, %p3606_p3 }
  0x10   :  { %3616 = shalt.err (!%p3613_p7)
}
  0x11   :  { %s3690_s19 = smov 192   ;;  %s3691_s20 = smov 12  }
  0x12   :  { %40 = dma.hbm_to_vmem [thread:$0]  %s4701_s1, 3072, %s35_s10, [#allocation7], %s3690_s19, %s3690_s19, %s3691_s20  }
  0x13   :  { %s3692_s23 = smov [#allocation4]   ;;  %s3617_s27 = scalar_lea.hbm %s4700_s0, 3072 }
  0x14   :  { %s22_s24 = sshll.u32 %s3692_s23, 4  ;;  %p3618_p8 = scmp.ne.s32.totalorder %s4700_s0, %s3617_s27  ;;  %s23_s24 = int_to_ptr.vmem [resolvable:$true] %s22_s24 }
  0x15   :  { %p3621_p9 = scmp.lt.u32.totalorder %s3617_s27, %s4700_s0 }
  0x17   :  { %p3623_p10 = pnand %p3621_p9, %p3618_p8 }
  0x19   :  { %3626 = shalt.err (!%p3623_p10)
}
  0x1a   :  { %s3627_s12 = scalar_lea.vmem %s23_s24, 3072  ;;  %p3632_p12 = scmp.lt.s32.totalorder %s23_s24, %s23_s24 }
  0x1b   :  { %p3628_p11 = scmp.ne.s32.totalorder %s23_s24, %s3627_s12  ;;  %p3633_p13 = scmp.lt.s32.totalorder %s3627_s12, %s3627_s12 }
  0x1d   :  { %p3634_p0 = por %p3633_p13, %p3632_p12 }
  0x1f   :  { %p3635_p1 = pnand %p3634_p0, %p3628_p11 }
  0x21   :  { %3638 = shalt.err (!%p3635_p1)
}
  0x22   :  { %s3693_s1 = smov 384   ;;  %s3694_s10 = smov 24  }
  0x23   :  { %28 = dma.hbm_to_vmem [thread:$0]  %s4700_s0, 3072, %s23_s24, [#allocation5], %s3693_s1, %s3693_s1, %s3694_s10  }
  0x24   :  { %s3695_s15 = smov [#allocation8]   ;;  %s3696_s17 = smov [#allocation9]  }
  0x25   :  { %s48_s16 = sshll.u32 %s3695_s15, 4  ;;  %s62_s18 = sshll.u32 %s3696_s17, 4  ;;  %s49_s16 = int_to_ptr.vmem [resolvable:$true] %s48_s16  ;;  %s3778_s18 = int_to_ptr.vmem [resolvable:$true] %s62_s18 }
  0x26   :  { %s3639_s23 = scalar_lea.hbm %s4703_s3, 3072 }
  0x27   :  { %p3640_p2 = scmp.ne.s32.totalorder %s4703_s3, %s3639_s23  ;;  %p3643_p3 = scmp.lt.u32.totalorder %s3639_s23, %s4703_s3 }
  0x29   :  { %p3645_p4 = pnand %p3643_p3, %p3640_p2 }
  0x2b   :  { %3648 = shalt.err (!%p3645_p4)
}
  0x2c   :  { %s3649_s0 = scalar_lea.vmem %s49_s16, 3072  ;;  %p3654_p6 = scmp.lt.s32.totalorder %s49_s16, %s49_s16 }
  0x2d   :  { %p3650_p5 = scmp.ne.s32.totalorder %s49_s16, %s3649_s0  ;;  %p3655_p7 = scmp.lt.s32.totalorder %s3649_s0, %s3649_s0 }
  0x2f   :  { %p3656_p8 = por %p3655_p7, %p3654_p6 }
  0x31   :  { %p3657_p9 = pnand %p3656_p8, %p3650_p5 }
  0x33   :  { %3660 = shalt.err (!%p3657_p9)
}
  0x34   :  { %54 = dma.hbm_to_vmem [thread:$0]  %s4703_s3, 3072, %s49_s16, [#allocation7], %s3690_s19, %s3690_s19, %s3691_s20  }
  0x35   :  { %s3661_s12 = scalar_lea.hbm %s4705_s5, 3072 }
  0x36   :  { %p3662_p10 = scmp.ne.s32.totalorder %s4705_s5, %s3661_s12  ;;  %p3665_p11 = scmp.lt.u32.totalorder %s3661_s12, %s4705_s5 }
  0x38   :  { %p3667_p12 = pnand %p3665_p11, %p3662_p10 }
  0x3a   :  { %3670 = shalt.err (!%p3667_p12)
}
  0x3b   :  { %s3671_s15 = scalar_lea.vmem %s3778_s18, 3072  ;;  %p3676_p0 = scmp.lt.s32.totalorder %s3778_s18, %s3778_s18 }
  0x3c   :  { %p3672_p13 = scmp.ne.s32.totalorder %s3778_s18, %s3671_s15  ;;  %p3677_p1 = scmp.lt.s32.totalorder %s3671_s15, %s3671_s15 }
  0x3e   :  { %p3678_p2 = por %p3677_p1, %p3676_p0 }
  0x40   :  { %p3679_p3 = pnand %p3678_p2, %p3672_p13 }
  0x42   :  { %3682 = shalt.err (!%p3679_p3)
}
  0x43   :  { %68 = dma.hbm_to_vmem [thread:$0]  %s4705_s5, 3072, %s3778_s18, [#allocation10], %s3690_s19, %s3690_s19, %s3691_s20  }
  0x44   :  { %3683 = dma.done.wait [#allocation5], 3072  }
  0x45   :  { %3684 = vsyncadd [#allocation5], 4294964224 }
  0x46   :  { %3685 = dma.done.wait [#allocation7], 6144  }
  0x47   :  { %3686 = vsyncadd [#allocation7], 4294961152 }
  0x48   :  { %3687 = dma.done.wait [#allocation10], 3072  }
  0x49   :  { %3688 = vsyncadd [#allocation10], 4294964224  ;;  %v4712_v0 = vmov 0.0   ;;  %v4710_v1 = vmov 0   ;;  %vm3699_vm0 = vmmov 0   ;;  %v127_v26 = vld [vmem:[#allocation4] sm:$0xff] }
  0x4a   :  { %2878 = vmatprep.subr.bf16.mxu1 %v4712_v0  ;;  %290 = vmatprep.mubr.bf16.mxu0 %v4710_v1  ;;  %v3819_v2 = vld [vmem:[#allocation6 + $0x4] ss:$12 sps:$4 sm:$0xff]   ;;  %v3821_v3 = vld [vmem:[#allocation6] ss:$12 sps:$4 sm:$0xff]   ;;  %v3824_v4 = vld [vmem:[#allocation6 + $0x1c] ss:$12 sps:$4 sm:$0xff]  }
  0x4b   :  { %2894 = vmatprep.mubr.msk.bf16.mxu1 %vm3699_vm0, %v4712_v0  ;;  %258 = vmatprep.subr.bf16.mxu0 %v3819_v2  ;;  %v3827_v5 = vld [vmem:[#allocation6 + $0x18] ss:$12 sps:$4 sm:$0xff]   ;;  %v3830_v6 = vld [vmem:[#allocation6 + $0x34] ss:$12 sps:$4 sm:$0xff]   ;;  %v3833_v7 = vld [vmem:[#allocation6 + $0x30] ss:$12 sps:$4 sm:$0xff]  }
  0x4c   :  { %259 = vmatpush1.bf16.msra.mxu0 %v3821_v3  ;;  %v3836_v8 = vld [vmem:[#allocation6 + $0x4c] ss:$12 sps:$4 sm:$0xff]   ;;  %v3838_v9 = vld [vmem:[#allocation6 + $0x8] ss:$12 sps:$4 sm:$0xff]   ;;  %v3845_v11 = vld [vmem:[#allocation6 + $0x64] ss:$12 sps:$4 sm:$0xff]  }
  0x4d   :  { %260 = vmatprep.subr.bf16.mxu0 %v3824_v4  ;;  %v3841_v10 = vld [vmem:[#allocation6 + $0x48] ss:$12 sps:$4 sm:$0xff]   ;;  %2879 = vmatpush3.bf16.msra.mxu1 %v3838_v9  ;;  %v3848_v12 = vld [vmem:[#allocation6 + $0x20] ss:$12 sps:$4 sm:$0xff]   ;;  %v3854_v14 = vld [vmem:[#allocation6 + $0x38] ss:$12 sps:$4 sm:$0xff]  }
  0x4e   :  { %2880 = vmatprep.subr.bf16.mxu1 %v4712_v0  ;;  %v3850_v13 = vld [vmem:[#allocation6 + $0x60] ss:$12 sps:$4 sm:$0xff]   ;;  %v3857_v15 = vld [vmem:[#allocation6 + $0x7c] ss:$12 sps:$4 sm:$0xff]   ;;  %v3860_v16 = vld [vmem:[#allocation6 + $0x78] ss:$12 sps:$4 sm:$0xff]  }
  0x4f   :  { %v3862_v17 = vld [vmem:[#allocation6 + $0x94] ss:$12 sps:$4 sm:$0xff]   ;;  %v3864_v18 = vld [vmem:[#allocation6 + $0x50] ss:$12 sps:$4 sm:$0xff]   ;;  %v3874_v21 = vld [vmem:[#allocation6 + $0xac] ss:$12 sps:$4 sm:$0xff]  }
  0x50   :  { %261 = vmatpush1.bf16.msra.mxu0 %v3827_v5  ;;  %v3870_v19 = vld [vmem:[#allocation6 + $0x90] ss:$12 sps:$4 sm:$0xff]   ;;  %v3872_v20 = vld [vmem:[#allocation6 + $0x68] ss:$12 sps:$4 sm:$0xff]   ;;  %v3882_v23 = vld [vmem:[#allocation6 + $0x80] ss:$12 sps:$4 sm:$0xff]  }
  0x51   :  { %262 = vmatprep.subr.bf16.mxu0 %v3830_v6  ;;  %2881 = vmatpush3.bf16.msra.mxu1 %v3848_v12  ;;  %v3880_v22 = vld [vmem:[#allocation6 + $0xa8] ss:$12 sps:$4 sm:$0xff]   ;;  %v3888_v24 = vld [vmem:[#allocation6 + $0x98] ss:$12 sps:$4 sm:$0xff]   ;;  %v3894_v25 = vld [vmem:[#allocation6 + $0xb0] ss:$12 sps:$4 sm:$0xff]  }
  0x52   :  { %2882 = vmatprep.subr.bf16.mxu1 %v4712_v0  ;;  %v128_v33 = vld [vmem:[#allocation4 + $0x8] sm:$0xff]  ;;  %v3940_v42 = vld [vmem:[%s4702_s2] ss:$0 sm:$0xff]  ;;  %v129_v46 = vld [vmem:[#allocation4 + $0x10] sm:$0xff]  ;;  %vm2589_vm1 = vcmask 15360  }
  0x53   :  { %v362_v56 = vld [vmem:[#allocation4 + $0x18] sm:$0xff] }
  0x54   :  { %263 = vmatpush1.bf16.msra.mxu0 %v3833_v7 }
  0x55   :  { %264 = vmatprep.subr.bf16.mxu0 %v3836_v8  ;;  %2883 = vmatpush3.bf16.msra.mxu1 %v3854_v14 }
  0x56   :  { %2884 = vmatprep.subr.bf16.mxu1 %v4712_v0 }
  0x58   :  { %265 = vmatpush1.bf16.msra.mxu0 %v3841_v10 }
  0x59   :  { %266 = vmatprep.subr.bf16.mxu0 %v3845_v11  ;;  %2885 = vmatpush3.bf16.msra.mxu1 %v3864_v18 }
  0x5a   :  { %2886 = vmatprep.subr.bf16.mxu1 %v4712_v0 }
  0x5c   :  { %267 = vmatpush1.bf16.msra.mxu0 %v3850_v13 }
  0x5d   :  { %268 = vmatprep.subr.bf16.mxu0 %v3857_v15  ;;  %2887 = vmatpush3.bf16.msra.mxu1 %v3872_v20 }
  0x5e   :  { %2888 = vmatprep.subr.bf16.mxu1 %v4712_v0 }
  0x60   :  { %269 = vmatpush1.bf16.msra.mxu0 %v3860_v16 }
  0x61   :  { %270 = vmatprep.subr.bf16.mxu0 %v3862_v17  ;;  %2889 = vmatpush3.bf16.msra.mxu1 %v3882_v23 }
  0x62   :  { %2890 = vmatprep.subr.bf16.mxu1 %v4712_v0 }
  0x64   :  { %271 = vmatpush1.bf16.msra.mxu0 %v3870_v19 }
  0x65   :  { %272 = vmatprep.subr.bf16.mxu0 %v3874_v21  ;;  %2891 = vmatpush3.bf16.msra.mxu1 %v3888_v24 }
  0x66   :  { %2892 = vmatprep.subr.bf16.mxu1 %v4712_v0 }
  0x68   :  { %273 = vmatpush1.bf16.msra.mxu0 %v3880_v22 }
  0x69   :  { %366 = vmatprep.subr.bf16.mxu0 %v3819_v2  ;;  %2893 = vmatpush3.bf16.msra.mxu1 %v3894_v25 }
  0x6a   :  { %2898 = vmatprep.subr.bf16.mxu1 %v4712_v0 }
  0x6b   :  { %291 = vmatmul.mubr.bf16.vlgmr.msra.gmra.mrb[0].mxu0 %v4710_v1 }
  0x6c   :  { %367 = vmatpush1.bf16.msra.mxu0 %v3821_v3  ;;  %398 = vmatprep.mubr.bf16.mxu0 %v4710_v1 }
  0x6d   :  { %368 = vmatprep.subr.bf16.mxu0 %v3824_v4  ;;  %2895 = vmatmul.mubr.bf16.vlgmr.msra.gmra.mrb[0].mxu1 %v4710_v1 }
  0x6e   :  { %2899 = vmatpush3.bf16.msra.mxu1 %v3838_v9  ;;  %2914 = vmatprep.mubr.msk.bf16.mxu1 %vm3699_vm0, %v4712_v0 }
  0x6f   :  { %2900 = vmatprep.subr.bf16.mxu1 %v4712_v0 }
  0x70   :  { %369 = vmatpush1.bf16.msra.mxu0 %v3827_v5 }
  0x71   :  { %370 = vmatprep.subr.bf16.mxu0 %v3830_v6 }
  0x72   :  { %2901 = vmatpush3.bf16.msra.mxu1 %v3848_v12 }
  0x73   :  { %2902 = vmatprep.subr.bf16.mxu1 %v4712_v0 }
  0x74   :  { %371 = vmatpush1.bf16.msra.mxu0 %v3833_v7 }
  0x75   :  { %372 = vmatprep.subr.bf16.mxu0 %v3836_v8 }
  0x76   :  { %2903 = vmatpush3.bf16.msra.mxu1 %v3854_v14 }
  0x77   :  { %2904 = vmatprep.subr.bf16.mxu1 %v4712_v0 }
  0x78   :  { %373 = vmatpush1.bf16.msra.mxu0 %v3841_v10 }
  0x79   :  { %374 = vmatprep.subr.bf16.mxu0 %v3845_v11 }
  0x7a   :  { %2905 = vmatpush3.bf16.msra.mxu1 %v3864_v18 }
  0x7b   :  { %2906 = vmatprep.subr.bf16.mxu1 %v4712_v0 }
  0x7c   :  { %375 = vmatpush1.bf16.msra.mxu0 %v3850_v13 }
  0x7d   :  { %376 = vmatprep.subr.bf16.mxu0 %v3857_v15 }
  0x7e   :  { %2907 = vmatpush3.bf16.msra.mxu1 %v3872_v20 }
  0x7f   :  { %2908 = vmatprep.subr.bf16.mxu1 %v4712_v0 }
  0x80   :  { %377 = vmatpush1.bf16.msra.mxu0 %v3860_v16 }
  0x81   :  { %378 = vmatprep.subr.bf16.mxu0 %v3862_v17 }
  0x82   :  { %2909 = vmatpush3.bf16.msra.mxu1 %v3882_v23 }
  0x83   :  { %2910 = vmatprep.subr.bf16.mxu1 %v4712_v0 }
  0x84   :  { %379 = vmatpush1.bf16.msra.mxu0 %v3870_v19 }
  0x85   :  { %380 = vmatprep.subr.bf16.mxu0 %v3874_v21 }
  0x86   :  { %2911 = vmatpush3.bf16.msra.mxu1 %v3888_v24 }
  0x87   :  { %2912 = vmatprep.subr.bf16.mxu1 %v4712_v0 }
  0x88   :  { %381 = vmatpush1.bf16.msra.mxu0 %v3880_v22 }
  0x89   :  { %475 = vmatprep.subr.bf16.mxu0 %v3819_v2 }
  0x8a   :  { %2913 = vmatpush3.bf16.msra.mxu1 %v3894_v25 }
  0x8b   :  { %2918 = vmatprep.subr.bf16.mxu1 %v4712_v0 }
 0x13e   :  { %v292_v27 = vpop.f32.mrb[0].mxu0 }
 0x13f   :  { %v339_v28 = vadd.f32 %v292_v27, %v127_v26  ;;  %v294_v29 = vpop.f32.mrb[1].mxu0 }
 0x140   :  { %v296_v30 = vpop.f32.mrb[2].mxu0  ;;  %v333_v34 = vpop.f32.mrb[0].mxu1  ;;  %v340_v35 = vadd.f32 %v294_v29, %v128_v33  ;;  %v363_v29 = vld [vmem:[#allocation4 + $0x20] sm:$0xff] }
 0x141   :  { %v2623_v31 = vmul.f32 -1.442695, %v339_v28  ;;  %v297_v32 = vpop.f32.mrb[3].mxu0  ;;  %v2896_v36 = vpop.f32.mrb[1].mxu1  ;;  %v353_v43 = vadd.f32 %v3940_v42, %v333_v34 }
 0x142   :  { %v336_v37 = vpop.f32.mrb[2].mxu1  ;;  %v2624_v39 = vmul.f32 -1.442695, %v340_v35 }
 0x143   :  { %3389 = vpow2.f32 %v2623_v31  ;;  %v2897_v38 = vpop.f32.mrb[3].mxu1  ;;  %v364_v37 = vld [vmem:[#allocation4 + $0x28] sm:$0xff] }
 0x144   :  { %3391 = vpow2.f32 %v2624_v39 }
 0x14d   :  { %v3390_v40 = vpop.eup %3389 }
 0x14e   :  { %v347_v41 = vadd.f32 1.0, %v3390_v40  ;;  %v3392_v44 = vpop.eup %3391 }
 0x14f   :  { %v348_v48 = vadd.f32 1.0, %v3392_v44 }
 0x150   :  { %3393 = vrcp.f32 %v347_v41 }
 0x15a   :  { %v3394_v45 = vpop.eup %3393 }
 0x15b   :  { %v354_v47 = vmul.f32 %v3394_v45, %v353_v43 }
 0x15d   :  { %v355_v49 = vadd.f32 %v354_v47, %v129_v46 }
 0x15f   :  { %3395 = vtanh.f32 %v355_v49 }
 0x160   :  { %3397 = vrcp.f32 %v348_v48  ;;  %v471_v48 = vld [vmem:[#allocation4 + $0x30] sm:$0xff] }
 0x169   :  { %v3396_v50 = vpop.eup %3395 }
 0x16a   :  { %v357_v51 = vsub.f32 0.0, %v3396_v50  ;;  %v3398_v52 = vpop.eup %3397 }
 0x16c   :  { %v358_v53 = vmul.f32 %v3398_v52, %v357_v51 }
 0x16e   :  { %v3943_v54 = vadd.f32 %v3396_v50, %v358_v53 }
 0x170   :  { %v365_v55 = vpack.c.bf16 %v3943_v54, %v3943_v54 }
 0x172   :  { %399 = vmatmul.mubr.bf16.vlgmr.msra.gmra.mrb[4].mxu0 %v365_v55  ;;  %2915 = vmatmul.mubr.bf16.vlgmr.msra.gmra.mrb[4].mxu1 %v365_v55 }
 0x173   :  { %476 = vmatpush1.bf16.msra.mxu0 %v3821_v3  ;;  %2919 = vmatpush3.bf16.msra.mxu1 %v3838_v9 }
 0x174   :  { %477 = vmatprep.subr.bf16.mxu0 %v3824_v4  ;;  %2920 = vmatprep.subr.bf16.mxu1 %v4712_v0 }
 0x175   :  { %507 = vmatprep.mubr.bf16.mxu0 %v4710_v1  ;;  %2934 = vmatprep.mubr.msk.bf16.mxu1 %vm3699_vm0, %v4712_v0 }
 0x177   :  { %478 = vmatpush1.bf16.msra.mxu0 %v3827_v5  ;;  %2921 = vmatpush3.bf16.msra.mxu1 %v3848_v12 }
 0x178   :  { %479 = vmatprep.subr.bf16.mxu0 %v3830_v6  ;;  %2922 = vmatprep.subr.bf16.mxu1 %v4712_v0 }
 0x17b   :  { %480 = vmatpush1.bf16.msra.mxu0 %v3833_v7  ;;  %2923 = vmatpush3.bf16.msra.mxu1 %v3854_v14 }
 0x17c   :  { %481 = vmatprep.subr.bf16.mxu0 %v3836_v8  ;;  %2924 = vmatprep.subr.bf16.mxu1 %v4712_v0 }
 0x17f   :  { %482 = vmatpush1.bf16.msra.mxu0 %v3841_v10  ;;  %2925 = vmatpush3.bf16.msra.mxu1 %v3864_v18 }
 0x180   :  { %483 = vmatprep.subr.bf16.mxu0 %v3845_v11  ;;  %2926 = vmatprep.subr.bf16.mxu1 %v4712_v0 }
 0x183   :  { %484 = vmatpush1.bf16.msra.mxu0 %v3850_v13  ;;  %2927 = vmatpush3.bf16.msra.mxu1 %v3872_v20 }
 0x184   :  { %485 = vmatprep.subr.bf16.mxu0 %v3857_v15  ;;  %2928 = vmatprep.subr.bf16.mxu1 %v4712_v0 }
 0x187   :  { %486 = vmatpush1.bf16.msra.mxu0 %v3860_v16  ;;  %2929 = vmatpush3.bf16.msra.mxu1 %v3882_v23 }
 0x188   :  { %487 = vmatprep.subr.bf16.mxu0 %v3862_v17  ;;  %2930 = vmatprep.subr.bf16.mxu1 %v4712_v0 }
 0x18b   :  { %488 = vmatpush1.bf16.msra.mxu0 %v3870_v19  ;;  %2931 = vmatpush3.bf16.msra.mxu1 %v3888_v24 }
 0x18c   :  { %489 = vmatprep.subr.bf16.mxu0 %v3874_v21  ;;  %2932 = vmatprep.subr.bf16.mxu1 %v4712_v0 }
 0x18f   :  { %490 = vmatpush1.bf16.msra.mxu0 %v3880_v22  ;;  %2933 = vmatpush3.bf16.msra.mxu1 %v3894_v25 }
 0x190   :  { %584 = vmatprep.subr.bf16.mxu0 %v3819_v2  ;;  %2938 = vmatprep.subr.bf16.mxu1 %v4712_v0 }
 0x245   :  { %v400_v57 = vpop.f32.mrb[4].mxu0  ;;  %v441_v58 = vpop.f32.mrb[4].mxu1 }
 0x246   :  { %v447_v59 = vadd.f32 %v400_v57, %v362_v56  ;;  %v402_v60 = vpop.f32.mrb[5].mxu0  ;;  %v2916_v61 = vpop.f32.mrb[5].mxu1  ;;  %v461_v35 = vadd.f32 %v3940_v42, %v441_v58 }
 0x247   :  { %v404_v62 = vpop.f32.mrb[6].mxu0  ;;  %v444_v63 = vpop.f32.mrb[6].mxu1  ;;  %v448_v30 = vadd.f32 %v402_v60, %v363_v29  ;;  %v472_v60 = vld [vmem:[#allocation4 + $0x38] sm:$0xff] }
 0x248   :  { %v2625_v26 = vmul.f32 -1.442695, %v447_v59  ;;  %v405_v27 = vpop.f32.mrb[7].mxu0  ;;  %v2917_v28 = vpop.f32.mrb[7].mxu1 }
 0x249   :  { %v2626_v31 = vmul.f32 -1.442695, %v448_v30  ;;  %v473_v30 = vld [vmem:[#allocation4 + $0x40] sm:$0xff] }
 0x24a   :  { %3399 = vpow2.f32 %v2625_v26 }
 0x24b   :  { %3401 = vpow2.f32 %v2626_v31 }
 0x254   :  { %v3400_v32 = vpop.eup %3399 }
 0x255   :  { %v455_v33 = vadd.f32 1.0, %v3400_v32  ;;  %v3402_v34 = vpop.eup %3401 }
 0x256   :  { %v456_v40 = vadd.f32 1.0, %v3402_v34 }
 0x257   :  { %3403 = vrcp.f32 %v455_v33 }
 0x261   :  { %v3404_v36 = vpop.eup %3403 }
 0x262   :  { %v462_v38 = vmul.f32 %v3404_v36, %v461_v35 }
 0x264   :  { %v463_v39 = vadd.f32 %v462_v38, %v364_v37 }
 0x266   :  { %3405 = vtanh.f32 %v463_v39 }
 0x267   :  { %3407 = vrcp.f32 %v456_v40  ;;  %v580_v40 = vld [vmem:[#allocation4 + $0x48] sm:$0xff] }
 0x270   :  { %v3406_v41 = vpop.eup %3405 }
 0x271   :  { %v465_v43 = vsub.f32 %v3943_v54, %v3406_v41  ;;  %v3408_v44 = vpop.eup %3407 }
 0x273   :  { %v466_v45 = vmul.f32 %v3408_v44, %v465_v43 }
 0x275   :  { %v3984_v46 = vadd.f32 %v3406_v41, %v466_v45 }
 0x277   :  { %v474_v47 = vpack.c.bf16 %v3984_v46, %v3984_v46 }
 0x279   :  { %508 = vmatmul.mubr.bf16.vlgmr.msra.gmra.mrb[8].mxu0 %v474_v47  ;;  %2935 = vmatmul.mubr.bf16.vlgmr.msra.gmra.mrb[8].mxu1 %v474_v47 }
 0x27a   :  { %585 = vmatpush1.bf16.msra.mxu0 %v3821_v3  ;;  %2939 = vmatpush3.bf16.msra.mxu1 %v3838_v9 }
 0x27b   :  { %586 = vmatprep.subr.bf16.mxu0 %v3824_v4  ;;  %2940 = vmatprep.subr.bf16.mxu1 %v4712_v0 }
 0x27c   :  { %616 = vmatprep.mubr.bf16.mxu0 %v4710_v1  ;;  %2954 = vmatprep.mubr.msk.bf16.mxu1 %vm3699_vm0, %v4712_v0 }
 0x27e   :  { %587 = vmatpush1.bf16.msra.mxu0 %v3827_v5  ;;  %2941 = vmatpush3.bf16.msra.mxu1 %v3848_v12 }
 0x27f   :  { %588 = vmatprep.subr.bf16.mxu0 %v3830_v6  ;;  %2942 = vmatprep.subr.bf16.mxu1 %v4712_v0 }
 0x282   :  { %589 = vmatpush1.bf16.msra.mxu0 %v3833_v7  ;;  %2943 = vmatpush3.bf16.msra.mxu1 %v3854_v14 }
 0x283   :  { %590 = vmatprep.subr.bf16.mxu0 %v3836_v8  ;;  %2944 = vmatprep.subr.bf16.mxu1 %v4712_v0 }
 0x286   :  { %591 = vmatpush1.bf16.msra.mxu0 %v3841_v10  ;;  %2945 = vmatpush3.bf16.msra.mxu1 %v3864_v18 }
 0x287   :  { %592 = vmatprep.subr.bf16.mxu0 %v3845_v11  ;;  %2946 = vmatprep.subr.bf16.mxu1 %v4712_v0 }
 0x28a   :  { %593 = vmatpush1.bf16.msra.mxu0 %v3850_v13  ;;  %2947 = vmatpush3.bf16.msra.mxu1 %v3872_v20 }
 0x28b   :  { %594 = vmatprep.subr.bf16.mxu0 %v3857_v15  ;;  %2948 = vmatprep.subr.bf16.mxu1 %v4712_v0 }
 0x28e   :  { %595 = vmatpush1.bf16.msra.mxu0 %v3860_v16  ;;  %2949 = vmatpush3.bf16.msra.mxu1 %v3882_v23 }
 0x28f   :  { %596 = vmatprep.subr.bf16.mxu0 %v3862_v17  ;;  %2950 = vmatprep.subr.bf16.mxu1 %v4712_v0 }
 0x292   :  { %597 = vmatpush1.bf16.msra.mxu0 %v3870_v19  ;;  %2951 = vmatpush3.bf16.msra.mxu1 %v3888_v24 }
 0x293   :  { %598 = vmatprep.subr.bf16.mxu0 %v3874_v21  ;;  %2952 = vmatprep.subr.bf16.mxu1 %v4712_v0 }
 0x296   :  { %599 = vmatpush1.bf16.msra.mxu0 %v3880_v22  ;;  %2953 = vmatpush3.bf16.msra.mxu1 %v3894_v25 }
 0x297   :  { %693 = vmatprep.subr.bf16.mxu0 %v3819_v2  ;;  %2958 = vmatprep.subr.bf16.mxu1 %v4712_v0 }
 0x34c   :  { %v509_v49 = vpop.f32.mrb[8].mxu0  ;;  %v550_v50 = vpop.f32.mrb[8].mxu1 }
 0x34d   :  { %v556_v51 = vadd.f32 %v509_v49, %v471_v48  ;;  %v511_v52 = vpop.f32.mrb[9].mxu0  ;;  %v2936_v53 = vpop.f32.mrb[9].mxu1  ;;  %v570_v28 = vadd.f32 %v3940_v42, %v550_v50 }
 0x34e   :  { %v513_v55 = vpop.f32.mrb[10].mxu0  ;;  %v553_v56 = vpop.f32.mrb[10].mxu1  ;;  %v557_v61 = vadd.f32 %v511_v52, %v472_v60  ;;  %v581_v53 = vld [vmem:[#allocation4 + $0x50] sm:$0xff] }
 0x34f   :  { %v2627_v57 = vmul.f32 -1.442695, %v556_v51  ;;  %v514_v58 = vpop.f32.mrb[11].mxu0  ;;  %v2937_v59 = vpop.f32.mrb[11].mxu1 }
 0x350   :  { %v2628_v62 = vmul.f32 -1.442695, %v557_v61 }
 0x351   :  { %3409 = vpow2.f32 %v2627_v57 }
 0x352   :  { %3411 = vpow2.f32 %v2628_v62  ;;  %v582_v62 = vld [vmem:[#allocation4 + $0x58] sm:$0xff] }
 0x35b   :  { %v3410_v63 = vpop.eup %3409 }
 0x35c   :  { %v564_v26 = vadd.f32 1.0, %v3410_v63  ;;  %v3412_v27 = vpop.eup %3411 }
 0x35d   :  { %v565_v33 = vadd.f32 1.0, %v3412_v27 }
 0x35e   :  { %3413 = vrcp.f32 %v564_v26 }
 0x368   :  { %v3414_v29 = vpop.eup %3413 }
 0x369   :  { %v571_v31 = vmul.f32 %v3414_v29, %v570_v28 }
 0x36b   :  { %v572_v32 = vadd.f32 %v571_v31, %v473_v30 }
 0x36d   :  { %3415 = vtanh.f32 %v572_v32 }
 0x36e   :  { %3417 = vrcp.f32 %v565_v33 }
 0x377   :  { %v3416_v34 = vpop.eup %3415 }
 0x378   :  { %v574_v35 = vsub.f32 %v3984_v46, %v3416_v34  ;;  %v3418_v36 = vpop.eup %3417 }
 0x37a   :  { %v575_v37 = vmul.f32 %v3418_v36, %v574_v35 }
 0x37c   :  { %v4025_v38 = vadd.f32 %v3416_v34, %v575_v37  ;;  %v689_v34 = vld [vmem:[#allocation4 + $0x60] sm:$0xff] }
 0x37e   :  { %v583_v39 = vpack.c.bf16 %v4025_v38, %v4025_v38 }
 0x380   :  { %617 = vmatmul.mubr.bf16.vlgmr.msra.gmra.mrb[12].mxu0 %v583_v39  ;;  %2955 = vmatmul.mubr.bf16.vlgmr.msra.gmra.mrb[12].mxu1 %v583_v39 }
 0x381   :  { %694 = vmatpush1.bf16.msra.mxu0 %v3821_v3  ;;  %2959 = vmatpush3.bf16.msra.mxu1 %v3838_v9 }
 0x382   :  { %695 = vmatprep.subr.bf16.mxu0 %v3824_v4  ;;  %2960 = vmatprep.subr.bf16.mxu1 %v4712_v0 }
 0x383   :  { %725 = vmatprep.mubr.bf16.mxu0 %v4710_v1  ;;  %2974 = vmatprep.mubr.msk.bf16.mxu1 %vm3699_vm0, %v4712_v0 }
 0x385   :  { %696 = vmatpush1.bf16.msra.mxu0 %v3827_v5  ;;  %2961 = vmatpush3.bf16.msra.mxu1 %v3848_v12 }
 0x386   :  { %697 = vmatprep.subr.bf16.mxu0 %v3830_v6  ;;  %2962 = vmatprep.subr.bf16.mxu1 %v4712_v0 }
 0x389   :  { %698 = vmatpush1.bf16.msra.mxu0 %v3833_v7  ;;  %2963 = vmatpush3.bf16.msra.mxu1 %v3854_v14 }
 0x38a   :  { %699 = vmatprep.subr.bf16.mxu0 %v3836_v8  ;;  %2964 = vmatprep.subr.bf16.mxu1 %v4712_v0 }
 0x38d   :  { %700 = vmatpush1.bf16.msra.mxu0 %v3841_v10  ;;  %2965 = vmatpush3.bf16.msra.mxu1 %v3864_v18 }
 0x38e   :  { %701 = vmatprep.subr.bf16.mxu0 %v3845_v11  ;;  %2966 = vmatprep.subr.bf16.mxu1 %v4712_v0 }
 0x391   :  { %702 = vmatpush1.bf16.msra.mxu0 %v3850_v13  ;;  %2967 = vmatpush3.bf16.msra.mxu1 %v3872_v20 }
 0x392   :  { %703 = vmatprep.subr.bf16.mxu0 %v3857_v15  ;;  %2968 = vmatprep.subr.bf16.mxu1 %v4712_v0 }
 0x395   :  { %704 = vmatpush1.bf16.msra.mxu0 %v3860_v16  ;;  %2969 = vmatpush3.bf16.msra.mxu1 %v3882_v23 }
 0x396   :  { %705 = vmatprep.subr.bf16.mxu0 %v3862_v17  ;;  %2970 = vmatprep.subr.bf16.mxu1 %v4712_v0 }
 0x399   :  { %706 = vmatpush1.bf16.msra.mxu0 %v3870_v19  ;;  %2971 = vmatpush3.bf16.msra.mxu1 %v3888_v24 }
 0x39a   :  { %707 = vmatprep.subr.bf16.mxu0 %v3874_v21  ;;  %2972 = vmatprep.subr.bf16.mxu1 %v4712_v0 }
 0x39d   :  { %708 = vmatpush1.bf16.msra.mxu0 %v3880_v22  ;;  %2973 = vmatpush3.bf16.msra.mxu1 %v3894_v25 }
 0x39e   :  { %802 = vmatprep.subr.bf16.mxu0 %v3819_v2  ;;  %2978 = vmatprep.subr.bf16.mxu1 %v4712_v0 }
 0x453   :  { %v618_v41 = vpop.f32.mrb[12].mxu0  ;;  %v659_v43 = vpop.f32.mrb[12].mxu1 }
 0x454   :  { %v665_v44 = vadd.f32 %v618_v41, %v580_v40  ;;  %v620_v45 = vpop.f32.mrb[13].mxu0  ;;  %v2956_v47 = vpop.f32.mrb[13].mxu1  ;;  %v679_v60 = vadd.f32 %v3940_v42, %v659_v43 }
 0x455   :  { %v622_v48 = vpop.f32.mrb[14].mxu0  ;;  %v662_v49 = vpop.f32.mrb[14].mxu1  ;;  %v666_v55 = vadd.f32 %v620_v45, %v581_v53 }
 0x456   :  { %v2629_v50 = vmul.f32 -1.442695, %v665_v44  ;;  %v623_v51 = vpop.f32.mrb[15].mxu0  ;;  %v2957_v52 = vpop.f32.mrb[15].mxu1  ;;  %v690_v48 = vld [vmem:[#allocation4 + $0x68] sm:$0xff] }
 0x457   :  { %v2630_v56 = vmul.f32 -1.442695, %v666_v55 }
 0x458   :  { %3419 = vpow2.f32 %v2629_v50 }
 0x459   :  { %3421 = vpow2.f32 %v2630_v56  ;;  %v691_v56 = vld [vmem:[#allocation4 + $0x70] sm:$0xff] }
 0x462   :  { %v3420_v57 = vpop.eup %3419 }
 0x463   :  { %v673_v58 = vadd.f32 1.0, %v3420_v57  ;;  %v3422_v59 = vpop.eup %3421 }
 0x464   :  { %v674_v27 = vadd.f32 1.0, %v3422_v59 }
 0x465   :  { %3423 = vrcp.f32 %v673_v58 }
 0x46f   :  { %v3424_v61 = vpop.eup %3423 }
 0x470   :  { %v680_v63 = vmul.f32 %v3424_v61, %v679_v60 }
 0x472   :  { %v681_v26 = vadd.f32 %v680_v63, %v582_v62 }
 0x474   :  { %3425 = vtanh.f32 %v681_v26 }
 0x475   :  { %3427 = vrcp.f32 %v674_v27 }
 0x47e   :  { %v3426_v28 = vpop.eup %3425 }
 0x47f   :  { %v683_v29 = vsub.f32 %v4025_v38, %v3426_v28  ;;  %v3428_v30 = vpop.eup %3427 }
 0x481   :  { %v684_v31 = vmul.f32 %v3428_v30, %v683_v29 }
 0x483   :  { %v4066_v32 = vadd.f32 %v3426_v28, %v684_v31  ;;  %v800_v28 = vld [vmem:[#allocation4 + $0x88] sm:$0xff] }
 0x485   :  { %v692_v33 = vpack.c.bf16 %v4066_v32, %v4066_v32 }
 0x487   :  { %726 = vmatmul.mubr.bf16.vlgmr.msra.gmra.mrb[16].mxu0 %v692_v33  ;;  %2975 = vmatmul.mubr.bf16.vlgmr.msra.gmra.mrb[16].mxu1 %v692_v33 }
 0x488   :  { %803 = vmatpush1.bf16.msra.mxu0 %v3821_v3  ;;  %2979 = vmatpush3.bf16.msra.mxu1 %v3838_v9 }
 0x489   :  { %804 = vmatprep.subr.bf16.mxu0 %v3824_v4  ;;  %2980 = vmatprep.subr.bf16.mxu1 %v4712_v0 }
 0x48a   :  { %834 = vmatprep.mubr.bf16.mxu0 %v4710_v1  ;;  %2994 = vmatprep.mubr.msk.bf16.mxu1 %vm3699_vm0, %v4712_v0 }
 0x48c   :  { %805 = vmatpush1.bf16.msra.mxu0 %v3827_v5  ;;  %2981 = vmatpush3.bf16.msra.mxu1 %v3848_v12 }
 0x48d   :  { %806 = vmatprep.subr.bf16.mxu0 %v3830_v6  ;;  %2982 = vmatprep.subr.bf16.mxu1 %v4712_v0 }
 0x490   :  { %807 = vmatpush1.bf16.msra.mxu0 %v3833_v7  ;;  %2983 = vmatpush3.bf16.msra.mxu1 %v3854_v14 }
 0x491   :  { %808 = vmatprep.subr.bf16.mxu0 %v3836_v8  ;;  %2984 = vmatprep.subr.bf16.mxu1 %v4712_v0 }
 0x494   :  { %809 = vmatpush1.bf16.msra.mxu0 %v3841_v10  ;;  %2985 = vmatpush3.bf16.msra.mxu1 %v3864_v18 }
 0x495   :  { %810 = vmatprep.subr.bf16.mxu0 %v3845_v11  ;;  %2986 = vmatprep.subr.bf16.mxu1 %v4712_v0 }
 0x498   :  { %811 = vmatpush1.bf16.msra.mxu0 %v3850_v13  ;;  %2987 = vmatpush3.bf16.msra.mxu1 %v3872_v20 }
 0x499   :  { %812 = vmatprep.subr.bf16.mxu0 %v3857_v15  ;;  %2988 = vmatprep.subr.bf16.mxu1 %v4712_v0 }
 0x49c   :  { %813 = vmatpush1.bf16.msra.mxu0 %v3860_v16  ;;  %2989 = vmatpush3.bf16.msra.mxu1 %v3882_v23 }
 0x49d   :  { %814 = vmatprep.subr.bf16.mxu0 %v3862_v17  ;;  %2990 = vmatprep.subr.bf16.mxu1 %v4712_v0 }
 0x4a0   :  { %815 = vmatpush1.bf16.msra.mxu0 %v3870_v19  ;;  %2991 = vmatpush3.bf16.msra.mxu1 %v3888_v24 }
 0x4a1   :  { %816 = vmatprep.subr.bf16.mxu0 %v3874_v21  ;;  %2992 = vmatprep.subr.bf16.mxu1 %v4712_v0 }
 0x4a4   :  { %817 = vmatpush1.bf16.msra.mxu0 %v3880_v22  ;;  %2993 = vmatpush3.bf16.msra.mxu1 %v3894_v25 }
 0x4a5   :  { %911 = vmatprep.subr.bf16.mxu0 %v3819_v2  ;;  %2998 = vmatprep.subr.bf16.mxu1 %v4712_v0 }
 0x55a   :  { %v727_v35 = vpop.f32.mrb[16].mxu0  ;;  %v768_v36 = vpop.f32.mrb[16].mxu1 }
 0x55b   :  { %v774_v37 = vadd.f32 %v727_v35, %v689_v34  ;;  %v729_v39 = vpop.f32.mrb[17].mxu0  ;;  %v2976_v40 = vpop.f32.mrb[17].mxu1  ;;  %v788_v53 = vadd.f32 %v3940_v42, %v768_v36 }
 0x55c   :  { %v731_v41 = vpop.f32.mrb[18].mxu0  ;;  %v771_v43 = vpop.f32.mrb[18].mxu1  ;;  %v775_v49 = vadd.f32 %v729_v39, %v690_v48  ;;  %v3550_v40 = vld [vmem:[#allocation6] ss:$12 sps:$4 sm:$0xff]   ;;  %v3556_v48 = vld [vmem:[#allocation6 + $0x30] ss:$12 sps:$4 sm:$0xff]  }
 0x55d   :  { %v2631_v44 = vmul.f32 -1.442695, %v774_v37  ;;  %v732_v45 = vpop.f32.mrb[19].mxu0  ;;  %v2977_v47 = vpop.f32.mrb[19].mxu1  ;;  %v3551_v41 = vld [vmem:[#allocation6 + $0x8] ss:$12 sps:$4 sm:$0xff]  }
 0x55e   :  { %v2632_v50 = vmul.f32 -1.442695, %v775_v49  ;;  %v3552_v43 = vld [vmem:[#allocation6 + $0x1c] ss:$12 sps:$4 sm:$0xff]   ;;  %v3554_v45 = vld [vmem:[#allocation6 + $0x20] ss:$12 sps:$4 sm:$0xff]  }
 0x55f   :  { %3429 = vpow2.f32 %v2631_v44  ;;  %v3553_v44 = vld [vmem:[#allocation6 + $0x18] ss:$12 sps:$4 sm:$0xff]   ;;  %v3555_v47 = vld [vmem:[#allocation6 + $0x34] ss:$12 sps:$4 sm:$0xff]  }
 0x560   :  { %3431 = vpow2.f32 %v2632_v50  ;;  %v3557_v49 = vld [vmem:[#allocation6 + $0x38] ss:$12 sps:$4 sm:$0xff]  }
 0x561   :  { %v3558_v50 = vld [vmem:[#allocation6 + $0x4c] ss:$12 sps:$4 sm:$0xff]  }
 0x569   :  { %v3430_v51 = vpop.eup %3429 }
 0x56a   :  { %v782_v52 = vadd.f32 1.0, %v3430_v51  ;;  %v3432_v2 = vpop.eup %3431  ;;  %v3559_v51 = vld [vmem:[#allocation6 + $0x48] ss:$12 sps:$4 sm:$0xff]  }
 0x56b   :  { %v783_v59 = vadd.f32 1.0, %v3432_v2  ;;  %v3561_v2 = vld [vmem:[#allocation6 + $0x64] ss:$12 sps:$4 sm:$0xff]  }
 0x56c   :  { %3433 = vrcp.f32 %v782_v52  ;;  %v3560_v52 = vld [vmem:[#allocation6 + $0x50] ss:$12 sps:$4 sm:$0xff]  }
 0x576   :  { %v3434_v55 = vpop.eup %3433 }
 0x577   :  { %v789_v57 = vmul.f32 %v3434_v55, %v788_v53  ;;  %v3562_v53 = vld [vmem:[#allocation6 + $0x60] ss:$12 sps:$4 sm:$0xff]   ;;  %v3563_v55 = vld [vmem:[#allocation6 + $0x68] ss:$12 sps:$4 sm:$0xff]  }
 0x579   :  { %v790_v58 = vadd.f32 %v789_v57, %v691_v56  ;;  %v3564_v56 = vld [vmem:[#allocation6 + $0x7c] ss:$12 sps:$4 sm:$0xff]   ;;  %v3565_v57 = vld [vmem:[#allocation6 + $0x78] ss:$12 sps:$4 sm:$0xff]  }
 0x57b   :  { %3435 = vtanh.f32 %v790_v58  ;;  %v3566_v58 = vld [vmem:[#allocation6 + $0x94] ss:$12 sps:$4 sm:$0xff]  }
 0x57c   :  { %3437 = vrcp.f32 %v783_v59  ;;  %v3567_v59 = vld [vmem:[#allocation6 + $0x90] ss:$12 sps:$4 sm:$0xff]  }
 0x585   :  { %v3436_v60 = vpop.eup %3435 }
 0x586   :  { %v792_v61 = vsub.f32 %v4066_v32, %v3436_v60  ;;  %v3438_v62 = vpop.eup %3437 }
 0x588   :  { %v793_v63 = vmul.f32 %v3438_v62, %v792_v61  ;;  %v3569_v61 = vld [vmem:[#allocation6 + $0xa8] ss:$12 sps:$4 sm:$0xff]   ;;  %v3327_v62 = vld [vmem:[#allocation9 + $0x4] ss:$12 sps:$4 sm:$0xff]  }
 0x58a   :  { %v4107_v26 = vadd.f32 %v3436_v60, %v793_v63  ;;  %v3568_v60 = vld [vmem:[#allocation6 + $0xac] ss:$12 sps:$4 sm:$0xff]   ;;  %v3328_v63 = vld [vmem:[#allocation9 + $0x8] ss:$12 sps:$4 sm:$0xff]  }
 0x58c   :  { %v801_v27 = vpack.c.bf16 %v4107_v26, %v4107_v26 }
 0x58e   :  { %835 = vmatmul.mubr.bf16.vlgmr.msra.gmra.mrb[20].mxu0 %v801_v27  ;;  %2995 = vmatmul.mubr.bf16.vlgmr.msra.gmra.mrb[20].mxu1 %v801_v27 }
 0x58f   :  { %912 = vmatpush1.bf16.msra.mxu0 %v3821_v3  ;;  %2999 = vmatpush3.bf16.msra.mxu1 %v3838_v9  ;;  %v3549_v3 = vld [vmem:[#allocation6 + $0x4] ss:$12 sps:$4 sm:$0xff]  }
 0x590   :  { %913 = vmatprep.subr.bf16.mxu0 %v3824_v4  ;;  %3000 = vmatprep.subr.bf16.mxu1 %v4712_v0  ;;  %v798_v4 = vld [vmem:[#allocation4 + $0x78] sm:$0xff] }
 0x591   :  { %943 = vmatprep.mubr.bf16.mxu0 %v4710_v1  ;;  %3014 = vmatprep.mubr.msk.bf16.mxu1 %vm3699_vm0, %v4712_v0 }
 0x593   :  { %914 = vmatpush1.bf16.msra.mxu0 %v3827_v5  ;;  %3001 = vmatpush3.bf16.msra.mxu1 %v3848_v12 }
 0x594   :  { %915 = vmatprep.subr.bf16.mxu0 %v3830_v6  ;;  %3002 = vmatprep.subr.bf16.mxu1 %v4712_v0 }
 0x597   :  { %916 = vmatpush1.bf16.msra.mxu0 %v3833_v7  ;;  %3003 = vmatpush3.bf16.msra.mxu1 %v3854_v14 }
 0x598   :  { %917 = vmatprep.subr.bf16.mxu0 %v3836_v8  ;;  %3004 = vmatprep.subr.bf16.mxu1 %v4712_v0 }
 0x59b   :  { %918 = vmatpush1.bf16.msra.mxu0 %v3841_v10  ;;  %3005 = vmatpush3.bf16.msra.mxu1 %v3864_v18 }
 0x59c   :  { %919 = vmatprep.subr.bf16.mxu0 %v3845_v11  ;;  %3006 = vmatprep.subr.bf16.mxu1 %v4712_v0 }
 0x59f   :  { %920 = vmatpush1.bf16.msra.mxu0 %v3850_v13  ;;  %3007 = vmatpush3.bf16.msra.mxu1 %v3872_v20 }
 0x5a0   :  { %921 = vmatprep.subr.bf16.mxu0 %v3857_v15  ;;  %3008 = vmatprep.subr.bf16.mxu1 %v4712_v0  ;;  %v799_v15 = vld [vmem:[#allocation4 + $0x80] sm:$0xff] }
 0x5a3   :  { %922 = vmatpush1.bf16.msra.mxu0 %v3860_v16  ;;  %3009 = vmatpush3.bf16.msra.mxu1 %v3882_v23 }
 0x5a4   :  { %923 = vmatprep.subr.bf16.mxu0 %v3862_v17  ;;  %3010 = vmatprep.subr.bf16.mxu1 %v4712_v0 }
 0x5a7   :  { %924 = vmatpush1.bf16.msra.mxu0 %v3870_v19  ;;  %3011 = vmatpush3.bf16.msra.mxu1 %v3888_v24 }
 0x5a8   :  { %925 = vmatprep.subr.bf16.mxu0 %v3874_v21  ;;  %3012 = vmatprep.subr.bf16.mxu1 %v4712_v0 }
 0x5ab   :  { %926 = vmatpush1.bf16.msra.mxu0 %v3880_v22  ;;  %3013 = vmatpush3.bf16.msra.mxu1 %v3894_v25 }
 0x5ac   :  { %1020 = vmatprep.subr.bf16.mxu0 %v3549_v3  ;;  %3018 = vmatprep.subr.bf16.mxu1 %v4712_v0 }
 0x661   :  { %v836_v5 = vpop.f32.mrb[20].mxu0  ;;  %v877_v6 = vpop.f32.mrb[20].mxu1 }
 0x662   :  { %v883_v7 = vadd.f32 %v836_v5, %v798_v4  ;;  %v838_v8 = vpop.f32.mrb[21].mxu0  ;;  %v2996_v9 = vpop.f32.mrb[21].mxu1  ;;  %v897_v21 = vadd.f32 %v3940_v42, %v877_v6 }
 0x663   :  { %v840_v10 = vpop.f32.mrb[22].mxu0  ;;  %v880_v11 = vpop.f32.mrb[22].mxu1  ;;  %v884_v16 = vadd.f32 %v838_v8, %v799_v15 }
 0x664   :  { %v2633_v12 = vmul.f32 -1.442695, %v883_v7  ;;  %v841_v13 = vpop.f32.mrb[23].mxu0  ;;  %v2997_v14 = vpop.f32.mrb[23].mxu1  ;;  %v908_v11 = vld [vmem:[#allocation4 + $0x98] sm:$0xff] }
 0x665   :  { %v2634_v17 = vmul.f32 -1.442695, %v884_v16 }
 0x666   :  { %3439 = vpow2.f32 %v2633_v12 }
 0x667   :  { %3441 = vpow2.f32 %v2634_v17 }
 0x670   :  { %v3440_v18 = vpop.eup %3439 }
 0x671   :  { %v891_v19 = vadd.f32 1.0, %v3440_v18  ;;  %v3442_v20 = vpop.eup %3441  ;;  %v909_v18 = vld [vmem:[#allocation4 + $0xa0] sm:$0xff] }
 0x672   :  { %v892_v31 = vadd.f32 1.0, %v3442_v20 }
 0x673   :  { %3443 = vrcp.f32 %v891_v19 }
 0x67d   :  { %v3444_v22 = vpop.eup %3443 }
 0x67e   :  { %v898_v29 = vmul.f32 %v3444_v22, %v897_v21 }
 0x680   :  { %v899_v30 = vadd.f32 %v898_v29, %v800_v28 }
 0x682   :  { %3445 = vtanh.f32 %v899_v30 }
 0x683   :  { %3447 = vrcp.f32 %v892_v31 }
 0x68c   :  { %v3446_v33 = vpop.eup %3445 }
 0x68d   :  { %v901_v34 = vsub.f32 %v4107_v26, %v3446_v33  ;;  %v3448_v35 = vpop.eup %3447 }
 0x68f   :  { %v902_v36 = vmul.f32 %v3448_v35, %v901_v34  ;;  %v3331_v35 = vld [vmem:[#allocation9 + $0x1c] ss:$12 sps:$4 sm:$0xff]  }
 0x691   :  { %v4147_v37 = vadd.f32 %v3446_v33, %v902_v36  ;;  %v3325_v33 = vld [vmem:[#allocation9] ss:$12 sps:$4 sm:$0xff]   ;;  %v1204_v36 = vpack.c.bf16 %v3984_v46, %v3943_v54  ;;  %v3337_v54 = vld [vmem:[#allocation9 + $0x48] ss:$12 sps:$4 sm:$0xff]   ;;  %v3343_v46 = vld [vmem:[#allocation9 + $0x64] ss:$12 sps:$4 sm:$0xff]  }
 0x693   :  { %v910_v39 = vpack.c.bf16 %v4147_v37, %v4147_v37 }
 0x695   :  { %944 = vmatmul.mubr.bf16.vlgmr.msra.gmra.mrb[24].mxu0 %v910_v39  ;;  %3015 = vmatmul.mubr.bf16.vlgmr.msra.gmra.mrb[24].mxu1 %v910_v39  ;;  %v3329_v39 = vld [vmem:[#allocation9 + $0x18] ss:$12 sps:$4 sm:$0xff]  }
 0x696   :  { %1021 = vmatpush1.bf16.msra.mxu0 %v3550_v40  ;;  %3019 = vmatpush3.bf16.msra.mxu1 %v3551_v41  ;;  %v3335_v40 = vld [vmem:[#allocation9 + $0x34] ss:$12 sps:$4 sm:$0xff]   ;;  %v3336_v41 = vld [vmem:[#allocation9 + $0x38] ss:$12 sps:$4 sm:$0xff]  }
 0x697   :  { %1022 = vmatprep.subr.bf16.mxu0 %v3552_v43  ;;  %3020 = vmatprep.subr.bf16.mxu1 %v4712_v0  ;;  %v3333_v43 = vld [vmem:[#allocation9 + $0x30] ss:$12 sps:$4 sm:$0xff]  }
 0x698   :  { %1052 = vmatprep.mubr.bf16.mxu0 %v4710_v1  ;;  %3034 = vmatprep.mubr.msk.bf16.mxu1 %vm3699_vm0, %v4712_v0 }
 0x69a   :  { %1023 = vmatpush1.bf16.msra.mxu0 %v3553_v44  ;;  %3021 = vmatpush3.bf16.msra.mxu1 %v3554_v45  ;;  %v3339_v44 = vld [vmem:[#allocation9 + $0x4c] ss:$12 sps:$4 sm:$0xff]   ;;  %v3340_v45 = vld [vmem:[#allocation9 + $0x50] ss:$12 sps:$4 sm:$0xff]  }
 0x69b   :  { %1024 = vmatprep.subr.bf16.mxu0 %v3555_v47  ;;  %3022 = vmatprep.subr.bf16.mxu1 %v4712_v0  ;;  %v3344_v47 = vld [vmem:[#allocation9 + $0x68] ss:$12 sps:$4 sm:$0xff]  }
 0x69e   :  { %1025 = vmatpush1.bf16.msra.mxu0 %v3556_v48  ;;  %3023 = vmatpush3.bf16.msra.mxu1 %v3557_v49  ;;  %v3341_v48 = vld [vmem:[#allocation9 + $0x60] ss:$12 sps:$4 sm:$0xff]   ;;  %v3347_v49 = vld [vmem:[#allocation9 + $0x7c] ss:$12 sps:$4 sm:$0xff]  }
 0x69f   :  { %1026 = vmatprep.subr.bf16.mxu0 %v3558_v50  ;;  %3024 = vmatprep.subr.bf16.mxu1 %v4712_v0  ;;  %v3348_v50 = vld [vmem:[#allocation9 + $0x80] ss:$12 sps:$4 sm:$0xff]  }
 0x6a2   :  { %1027 = vmatpush1.bf16.msra.mxu0 %v3559_v51  ;;  %3025 = vmatpush3.bf16.msra.mxu1 %v3560_v52  ;;  %v3345_v51 = vld [vmem:[#allocation9 + $0x78] ss:$12 sps:$4 sm:$0xff]   ;;  %v3351_v52 = vld [vmem:[#allocation9 + $0x94] ss:$12 sps:$4 sm:$0xff]  }
 0x6a3   :  { %1028 = vmatprep.subr.bf16.mxu0 %v3561_v2  ;;  %3026 = vmatprep.subr.bf16.mxu1 %v4712_v0  ;;  %v3352_v2 = vld [vmem:[#allocation9 + $0x98] ss:$12 sps:$4 sm:$0xff]  }
 0x6a6   :  { %1029 = vmatpush1.bf16.msra.mxu0 %v3562_v53  ;;  %3027 = vmatpush3.bf16.msra.mxu1 %v3563_v55  ;;  %v3349_v53 = vld [vmem:[#allocation9 + $0x90] ss:$12 sps:$4 sm:$0xff]   ;;  %v3355_v55 = vld [vmem:[#allocation9 + $0xac] ss:$12 sps:$4 sm:$0xff]  }
 0x6a7   :  { %1030 = vmatprep.subr.bf16.mxu0 %v3564_v56  ;;  %3028 = vmatprep.subr.bf16.mxu1 %v4712_v0  ;;  %v3356_v56 = vld [vmem:[#allocation9 + $0xb0] ss:$12 sps:$4 sm:$0xff]  }
 0x6aa   :  { %1031 = vmatpush1.bf16.msra.mxu0 %v3565_v57  ;;  %3029 = vmatpush3.bf16.msra.mxu1 %v3882_v23  ;;  %v907_v23 = vld [vmem:[#allocation4 + $0x90] sm:$0xff] }
 0x6ab   :  { %1032 = vmatprep.subr.bf16.mxu0 %v3566_v58  ;;  %3030 = vmatprep.subr.bf16.mxu1 %v4712_v0  ;;  %v3353_v57 = vld [vmem:[#allocation9 + $0xa8] ss:$12 sps:$4 sm:$0xff]   ;;  %v1205_v58 = vpack.c.bf16 %v4066_v32, %v4025_v38  ;;  %v4189_v32 = vld [vmem:[#allocation8 + $0x18] ss:$12 sps:$4 sm:$0xff]  }
 0x6ac   :  { %v4187_v38 = vld [vmem:[#allocation8 + $0x1c] ss:$12 sps:$4 sm:$0xff]  }
 0x6ae   :  { %1033 = vmatpush1.bf16.msra.mxu0 %v3567_v59  ;;  %3031 = vmatpush3.bf16.msra.mxu1 %v3888_v24  ;;  %v1206_v59 = vpack.c.bf16 %v4147_v37, %v4107_v26  ;;  %v4193_v26 = vld [vmem:[#allocation8 + $0x34] ss:$12 sps:$4 sm:$0xff]  }
 0x6af   :  { %1034 = vmatprep.subr.bf16.mxu0 %v3568_v60  ;;  %3032 = vmatprep.subr.bf16.mxu1 %v4712_v0  ;;  %v4181_v60 = vld [vmem:[#allocation8 + $0x4] ss:$12 sps:$4 sm:$0xff]  }
 0x6b2   :  { %1035 = vmatpush1.bf16.msra.mxu0 %v3569_v61  ;;  %3033 = vmatpush3.bf16.msra.mxu1 %v3894_v25  ;;  %v4183_v61 = vld [vmem:[#allocation8] ss:$12 sps:$4 sm:$0xff]  }
 0x6b3   :  { %1352 = vmatprep.subr.bf16.mxu0 %v3327_v62  ;;  %3038 = vmatprep.subr.bf16.mxu1 %v3328_v63  ;;  %v4199_v62 = vld [vmem:[#allocation8 + $0x4c] ss:$12 sps:$4 sm:$0xff]  }
 0x768   :  { %v945_v27 = vpop.f32.mrb[24].mxu0  ;;  %v986_v3 = vpop.f32.mrb[24].mxu1 }
 0x769   :  { %v992_v4 = vadd.f32 %v945_v27, %v907_v23  ;;  %v947_v5 = vpop.f32.mrb[25].mxu0  ;;  %v3016_v6 = vpop.f32.mrb[25].mxu1  ;;  %v1006_v16 = vadd.f32 %v3940_v42, %v986_v3  ;;  %v3332_v42 = vld [vmem:[#allocation9 + $0x20] ss:$12 sps:$4 sm:$0xff]   ;;  %v4205_v23 = vld [vmem:[#allocation8 + $0x64] ss:$12 sps:$4 sm:$0xff]  }
 0x76a   :  { %v949_v7 = vpop.f32.mrb[26].mxu0  ;;  %v989_v24 = vpop.f32.mrb[26].mxu1  ;;  %v993_v12 = vadd.f32 %v947_v5, %v908_v11  ;;  %v4207_v27 = vld [vmem:[#allocation8 + $0x60] ss:$12 sps:$4 sm:$0xff]   ;;  %v4211_v3 = vld [vmem:[#allocation8 + $0x7c] ss:$12 sps:$4 sm:$0xff]  }
 0x76b   :  { %v2635_v8 = vmul.f32 -1.442695, %v992_v4  ;;  %v950_v9 = vpop.f32.mrb[27].mxu0  ;;  %v3017_v10 = vpop.f32.mrb[27].mxu1  ;;  %v4213_v4 = vld [vmem:[#allocation8 + $0x78] ss:$12 sps:$4 sm:$0xff]  }
 0x76c   :  { %v2636_v13 = vmul.f32 -1.442695, %v993_v12  ;;  %v4217_v5 = vld [vmem:[#allocation8 + $0x94] ss:$12 sps:$4 sm:$0xff]   ;;  %v4221_v7 = vld [vmem:[#allocation8 + $0x90] ss:$12 sps:$4 sm:$0xff]  }
 0x76d   :  { %3449 = vpow2.f32 %v2635_v8  ;;  %v4219_v6 = vld [vmem:[#allocation8 + $0x8] ss:$12 sps:$4 sm:$0xff]   ;;  %v4223_v24 = vld [vmem:[#allocation8 + $0xac] ss:$12 sps:$4 sm:$0xff]   ;;  %v4241_v11 = vld [vmem:[#allocation8 + $0x50] ss:$12 sps:$4 sm:$0xff]  }
 0x76e   :  { %3451 = vpow2.f32 %v2636_v13  ;;  %v4227_v8 = vld [vmem:[#allocation8 + $0x20] ss:$12 sps:$4 sm:$0xff]   ;;  %v4231_v9 = vld [vmem:[#allocation8 + $0xa8] ss:$12 sps:$4 sm:$0xff]   ;;  %v4237_v10 = vld [vmem:[#allocation8 + $0x38] ss:$12 sps:$4 sm:$0xff]  }
 0x76f   :  { %v4245_v12 = vld [vmem:[#allocation8 + $0x68] ss:$12 sps:$4 sm:$0xff]   ;;  %v4249_v13 = vld [vmem:[#allocation8 + $0x80] ss:$12 sps:$4 sm:$0xff]  }
 0x777   :  { %v3450_v25 = vpop.eup %3449 }
 0x778   :  { %v1000_v14 = vadd.f32 1.0, %v3450_v25  ;;  %v3452_v15 = vpop.eup %3451  ;;  %v4253_v25 = vld [vmem:[#allocation8 + $0x98] ss:$12 sps:$4 sm:$0xff]  }
 0x779   :  { %v1001_v21 = vadd.f32 1.0, %v3452_v15  ;;  %v1016_v15 = vld [vmem:[#allocation4 + $0xa8] sm:$0xff] }
 0x77a   :  { %3453 = vrcp.f32 %v1000_v14  ;;  %v4257_v14 = vld [vmem:[#allocation8 + $0xb0] ss:$12 sps:$4 sm:$0xff]  }
 0x784   :  { %v3454_v17 = vpop.eup %3453 }
 0x785   :  { %v1007_v19 = vmul.f32 %v3454_v17, %v1006_v16 }
 0x787   :  { %v1008_v20 = vadd.f32 %v1007_v19, %v909_v18 }
 0x789   :  { %3455 = vtanh.f32 %v1008_v20 }
 0x78a   :  { %3457 = vrcp.f32 %v1001_v21 }
 0x793   :  { %v3456_v22 = vpop.eup %3455 }
 0x794   :  { %v1010_v28 = vsub.f32 %v4147_v37, %v3456_v22  ;;  %v3458_v29 = vpop.eup %3457  ;;  %v4195_v37 = vld [vmem:[#allocation8 + $0x30] ss:$12 sps:$4 sm:$0xff]  }
 0x796   :  { %v1011_v30 = vmul.f32 %v3458_v29, %v1010_v28 }
 0x798   :  { %v4166_v31 = vadd.f32 %v3456_v22, %v1011_v30 }
 0x79a   :  { %v1019_v34 = vpack.c.bf16 %v4166_v31, %v4166_v31 }
 0x79c   :  { %1053 = vmatmul.mubr.bf16.vlgmr.msra.gmra.mrb[28].mxu0 %v1019_v34  ;;  %3035 = vmatmul.mubr.bf16.vlgmr.msra.gmra.mrb[28].mxu1 %v1019_v34 }
 0x79d   :  { %1353 = vmatpush1.bf16.msra.mxu0 %v3325_v33  ;;  %3039 = vmatpush3.bf16.msra.mxu1 %v3328_v63  ;;  %v4201_v63 = vld [vmem:[#allocation8 + $0x48] ss:$12 sps:$4 sm:$0xff]  }
 0x79e   :  { %3054 = vmatprep.mubr.bf16.mxu1 %v1204_v36  ;;  %1354 = vmatprep.subr.bf16.mxu0 %v3331_v35  ;;  %v1017_v33 = vld [vmem:[#allocation4 + $0xb0] sm:$0xff] }
 0x79f   :  { %3040 = vmatprep.subr.bf16.mxu1 %v3332_v42  ;;  %1384 = vmatprep.mubr.bf16.mxu0 %v4710_v1 }
 0x7a1   :  { %1355 = vmatpush1.bf16.msra.mxu0 %v3329_v39  ;;  %3041 = vmatpush3.bf16.msra.mxu1 %v3332_v42 }
 0x7a2   :  { %1356 = vmatprep.subr.bf16.mxu0 %v3335_v40  ;;  %3042 = vmatprep.subr.bf16.mxu1 %v3336_v41  ;;  %v3570_v40 = vld [vmem:[%s4702_s2] ss:$0 sm:$0xff] }
 0x7a5   :  { %1357 = vmatpush1.bf16.msra.mxu0 %v3333_v43  ;;  %3043 = vmatpush3.bf16.msra.mxu1 %v3336_v41 }
 0x7a6   :  { %1358 = vmatprep.subr.bf16.mxu0 %v3339_v44  ;;  %3044 = vmatprep.subr.bf16.mxu1 %v3340_v45  ;;  %v1018_v44 = vld [vmem:[#allocation4 + $0xb8] sm:$0xff] }
 0x7a9   :  { %1359 = vmatpush1.bf16.msra.mxu0 %v3337_v54  ;;  %3045 = vmatpush3.bf16.msra.mxu1 %v3340_v45 }
 0x7aa   :  { %1360 = vmatprep.subr.bf16.mxu0 %v3343_v46  ;;  %3046 = vmatprep.subr.bf16.mxu1 %v3344_v47 }
 0x7ad   :  { %1361 = vmatpush1.bf16.msra.mxu0 %v3341_v48  ;;  %3047 = vmatpush3.bf16.msra.mxu1 %v3344_v47 }
 0x7ae   :  { %1362 = vmatprep.subr.bf16.mxu0 %v3347_v49  ;;  %3048 = vmatprep.subr.bf16.mxu1 %v3348_v50 }
 0x7b1   :  { %1363 = vmatpush1.bf16.msra.mxu0 %v3345_v51  ;;  %3049 = vmatpush3.bf16.msra.mxu1 %v3348_v50 }
 0x7b2   :  { %1364 = vmatprep.subr.bf16.mxu0 %v3351_v52  ;;  %3050 = vmatprep.subr.bf16.mxu1 %v3352_v2 }
 0x7b5   :  { %1365 = vmatpush1.bf16.msra.mxu0 %v3349_v53  ;;  %3051 = vmatpush3.bf16.msra.mxu1 %v3352_v2 }
 0x7b6   :  { %1366 = vmatprep.subr.bf16.mxu0 %v3355_v55  ;;  %3052 = vmatprep.subr.bf16.mxu1 %v3356_v56 }
 0x7b9   :  { %1367 = vmatpush1.bf16.msra.mxu0 %v3353_v57  ;;  %3053 = vmatpush3.bf16.msra.mxu1 %v3356_v56 }
 0x7ba   :  { %3062 = vmatprep.subr.bf16.mxu1 %v4712_v0  ;;  %1645 = vmatprep.subr.bf16.mxu0 %v4181_v60 }
 0x7bc   :  { %1385 = vmatmul.mubr.bf16.vlgmr.msra.gmra.mrb[32].mxu0 %v1204_v36  ;;  %3055 = vmatmul.mubr.bf16.vlgmr.msra.gmra.mrb[32].mxu1 %v1205_v58 }
 0x7bd   :  { %3058 = vmatprep.mubr.bf16.mxu1 %v1206_v59  ;;  %1394 = vmatprep.mubr.bf16.mxu0 %v4710_v1 }
 0x7be   :  { %1646 = vmatpush1.bf16.msra.mxu0 %v4183_v61  ;;  %3063 = vmatpush3.bf16.msra.mxu1 %v4219_v6 }
 0x7bf   :  { %1647 = vmatprep.subr.bf16.mxu0 %v4187_v38  ;;  %3064 = vmatprep.subr.bf16.mxu1 %v4712_v0 }
 0x7c2   :  { %1648 = vmatpush1.bf16.msra.mxu0 %v4189_v32  ;;  %3065 = vmatpush3.bf16.msra.mxu1 %v4227_v8 }
 0x7c3   :  { %1649 = vmatprep.subr.bf16.mxu0 %v4193_v26  ;;  %3066 = vmatprep.subr.bf16.mxu1 %v4712_v0 }
 0x7c4   :  { %1395 = vmatmul.mubr.bf16.gmra.mrb[36].mxu0 %v1205_v58 }
 0x7c5   :  { %1404 = vmatprep.mubr.bf16.mxu0 %v4710_v1 }
 0x7c6   :  { %1650 = vmatpush1.bf16.msra.mxu0 %v4195_v37  ;;  %3067 = vmatpush3.bf16.msra.mxu1 %v4237_v10 }
 0x7c7   :  { %1651 = vmatprep.subr.bf16.mxu0 %v4199_v62  ;;  %3068 = vmatprep.subr.bf16.mxu1 %v4712_v0 }
 0x7ca   :  { %1652 = vmatpush1.bf16.msra.mxu0 %v4201_v63  ;;  %3069 = vmatpush3.bf16.msra.mxu1 %v4241_v11 }
 0x7cb   :  { %1653 = vmatprep.subr.bf16.mxu0 %v4205_v23  ;;  %3070 = vmatprep.subr.bf16.mxu1 %v4712_v0 }
 0x7cc   :  { %1405 = vmatmul.mubr.bf16.gmra.mrb[40].mxu0 %v1206_v59 }
 0x7cd   :  { %1414 = vmatprep.mubr.bf16.mxu0 %v4710_v1 }
 0x7ce   :  { %1654 = vmatpush1.bf16.msra.mxu0 %v4207_v27  ;;  %3071 = vmatpush3.bf16.msra.mxu1 %v4245_v12 }
 0x7cf   :  { %1655 = vmatprep.subr.bf16.mxu0 %v4211_v3  ;;  %3072 = vmatprep.subr.bf16.mxu1 %v4712_v0 }
 0x7d2   :  { %1656 = vmatpush1.bf16.msra.mxu0 %v4213_v4  ;;  %3073 = vmatpush3.bf16.msra.mxu1 %v4249_v13 }
 0x7d3   :  { %1657 = vmatprep.subr.bf16.mxu0 %v4217_v5  ;;  %3074 = vmatprep.subr.bf16.mxu1 %v4712_v0 }
 0x7d6   :  { %1658 = vmatpush1.bf16.msra.mxu0 %v4221_v7  ;;  %3075 = vmatpush3.bf16.msra.mxu1 %v4253_v25 }
 0x7d7   :  { %1659 = vmatprep.subr.bf16.mxu0 %v4223_v24  ;;  %3076 = vmatprep.subr.bf16.mxu1 %v4712_v0 }
 0x7da   :  { %1660 = vmatpush1.bf16.msra.mxu0 %v4231_v9  ;;  %3077 = vmatpush3.bf16.msra.mxu1 %v4257_v14 }
 0x7db   :  { %1752 = vmatprep.subr.bf16.mxu0 %v4181_v60  ;;  %3082 = vmatprep.subr.bf16.mxu1 %v4712_v0 }
 0x86f   :  { %v1054_v16 = vpop.f32.mrb[28].mxu0  ;;  %v1095_v17 = vpop.f32.mrb[28].mxu1 }
 0x870   :  { %v1101_v18 = vadd.f32 %v1054_v16, %v1016_v15  ;;  %v1056_v19 = vpop.f32.mrb[29].mxu0  ;;  %v3036_v20 = vpop.f32.mrb[29].mxu1  ;;  %v1115_v41 = vadd.f32 %v3570_v40, %v1095_v17 }
 0x871   :  { %v1058_v21 = vpop.f32.mrb[30].mxu0  ;;  %v1098_v22 = vpop.f32.mrb[30].mxu1  ;;  %v1102_v34 = vadd.f32 %v1056_v19, %v1017_v33  ;;  %v1156_v33 = vld [vmem:[%s4706_s6] sm:$0x7] }
 0x872   :  { %v2637_v28 = vmul.f32 -1.442695, %v1101_v18  ;;  %v1059_v29 = vpop.f32.mrb[31].mxu0  ;;  %v3037_v30 = vpop.f32.mrb[31].mxu1 }
 0x873   :  { %v2638_v35 = vmul.f32 -1.442695, %v1102_v34 }
 0x874   :  { %3459 = vpow2.f32 %v2637_v28 }
 0x875   :  { %3461 = vpow2.f32 %v2638_v35 }
 0x87e   :  { %v3460_v42 = vpop.eup %3459 }
 0x87f   :  { %v1109_v36 = vadd.f32 1.0, %v3460_v42  ;;  %v3462_v39 = vpop.eup %3461 }
 0x880   :  { %v1110_v46 = vadd.f32 1.0, %v3462_v39 }
 0x881   :  { %3463 = vrcp.f32 %v1109_v36 }
 0x88b   :  { %v3464_v43 = vpop.eup %3463 }
 0x88c   :  { %v1116_v45 = vmul.f32 %v3464_v43, %v1115_v41 }
 0x88e   :  { %v1117_v54 = vadd.f32 %v1116_v45, %v1018_v44 }
 0x88f   :  { %v4265_v47 = vpop.f32.mrb[32].mxu0  ;;  %v4267_v48 = vpop.f32.mrb[32].mxu1 }
 0x890   :  { %3465 = vtanh.f32 %v1117_v54  ;;  %v4269_v49 = vpop.f32.mrb[33].mxu0  ;;  %v4271_v50 = vpop.f32.mrb[33].mxu1 }
 0x891   :  { %v4273_v51 = vpop.f32.mrb[34].mxu0  ;;  %v4275_v52 = vpop.f32.mrb[34].mxu1  ;;  %3467 = vrcp.f32 %v1110_v46 }
 0x892   :  { %v4277_v2 = vpop.f32.mrb[35].mxu0  ;;  %v4279_v53 = vpop.f32.mrb[35].mxu1 }
 0x897   :  { %v4281_v55 = vpop.f32.mrb[36].mxu0 }
 0x898   :  { %v4283_v56 = vpop.f32.mrb[37].mxu0 }
 0x899   :  { %v4285_v57 = vpop.f32.mrb[38].mxu0 }
 0x89a   :  { %v3466_v58 = vpop.eup %3465  ;;  %v4287_v59 = vpop.f32.mrb[39].mxu0 }
 0x89b   :  { %v1119_v15 = vsub.f32 %v4166_v31, %v3466_v58  ;;  %v3468_v16 = vpop.eup %3467 }
 0x89d   :  { %v1120_v17 = vmul.f32 %v3468_v16, %v1119_v15 }
 0x89f   :  { %v4290_v18 = vpop.f32.mrb[40].mxu0  ;;  %v1121_v19 = vadd.f32 %v3466_v58, %v1120_v17 }
 0x8a0   :  { %v4292_v20 = vpop.f32.mrb[41].mxu0 }
 0x8a1   :  { %v4294_v21 = vpop.f32.mrb[42].mxu0  ;;  %v1207_v22 = vpack.c.bf16 %v1121_v19, %v4166_v31  ;;  %v1209_v31 = vlaneseq }
 0x8a2   :  { %v4297_v28 = vpop.f32.mrb[43].mxu0 }
 0x8a3   :  { %1415 = vmatmul.mubr.bf16.gmra.mrb[44].mxu0 %v1207_v22  ;;  %3059 = vmatmul.mubr.bf16.gmra.mrb[36].mxu1 %v1207_v22  ;;  %v1210_v29 = vshrl.u32 %v1209_v31, 7 }
 0x8a4   :  { %1677 = vmatprep.mubr.bf16.mxu0 %v4710_v1  ;;  %3078 = vmatprep.mubr.msk.bf16.mxu1 %vm3699_vm0, %v4712_v0 }
 0x8a5   :  { %v1211_v30 = vsub.s32 0, %v1210_v29  ;;  %v1215_v34 = vsub.s32 1, %v1210_v29 }
 0x8a7   :  { %v4354_v43 = vrot.slane %v1156_v33, %v1211_v30  ;;  %v4360_v54 = vrot.slane %v1156_v33, %v1215_v34 }
 0x8a9   :  { %v1387_v46 = vadd.f32 %v4265_v47, %v4354_v43  ;;  %v1389_v58 = vadd.f32 %v4269_v49, %v4360_v54  ;;  %v1219_v47 = vsub.s32 2, %v1210_v29  ;;  %v4369_v49 = vld [vmem:[%s4704_s4] ss:$0 sm:$0xff] }
 0x8ab   :  { %1678 = vmatmul.mubr.bf16.vlgmr.msra.gmra.mrb[48].mxu0 %v4710_v1  ;;  %3079 = vmatmul.mubr.bf16.vlgmr.msra.gmra.mrb[40].mxu1 %v4710_v1 }
 0x8ac   :  { %1753 = vmatpush1.bf16.msra.mxu0 %v4183_v61  ;;  %3083 = vmatpush3.bf16.msra.mxu1 %v4219_v6 }
 0x8ad   :  { %1754 = vmatprep.subr.bf16.mxu0 %v4187_v38  ;;  %3084 = vmatprep.subr.bf16.mxu1 %v4712_v0 }
 0x8ae   :  { %1784 = vmatprep.mubr.bf16.mxu0 %v4710_v1  ;;  %3098 = vmatprep.mubr.msk.bf16.mxu1 %vm3699_vm0, %v4712_v0 }
 0x8b0   :  { %1755 = vmatpush1.bf16.msra.mxu0 %v4189_v32  ;;  %3085 = vmatpush3.bf16.msra.mxu1 %v4227_v8 }
 0x8b1   :  { %1756 = vmatprep.subr.bf16.mxu0 %v4193_v26  ;;  %3086 = vmatprep.subr.bf16.mxu1 %v4712_v0 }
 0x8b4   :  { %1757 = vmatpush1.bf16.msra.mxu0 %v4195_v37  ;;  %3087 = vmatpush3.bf16.msra.mxu1 %v4237_v10 }
 0x8b5   :  { %1758 = vmatprep.subr.bf16.mxu0 %v4199_v62  ;;  %3088 = vmatprep.subr.bf16.mxu1 %v4712_v0 }
 0x8b8   :  { %1759 = vmatpush1.bf16.msra.mxu0 %v4201_v63  ;;  %3089 = vmatpush3.bf16.msra.mxu1 %v4241_v11 }
 0x8b9   :  { %1760 = vmatprep.subr.bf16.mxu0 %v4205_v23  ;;  %3090 = vmatprep.subr.bf16.mxu1 %v4712_v0 }
 0x8bc   :  { %1761 = vmatpush1.bf16.msra.mxu0 %v4207_v27  ;;  %3091 = vmatpush3.bf16.msra.mxu1 %v4245_v12 }
 0x8bd   :  { %1762 = vmatprep.subr.bf16.mxu0 %v4211_v3  ;;  %3092 = vmatprep.subr.bf16.mxu1 %v4712_v0 }
 0x8c0   :  { %1763 = vmatpush1.bf16.msra.mxu0 %v4213_v4  ;;  %3093 = vmatpush3.bf16.msra.mxu1 %v4249_v13 }
 0x8c1   :  { %1764 = vmatprep.subr.bf16.mxu0 %v4217_v5  ;;  %3094 = vmatprep.subr.bf16.mxu1 %v4712_v0 }
 0x8c4   :  { %1765 = vmatpush1.bf16.msra.mxu0 %v4221_v7  ;;  %3095 = vmatpush3.bf16.msra.mxu1 %v4253_v25 }
 0x8c5   :  { %1766 = vmatprep.subr.bf16.mxu0 %v4223_v24  ;;  %3096 = vmatprep.subr.bf16.mxu1 %v4712_v0 }
 0x8c8   :  { %1767 = vmatpush1.bf16.msra.mxu0 %v4231_v9  ;;  %3097 = vmatpush3.bf16.msra.mxu1 %v4257_v14 }
 0x8c9   :  { %1859 = vmatprep.subr.bf16.mxu0 %v4181_v60  ;;  %3102 = vmatprep.subr.bf16.mxu1 %v4712_v0 }
 0x976   :  { %v4342_v35 = vpop.f32.mrb[44].mxu0  ;;  %v4344_v42 = vpop.f32.mrb[36].mxu1 }
 0x977   :  { %4714 = vst [vmem:[#allocation14_spill] sm:$0xff] %v4344_v42  ;;  %v4346_v36 = vpop.f32.mrb[45].mxu0  ;;  %v4348_v39 = vpop.f32.mrb[37].mxu1 }
 0x978   :  { %4715 = vst [vmem:[#allocation15_spill] sm:$0xff] %v4346_v36  ;;  %v4350_v40 = vpop.f32.mrb[46].mxu0  ;;  %v4352_v41 = vpop.f32.mrb[38].mxu1 }
 0x979   :  { %4716 = vst [vmem:[#allocation16_spill] sm:$0xff] %v4350_v40  ;;  %4717 = vst [vmem:[#allocation17_spill] sm:$0xff] %v4352_v41  ;;  %v4356_v44 = vpop.f32.mrb[47].mxu0  ;;  %v4358_v45 = vpop.f32.mrb[39].mxu1 }
 0x97a   :  { %4718 = vst [vmem:[#allocation18_spill] sm:$0xff] %v4356_v44 }
 0x97e   :  { %v1679_v15 = vpop.f32.mrb[48].mxu0  ;;  %v1720_v16 = vpop.f32.mrb[40].mxu1 }
 0x97f   :  { %v1726_v17 = vadd.f32 %v1679_v15, %v1387_v46  ;;  %v1681_v19 = vpop.f32.mrb[49].mxu0  ;;  %v3080_v22 = vpop.f32.mrb[41].mxu1  ;;  %v4371_v46 = vrot.slane %v1156_v33, %v1219_v47 }
 0x980   :  { %v1727_v31 = vadd.f32 %v1681_v19, %v1389_v58  ;;  %v1683_v30 = vpop.f32.mrb[50].mxu0  ;;  %v1723_v1 = vpop.f32.mrb[42].mxu1  ;;  %v1740_v58 = vadd.f32 %v4369_v49, %v1720_v16  ;;  %v4720_v16 = vmov 0  }
 0x981   :  { %v2688_v0 = vmul.f32 -1.442695, %v1726_v17  ;;  %v1684_v41 = vpop.f32.mrb[51].mxu0  ;;  %v3081_v44 = vpop.f32.mrb[43].mxu1  ;;  %v1393_v30 = vadd.f32 %v4277_v2, %v4360_v54 }
 0x982   :  { %v2689_v34 = vmul.f32 -1.442695, %v1727_v31  ;;  %v1391_v31 = vadd.f32 %v4273_v51, %v4354_v43 }
 0x983   :  { %3469 = vpow2.f32 %v2688_v0  ;;  %v1460_v0 = vadd.f32 %v4271_v50, %v4371_v46  ;;  %v4719_v50 = vmov 0.0  }
 0x984   :  { %3471 = vpow2.f32 %v2689_v34 }
 0x98d   :  { %v3470_v40 = vpop.eup %3469 }
 0x98e   :  { %v1734_v42 = vadd.f32 1.0, %v3470_v40  ;;  %v3472_v1 = vpop.eup %3471 }
 0x98f   :  { %v1735_v44 = vadd.f32 1.0, %v3472_v1 }
 0x990   :  { %3473 = vrcp.f32 %v1734_v42 }
 0x99a   :  { %v3474_v15 = vpop.eup %3473 }
 0x99b   :  { %v1741_v41 = vmul.f32 %v3474_v15, %v1740_v58 }
 0x99d   :  { %v1742_v40 = vadd.f32 %v1741_v41, %v1460_v0 }
 0x99f   :  { %3475 = vtanh.f32 %v1742_v40 }
 0x9a0   :  { %3477 = vrcp.f32 %v1735_v44 }
 0x9a9   :  { %v3476_v29 = vpop.eup %3475 }
 0x9aa   :  { %v1744_v42 = vsub.f32 0.0, %v3476_v29  ;;  %v3478_v17 = vpop.eup %3477 }
 0x9ac   :  { %v1745_v19 = vmul.f32 %v3478_v17, %v1744_v42 }
 0x9ae   :  { %v4376_v22 = vadd.f32 %v3476_v29, %v1745_v19 }
 0x9b0   :  { %v1751_v33 = vpack.c.bf16 %v4376_v22, %v4376_v22 }
 0x9b2   :  { %1785 = vmatmul.mubr.bf16.vlgmr.msra.gmra.mrb[52].mxu0 %v1751_v33  ;;  %3099 = vmatmul.mubr.bf16.vlgmr.msra.gmra.mrb[44].mxu1 %v1751_v33 }
 0x9b3   :  { %1860 = vmatpush1.bf16.msra.mxu0 %v4183_v61  ;;  %3103 = vmatpush3.bf16.msra.mxu1 %v4219_v6 }
 0x9b4   :  { %1861 = vmatprep.subr.bf16.mxu0 %v4187_v38  ;;  %3104 = vmatprep.subr.bf16.mxu1 %v4719_v50 }
 0x9b5   :  { %1891 = vmatprep.mubr.bf16.mxu0 %v4720_v16  ;;  %3118 = vmatprep.mubr.msk.bf16.mxu1 %vm3699_vm0, %v4719_v50 }
 0x9b7   :  { %1862 = vmatpush1.bf16.msra.mxu0 %v4189_v32  ;;  %3105 = vmatpush3.bf16.msra.mxu1 %v4227_v8 }
 0x9b8   :  { %1863 = vmatprep.subr.bf16.mxu0 %v4193_v26  ;;  %3106 = vmatprep.subr.bf16.mxu1 %v4719_v50 }
 0x9bb   :  { %1864 = vmatpush1.bf16.msra.mxu0 %v4195_v37  ;;  %3107 = vmatpush3.bf16.msra.mxu1 %v4237_v10 }
 0x9bc   :  { %1865 = vmatprep.subr.bf16.mxu0 %v4199_v62  ;;  %3108 = vmatprep.subr.bf16.mxu1 %v4719_v50 }
 0x9bf   :  { %1866 = vmatpush1.bf16.msra.mxu0 %v4201_v63  ;;  %3109 = vmatpush3.bf16.msra.mxu1 %v4241_v11 }
 0x9c0   :  { %1867 = vmatprep.subr.bf16.mxu0 %v4205_v23  ;;  %3110 = vmatprep.subr.bf16.mxu1 %v4719_v50 }
 0x9c3   :  { %1868 = vmatpush1.bf16.msra.mxu0 %v4207_v27  ;;  %3111 = vmatpush3.bf16.msra.mxu1 %v4245_v12 }
 0x9c4   :  { %1869 = vmatprep.subr.bf16.mxu0 %v4211_v3  ;;  %3112 = vmatprep.subr.bf16.mxu1 %v4719_v50 }
 0x9c7   :  { %1870 = vmatpush1.bf16.msra.mxu0 %v4213_v4  ;;  %3113 = vmatpush3.bf16.msra.mxu1 %v4249_v13 }
 0x9c8   :  { %1871 = vmatprep.subr.bf16.mxu0 %v4217_v5  ;;  %3114 = vmatprep.subr.bf16.mxu1 %v4719_v50 }
 0x9cb   :  { %1872 = vmatpush1.bf16.msra.mxu0 %v4221_v7  ;;  %3115 = vmatpush3.bf16.msra.mxu1 %v4253_v25 }
 0x9cc   :  { %1873 = vmatprep.subr.bf16.mxu0 %v4223_v24  ;;  %3116 = vmatprep.subr.bf16.mxu1 %v4719_v50 }
 0x9cf   :  { %1874 = vmatpush1.bf16.msra.mxu0 %v4231_v9  ;;  %3117 = vmatpush3.bf16.msra.mxu1 %v4257_v14 }
 0x9d0   :  { %1966 = vmatprep.subr.bf16.mxu0 %v4181_v60  ;;  %3122 = vmatprep.subr.bf16.mxu1 %v4719_v50 }
 0xa85   :  { %v1786_v34 = vpop.f32.mrb[52].mxu0  ;;  %v1827_v47 = vpop.f32.mrb[44].mxu1 }
 0xa86   :  { %v1833_v58 = vadd.f32 %v1786_v34, %v1391_v31  ;;  %v1788_v1 = vpop.f32.mrb[53].mxu0  ;;  %v3100_v15 = vpop.f32.mrb[45].mxu1  ;;  %v1847_v2 = vadd.f32 %v4369_v49, %v1827_v47  ;;  %v1463_v31 = vadd.f32 %v4279_v53, %v4371_v46  ;;  %v1397_v53 = vadd.f32 %v4281_v55, %v4354_v43 }
 0xa87   :  { %v1834_v0 = vadd.f32 %v1788_v1, %v1393_v30  ;;  %v1790_v41 = vpop.f32.mrb[54].mxu0  ;;  %v1830_v44 = vpop.f32.mrb[46].mxu1 }
 0xa88   :  { %v2690_v40 = vmul.f32 -1.442695, %v1833_v58  ;;  %v1791_v29 = vpop.f32.mrb[55].mxu0  ;;  %v3101_v42 = vpop.f32.mrb[47].mxu1 }
 0xa89   :  { %v2691_v17 = vmul.f32 -1.442695, %v1834_v0 }
 0xa8a   :  { %3479 = vpow2.f32 %v2690_v40 }
 0xa8b   :  { %3481 = vpow2.f32 %v2691_v17 }
 0xa94   :  { %v3480_v19 = vpop.eup %3479 }
 0xa95   :  { %v1841_v33 = vadd.f32 1.0, %v3480_v19  ;;  %v3482_v51 = vpop.eup %3481 }
 0xa96   :  { %v1842_v1 = vadd.f32 1.0, %v3482_v51 }
 0xa97   :  { %3483 = vrcp.f32 %v1841_v33 }
 0xaa1   :  { %v3484_v36 = vpop.eup %3483 }
 0xaa2   :  { %v1848_v34 = vmul.f32 %v3484_v36, %v1847_v2  ;;  %v1399_v36 = vadd.f32 %v4283_v56, %v4360_v54 }
 0xaa4   :  { %v1849_v30 = vadd.f32 %v1848_v34, %v1463_v31 }
 0xaa6   :  { %3485 = vtanh.f32 %v1849_v30 }
 0xaa7   :  { %3487 = vrcp.f32 %v1842_v1 }
 0xab0   :  { %v3486_v58 = vpop.eup %3485 }
 0xab1   :  { %v1851_v15 = vsub.f32 %v4376_v22, %v3486_v58  ;;  %v3488_v0 = vpop.eup %3487 }
 0xab3   :  { %v1852_v41 = vmul.f32 %v3488_v0, %v1851_v15  ;;  %v1468_v0 = vadd.f32 %v4267_v48, %v4371_v46  ;;  %v1401_v48 = vadd.f32 %v4285_v57, %v4354_v43 }
 0xab5   :  { %v4423_v44 = vadd.f32 %v3486_v58, %v1852_v41 }
 0xab7   :  { %v1858_v40 = vpack.c.bf16 %v4423_v44, %v4423_v44 }
 0xab9   :  { %1892 = vmatmul.mubr.bf16.vlgmr.msra.gmra.mrb[56].mxu0 %v1858_v40  ;;  %3119 = vmatmul.mubr.bf16.vlgmr.msra.gmra.mrb[48].mxu1 %v1858_v40 }
 0xaba   :  { %1967 = vmatpush1.bf16.msra.mxu0 %v4183_v61  ;;  %3123 = vmatpush3.bf16.msra.mxu1 %v4219_v6 }
 0xabb   :  { %1968 = vmatprep.subr.bf16.mxu0 %v4187_v38  ;;  %3124 = vmatprep.subr.bf16.mxu1 %v4719_v50 }
 0xabc   :  { %1998 = vmatprep.mubr.bf16.mxu0 %v4720_v16  ;;  %3138 = vmatprep.mubr.msk.bf16.mxu1 %vm3699_vm0, %v4719_v50 }
 0xabe   :  { %1969 = vmatpush1.bf16.msra.mxu0 %v4189_v32  ;;  %3125 = vmatpush3.bf16.msra.mxu1 %v4227_v8 }
 0xabf   :  { %1970 = vmatprep.subr.bf16.mxu0 %v4193_v26  ;;  %3126 = vmatprep.subr.bf16.mxu1 %v4719_v50 }
 0xac2   :  { %1971 = vmatpush1.bf16.msra.mxu0 %v4195_v37  ;;  %3127 = vmatpush3.bf16.msra.mxu1 %v4237_v10 }
 0xac3   :  { %1972 = vmatprep.subr.bf16.mxu0 %v4199_v62  ;;  %3128 = vmatprep.subr.bf16.mxu1 %v4719_v50 }
 0xac6   :  { %1973 = vmatpush1.bf16.msra.mxu0 %v4201_v63  ;;  %3129 = vmatpush3.bf16.msra.mxu1 %v4241_v11 }
 0xac7   :  { %1974 = vmatprep.subr.bf16.mxu0 %v4205_v23  ;;  %3130 = vmatprep.subr.bf16.mxu1 %v4719_v50 }
 0xaca   :  { %1975 = vmatpush1.bf16.msra.mxu0 %v4207_v27  ;;  %3131 = vmatpush3.bf16.msra.mxu1 %v4245_v12 }
 0xacb   :  { %1976 = vmatprep.subr.bf16.mxu0 %v4211_v3  ;;  %3132 = vmatprep.subr.bf16.mxu1 %v4719_v50 }
 0xace   :  { %1977 = vmatpush1.bf16.msra.mxu0 %v4213_v4  ;;  %3133 = vmatpush3.bf16.msra.mxu1 %v4249_v13 }
 0xacf   :  { %1978 = vmatprep.subr.bf16.mxu0 %v4217_v5  ;;  %3134 = vmatprep.subr.bf16.mxu1 %v4719_v50 }
 0xad2   :  { %1979 = vmatpush1.bf16.msra.mxu0 %v4221_v7  ;;  %3135 = vmatpush3.bf16.msra.mxu1 %v4253_v25 }
 0xad3   :  { %1980 = vmatprep.subr.bf16.mxu0 %v4223_v24  ;;  %3136 = vmatprep.subr.bf16.mxu1 %v4719_v50 }
 0xad6   :  { %1981 = vmatpush1.bf16.msra.mxu0 %v4231_v9  ;;  %3137 = vmatpush3.bf16.msra.mxu1 %v4257_v14 }
 0xad7   :  { %2073 = vmatprep.subr.bf16.mxu0 %v4181_v60  ;;  %3142 = vmatprep.subr.bf16.mxu1 %v4719_v50 }
 0xb8c   :  { %v1893_v22 = vpop.f32.mrb[56].mxu0  ;;  %v1934_v47 = vpop.f32.mrb[48].mxu1 }
 0xb8d   :  { %v1940_v29 = vadd.f32 %v1893_v22, %v1397_v53  ;;  %v1895_v42 = vpop.f32.mrb[57].mxu0  ;;  %v3120_v17 = vpop.f32.mrb[49].mxu1  ;;  %v1954_v56 = vadd.f32 %v4369_v49, %v1934_v47 }
 0xb8e   :  { %v1941_v19 = vadd.f32 %v1895_v42, %v1399_v36  ;;  %v1897_v33 = vpop.f32.mrb[58].mxu0  ;;  %v1937_v51 = vpop.f32.mrb[50].mxu1 }
 0xb8f   :  { %v2692_v2 = vmul.f32 -1.442695, %v1940_v29  ;;  %v1898_v31 = vpop.f32.mrb[59].mxu0  ;;  %v3121_v34 = vpop.f32.mrb[51].mxu1 }
 0xb90   :  { %v2693_v30 = vmul.f32 -1.442695, %v1941_v19 }
 0xb91   :  { %3489 = vpow2.f32 %v2692_v2 }
 0xb92   :  { %3491 = vpow2.f32 %v2693_v30 }
 0xb9b   :  { %v3490_v1 = vpop.eup %3489 }
 0xb9c   :  { %v1948_v58 = vadd.f32 1.0, %v3490_v1  ;;  %v3492_v55 = vpop.eup %3491 }
 0xb9d   :  { %v1949_v53 = vadd.f32 1.0, %v3492_v55 }
 0xb9e   :  { %3493 = vrcp.f32 %v1948_v58 }
 0xba8   :  { %v3494_v15 = vpop.eup %3493 }
 0xba9   :  { %v1955_v41 = vmul.f32 %v3494_v15, %v1954_v56 }
 0xbab   :  { %v1956_v40 = vadd.f32 %v1955_v41, %v1468_v0 }
 0xbad   :  { %3495 = vtanh.f32 %v1956_v40 }
 0xbae   :  { %3497 = vrcp.f32 %v1949_v53  ;;  %v1471_v53 = vadd.f32 %v4275_v52, %v4371_v46  ;;  %v1407_v52 = vadd.f32 %v4290_v18, %v4354_v43 }
 0xbb7   :  { %v3496_v36 = vpop.eup %3495 }
 0xbb8   :  { %v1958_v22 = vsub.f32 %v4423_v44, %v3496_v36  ;;  %v3498_v29 = vpop.eup %3497  ;;  %v1403_v44 = vadd.f32 %v4287_v59, %v4360_v54 }
 0xbba   :  { %v1959_v42 = vmul.f32 %v3498_v29, %v1958_v22 }
 0xbbc   :  { %v4470_v17 = vadd.f32 %v3496_v36, %v1959_v42 }
 0xbbe   :  { %v1965_v19 = vpack.c.bf16 %v4470_v17, %v4470_v17 }
 0xbc0   :  { %1999 = vmatmul.mubr.bf16.vlgmr.msra.gmra.mrb[60].mxu0 %v1965_v19  ;;  %3139 = vmatmul.mubr.bf16.vlgmr.msra.gmra.mrb[52].mxu1 %v1965_v19 }
 0xbc1   :  { %2074 = vmatpush1.bf16.msra.mxu0 %v4183_v61  ;;  %3143 = vmatpush3.bf16.msra.mxu1 %v4219_v6 }
 0xbc2   :  { %2075 = vmatprep.subr.bf16.mxu0 %v4187_v38  ;;  %3144 = vmatprep.subr.bf16.mxu1 %v4719_v50 }
 0xbc3   :  { %2105 = vmatprep.mubr.bf16.mxu0 %v4720_v16  ;;  %3158 = vmatprep.mubr.msk.bf16.mxu1 %vm3699_vm0, %v4719_v50 }
 0xbc5   :  { %2076 = vmatpush1.bf16.msra.mxu0 %v4189_v32  ;;  %3145 = vmatpush3.bf16.msra.mxu1 %v4227_v8 }
 0xbc6   :  { %2077 = vmatprep.subr.bf16.mxu0 %v4193_v26  ;;  %3146 = vmatprep.subr.bf16.mxu1 %v4719_v50 }
 0xbc9   :  { %2078 = vmatpush1.bf16.msra.mxu0 %v4195_v37  ;;  %3147 = vmatpush3.bf16.msra.mxu1 %v4237_v10 }
 0xbca   :  { %2079 = vmatprep.subr.bf16.mxu0 %v4199_v62  ;;  %3148 = vmatprep.subr.bf16.mxu1 %v4719_v50 }
 0xbcd   :  { %2080 = vmatpush1.bf16.msra.mxu0 %v4201_v63  ;;  %3149 = vmatpush3.bf16.msra.mxu1 %v4241_v11 }
 0xbce   :  { %2081 = vmatprep.subr.bf16.mxu0 %v4205_v23  ;;  %3150 = vmatprep.subr.bf16.mxu1 %v4719_v50 }
 0xbd1   :  { %2082 = vmatpush1.bf16.msra.mxu0 %v4207_v27  ;;  %3151 = vmatpush3.bf16.msra.mxu1 %v4245_v12 }
 0xbd2   :  { %2083 = vmatprep.subr.bf16.mxu0 %v4211_v3  ;;  %3152 = vmatprep.subr.bf16.mxu1 %v4719_v50 }
 0xbd5   :  { %2084 = vmatpush1.bf16.msra.mxu0 %v4213_v4  ;;  %3153 = vmatpush3.bf16.msra.mxu1 %v4249_v13 }
 0xbd6   :  { %2085 = vmatprep.subr.bf16.mxu0 %v4217_v5  ;;  %3154 = vmatprep.subr.bf16.mxu1 %v4719_v50 }
 0xbd9   :  { %2086 = vmatpush1.bf16.msra.mxu0 %v4221_v7  ;;  %3155 = vmatpush3.bf16.msra.mxu1 %v4253_v25 }
 0xbda   :  { %2087 = vmatprep.subr.bf16.mxu0 %v4223_v24  ;;  %3156 = vmatprep.subr.bf16.mxu1 %v4719_v50 }
 0xbdd   :  { %2088 = vmatpush1.bf16.msra.mxu0 %v4231_v9  ;;  %3157 = vmatpush3.bf16.msra.mxu1 %v4257_v14 }
 0xbde   :  { %2180 = vmatprep.subr.bf16.mxu0 %v4181_v60  ;;  %3162 = vmatprep.subr.bf16.mxu1 %v4719_v50 }
 0xc93   :  { %v2000_v47 = vpop.f32.mrb[60].mxu0  ;;  %v2041_v33 = vpop.f32.mrb[52].mxu1 }
 0xc94   :  { %v2047_v51 = vadd.f32 %v2000_v47, %v1401_v48  ;;  %v2002_v2 = vpop.f32.mrb[61].mxu0  ;;  %v3140_v31 = vpop.f32.mrb[53].mxu1  ;;  %v2061_v59 = vadd.f32 %v4369_v49, %v2041_v33 }
 0xc95   :  { %v2048_v34 = vadd.f32 %v2002_v2, %v1403_v44  ;;  %v2004_v30 = vpop.f32.mrb[62].mxu0  ;;  %v2044_v1 = vpop.f32.mrb[54].mxu1 }
 0xc96   :  { %v2694_v58 = vmul.f32 -1.442695, %v2047_v51  ;;  %v2005_v55 = vpop.f32.mrb[63].mxu0  ;;  %v3141_v56 = vpop.f32.mrb[55].mxu1 }
 0xc97   :  { %v2695_v15 = vmul.f32 -1.442695, %v2048_v34 }
 0xc98   :  { %3499 = vpow2.f32 %v2694_v58 }
 0xc99   :  { %3501 = vpow2.f32 %v2695_v15 }
 0xca2   :  { %v3500_v0 = vpop.eup %3499 }
 0xca3   :  { %v2055_v41 = vadd.f32 1.0, %v3500_v0  ;;  %v3502_v57 = vpop.eup %3501 }
 0xca4   :  { %v2056_v29 = vadd.f32 1.0, %v3502_v57 }
 0xca5   :  { %3503 = vrcp.f32 %v2055_v41 }
 0xcaf   :  { %v3504_v40 = vpop.eup %3503 }
 0xcb0   :  { %v2062_v36 = vmul.f32 %v3504_v40, %v2061_v59  ;;  %v1476_v40 = vadd.f32 %v4348_v39, %v4371_v46 }
 0xcb2   :  { %v2063_v22 = vadd.f32 %v2062_v36, %v1471_v53 }
 0xcb4   :  { %3505 = vtanh.f32 %v2063_v22 }
 0xcb5   :  { %3507 = vrcp.f32 %v2056_v29 }
 0xcbe   :  { %v3506_v42 = vpop.eup %3505 }
 0xcbf   :  { %v2065_v19 = vsub.f32 %v4470_v17, %v3506_v42  ;;  %v3508_v48 = vpop.eup %3507  ;;  %v1409_v17 = vadd.f32 %v4292_v20, %v4360_v54 }
 0xcc1   :  { %v2066_v44 = vmul.f32 %v3508_v48, %v2065_v19 }
 0xcc3   :  { %v4517_v47 = vadd.f32 %v3506_v42, %v2066_v44 }
 0xcc5   :  { %v2072_v51 = vpack.c.bf16 %v4517_v47, %v4517_v47 }
 0xcc7   :  { %2106 = vmatmul.mubr.bf16.vlgmr.msra.gmra.mrb[64].mxu0 %v2072_v51  ;;  %3159 = vmatmul.mubr.bf16.vlgmr.msra.gmra.mrb[56].mxu1 %v2072_v51 }
 0xcc8   :  { %2181 = vmatpush1.bf16.msra.mxu0 %v4183_v61  ;;  %3163 = vmatpush3.bf16.msra.mxu1 %v4219_v6 }
 0xcc9   :  { %2182 = vmatprep.subr.bf16.mxu0 %v4187_v38  ;;  %3164 = vmatprep.subr.bf16.mxu1 %v4719_v50 }
 0xcca   :  { %2212 = vmatprep.mubr.bf16.mxu0 %v4720_v16  ;;  %3178 = vmatprep.mubr.msk.bf16.mxu1 %vm3699_vm0, %v4719_v50 }
 0xccc   :  { %2183 = vmatpush1.bf16.msra.mxu0 %v4189_v32  ;;  %3165 = vmatpush3.bf16.msra.mxu1 %v4227_v8 }
 0xccd   :  { %2184 = vmatprep.subr.bf16.mxu0 %v4193_v26  ;;  %3166 = vmatprep.subr.bf16.mxu1 %v4719_v50 }
 0xcd0   :  { %2185 = vmatpush1.bf16.msra.mxu0 %v4195_v37  ;;  %3167 = vmatpush3.bf16.msra.mxu1 %v4237_v10 }
 0xcd1   :  { %2186 = vmatprep.subr.bf16.mxu0 %v4199_v62  ;;  %3168 = vmatprep.subr.bf16.mxu1 %v4719_v50 }
 0xcd4   :  { %2187 = vmatpush1.bf16.msra.mxu0 %v4201_v63  ;;  %3169 = vmatpush3.bf16.msra.mxu1 %v4241_v11 }
 0xcd5   :  { %2188 = vmatprep.subr.bf16.mxu0 %v4205_v23  ;;  %3170 = vmatprep.subr.bf16.mxu1 %v4719_v50 }
 0xcd8   :  { %2189 = vmatpush1.bf16.msra.mxu0 %v4207_v27  ;;  %3171 = vmatpush3.bf16.msra.mxu1 %v4245_v12 }
 0xcd9   :  { %2190 = vmatprep.subr.bf16.mxu0 %v4211_v3  ;;  %3172 = vmatprep.subr.bf16.mxu1 %v4719_v50 }
 0xcdc   :  { %2191 = vmatpush1.bf16.msra.mxu0 %v4213_v4  ;;  %3173 = vmatpush3.bf16.msra.mxu1 %v4249_v13 }
 0xcdd   :  { %2192 = vmatprep.subr.bf16.mxu0 %v4217_v5  ;;  %3174 = vmatprep.subr.bf16.mxu1 %v4719_v50 }
 0xce0   :  { %2193 = vmatpush1.bf16.msra.mxu0 %v4221_v7  ;;  %3175 = vmatpush3.bf16.msra.mxu1 %v4253_v25 }
 0xce1   :  { %2194 = vmatprep.subr.bf16.mxu0 %v4223_v24  ;;  %3176 = vmatprep.subr.bf16.mxu1 %v4719_v50 }
 0xce4   :  { %2195 = vmatpush1.bf16.msra.mxu0 %v4231_v9  ;;  %3177 = vmatpush3.bf16.msra.mxu1 %v4257_v14 }
 0xce5   :  { %2287 = vmatprep.subr.bf16.mxu0 %v4181_v60  ;;  %3182 = vmatprep.subr.bf16.mxu1 %v4719_v50 }
 0xd9a   :  { %v2107_v33 = vpop.f32.mrb[64].mxu0  ;;  %v2148_v2 = vpop.f32.mrb[56].mxu1 }
 0xd9b   :  { %v2154_v31 = vadd.f32 %v2107_v33, %v1407_v52  ;;  %v2109_v34 = vpop.f32.mrb[65].mxu0  ;;  %v3160_v30 = vpop.f32.mrb[57].mxu1  ;;  %v2168_v20 = vadd.f32 %v4369_v49, %v2148_v2  ;;  %v3572_v2 = vld [vmem:[#allocation8] ss:$12 sps:$4 sm:$0xff]  }
 0xd9c   :  { %v2155_v1 = vadd.f32 %v2109_v34, %v1409_v17  ;;  %v2111_v58 = vpop.f32.mrb[66].mxu0  ;;  %v2151_v55 = vpop.f32.mrb[58].mxu1  ;;  %v3575_v34 = vld [vmem:[#allocation8 + $0x18] ss:$12 sps:$4 sm:$0xff]   ;;  %v3576_v30 = vld [vmem:[#allocation8 + $0x20] ss:$12 sps:$4 sm:$0xff]  }
 0xd9d   :  { %v2696_v56 = vmul.f32 -1.442695, %v2154_v31  ;;  %v2112_v15 = vpop.f32.mrb[67].mxu0  ;;  %v3161_v0 = vpop.f32.mrb[59].mxu1  ;;  %v3574_v31 = vld [vmem:[#allocation8 + $0x1c] ss:$12 sps:$4 sm:$0xff]  }
 0xd9e   :  { %v2697_v60 = vmul.f32 -1.442695, %v2155_v1  ;;  %v3577_v1 = vld [vmem:[#allocation8 + $0x34] ss:$12 sps:$4 sm:$0xff]   ;;  %v3578_v58 = vld [vmem:[#allocation8 + $0x30] ss:$12 sps:$4 sm:$0xff]  }
 0xd9f   :  { %3509 = vpow2.f32 %v2696_v56  ;;  %v3579_v55 = vld [vmem:[#allocation8 + $0x38] ss:$12 sps:$4 sm:$0xff]   ;;  %v3582_v15 = vld [vmem:[#allocation8 + $0x50] ss:$12 sps:$4 sm:$0xff]  }
 0xda0   :  { %3511 = vpow2.f32 %v2697_v60  ;;  %v3580_v56 = vld [vmem:[#allocation8 + $0x4c] ss:$12 sps:$4 sm:$0xff]   ;;  %v3583_v0 = vld [vmem:[#allocation8 + $0x64] ss:$12 sps:$4 sm:$0xff]  }
 0xda1   :  { %v3584_v60 = vld [vmem:[#allocation8 + $0x60] ss:$12 sps:$4 sm:$0xff]  }
 0xda9   :  { %v3510_v41 = vpop.eup %3509 }
 0xdaa   :  { %v2162_v57 = vadd.f32 1.0, %v3510_v41  ;;  %v3512_v18 = vpop.eup %3511  ;;  %v3585_v41 = vld [vmem:[#allocation8 + $0x68] ss:$12 sps:$4 sm:$0xff]  }
 0xdab   :  { %v2163_v22 = vadd.f32 1.0, %v3512_v18  ;;  %v3587_v18 = vld [vmem:[#allocation8 + $0x78] ss:$12 sps:$4 sm:$0xff]  }
 0xdac   :  { %3513 = vrcp.f32 %v2162_v57  ;;  %v3586_v57 = vld [vmem:[#allocation8 + $0x7c] ss:$12 sps:$4 sm:$0xff]  }
 0xdb6   :  { %v3514_v59 = vpop.eup %3513 }
 0xdb7   :  { %v2169_v53 = vmul.f32 %v3514_v59, %v2168_v20  ;;  %v3588_v20 = vld [vmem:[#allocation8 + $0x80] ss:$12 sps:$4 sm:$0xff]  }
 0xdb8   :  { %v3589_v59 = vld [vmem:[#allocation8 + $0x94] ss:$12 sps:$4 sm:$0xff]  }
 0xdb9   :  { %v2170_v36 = vadd.f32 %v2169_v53, %v1476_v40  ;;  %v3590_v40 = vld [vmem:[#allocation8 + $0x90] ss:$12 sps:$4 sm:$0xff]   ;;  %v3591_v53 = vld [vmem:[#allocation8 + $0x98] ss:$12 sps:$4 sm:$0xff]  }
 0xdbb   :  { %3515 = vtanh.f32 %v2170_v36  ;;  %v3592_v36 = vld [vmem:[#allocation8 + $0xac] ss:$12 sps:$4 sm:$0xff]  }
 0xdbc   :  { %3517 = vrcp.f32 %v2163_v22  ;;  %v3593_v22 = vld [vmem:[#allocation8 + $0xa8] ss:$12 sps:$4 sm:$0xff]  }
 0xdc5   :  { %v3516_v29 = vpop.eup %3515 }
 0xdc6   :  { %v2172_v42 = vsub.f32 %v4517_v47, %v3516_v29  ;;  %v3518_v19 = vpop.eup %3517 }
 0xdc8   :  { %v2173_v48 = vmul.f32 %v3518_v19, %v2172_v42  ;;  %v1417_v42 = vadd.f32 %v4342_v35, %v4354_v43  ;;  %v4721_v19 = vld [vmem:[#allocation15_spill] sm:$0xff] }
 0xdca   :  { %v4564_v44 = vadd.f32 %v3516_v29, %v2173_v48  ;;  %v3594_v29 = vld [vmem:[#allocation8 + $0xb0] ss:$12 sps:$4 sm:$0xff]   ;;  %v1419_v48 = vadd.f32 %v4721_v19, %v4360_v54 }
 0xdcc   :  { %v2179_v51 = vpack.c.bf16 %v4564_v44, %v4564_v44 }
 0xdce   :  { %2213 = vmatmul.mubr.bf16.vlgmr.msra.gmra.mrb[68].mxu0 %v2179_v51  ;;  %3179 = vmatmul.mubr.bf16.vlgmr.msra.gmra.mrb[60].mxu1 %v2179_v51 }
 0xdcf   :  { %2288 = vmatpush1.bf16.msra.mxu0 %v4183_v61  ;;  %3183 = vmatpush3.bf16.msra.mxu1 %v4219_v6  ;;  %v3571_v61 = vld [vmem:[#allocation8 + $0x4] ss:$12 sps:$4 sm:$0xff]  }
 0xdd0   :  { %2289 = vmatprep.subr.bf16.mxu0 %v4187_v38  ;;  %3184 = vmatprep.subr.bf16.mxu1 %v4719_v50  ;;  %v1411_v38 = vadd.f32 %v4294_v21, %v4354_v43 }
 0xdd1   :  { %2319 = vmatprep.mubr.bf16.mxu0 %v4720_v16  ;;  %3198 = vmatprep.mubr.msk.bf16.mxu1 %vm3699_vm0, %v4719_v50 }
 0xdd3   :  { %2290 = vmatpush1.bf16.msra.mxu0 %v4189_v32  ;;  %3185 = vmatpush3.bf16.msra.mxu1 %v4227_v8  ;;  %v1413_v32 = vadd.f32 %v4297_v28, %v4360_v54 }
 0xdd4   :  { %2291 = vmatprep.subr.bf16.mxu0 %v4193_v26  ;;  %3186 = vmatprep.subr.bf16.mxu1 %v4719_v50 }
 0xdd7   :  { %2292 = vmatpush1.bf16.msra.mxu0 %v4195_v37  ;;  %3187 = vmatpush3.bf16.msra.mxu1 %v4237_v10 }
 0xdd8   :  { %2293 = vmatprep.subr.bf16.mxu0 %v4199_v62  ;;  %3188 = vmatprep.subr.bf16.mxu1 %v4719_v50 }
 0xddb   :  { %2294 = vmatpush1.bf16.msra.mxu0 %v4201_v63  ;;  %3189 = vmatpush3.bf16.msra.mxu1 %v4241_v11 }
 0xddc   :  { %2295 = vmatprep.subr.bf16.mxu0 %v4205_v23  ;;  %3190 = vmatprep.subr.bf16.mxu1 %v4719_v50 }
 0xddf   :  { %2296 = vmatpush1.bf16.msra.mxu0 %v4207_v27  ;;  %3191 = vmatpush3.bf16.msra.mxu1 %v4245_v12 }
 0xde0   :  { %2297 = vmatprep.subr.bf16.mxu0 %v4211_v3  ;;  %3192 = vmatprep.subr.bf16.mxu1 %v4719_v50 }
 0xde3   :  { %2298 = vmatpush1.bf16.msra.mxu0 %v4213_v4  ;;  %3193 = vmatpush3.bf16.msra.mxu1 %v4249_v13  ;;  %v1479_v13 = vadd.f32 %v4358_v45, %v4371_v46  ;;  %v3573_v45 = vld [vmem:[#allocation8 + $0x8] ss:$12 sps:$4 sm:$0xff]  }
 0xde4   :  { %2299 = vmatprep.subr.bf16.mxu0 %v4217_v5  ;;  %3194 = vmatprep.subr.bf16.mxu1 %v4719_v50 }
 0xde7   :  { %2300 = vmatpush1.bf16.msra.mxu0 %v4221_v7  ;;  %3195 = vmatpush3.bf16.msra.mxu1 %v4253_v25 }
 0xde8   :  { %2301 = vmatprep.subr.bf16.mxu0 %v4223_v24  ;;  %3196 = vmatprep.subr.bf16.mxu1 %v4719_v50 }
 0xdeb   :  { %2302 = vmatpush1.bf16.msra.mxu0 %v4231_v9  ;;  %3197 = vmatpush3.bf16.msra.mxu1 %v4257_v14 }
 0xdec   :  { %2394 = vmatprep.subr.bf16.mxu0 %v3571_v61  ;;  %3202 = vmatprep.subr.bf16.mxu1 %v4719_v50 }
 0xea1   :  { %v2214_v26 = vpop.f32.mrb[68].mxu0  ;;  %v2255_v37 = vpop.f32.mrb[60].mxu1 }
 0xea2   :  { %v2261_v62 = vadd.f32 %v2214_v26, %v1411_v38  ;;  %v2216_v63 = vpop.f32.mrb[69].mxu0  ;;  %v3180_v23 = vpop.f32.mrb[61].mxu1  ;;  %v2275_v11 = vadd.f32 %v4369_v49, %v2255_v37 }
 0xea3   :  { %v2262_v27 = vadd.f32 %v2216_v63, %v1413_v32  ;;  %v2218_v3 = vpop.f32.mrb[70].mxu0  ;;  %v2258_v4 = vpop.f32.mrb[62].mxu1 }
 0xea4   :  { %v2698_v5 = vmul.f32 -1.442695, %v2261_v62  ;;  %v2219_v6 = vpop.f32.mrb[71].mxu0  ;;  %v3181_v7 = vpop.f32.mrb[63].mxu1 }
 0xea5   :  { %v2699_v24 = vmul.f32 -1.442695, %v2262_v27 }
 0xea6   :  { %3519 = vpow2.f32 %v2698_v5 }
 0xea7   :  { %3521 = vpow2.f32 %v2699_v24  ;;  %v4722_v24 = vld [vmem:[#allocation14_spill] sm:$0xff] }
 0xeb0   :  { %v3520_v8 = vpop.eup %3519 }
 0xeb1   :  { %v2269_v9 = vadd.f32 1.0, %v3520_v8  ;;  %v3522_v10 = vpop.eup %3521  ;;  %v1484_v8 = vadd.f32 %v4722_v24, %v4371_v46 }
 0xeb2   :  { %v2270_v21 = vadd.f32 1.0, %v3522_v10 }
 0xeb3   :  { %3523 = vrcp.f32 %v2269_v9 }
 0xebd   :  { %v3524_v12 = vpop.eup %3523 }
 0xebe   :  { %v2276_v25 = vmul.f32 %v3524_v12, %v2275_v11 }
 0xec0   :  { %v2277_v14 = vadd.f32 %v2276_v25, %v1479_v13 }
 0xec2   :  { %3525 = vtanh.f32 %v2277_v14 }
 0xec3   :  { %3527 = vrcp.f32 %v2270_v21 }
 0xecc   :  { %v3526_v28 = vpop.eup %3525 }
 0xecd   :  { %v2279_v39 = vsub.f32 %v4564_v44, %v3526_v28  ;;  %v3528_v47 = vpop.eup %3527 }
 0xecf   :  { %v2280_v52 = vmul.f32 %v3528_v47, %v2279_v39  ;;  %v2496_v39 = vld [vmem:[%s4707_s7] sm:$0xff]  ;;  %v2497_v47 = vld [vmem:[%s4707_s7 + $0x8] sm:$0xff] }
 0xed1   :  { %v4610_v17 = vadd.f32 %v3526_v28, %v2280_v52  ;;  %v3258_v52 = vpack.c.bf16 %v2497_v47, %v2496_v39 }
 0xed3   :  { %v2286_v33 = vpack.c.bf16 %v4610_v17, %v4610_v17 }
 0xed5   :  { %2320 = vmatmul.mubr.bf16.vlgmr.msra.gmra.mrb[72].mxu0 %v2286_v33  ;;  %3199 = vmatmul.mubr.bf16.vlgmr.msra.gmra.mrb[64].mxu1 %v2286_v33  ;;  %v2498_v33 = vld [vmem:[%s4707_s7 + $0x10] sm:$0xff] }
 0xed6   :  { %2395 = vmatpush1.bf16.msra.mxu0 %v3572_v2  ;;  %3203 = vmatpush3.bf16.msra.mxu1 %v3573_v45  ;;  %v2500_v45 = vld [vmem:[%s4707_s7 + $0x20] sm:$0xff] }
 0xed7   :  { %2396 = vmatprep.subr.bf16.mxu0 %v3574_v31  ;;  %3204 = vmatprep.subr.bf16.mxu1 %v4719_v50  ;;  %v2501_v31 = vld [vmem:[%s4707_s7 + $0x28] sm:$0xff] }
 0xed8   :  { %2426 = vmatprep.mubr.bf16.mxu0 %v4720_v16  ;;  %3218 = vmatprep.mubr.msk.bf16.mxu1 %vm3699_vm0, %v4719_v50  ;;  %v3581_v16 = vld [vmem:[#allocation8 + $0x48] ss:$12 sps:$4 sm:$0xff]  }
 0xeda   :  { %2397 = vmatpush1.bf16.msra.mxu0 %v3575_v34  ;;  %3205 = vmatpush3.bf16.msra.mxu1 %v3576_v30  ;;  %v3264_v34 = vpack.c.bf16 %v2501_v31, %v2500_v45  ;;  %v2502_v30 = vld [vmem:[%s4707_s7 + $0x30] sm:$0xff] }
 0xedb   :  { %2398 = vmatprep.subr.bf16.mxu0 %v3577_v1  ;;  %3206 = vmatprep.subr.bf16.mxu1 %v4719_v50  ;;  %v2503_v1 = vld [vmem:[%s4707_s7 + $0x38] sm:$0xff] }
 0xede   :  { %2399 = vmatpush1.bf16.msra.mxu0 %v3578_v58  ;;  %3207 = vmatpush3.bf16.msra.mxu1 %v3579_v55  ;;  %v3267_v58 = vpack.c.bf16 %v2503_v1, %v2502_v30  ;;  %v2504_v55 = vld [vmem:[%s4707_s7 + $0x40] sm:$0xff] }
 0xedf   :  { %2400 = vmatprep.subr.bf16.mxu0 %v3580_v56  ;;  %3208 = vmatprep.subr.bf16.mxu1 %v4719_v50  ;;  %v2505_v56 = vld [vmem:[%s4707_s7 + $0x48] sm:$0xff] }
 0xee2   :  { %2401 = vmatpush1.bf16.msra.mxu0 %v3581_v16  ;;  %3209 = vmatpush3.bf16.msra.mxu1 %v3582_v15  ;;  %v2506_v16 = vld [vmem:[%s4707_s7 + $0x50] sm:$0xff]  ;;  %v3270_v15 = vpack.c.bf16 %v2505_v56, %v2504_v55 }
 0xee3   :  { %2402 = vmatprep.subr.bf16.mxu0 %v3583_v0  ;;  %3210 = vmatprep.subr.bf16.mxu1 %v4719_v50  ;;  %v2507_v0 = vld [vmem:[%s4707_s7 + $0x58] sm:$0xff] }
 0xee6   :  { %2403 = vmatpush1.bf16.msra.mxu0 %v3584_v60  ;;  %3211 = vmatpush3.bf16.msra.mxu1 %v3585_v41  ;;  %v3273_v60 = vpack.c.bf16 %v2507_v0, %v2506_v16  ;;  %v2508_v41 = vld [vmem:[%s4707_s7 + $0x60] sm:$0xff] }
 0xee7   :  { %2404 = vmatprep.subr.bf16.mxu0 %v3586_v57  ;;  %3212 = vmatprep.subr.bf16.mxu1 %v4719_v50  ;;  %v2509_v57 = vld [vmem:[%s4707_s7 + $0x68] sm:$0xff] }
 0xeea   :  { %2405 = vmatpush1.bf16.msra.mxu0 %v3587_v18  ;;  %3213 = vmatpush3.bf16.msra.mxu1 %v3588_v20  ;;  %v3276_v18 = vpack.c.bf16 %v2509_v57, %v2508_v41  ;;  %v2510_v20 = vld [vmem:[%s4707_s7 + $0x70] sm:$0xff] }
 0xeeb   :  { %2406 = vmatprep.subr.bf16.mxu0 %v3589_v59  ;;  %3214 = vmatprep.subr.bf16.mxu1 %v4719_v50  ;;  %v2511_v59 = vld [vmem:[%s4707_s7 + $0x78] sm:$0xff] }
 0xeee   :  { %2407 = vmatpush1.bf16.msra.mxu0 %v3590_v40  ;;  %3215 = vmatpush3.bf16.msra.mxu1 %v3591_v53  ;;  %v3279_v40 = vpack.c.bf16 %v2511_v59, %v2510_v20  ;;  %v4723_v53 = vld [vmem:[#allocation16_spill] sm:$0xff] }
 0xeef   :  { %2408 = vmatprep.subr.bf16.mxu0 %v3592_v36  ;;  %3216 = vmatprep.subr.bf16.mxu1 %v4719_v50  ;;  %v1421_v36 = vadd.f32 %v4723_v53, %v4354_v43 }
 0xef2   :  { %2409 = vmatpush1.bf16.msra.mxu0 %v3593_v22  ;;  %3217 = vmatpush3.bf16.msra.mxu1 %v3594_v29  ;;  %v4724_v22 = vld [vmem:[#allocation18_spill] sm:$0xff] }
 0xef3   :  { %v1423_v29 = vadd.f32 %v4724_v22, %v4360_v54 }
 0xfa8   :  { %v2321_v44 = vpop.f32.mrb[72].mxu0  ;;  %v2362_v51 = vpop.f32.mrb[64].mxu1 }
 0xfa9   :  { %v2368_v61 = vadd.f32 %v2321_v44, %v1417_v42  ;;  %v2323_v38 = vpop.f32.mrb[73].mxu0  ;;  %v3200_v32 = vpop.f32.mrb[65].mxu1  ;;  %v2382_v6 = vadd.f32 %v4369_v49, %v2362_v51 }
 0xfaa   :  { %v2369_v26 = vadd.f32 %v2323_v38, %v1419_v48  ;;  %v2325_v37 = vpop.f32.mrb[74].mxu0  ;;  %v2365_v62 = vpop.f32.mrb[66].mxu1 }
 0xfab   :  { %v2700_v63 = vmul.f32 -1.442695, %v2368_v61  ;;  %v2326_v23 = vpop.f32.mrb[75].mxu0  ;;  %v3201_v27 = vpop.f32.mrb[67].mxu1 }
 0xfac   :  { %v2701_v3 = vmul.f32 -1.442695, %v2369_v26 }
 0xfad   :  { %3529 = vpow2.f32 %v2700_v63 }
 0xfae   :  { %3531 = vpow2.f32 %v2701_v3 }
 0xfb7   :  { %v3530_v4 = vpop.eup %3529 }
 0xfb8   :  { %v2376_v5 = vadd.f32 1.0, %v3530_v4  ;;  %v3532_v35 = vpop.eup %3531  ;;  %v4725_v4 = vld [vmem:[#allocation17_spill] sm:$0xff] }
 0xfb9   :  { %v2377_v11 = vadd.f32 1.0, %v3532_v35 }
 0xfba   :  { %3533 = vrcp.f32 %v2376_v5  ;;  %v1487_v5 = vadd.f32 %v4725_v4, %v4371_v46 }
 0xfc4   :  { %v3534_v7 = vpop.eup %3533 }
 0xfc5   :  { %v2383_v9 = vmul.f32 %v3534_v7, %v2382_v6 }
 0xfc7   :  { %v2384_v10 = vadd.f32 %v2383_v9, %v1484_v8 }
 0xfc9   :  { %3535 = vtanh.f32 %v2384_v10 }
 0xfca   :  { %3537 = vrcp.f32 %v2377_v11 }
 0xfd3   :  { %v3536_v12 = vpop.eup %3535 }
 0xfd4   :  { %v2386_v13 = vsub.f32 %v4610_v17, %v3536_v12  ;;  %v3538_v25 = vpop.eup %3537  ;;  %v3700_v17 = vmov 0.0|0.0  }
 0xfd5   :  { %3257 = vmatprep.subr.bf16.mxu0 %v3700_v17 }
 0xfd6   :  { %v2387_v14 = vmul.f32 %v3538_v25, %v2386_v13 }
 0xfd8   :  { %v4632_v21 = vadd.f32 %v3536_v12, %v2387_v14 }
 0xfda   :  { %v2393_v28 = vpack.c.bf16 %v4632_v21, %v4632_v21 }
 0xfdc   :  { %2427 = vmatmul.mubr.bf16.vlgmr.msra.gmra.mrb[76].mxu0 %v2393_v28  ;;  %3219 = vmatmul.mubr.bf16.vlgmr.msra.gmra.mrb[68].mxu1 %v2393_v28 }
 0xfdd   :  { %3254 = vmatprep.mubr.msk.f32.mxu0 %vm3699_vm0, %v4719_v50  ;;  %3259 = vmatpush3.bf16.msra.mxu0 %v3258_v52  ;;  %v2499_v50 = vld [vmem:[%s4707_s7 + $0x18] sm:$0xff] }
 0xfde   :  { %3260 = vmatprep.subr.bf16.mxu0 %v3700_v17  ;;  %v3261_v2 = vpack.c.bf16 %v2499_v50, %v2498_v33 }
 0xfe1   :  { %3262 = vmatpush3.bf16.msra.mxu0 %v3261_v2 }
 0xfe2   :  { %3263 = vmatprep.subr.bf16.mxu0 %v3700_v17 }
 0xfe5   :  { %3265 = vmatpush3.bf16.msra.mxu0 %v3264_v34 }
 0xfe6   :  { %3266 = vmatprep.subr.bf16.mxu0 %v3700_v17 }
 0xfe9   :  { %3268 = vmatpush3.bf16.msra.mxu0 %v3267_v58 }
 0xfea   :  { %3269 = vmatprep.subr.bf16.mxu0 %v3700_v17 }
 0xfed   :  { %3271 = vmatpush3.bf16.msra.mxu0 %v3270_v15 }
 0xfee   :  { %3272 = vmatprep.subr.bf16.mxu0 %v3700_v17 }
 0xff1   :  { %3274 = vmatpush3.bf16.msra.mxu0 %v3273_v60 }
 0xff2   :  { %3275 = vmatprep.subr.bf16.mxu0 %v3700_v17 }
 0xff5   :  { %3277 = vmatpush3.bf16.msra.mxu0 %v3276_v18 }
 0xff6   :  { %3278 = vmatprep.subr.bf16.mxu0 %v3700_v17 }
 0xff9   :  { %3280 = vmatpush3.bf16.msra.mxu0 %v3279_v40 }
0x10af   :  { %v2428_v42 = vpop.f32.mrb[76].mxu0  ;;  %v2469_v19 = vpop.f32.mrb[68].mxu1 }
0x10b0   :  { %v2475_v48 = vadd.f32 %v2428_v42, %v1421_v36  ;;  %v2430_v44 = vpop.f32.mrb[77].mxu0  ;;  %v3220_v51 = vpop.f32.mrb[69].mxu1  ;;  %v2489_v54 = vadd.f32 %v4369_v49, %v2469_v19  ;;  %v2704_v49 = vld [vmem:[%s4708_s8] ss:$0 sm:$0xff] }
0x10b1   :  { %v2476_v61 = vadd.f32 %v2430_v44, %v1423_v29  ;;  %v2432_v38 = vpop.f32.mrb[78].mxu0  ;;  %v2472_v32 = vpop.f32.mrb[70].mxu1 }
0x10b2   :  { %v2702_v26 = vmul.f32 -1.442695, %v2475_v48  ;;  %v2433_v37 = vpop.f32.mrb[79].mxu0  ;;  %v3221_v62 = vpop.f32.mrb[71].mxu1 }
0x10b3   :  { %v2703_v63 = vmul.f32 -1.442695, %v2476_v61 }
0x10b4   :  { %3539 = vpow2.f32 %v2702_v26 }
0x10b5   :  { %3541 = vpow2.f32 %v2703_v63 }
0x10be   :  { %v3540_v23 = vpop.eup %3539 }
0x10bf   :  { %v2483_v27 = vadd.f32 1.0, %v3540_v23  ;;  %v3542_v43 = vpop.eup %3541 }
0x10c0   :  { %v2484_v7 = vadd.f32 1.0, %v3542_v43 }
0x10c1   :  { %3543 = vrcp.f32 %v2483_v27 }
0x10cb   :  { %v3544_v3 = vpop.eup %3543 }
0x10cc   :  { %v2490_v35 = vmul.f32 %v3544_v3, %v2489_v54 }
0x10ce   :  { %v2491_v6 = vadd.f32 %v2490_v35, %v1487_v5 }
0x10d0   :  { %3545 = vtanh.f32 %v2491_v6 }
0x10d1   :  { %3547 = vrcp.f32 %v2484_v7 }
0x10da   :  { %v3546_v24 = vpop.eup %3545 }
0x10db   :  { %v2493_v8 = vsub.f32 %v4632_v21, %v3546_v24  ;;  %v3548_v9 = vpop.eup %3547 }
0x10dd   :  { %v2494_v10 = vmul.f32 %v3548_v9, %v2493_v8 }
0x10df   :  { %v2495_v11 = vadd.f32 %v3546_v24, %v2494_v10 }
0x10e1   :  { %3255 = vmatmul.mubr.f32.vlgmr.msra.gmra.mrb[80].mxu0 %v2495_v11 }
0x11b4   :  { %v2585_v12 = vpop.f32.mrb[80].mxu0 }
0x11b5   :  { %v2586_v13 = vadd.f32 %v2704_v49, %v2585_v12  ;;  %v3256_v46 = vpop.f32.mrb[81].mxu0 }
0x11b7   :  { %2590 = vst.msk [vmem:[%s4709_s9] sm:$0xff] %vm2589_vm1, %v2586_v13 }
0x11b8   :  { %2595 = vsyncpa [#allocation5], 1 }
0x11b9   :  { %2596 = vsyncpa [#allocation7], 1 }
0x11ba   :  { %2597 = vsyncpa [#allocation10], 1 }

// kernel: tpu_custom_call.1
= control target key start
LH: loop header
LB: loop body
LE: loop exit
PB: predicated region body
PF: predicated region fallthrough
CT: control target
= control target key end

     0   :  { %14 = vsyncpa [#allocation5], 0  ;;  %s4700_s0 = inlined_call_operand.hbm [shape: f32[8,8,384], index: 0, kind: input, shape index: {}]   ;;  %s4701_s1 = inlined_call_operand.hbm [shape: bf16[128,384], index: 1, kind: input, shape index: {}]   ;;  %s4702_s2 = inlined_call_operand.vmem [shape: f32[1,128], index: 2, kind: input, shape index: {}]   ;;  %s4703_s3 = inlined_call_operand.hbm [shape: bf16[128,384], index: 3, kind: input, shape index: {}]   ;;  %s4704_s4 = inlined_call_operand.vmem [shape: f32[1,128], index: 4, kind: input, shape index: {}]   ;;  %s4705_s5 = inlined_call_operand.hbm [shape: bf16[128,384], index: 5, kind: input, shape index: {}]   ;;  %s4706_s6 = inlined_call_operand.vmem [shape: f32[1,384], index: 6, kind: input, shape index: {}]   ;;  %s4707_s7 = inlined_call_operand.vmem [shape: f32[128,2], index: 7, kind: input, shape index: {}]   ;;  %s4708_s8 = inlined_call_operand.vmem [shape: f32[1,2], index: 8, kind: input, shape index: {}]   ;;  %s4709_s9 = inlined_call_operand.vmem [shape: f32[8,2], index: 9, kind: output, shape index: {}]  }
   0x1   :  { %15 = vsyncpa [#allocation7], 0 }
   0x2   :  { %16 = vsyncpa [#allocation10], 0  ;;  %s3689_s30 = smov [#allocation6]   ;;  %s3595_s13 = scalar_lea.hbm %s4701_s1, 3072 }
   0x3   :  { %s34_s10 = sshll.u32 %s3689_s30, 4  ;;  %p3596_p0 = scmp.ne.s32.totalorder %s4701_s1, %s3595_s13  ;;  %s35_s10 = int_to_ptr.vmem [resolvable:$true] %s34_s10 }
   0x4   :  { %p3599_p1 = scmp.lt.u32.totalorder %s3595_s13, %s4701_s1 }
   0x6   :  { %p3601_p2 = pnand %p3599_p1, %p3596_p0 }
   0x8   :  { %3604 = shalt.err (!%p3601_p2)
}
   0x9   :  { %s3605_s18 = scalar_lea.vmem %s35_s10, 3072  ;;  %p3610_p4 = scmp.lt.s32.totalorder %s35_s10, %s35_s10 }
   0xa   :  { %p3606_p3 = scmp.ne.s32.totalorder %s35_s10, %s3605_s18  ;;  %p3611_p5 = scmp.lt.s32.totalorder %s3605_s18, %s3605_s18 }
   0xc   :  { %p3612_p6 = por %p3611_p5, %p3610_p4 }
   0xe   :  { %p3613_p7 = pnand %p3612_p6, %p3606_p3 }
  0x10   :  { %3616 = shalt.err (!%p3613_p7)
}
  0x11   :  { %s3690_s19 = smov 192   ;;  %s3691_s20 = smov 12  }
  0x12   :  { %40 = dma.hbm_to_vmem [thread:$0]  %s4701_s1, 3072, %s35_s10, [#allocation7], %s3690_s19, %s3690_s19, %s3691_s20  }
  0x13   :  { %s3692_s23 = smov [#allocation4]   ;;  %s3617_s27 = scalar_lea.hbm %s4700_s0, 3072 }
  0x14   :  { %s22_s24 = sshll.u32 %s3692_s23, 4  ;;  %p3618_p8 = scmp.ne.s32.totalorder %s4700_s0, %s3617_s27  ;;  %s23_s24 = int_to_ptr.vmem [resolvable:$true] %s22_s24 }
  0x15   :  { %p3621_p9 = scmp.lt.u32.totalorder %s3617_s27, %s4700_s0 }
  0x17   :  { %p3623_p10 = pnand %p3621_p9, %p3618_p8 }
  0x19   :  { %3626 = shalt.err (!%p3623_p10)
}
  0x1a   :  { %s3627_s12 = scalar_lea.vmem %s23_s24, 3072  ;;  %p3632_p12 = scmp.lt.s32.totalorder %s23_s24, %s23_s24 }
  0x1b   :  { %p3628_p11 = scmp.ne.s32.totalorder %s23_s24, %s3627_s12  ;;  %p3633_p13 = scmp.lt.s32.totalorder %s3627_s12, %s3627_s12 }
  0x1d   :  { %p3634_p0 = por %p3633_p13, %p3632_p12 }
  0x1f   :  { %p3635_p1 = pnand %p3634_p0, %p3628_p11 }
  0x21   :  { %3638 = shalt.err (!%p3635_p1)
}
  0x22   :  { %s3693_s1 = smov 384   ;;  %s3694_s10 = smov 24  }
  0x23   :  { %28 = dma.hbm_to_vmem [thread:$0]  %s4700_s0, 3072, %s23_s24, [#allocation5], %s3693_s1, %s3693_s1, %s3694_s10  }
  0x24   :  { %s3695_s15 = smov [#allocation8]   ;;  %s3696_s17 = smov [#allocation9]  }
  0x25   :  { %s48_s16 = sshll.u32 %s3695_s15, 4  ;;  %s62_s18 = sshll.u32 %s3696_s17, 4  ;;  %s49_s16 = int_to_ptr.vmem [resolvable:$true] %s48_s16  ;;  %s3778_s18 = int_to_ptr.vmem [resolvable:$true] %s62_s18 }
  0x26   :  { %s3639_s23 = scalar_lea.hbm %s4703_s3, 3072 }
  0x27   :  { %p3640_p2 = scmp.ne.s32.totalorder %s4703_s3, %s3639_s23  ;;  %p3643_p3 = scmp.lt.u32.totalorder %s3639_s23, %s4703_s3 }
  0x29   :  { %p3645_p4 = pnand %p3643_p3, %p3640_p2 }
  0x2b   :  { %3648 = shalt.err (!%p3645_p4)
}
  0x2c   :  { %s3649_s0 = scalar_lea.vmem %s49_s16, 3072  ;;  %p3654_p6 = scmp.lt.s32.totalorder %s49_s16, %s49_s16 }
  0x2d   :  { %p3650_p5 = scmp.ne.s32.totalorder %s49_s16, %s3649_s0  ;;  %p3655_p7 = scmp.lt.s32.totalorder %s3649_s0, %s3649_s0 }
  0x2f   :  { %p3656_p8 = por %p3655_p7, %p3654_p6 }
  0x31   :  { %p3657_p9 = pnand %p3656_p8, %p3650_p5 }
  0x33   :  { %3660 = shalt.err (!%p3657_p9)
}
  0x34   :  { %54 = dma.hbm_to_vmem [thread:$0]  %s4703_s3, 3072, %s49_s16, [#allocation7], %s3690_s19, %s3690_s19, %s3691_s20  }
  0x35   :  { %s3661_s12 = scalar_lea.hbm %s4705_s5, 3072 }
  0x36   :  { %p3662_p10 = scmp.ne.s32.totalorder %s4705_s5, %s3661_s12  ;;  %p3665_p11 = scmp.lt.u32.totalorder %s3661_s12, %s4705_s5 }
  0x38   :  { %p3667_p12 = pnand %p3665_p11, %p3662_p10 }
  0x3a   :  { %3670 = shalt.err (!%p3667_p12)
}
  0x3b   :  { %s3671_s15 = scalar_lea.vmem %s3778_s18, 3072  ;;  %p3676_p0 = scmp.lt.s32.totalorder %s3778_s18, %s3778_s18 }
  0x3c   :  { %p3672_p13 = scmp.ne.s32.totalorder %s3778_s18, %s3671_s15  ;;  %p3677_p1 = scmp.lt.s32.totalorder %s3671_s15, %s3671_s15 }
  0x3e   :  { %p3678_p2 = por %p3677_p1, %p3676_p0 }
  0x40   :  { %p3679_p3 = pnand %p3678_p2, %p3672_p13 }
  0x42   :  { %3682 = shalt.err (!%p3679_p3)
}
  0x43   :  { %68 = dma.hbm_to_vmem [thread:$0]  %s4705_s5, 3072, %s3778_s18, [#allocation10], %s3690_s19, %s3690_s19, %s3691_s20  }
  0x44   :  { %3683 = dma.done.wait [#allocation5], 3072  }
  0x45   :  { %3684 = vsyncadd [#allocation5], 4294964224 }
  0x46   :  { %3685 = dma.done.wait [#allocation7], 6144  }
  0x47   :  { %3686 = vsyncadd [#allocation7], 4294961152 }
  0x48   :  { %3687 = dma.done.wait [#allocation10], 3072  }
  0x49   :  { %3688 = vsyncadd [#allocation10], 4294964224  ;;  %v4712_v0 = vmov 0.0   ;;  %v4710_v1 = vmov 0   ;;  %vm3699_vm0 = vmmov 0   ;;  %v127_v26 = vld [vmem:[#allocation4] sm:$0xff] }
  0x4a   :  { %2878 = vmatprep.subr.bf16.mxu1 %v4712_v0  ;;  %290 = vmatprep.mubr.bf16.mxu0 %v4710_v1  ;;  %v3819_v2 = vld [vmem:[#allocation6 + $0x4] ss:$12 sps:$4 sm:$0xff]   ;;  %v3821_v3 = vld [vmem:[#allocation6] ss:$12 sps:$4 sm:$0xff]   ;;  %v3824_v4 = vld [vmem:[#allocation6 + $0x1c] ss:$12 sps:$4 sm:$0xff]  }
  0x4b   :  { %2894 = vmatprep.mubr.msk.bf16.mxu1 %vm3699_vm0, %v4712_v0  ;;  %258 = vmatprep.subr.bf16.mxu0 %v3819_v2  ;;  %v3827_v5 = vld [vmem:[#allocation6 + $0x18] ss:$12 sps:$4 sm:$0xff]   ;;  %v3830_v6 = vld [vmem:[#allocation6 + $0x34] ss:$12 sps:$4 sm:$0xff]   ;;  %v3833_v7 = vld [vmem:[#allocation6 + $0x30] ss:$12 sps:$4 sm:$0xff]  }
  0x4c   :  { %259 = vmatpush1.bf16.msra.mxu0 %v3821_v3  ;;  %v3836_v8 = vld [vmem:[#allocation6 + $0x4c] ss:$12 sps:$4 sm:$0xff]   ;;  %v3838_v9 = vld [vmem:[#allocation6 + $0x8] ss:$12 sps:$4 sm:$0xff]   ;;  %v3845_v11 = vld [vmem:[#allocation6 + $0x64] ss:$12 sps:$4 sm:$0xff]  }
  0x4d   :  { %260 = vmatprep.subr.bf16.mxu0 %v3824_v4  ;;  %v3841_v10 = vld [vmem:[#allocation6 + $0x48] ss:$12 sps:$4 sm:$0xff]   ;;  %2879 = vmatpush3.bf16.msra.mxu1 %v3838_v9  ;;  %v3848_v12 = vld [vmem:[#allocation6 + $0x20] ss:$12 sps:$4 sm:$0xff]   ;;  %v3854_v14 = vld [vmem:[#allocation6 + $0x38] ss:$12 sps:$4 sm:$0xff]  }
  0x4e   :  { %2880 = vmatprep.subr.bf16.mxu1 %v4712_v0  ;;  %v3850_v13 = vld [vmem:[#allocation6 + $0x60] ss:$12 sps:$4 sm:$0xff]   ;;  %v3857_v15 = vld [vmem:[#allocation6 + $0x7c] ss:$12 sps:$4 sm:$0xff]   ;;  %v3860_v16 = vld [vmem:[#allocation6 + $0x78] ss:$12 sps:$4 sm:$0xff]  }
  0x4f   :  { %v3862_v17 = vld [vmem:[#allocation6 + $0x94] ss:$12 sps:$4 sm:$0xff]   ;;  %v3864_v18 = vld [vmem:[#allocation6 + $0x50] ss:$12 sps:$4 sm:$0xff]   ;;  %v3874_v21 = vld [vmem:[#allocation6 + $0xac] ss:$12 sps:$4 sm:$0xff]  }
  0x50   :  { %261 = vmatpush1.bf16.msra.mxu0 %v3827_v5  ;;  %v3870_v19 = vld [vmem:[#allocation6 + $0x90] ss:$12 sps:$4 sm:$0xff]   ;;  %v3872_v20 = vld [vmem:[#allocation6 + $0x68] ss:$12 sps:$4 sm:$0xff]   ;;  %v3882_v23 = vld [vmem:[#allocation6 + $0x80] ss:$12 sps:$4 sm:$0xff]  }
  0x51   :  { %262 = vmatprep.subr.bf16.mxu0 %v3830_v6  ;;  %2881 = vmatpush3.bf16.msra.mxu1 %v3848_v12  ;;  %v3880_v22 = vld [vmem:[#allocation6 + $0xa8] ss:$12 sps:$4 sm:$0xff]   ;;  %v3888_v24 = vld [vmem:[#allocation6 + $0x98] ss:$12 sps:$4 sm:$0xff]   ;;  %v3894_v25 = vld [vmem:[#allocation6 + $0xb0] ss:$12 sps:$4 sm:$0xff]  }
  0x52   :  { %2882 = vmatprep.subr.bf16.mxu1 %v4712_v0  ;;  %v128_v33 = vld [vmem:[#allocation4 + $0x8] sm:$0xff]  ;;  %v3940_v42 = vld [vmem:[%s4702_s2] ss:$0 sm:$0xff]  ;;  %v129_v46 = vld [vmem:[#allocation4 + $0x10] sm:$0xff]  ;;  %vm2589_vm1 = vcmask 15360  }
  0x53   :  { %v362_v56 = vld [vmem:[#allocation4 + $0x18] sm:$0xff] }
  0x54   :  { %263 = vmatpush1.bf16.msra.mxu0 %v3833_v7 }
  0x55   :  { %264 = vmatprep.subr.bf16.mxu0 %v3836_v8  ;;  %2883 = vmatpush3.bf16.msra.mxu1 %v3854_v14 }
  0x56   :  { %2884 = vmatprep.subr.bf16.mxu1 %v4712_v0 }
  0x58   :  { %265 = vmatpush1.bf16.msra.mxu0 %v3841_v10 }
  0x59   :  { %266 = vmatprep.subr.bf16.mxu0 %v3845_v11  ;;  %2885 = vmatpush3.bf16.msra.mxu1 %v3864_v18 }
  0x5a   :  { %2886 = vmatprep.subr.bf16.mxu1 %v4712_v0 }
  0x5c   :  { %267 = vmatpush1.bf16.msra.mxu0 %v3850_v13 }
  0x5d   :  { %268 = vmatprep.subr.bf16.mxu0 %v3857_v15  ;;  %2887 = vmatpush3.bf16.msra.mxu1 %v3872_v20 }
  0x5e   :  { %2888 = vmatprep.subr.bf16.mxu1 %v4712_v0 }
  0x60   :  { %269 = vmatpush1.bf16.msra.mxu0 %v3860_v16 }
  0x61   :  { %270 = vmatprep.subr.bf16.mxu0 %v3862_v17  ;;  %2889 = vmatpush3.bf16.msra.mxu1 %v3882_v23 }
  0x62   :  { %2890 = vmatprep.subr.bf16.mxu1 %v4712_v0 }
  0x64   :  { %271 = vmatpush1.bf16.msra.mxu0 %v3870_v19 }
  0x65   :  { %272 = vmatprep.subr.bf16.mxu0 %v3874_v21  ;;  %2891 = vmatpush3.bf16.msra.mxu1 %v3888_v24 }
  0x66   :  { %2892 = vmatprep.subr.bf16.mxu1 %v4712_v0 }
  0x68   :  { %273 = vmatpush1.bf16.msra.mxu0 %v3880_v22 }
  0x69   :  { %366 = vmatprep.subr.bf16.mxu0 %v3819_v2  ;;  %2893 = vmatpush3.bf16.msra.mxu1 %v3894_v25 }
  0x6a   :  { %2898 = vmatprep.subr.bf16.mxu1 %v4712_v0 }
  0x6b   :  { %291 = vmatmul.mubr.bf16.vlgmr.msra.gmra.mrb[0].mxu0 %v4710_v1 }
  0x6c   :  { %367 = vmatpush1.bf16.msra.mxu0 %v3821_v3  ;;  %398 = vmatprep.mubr.bf16.mxu0 %v4710_v1 }
  0x6d   :  { %368 = vmatprep.subr.bf16.mxu0 %v3824_v4  ;;  %2895 = vmatmul.mubr.bf16.vlgmr.msra.gmra.mrb[0].mxu1 %v4710_v1 }
  0x6e   :  { %2899 = vmatpush3.bf16.msra.mxu1 %v3838_v9  ;;  %2914 = vmatprep.mubr.msk.bf16.mxu1 %vm3699_vm0, %v4712_v0 }
  0x6f   :  { %2900 = vmatprep.subr.bf16.mxu1 %v4712_v0 }
  0x70   :  { %369 = vmatpush1.bf16.msra.mxu0 %v3827_v5 }
  0x71   :  { %370 = vmatprep.subr.bf16.mxu0 %v3830_v6 }
  0x72   :  { %2901 = vmatpush3.bf16.msra.mxu1 %v3848_v12 }
  0x73   :  { %2902 = vmatprep.subr.bf16.mxu1 %v4712_v0 }
  0x74   :  { %371 = vmatpush1.bf16.msra.mxu0 %v3833_v7 }
  0x75   :  { %372 = vmatprep.subr.bf16.mxu0 %v3836_v8 }
  0x76   :  { %2903 = vmatpush3.bf16.msra.mxu1 %v3854_v14 }
  0x77   :  { %2904 = vmatprep.subr.bf16.mxu1 %v4712_v0 }
  0x78   :  { %373 = vmatpush1.bf16.msra.mxu0 %v3841_v10 }
  0x79   :  { %374 = vmatprep.subr.bf16.mxu0 %v3845_v11 }
  0x7a   :  { %2905 = vmatpush3.bf16.msra.mxu1 %v3864_v18 }
  0x7b   :  { %2906 = vmatprep.subr.bf16.mxu1 %v4712_v0 }
  0x7c   :  { %375 = vmatpush1.bf16.msra.mxu0 %v3850_v13 }
  0x7d   :  { %376 = vmatprep.subr.bf16.mxu0 %v3857_v15 }
  0x7e   :  { %2907 = vmatpush3.bf16.msra.mxu1 %v3872_v20 }
  0x7f   :  { %2908 = vmatprep.subr.bf16.mxu1 %v4712_v0 }
  0x80   :  { %377 = vmatpush1.bf16.msra.mxu0 %v3860_v16 }
  0x81   :  { %378 = vmatprep.subr.bf16.mxu0 %v3862_v17 }
  0x82   :  { %2909 = vmatpush3.bf16.msra.mxu1 %v3882_v23 }
  0x83   :  { %2910 = vmatprep.subr.bf16.mxu1 %v4712_v0 }
  0x84   :  { %379 = vmatpush1.bf16.msra.mxu0 %v3870_v19 }
  0x85   :  { %380 = vmatprep.subr.bf16.mxu0 %v3874_v21 }
  0x86   :  { %2911 = vmatpush3.bf16.msra.mxu1 %v3888_v24 }
  0x87   :  { %2912 = vmatprep.subr.bf16.mxu1 %v4712_v0 }
  0x88   :  { %381 = vmatpush1.bf16.msra.mxu0 %v3880_v22 }
  0x89   :  { %475 = vmatprep.subr.bf16.mxu0 %v3819_v2 }
  0x8a   :  { %2913 = vmatpush3.bf16.msra.mxu1 %v3894_v25 }
  0x8b   :  { %2918 = vmatprep.subr.bf16.mxu1 %v4712_v0 }
 0x13e   :  { %v292_v27 = vpop.f32.mrb[0].mxu0 }
 0x13f   :  { %v339_v28 = vadd.f32 %v292_v27, %v127_v26  ;;  %v294_v29 = vpop.f32.mrb[1].mxu0 }
 0x140   :  { %v296_v30 = vpop.f32.mrb[2].mxu0  ;;  %v333_v34 = vpop.f32.mrb[0].mxu1  ;;  %v340_v35 = vadd.f32 %v294_v29, %v128_v33  ;;  %v363_v29 = vld [vmem:[#allocation4 + $0x20] sm:$0xff] }
 0x141   :  { %v2623_v31 = vmul.f32 -1.442695, %v339_v28  ;;  %v297_v32 = vpop.f32.mrb[3].mxu0  ;;  %v2896_v36 = vpop.f32.mrb[1].mxu1  ;;  %v353_v43 = vadd.f32 %v3940_v42, %v333_v34 }
 0x142   :  { %v336_v37 = vpop.f32.mrb[2].mxu1  ;;  %v2624_v39 = vmul.f32 -1.442695, %v340_v35 }
 0x143   :  { %3389 = vpow2.f32 %v2623_v31  ;;  %v2897_v38 = vpop.f32.mrb[3].mxu1  ;;  %v364_v37 = vld [vmem:[#allocation4 + $0x28] sm:$0xff] }
 0x144   :  { %3391 = vpow2.f32 %v2624_v39 }
 0x14d   :  { %v3390_v40 = vpop.eup %3389 }
 0x14e   :  { %v347_v41 = vadd.f32 1.0, %v3390_v40  ;;  %v3392_v44 = vpop.eup %3391 }
 0x14f   :  { %v348_v48 = vadd.f32 1.0, %v3392_v44 }
 0x150   :  { %3393 = vrcp.f32 %v347_v41 }
 0x15a   :  { %v3394_v45 = vpop.eup %3393 }
 0x15b   :  { %v354_v47 = vmul.f32 %v3394_v45, %v353_v43 }
 0x15d   :  { %v355_v49 = vadd.f32 %v354_v47, %v129_v46 }
 0x15f   :  { %3395 = vtanh.f32 %v355_v49 }
 0x160   :  { %3397 = vrcp.f32 %v348_v48  ;;  %v471_v48 = vld [vmem:[#allocation4 + $0x30] sm:$0xff] }
 0x169   :  { %v3396_v50 = vpop.eup %3395 }
 0x16a   :  { %v357_v51 = vsub.f32 0.0, %v3396_v50  ;;  %v3398_v52 = vpop.eup %3397 }
 0x16c   :  { %v358_v53 = vmul.f32 %v3398_v52, %v357_v51 }
 0x16e   :  { %v3943_v54 = vadd.f32 %v3396_v50, %v358_v53 }
 0x170   :  { %v365_v55 = vpack.c.bf16 %v3943_v54, %v3943_v54 }
 0x172   :  { %399 = vmatmul.mubr.bf16.vlgmr.msra.gmra.mrb[4].mxu0 %v365_v55  ;;  %2915 = vmatmul.mubr.bf16.vlgmr.msra.gmra.mrb[4].mxu1 %v365_v55 }
 0x173   :  { %476 = vmatpush1.bf16.msra.mxu0 %v3821_v3  ;;  %2919 = vmatpush3.bf16.msra.mxu1 %v3838_v9 }
 0x174   :  { %477 = vmatprep.subr.bf16.mxu0 %v3824_v4  ;;  %2920 = vmatprep.subr.bf16.mxu1 %v4712_v0 }
 0x175   :  { %507 = vmatprep.mubr.bf16.mxu0 %v4710_v1  ;;  %2934 = vmatprep.mubr.msk.bf16.mxu1 %vm3699_vm0, %v4712_v0 }
 0x177   :  { %478 = vmatpush1.bf16.msra.mxu0 %v3827_v5  ;;  %2921 = vmatpush3.bf16.msra.mxu1 %v3848_v12 }
 0x178   :  { %479 = vmatprep.subr.bf16.mxu0 %v3830_v6  ;;  %2922 = vmatprep.subr.bf16.mxu1 %v4712_v0 }
 0x17b   :  { %480 = vmatpush1.bf16.msra.mxu0 %v3833_v7  ;;  %2923 = vmatpush3.bf16.msra.mxu1 %v3854_v14 }
 0x17c   :  { %481 = vmatprep.subr.bf16.mxu0 %v3836_v8  ;;  %2924 = vmatprep.subr.bf16.mxu1 %v4712_v0 }
 0x17f   :  { %482 = vmatpush1.bf16.msra.mxu0 %v3841_v10  ;;  %2925 = vmatpush3.bf16.msra.mxu1 %v3864_v18 }
 0x180   :  { %483 = vmatprep.subr.bf16.mxu0 %v3845_v11  ;;  %2926 = vmatprep.subr.bf16.mxu1 %v4712_v0 }
 0x183   :  { %484 = vmatpush1.bf16.msra.mxu0 %v3850_v13  ;;  %2927 = vmatpush3.bf16.msra.mxu1 %v3872_v20 }
 0x184   :  { %485 = vmatprep.subr.bf16.mxu0 %v3857_v15  ;;  %2928 = vmatprep.subr.bf16.mxu1 %v4712_v0 }
 0x187   :  { %486 = vmatpush1.bf16.msra.mxu0 %v3860_v16  ;;  %2929 = vmatpush3.bf16.msra.mxu1 %v3882_v23 }
 0x188   :  { %487 = vmatprep.subr.bf16.mxu0 %v3862_v17  ;;  %2930 = vmatprep.subr.bf16.mxu1 %v4712_v0 }
 0x18b   :  { %488 = vmatpush1.bf16.msra.mxu0 %v3870_v19  ;;  %2931 = vmatpush3.bf16.msra.mxu1 %v3888_v24 }
 0x18c   :  { %489 = vmatprep.subr.bf16.mxu0 %v3874_v21  ;;  %2932 = vmatprep.subr.bf16.mxu1 %v4712_v0 }
 0x18f   :  { %490 = vmatpush1.bf16.msra.mxu0 %v3880_v22  ;;  %2933 = vmatpush3.bf16.msra.mxu1 %v3894_v25 }
 0x190   :  { %584 = vmatprep.subr.bf16.mxu0 %v3819_v2  ;;  %2938 = vmatprep.subr.bf16.mxu1 %v4712_v0 }
 0x245   :  { %v400_v57 = vpop.f32.mrb[4].mxu0  ;;  %v441_v58 = vpop.f32.mrb[4].mxu1 }
 0x246   :  { %v447_v59 = vadd.f32 %v400_v57, %v362_v56  ;;  %v402_v60 = vpop.f32.mrb[5].mxu0  ;;  %v2916_v61 = vpop.f32.mrb[5].mxu1  ;;  %v461_v35 = vadd.f32 %v3940_v42, %v441_v58 }
 0x247   :  { %v404_v62 = vpop.f32.mrb[6].mxu0  ;;  %v444_v63 = vpop.f32.mrb[6].mxu1  ;;  %v448_v30 = vadd.f32 %v402_v60, %v363_v29  ;;  %v472_v60 = vld [vmem:[#allocation4 + $0x38] sm:$0xff] }
 0x248   :  { %v2625_v26 = vmul.f32 -1.442695, %v447_v59  ;;  %v405_v27 = vpop.f32.mrb[7].mxu0  ;;  %v2917_v28 = vpop.f32.mrb[7].mxu1 }
 0x249   :  { %v2626_v31 = vmul.f32 -1.442695, %v448_v30  ;;  %v473_v30 = vld [vmem:[#allocation4 + $0x40] sm:$0xff] }
 0x24a   :  { %3399 = vpow2.f32 %v2625_v26 }
 0x24b   :  { %3401 = vpow2.f32 %v2626_v31 }
 0x254   :  { %v3400_v32 = vpop.eup %3399 }
 0x255   :  { %v455_v33 = vadd.f32 1.0, %v3400_v32  ;;  %v3402_v34 = vpop.eup %3401 }
 0x256   :  { %v456_v40 = vadd.f32 1.0, %v3402_v34 }
 0x257   :  { %3403 = vrcp.f32 %v455_v33 }
 0x261   :  { %v3404_v36 = vpop.eup %3403 }
 0x262   :  { %v462_v38 = vmul.f32 %v3404_v36, %v461_v35 }
 0x264   :  { %v463_v39 = vadd.f32 %v462_v38, %v364_v37 }
 0x266   :  { %3405 = vtanh.f32 %v463_v39 }
 0x267   :  { %3407 = vrcp.f32 %v456_v40  ;;  %v580_v40 = vld [vmem:[#allocation4 + $0x48] sm:$0xff] }
 0x270   :  { %v3406_v41 = vpop.eup %3405 }
 0x271   :  { %v465_v43 = vsub.f32 %v3943_v54, %v3406_v41  ;;  %v3408_v44 = vpop.eup %3407 }
 0x273   :  { %v466_v45 = vmul.f32 %v3408_v44, %v465_v43 }
 0x275   :  { %v3984_v46 = vadd.f32 %v3406_v41, %v466_v45 }
 0x277   :  { %v474_v47 = vpack.c.bf16 %v3984_v46, %v3984_v46 }
 0x279   :  { %508 = vmatmul.mubr.bf16.vlgmr.msra.gmra.mrb[8].mxu0 %v474_v47  ;;  %2935 = vmatmul.mubr.bf16.vlgmr.msra.gmra.mrb[8].mxu1 %v474_v47 }
 0x27a   :  { %585 = vmatpush1.bf16.msra.mxu0 %v3821_v3  ;;  %2939 = vmatpush3.bf16.msra.mxu1 %v3838_v9 }
 0x27b   :  { %586 = vmatprep.subr.bf16.mxu0 %v3824_v4  ;;  %2940 = vmatprep.subr.bf16.mxu1 %v4712_v0 }
 0x27c   :  { %616 = vmatprep.mubr.bf16.mxu0 %v4710_v1  ;;  %2954 = vmatprep.mubr.msk.bf16.mxu1 %vm3699_vm0, %v4712_v0 }
 0x27e   :  { %587 = vmatpush1.bf16.msra.mxu0 %v3827_v5  ;;  %2941 = vmatpush3.bf16.msra.mxu1 %v3848_v12 }
 0x27f   :  { %588 = vmatprep.subr.bf16.mxu0 %v3830_v6  ;;  %2942 = vmatprep.subr.bf16.mxu1 %v4712_v0 }
 0x282   :  { %589 = vmatpush1.bf16.msra.mxu0 %v3833_v7  ;;  %2943 = vmatpush3.bf16.msra.mxu1 %v3854_v14 }
 0x283   :  { %590 = vmatprep.subr.bf16.mxu0 %v3836_v8  ;;  %2944 = vmatprep.subr.bf16.mxu1 %v4712_v0 }
 0x286   :  { %591 = vmatpush1.bf16.msra.mxu0 %v3841_v10  ;;  %2945 = vmatpush3.bf16.msra.mxu1 %v3864_v18 }
 0x287   :  { %592 = vmatprep.subr.bf16.mxu0 %v3845_v11  ;;  %2946 = vmatprep.subr.bf16.mxu1 %v4712_v0 }
 0x28a   :  { %593 = vmatpush1.bf16.msra.mxu0 %v3850_v13  ;;  %2947 = vmatpush3.bf16.msra.mxu1 %v3872_v20 }
 0x28b   :  { %594 = vmatprep.subr.bf16.mxu0 %v3857_v15  ;;  %2948 = vmatprep.subr.bf16.mxu1 %v4712_v0 }
 0x28e   :  { %595 = vmatpush1.bf16.msra.mxu0 %v3860_v16  ;;  %2949 = vmatpush3.bf16.msra.mxu1 %v3882_v23 }
 0x28f   :  { %596 = vmatprep.subr.bf16.mxu0 %v3862_v17  ;;  %2950 = vmatprep.subr.bf16.mxu1 %v4712_v0 }
 0x292   :  { %597 = vmatpush1.bf16.msra.mxu0 %v3870_v19  ;;  %2951 = vmatpush3.bf16.msra.mxu1 %v3888_v24 }
 0x293   :  { %598 = vmatprep.subr.bf16.mxu0 %v3874_v21  ;;  %2952 = vmatprep.subr.bf16.mxu1 %v4712_v0 }
 0x296   :  { %599 = vmatpush1.bf16.msra.mxu0 %v3880_v22  ;;  %2953 = vmatpush3.bf16.msra.mxu1 %v3894_v25 }
 0x297   :  { %693 = vmatprep.subr.bf16.mxu0 %v3819_v2  ;;  %2958 = vmatprep.subr.bf16.mxu1 %v4712_v0 }
 0x34c   :  { %v509_v49 = vpop.f32.mrb[8].mxu0  ;;  %v550_v50 = vpop.f32.mrb[8].mxu1 }
 0x34d   :  { %v556_v51 = vadd.f32 %v509_v49, %v471_v48  ;;  %v511_v52 = vpop.f32.mrb[9].mxu0  ;;  %v2936_v53 = vpop.f32.mrb[9].mxu1  ;;  %v570_v28 = vadd.f32 %v3940_v42, %v550_v50 }
 0x34e   :  { %v513_v55 = vpop.f32.mrb[10].mxu0  ;;  %v553_v56 = vpop.f32.mrb[10].mxu1  ;;  %v557_v61 = vadd.f32 %v511_v52, %v472_v60  ;;  %v581_v53 = vld [vmem:[#allocation4 + $0x50] sm:$0xff] }
 0x34f   :  { %v2627_v57 = vmul.f32 -1.442695, %v556_v51  ;;  %v514_v58 = vpop.f32.mrb[11].mxu0  ;;  %v2937_v59 = vpop.f32.mrb[11].mxu1 }
 0x350   :  { %v2628_v62 = vmul.f32 -1.442695, %v557_v61 }
 0x351   :  { %3409 = vpow2.f32 %v2627_v57 }
 0x352   :  { %3411 = vpow2.f32 %v2628_v62  ;;  %v582_v62 = vld [vmem:[#allocation4 + $0x58] sm:$0xff] }
 0x35b   :  { %v3410_v63 = vpop.eup %3409 }
 0x35c   :  { %v564_v26 = vadd.f32 1.0, %v3410_v63  ;;  %v3412_v27 = vpop.eup %3411 }
 0x35d   :  { %v565_v33 = vadd.f32 1.0, %v3412_v27 }
 0x35e   :  { %3413 = vrcp.f32 %v564_v26 }
 0x368   :  { %v3414_v29 = vpop.eup %3413 }
 0x369   :  { %v571_v31 = vmul.f32 %v3414_v29, %v570_v28 }
 0x36b   :  { %v572_v32 = vadd.f32 %v571_v31, %v473_v30 }
 0x36d   :  { %3415 = vtanh.f32 %v572_v32 }
 0x36e   :  { %3417 = vrcp.f32 %v565_v33 }
 0x377   :  { %v3416_v34 = vpop.eup %3415 }
 0x378   :  { %v574_v35 = vsub.f32 %v3984_v46, %v3416_v34  ;;  %v3418_v36 = vpop.eup %3417 }
 0x37a   :  { %v575_v37 = vmul.f32 %v3418_v36, %v574_v35 }
 0x37c   :  { %v4025_v38 = vadd.f32 %v3416_v34, %v575_v37  ;;  %v689_v34 = vld [vmem:[#allocation4 + $0x60] sm:$0xff] }
 0x37e   :  { %v583_v39 = vpack.c.bf16 %v4025_v38, %v4025_v38 }
 0x380   :  { %617 = vmatmul.mubr.bf16.vlgmr.msra.gmra.mrb[12].mxu0 %v583_v39  ;;  %2955 = vmatmul.mubr.bf16.vlgmr.msra.gmra.mrb[12].mxu1 %v583_v39 }
 0x381   :  { %694 = vmatpush1.bf16.msra.mxu0 %v3821_v3  ;;  %2959 = vmatpush3.bf16.msra.mxu1 %v3838_v9 }
 0x382   :  { %695 = vmatprep.subr.bf16.mxu0 %v3824_v4  ;;  %2960 = vmatprep.subr.bf16.mxu1 %v4712_v0 }
 0x383   :  { %725 = vmatprep.mubr.bf16.mxu0 %v4710_v1  ;;  %2974 = vmatprep.mubr.msk.bf16.mxu1 %vm3699_vm0, %v4712_v0 }
 0x385   :  { %696 = vmatpush1.bf16.msra.mxu0 %v3827_v5  ;;  %2961 = vmatpush3.bf16.msra.mxu1 %v3848_v12 }
 0x386   :  { %697 = vmatprep.subr.bf16.mxu0 %v3830_v6  ;;  %2962 = vmatprep.subr.bf16.mxu1 %v4712_v0 }
 0x389   :  { %698 = vmatpush1.bf16.msra.mxu0 %v3833_v7  ;;  %2963 = vmatpush3.bf16.msra.mxu1 %v3854_v14 }
 0x38a   :  { %699 = vmatprep.subr.bf16.mxu0 %v3836_v8  ;;  %2964 = vmatprep.subr.bf16.mxu1 %v4712_v0 }
 0x38d   :  { %700 = vmatpush1.bf16.msra.mxu0 %v3841_v10  ;;  %2965 = vmatpush3.bf16.msra.mxu1 %v3864_v18 }
 0x38e   :  { %701 = vmatprep.subr.bf16.mxu0 %v3845_v11  ;;  %2966 = vmatprep.subr.bf16.mxu1 %v4712_v0 }
 0x391   :  { %702 = vmatpush1.bf16.msra.mxu0 %v3850_v13  ;;  %2967 = vmatpush3.bf16.msra.mxu1 %v3872_v20 }
 0x392   :  { %703 = vmatprep.subr.bf16.mxu0 %v3857_v15  ;;  %2968 = vmatprep.subr.bf16.mxu1 %v4712_v0 }
 0x395   :  { %704 = vmatpush1.bf16.msra.mxu0 %v3860_v16  ;;  %2969 = vmatpush3.bf16.msra.mxu1 %v3882_v23 }
 0x396   :  { %705 = vmatprep.subr.bf16.mxu0 %v3862_v17  ;;  %2970 = vmatprep.subr.bf16.mxu1 %v4712_v0 }
 0x399   :  { %706 = vmatpush1.bf16.msra.mxu0 %v3870_v19  ;;  %2971 = vmatpush3.bf16.msra.mxu1 %v3888_v24 }
 0x39a   :  { %707 = vmatprep.subr.bf16.mxu0 %v3874_v21  ;;  %2972 = vmatprep.subr.bf16.mxu1 %v4712_v0 }
 0x39d   :  { %708 = vmatpush1.bf16.msra.mxu0 %v3880_v22  ;;  %2973 = vmatpush3.bf16.msra.mxu1 %v3894_v25 }
 0x39e   :  { %802 = vmatprep.subr.bf16.mxu0 %v3819_v2  ;;  %2978 = vmatprep.subr.bf16.mxu1 %v4712_v0 }
 0x453   :  { %v618_v41 = vpop.f32.mrb[12].mxu0  ;;  %v659_v43 = vpop.f32.mrb[12].mxu1 }
 0x454   :  { %v665_v44 = vadd.f32 %v618_v41, %v580_v40  ;;  %v620_v45 = vpop.f32.mrb[13].mxu0  ;;  %v2956_v47 = vpop.f32.mrb[13].mxu1  ;;  %v679_v60 = vadd.f32 %v3940_v42, %v659_v43 }
 0x455   :  { %v622_v48 = vpop.f32.mrb[14].mxu0  ;;  %v662_v49 = vpop.f32.mrb[14].mxu1  ;;  %v666_v55 = vadd.f32 %v620_v45, %v581_v53 }
 0x456   :  { %v2629_v50 = vmul.f32 -1.442695, %v665_v44  ;;  %v623_v51 = vpop.f32.mrb[15].mxu0  ;;  %v2957_v52 = vpop.f32.mrb[15].mxu1  ;;  %v690_v48 = vld [vmem:[#allocation4 + $0x68] sm:$0xff] }
 0x457   :  { %v2630_v56 = vmul.f32 -1.442695, %v666_v55 }
 0x458   :  { %3419 = vpow2.f32 %v2629_v50 }
 0x459   :  { %3421 = vpow2.f32 %v2630_v56  ;;  %v691_v56 = vld [vmem:[#allocation4 + $0x70] sm:$0xff] }
 0x462   :  { %v3420_v57 = vpop.eup %3419 }
 0x463   :  { %v673_v58 = vadd.f32 1.0, %v3420_v57  ;;  %v3422_v59 = vpop.eup %3421 }
 0x464   :  { %v674_v27 = vadd.f32 1.0, %v3422_v59 }
 0x465   :  { %3423 = vrcp.f32 %v673_v58 }
 0x46f   :  { %v3424_v61 = vpop.eup %3423 }
 0x470   :  { %v680_v63 = vmul.f32 %v3424_v61, %v679_v60 }
 0x472   :  { %v681_v26 = vadd.f32 %v680_v63, %v582_v62 }
 0x474   :  { %3425 = vtanh.f32 %v681_v26 }
 0x475   :  { %3427 = vrcp.f32 %v674_v27 }
 0x47e   :  { %v3426_v28 = vpop.eup %3425 }
 0x47f   :  { %v683_v29 = vsub.f32 %v4025_v38, %v3426_v28  ;;  %v3428_v30 = vpop.eup %3427 }
 0x481   :  { %v684_v31 = vmul.f32 %v3428_v30, %v683_v29 }
 0x483   :  { %v4066_v32 = vadd.f32 %v3426_v28, %v684_v31  ;;  %v800_v28 = vld [vmem:[#allocation4 + $0x88] sm:$0xff] }
 0x485   :  { %v692_v33 = vpack.c.bf16 %v4066_v32, %v4066_v32 }
 0x487   :  { %726 = vmatmul.mubr.bf16.vlgmr.msra.gmra.mrb[16].mxu0 %v692_v33  ;;  %2975 = vmatmul.mubr.bf16.vlgmr.msra.gmra.mrb[16].mxu1 %v692_v33 }
 0x488   :  { %803 = vmatpush1.bf16.msra.mxu0 %v3821_v3  ;;  %2979 = vmatpush3.bf16.msra.mxu1 %v3838_v9 }
 0x489   :  { %804 = vmatprep.subr.bf16.mxu0 %v3824_v4  ;;  %2980 = vmatprep.subr.bf16.mxu1 %v4712_v0 }
 0x48a   :  { %834 = vmatprep.mubr.bf16.mxu0 %v4710_v1  ;;  %2994 = vmatprep.mubr.msk.bf16.mxu1 %vm3699_vm0, %v4712_v0 }
 0x48c   :  { %805 = vmatpush1.bf16.msra.mxu0 %v3827_v5  ;;  %2981 = vmatpush3.bf16.msra.mxu1 %v3848_v12 }
 0x48d   :  { %806 = vmatprep.subr.bf16.mxu0 %v3830_v6  ;;  %2982 = vmatprep.subr.bf16.mxu1 %v4712_v0 }
 0x490   :  { %807 = vmatpush1.bf16.msra.mxu0 %v3833_v7  ;;  %2983 = vmatpush3.bf16.msra.mxu1 %v3854_v14 }
 0x491   :  { %808 = vmatprep.subr.bf16.mxu0 %v3836_v8  ;;  %2984 = vmatprep.subr.bf16.mxu1 %v4712_v0 }
 0x494   :  { %809 = vmatpush1.bf16.msra.mxu0 %v3841_v10  ;;  %2985 = vmatpush3.bf16.msra.mxu1 %v3864_v18 }
 0x495   :  { %810 = vmatprep.subr.bf16.mxu0 %v3845_v11  ;;  %2986 = vmatprep.subr.bf16.mxu1 %v4712_v0 }
 0x498   :  { %811 = vmatpush1.bf16.msra.mxu0 %v3850_v13  ;;  %2987 = vmatpush3.bf16.msra.mxu1 %v3872_v20 }
 0x499   :  { %812 = vmatprep.subr.bf16.mxu0 %v3857_v15  ;;  %2988 = vmatprep.subr.bf16.mxu1 %v4712_v0 }
 0x49c   :  { %813 = vmatpush1.bf16.msra.mxu0 %v3860_v16  ;;  %2989 = vmatpush3.bf16.msra.mxu1 %v3882_v23 }
 0x49d   :  { %814 = vmatprep.subr.bf16.mxu0 %v3862_v17  ;;  %2990 = vmatprep.subr.bf16.mxu1 %v4712_v0 }
 0x4a0   :  { %815 = vmatpush1.bf16.msra.mxu0 %v3870_v19  ;;  %2991 = vmatpush3.bf16.msra.mxu1 %v3888_v24 }
 0x4a1   :  { %816 = vmatprep.subr.bf16.mxu0 %v3874_v21  ;;  %2992 = vmatprep.subr.bf16.mxu1 %v4712_v0 }
 0x4a4   :  { %817 = vmatpush1.bf16.msra.mxu0 %v3880_v22  ;;  %2993 = vmatpush3.bf16.msra.mxu1 %v3894_v25 }
 0x4a5   :  { %911 = vmatprep.subr.bf16.mxu0 %v3819_v2  ;;  %2998 = vmatprep.subr.bf16.mxu1 %v4712_v0 }
 0x55a   :  { %v727_v35 = vpop.f32.mrb[16].mxu0  ;;  %v768_v36 = vpop.f32.mrb[16].mxu1 }
 0x55b   :  { %v774_v37 = vadd.f32 %v727_v35, %v689_v34  ;;  %v729_v39 = vpop.f32.mrb[17].mxu0  ;;  %v2976_v40 = vpop.f32.mrb[17].mxu1  ;;  %v788_v53 = vadd.f32 %v3940_v42, %v768_v36 }
 0x55c   :  { %v731_v41 = vpop.f32.mrb[18].mxu0  ;;  %v771_v43 = vpop.f32.mrb[18].mxu1  ;;  %v775_v49 = vadd.f32 %v729_v39, %v690_v48  ;;  %v3550_v40 = vld [vmem:[#allocation6] ss:$12 sps:$4 sm:$0xff]   ;;  %v3556_v48 = vld [vmem:[#allocation6 + $0x30] ss:$12 sps:$4 sm:$0xff]  }
 0x55d   :  { %v2631_v44 = vmul.f32 -1.442695, %v774_v37  ;;  %v732_v45 = vpop.f32.mrb[19].mxu0  ;;  %v2977_v47 = vpop.f32.mrb[19].mxu1  ;;  %v3551_v41 = vld [vmem:[#allocation6 + $0x8] ss:$12 sps:$4 sm:$0xff]  }
 0x55e   :  { %v2632_v50 = vmul.f32 -1.442695, %v775_v49  ;;  %v3552_v43 = vld [vmem:[#allocation6 + $0x1c] ss:$12 sps:$4 sm:$0xff]   ;;  %v3554_v45 = vld [vmem:[#allocation6 + $0x20] ss:$12 sps:$4 sm:$0xff]  }
 0x55f   :  { %3429 = vpow2.f32 %v2631_v44  ;;  %v3553_v44 = vld [vmem:[#allocation6 + $0x18] ss:$12 sps:$4 sm:$0xff]   ;;  %v3555_v47 = vld [vmem:[#allocation6 + $0x34] ss:$12 sps:$4 sm:$0xff]  }
 0x560   :  { %3431 = vpow2.f32 %v2632_v50  ;;  %v3557_v49 = vld [vmem:[#allocation6 + $0x38] ss:$12 sps:$4 sm:$0xff]  }
 0x561   :  { %v3558_v50 = vld [vmem:[#allocation6 + $0x4c] ss:$12 sps:$4 sm:$0xff]  }
 0x569   :  { %v3430_v51 = vpop.eup %3429 }
 0x56a   :  { %v782_v52 = vadd.f32 1.0, %v3430_v51  ;;  %v3432_v2 = vpop.eup %3431  ;;  %v3559_v51 = vld [vmem:[#allocation6 + $0x48] ss:$12 sps:$4 sm:$0xff]  }
 0x56b   :  { %v783_v59 = vadd.f32 1.0, %v3432_v2  ;;  %v3561_v2 = vld [vmem:[#allocation6 + $0x64] ss:$12 sps:$4 sm:$0xff]  }
 0x56c   :  { %3433 = vrcp.f32 %v782_v52  ;;  %v3560_v52 = vld [vmem:[#allocation6 + $0x50] ss:$12 sps:$4 sm:$0xff]  }
 0x576   :  { %v3434_v55 = vpop.eup %3433 }
 0x577   :  { %v789_v57 = vmul.f32 %v3434_v55, %v788_v53  ;;  %v3562_v53 = vld [vmem:[#allocation6 + $0x60] ss:$12 sps:$4 sm:$0xff]   ;;  %v3563_v55 = vld [vmem:[#allocation6 + $0x68] ss:$12 sps:$4 sm:$0xff]  }
 0x579   :  { %v790_v58 = vadd.f32 %v789_v57, %v691_v56  ;;  %v3564_v56 = vld [vmem:[#allocation6 + $0x7c] ss:$12 sps:$4 sm:$0xff]   ;;  %v3565_v57 = vld [vmem:[#allocation6 + $0x78] ss:$12 sps:$4 sm:$0xff]  }
 0x57b   :  { %3435 = vtanh.f32 %v790_v58  ;;  %v3566_v58 = vld [vmem:[#allocation6 + $0x94] ss:$12 sps:$4 sm:$0xff]  }
 0x57c   :  { %3437 = vrcp.f32 %v783_v59  ;;  %v3567_v59 = vld [vmem:[#allocation6 + $0x90] ss:$12 sps:$4 sm:$0xff]  }
 0x585   :  { %v3436_v60 = vpop.eup %3435 }
 0x586   :  { %v792_v61 = vsub.f32 %v4066_v32, %v3436_v60  ;;  %v3438_v62 = vpop.eup %3437 }
 0x588   :  { %v793_v63 = vmul.f32 %v3438_v62, %v792_v61  ;;  %v3569_v61 = vld [vmem:[#allocation6 + $0xa8] ss:$12 sps:$4 sm:$0xff]   ;;  %v3327_v62 = vld [vmem:[#allocation9 + $0x4] ss:$12 sps:$4 sm:$0xff]  }
 0x58a   :  { %v4107_v26 = vadd.f32 %v3436_v60, %v793_v63  ;;  %v3568_v60 = vld [vmem:[#allocation6 + $0xac] ss:$12 sps:$4 sm:$0xff]   ;;  %v3328_v63 = vld [vmem:[#allocation9 + $0x8] ss:$12 sps:$4 sm:$0xff]  }
 0x58c   :  { %v801_v27 = vpack.c.bf16 %v4107_v26, %v4107_v26 }
 0x58e   :  { %835 = vmatmul.mubr.bf16.vlgmr.msra.gmra.mrb[20].mxu0 %v801_v27  ;;  %2995 = vmatmul.mubr.bf16.vlgmr.msra.gmra.mrb[20].mxu1 %v801_v27 }
 0x58f   :  { %912 = vmatpush1.bf16.msra.mxu0 %v3821_v3  ;;  %2999 = vmatpush3.bf16.msra.mxu1 %v3838_v9  ;;  %v3549_v3 = vld [vmem:[#allocation6 + $0x4] ss:$12 sps:$4 sm:$0xff]  }
 0x590   :  { %913 = vmatprep.subr.bf16.mxu0 %v3824_v4  ;;  %3000 = vmatprep.subr.bf16.mxu1 %v4712_v0  ;;  %v798_v4 = vld [vmem:[#allocation4 + $0x78] sm:$0xff] }
 0x591   :  { %943 = vmatprep.mubr.bf16.mxu0 %v4710_v1  ;;  %3014 = vmatprep.mubr.msk.bf16.mxu1 %vm3699_vm0, %v4712_v0 }
 0x593   :  { %914 = vmatpush1.bf16.msra.mxu0 %v3827_v5  ;;  %3001 = vmatpush3.bf16.msra.mxu1 %v3848_v12 }
 0x594   :  { %915 = vmatprep.subr.bf16.mxu0 %v3830_v6  ;;  %3002 = vmatprep.subr.bf16.mxu1 %v4712_v0 }
 0x597   :  { %916 = vmatpush1.bf16.msra.mxu0 %v3833_v7  ;;  %3003 = vmatpush3.bf16.msra.mxu1 %v3854_v14 }
 0x598   :  { %917 = vmatprep.subr.bf16.mxu0 %v3836_v8  ;;  %3004 = vmatprep.subr.bf16.mxu1 %v4712_v0 }
 0x59b   :  { %918 = vmatpush1.bf16.msra.mxu0 %v3841_v10  ;;  %3005 = vmatpush3.bf16.msra.mxu1 %v3864_v18 }
 0x59c   :  { %919 = vmatprep.subr.bf16.mxu0 %v3845_v11  ;;  %3006 = vmatprep.subr.bf16.mxu1 %v4712_v0 }
 0x59f   :  { %920 = vmatpush1.bf16.msra.mxu0 %v3850_v13  ;;  %3007 = vmatpush3.bf16.msra.mxu1 %v3872_v20 }
 0x5a0   :  { %921 = vmatprep.subr.bf16.mxu0 %v3857_v15  ;;  %3008 = vmatprep.subr.bf16.mxu1 %v4712_v0  ;;  %v799_v15 = vld [vmem:[#allocation4 + $0x80] sm:$0xff] }
 0x5a3   :  { %922 = vmatpush1.bf16.msra.mxu0 %v3860_v16  ;;  %3009 = vmatpush3.bf16.msra.mxu1 %v3882_v23 }
 0x5a4   :  { %923 = vmatprep.subr.bf16.mxu0 %v3862_v17  ;;  %3010 = vmatprep.subr.bf16.mxu1 %v4712_v0 }
 0x5a7   :  { %924 = vmatpush1.bf16.msra.mxu0 %v3870_v19  ;;  %3011 = vmatpush3.bf16.msra.mxu1 %v3888_v24 }
 0x5a8   :  { %925 = vmatprep.subr.bf16.mxu0 %v3874_v21  ;;  %3012 = vmatprep.subr.bf16.mxu1 %v4712_v0 }
 0x5ab   :  { %926 = vmatpush1.bf16.msra.mxu0 %v3880_v22  ;;  %3013 = vmatpush3.bf16.msra.mxu1 %v3894_v25 }
 0x5ac   :  { %1020 = vmatprep.subr.bf16.mxu0 %v3549_v3  ;;  %3018 = vmatprep.subr.bf16.mxu1 %v4712_v0 }
 0x661   :  { %v836_v5 = vpop.f32.mrb[20].mxu0  ;;  %v877_v6 = vpop.f32.mrb[20].mxu1 }
 0x662   :  { %v883_v7 = vadd.f32 %v836_v5, %v798_v4  ;;  %v838_v8 = vpop.f32.mrb[21].mxu0  ;;  %v2996_v9 = vpop.f32.mrb[21].mxu1  ;;  %v897_v21 = vadd.f32 %v3940_v42, %v877_v6 }
 0x663   :  { %v840_v10 = vpop.f32.mrb[22].mxu0  ;;  %v880_v11 = vpop.f32.mrb[22].mxu1  ;;  %v884_v16 = vadd.f32 %v838_v8, %v799_v15 }
 0x664   :  { %v2633_v12 = vmul.f32 -1.442695, %v883_v7  ;;  %v841_v13 = vpop.f32.mrb[23].mxu0  ;;  %v2997_v14 = vpop.f32.mrb[23].mxu1  ;;  %v908_v11 = vld [vmem:[#allocation4 + $0x98] sm:$0xff] }
 0x665   :  { %v2634_v17 = vmul.f32 -1.442695, %v884_v16 }
 0x666   :  { %3439 = vpow2.f32 %v2633_v12 }
 0x667   :  { %3441 = vpow2.f32 %v2634_v17 }
 0x670   :  { %v3440_v18 = vpop.eup %3439 }
 0x671   :  { %v891_v19 = vadd.f32 1.0, %v3440_v18  ;;  %v3442_v20 = vpop.eup %3441  ;;  %v909_v18 = vld [vmem:[#allocation4 + $0xa0] sm:$0xff] }
 0x672   :  { %v892_v31 = vadd.f32 1.0, %v3442_v20 }
 0x673   :  { %3443 = vrcp.f32 %v891_v19 }
 0x67d   :  { %v3444_v22 = vpop.eup %3443 }
 0x67e   :  { %v898_v29 = vmul.f32 %v3444_v22, %v897_v21 }
 0x680   :  { %v899_v30 = vadd.f32 %v898_v29, %v800_v28 }
 0x682   :  { %3445 = vtanh.f32 %v899_v30 }
 0x683   :  { %3447 = vrcp.f32 %v892_v31 }
 0x68c   :  { %v3446_v33 = vpop.eup %3445 }
 0x68d   :  { %v901_v34 = vsub.f32 %v4107_v26, %v3446_v33  ;;  %v3448_v35 = vpop.eup %3447 }
 0x68f   :  { %v902_v36 = vmul.f32 %v3448_v35, %v901_v34  ;;  %v3331_v35 = vld [vmem:[#allocation9 + $0x1c] ss:$12 sps:$4 sm:$0xff]  }
 0x691   :  { %v4147_v37 = vadd.f32 %v3446_v33, %v902_v36  ;;  %v3325_v33 = vld [vmem:[#allocation9] ss:$12 sps:$4 sm:$0xff]   ;;  %v1204_v36 = vpack.c.bf16 %v3984_v46, %v3943_v54  ;;  %v3337_v54 = vld [vmem:[#allocation9 + $0x48] ss:$12 sps:$4 sm:$0xff]   ;;  %v3343_v46 = vld [vmem:[#allocation9 + $0x64] ss:$12 sps:$4 sm:$0xff]  }
 0x693   :  { %v910_v39 = vpack.c.bf16 %v4147_v37, %v4147_v37 }
 0x695   :  { %944 = vmatmul.mubr.bf16.vlgmr.msra.gmra.mrb[24].mxu0 %v910_v39  ;;  %3015 = vmatmul.mubr.bf16.vlgmr.msra.gmra.mrb[24].mxu1 %v910_v39  ;;  %v3329_v39 = vld [vmem:[#allocation9 + $0x18] ss:$12 sps:$4 sm:$0xff]  }
 0x696   :  { %1021 = vmatpush1.bf16.msra.mxu0 %v3550_v40  ;;  %3019 = vmatpush3.bf16.msra.mxu1 %v3551_v41  ;;  %v3335_v40 = vld [vmem:[#allocation9 + $0x34] ss:$12 sps:$4 sm:$0xff]   ;;  %v3336_v41 = vld [vmem:[#allocation9 + $0x38] ss:$12 sps:$4 sm:$0xff]  }
 0x697   :  { %1022 = vmatprep.subr.bf16.mxu0 %v3552_v43  ;;  %3020 = vmatprep.subr.bf16.mxu1 %v4712_v0  ;;  %v3333_v43 = vld [vmem:[#allocation9 + $0x30] ss:$12 sps:$4 sm:$0xff]  }
 0x698   :  { %1052 = vmatprep.mubr.bf16.mxu0 %v4710_v1  ;;  %3034 = vmatprep.mubr.msk.bf16.mxu1 %vm3699_vm0, %v4712_v0 }
 0x69a   :  { %1023 = vmatpush1.bf16.msra.mxu0 %v3553_v44  ;;  %3021 = vmatpush3.bf16.msra.mxu1 %v3554_v45  ;;  %v3339_v44 = vld [vmem:[#allocation9 + $0x4c] ss:$12 sps:$4 sm:$0xff]   ;;  %v3340_v45 = vld [vmem:[#allocation9 + $0x50] ss:$12 sps:$4 sm:$0xff]  }
 0x69b   :  { %1024 = vmatprep.subr.bf16.mxu0 %v3555_v47  ;;  %3022 = vmatprep.subr.bf16.mxu1 %v4712_v0  ;;  %v3344_v47 = vld [vmem:[#allocation9 + $0x68] ss:$12 sps:$4 sm:$0xff]  }
 0x69e   :  { %1025 = vmatpush1.bf16.msra.mxu0 %v3556_v48  ;;  %3023 = vmatpush3.bf16.msra.mxu1 %v3557_v49  ;;  %v3341_v48 = vld [vmem:[#allocation9 + $0x60] ss:$12 sps:$4 sm:$0xff]   ;;  %v3347_v49 = vld [vmem:[#allocation9 + $0x7c] ss:$12 sps:$4 sm:$0xff]  }
 0x69f   :  { %1026 = vmatprep.subr.bf16.mxu0 %v3558_v50  ;;  %3024 = vmatprep.subr.bf16.mxu1 %v4712_v0  ;;  %v3348_v50 = vld [vmem:[#allocation9 + $0x80] ss:$12 sps:$4 sm:$0xff]  }
 0x6a2   :  { %1027 = vmatpush1.bf16.msra.mxu0 %v3559_v51  ;;  %3025 = vmatpush3.bf16.msra.mxu1 %v3560_v52  ;;  %v3345_v51 = vld [vmem:[#allocation9 + $0x78] ss:$12 sps:$4 sm:$0xff]   ;;  %v3351_v52 = vld [vmem:[#allocation9 + $0x94] ss:$12 sps:$4 sm:$0xff]  }
 0x6a3   :  { %1028 = vmatprep.subr.bf16.mxu0 %v3561_v2  ;;  %3026 = vmatprep.subr.bf16.mxu1 %v4712_v0  ;;  %v3352_v2 = vld [vmem:[#allocation9 + $0x98] ss:$12 sps:$4 sm:$0xff]  }
 0x6a6   :  { %1029 = vmatpush1.bf16.msra.mxu0 %v3562_v53  ;;  %3027 = vmatpush3.bf16.msra.mxu1 %v3563_v55  ;;  %v3349_v53 = vld [vmem:[#allocation9 + $0x90] ss:$12 sps:$4 sm:$0xff]   ;;  %v3355_v55 = vld [vmem:[#allocation9 + $0xac] ss:$12 sps:$4 sm:$0xff]  }
 0x6a7   :  { %1030 = vmatprep.subr.bf16.mxu0 %v3564_v56  ;;  %3028 = vmatprep.subr.bf16.mxu1 %v4712_v0  ;;  %v3356_v56 = vld [vmem:[#allocation9 + $0xb0] ss:$12 sps:$4 sm:$0xff]  }
 0x6aa   :  { %1031 = vmatpush1.bf16.msra.mxu0 %v3565_v57  ;;  %3029 = vmatpush3.bf16.msra.mxu1 %v3882_v23  ;;  %v907_v23 = vld [vmem:[#allocation4 + $0x90] sm:$0xff] }
 0x6ab   :  { %1032 = vmatprep.subr.bf16.mxu0 %v3566_v58  ;;  %3030 = vmatprep.subr.bf16.mxu1 %v4712_v0  ;;  %v3353_v57 = vld [vmem:[#allocation9 + $0xa8] ss:$12 sps:$4 sm:$0xff]   ;;  %v1205_v58 = vpack.c.bf16 %v4066_v32, %v4025_v38  ;;  %v4189_v32 = vld [vmem:[#allocation8 + $0x18] ss:$12 sps:$4 sm:$0xff]  }
 0x6ac   :  { %v4187_v38 = vld [vmem:[#allocation8 + $0x1c] ss:$12 sps:$4 sm:$0xff]  }
 0x6ae   :  { %1033 = vmatpush1.bf16.msra.mxu0 %v3567_v59  ;;  %3031 = vmatpush3.bf16.msra.mxu1 %v3888_v24  ;;  %v1206_v59 = vpack.c.bf16 %v4147_v37, %v4107_v26  ;;  %v4193_v26 = vld [vmem:[#allocation8 + $0x34] ss:$12 sps:$4 sm:$0xff]  }
 0x6af   :  { %1034 = vmatprep.subr.bf16.mxu0 %v3568_v60  ;;  %3032 = vmatprep.subr.bf16.mxu1 %v4712_v0  ;;  %v4181_v60 = vld [vmem:[#allocation8 + $0x4] ss:$12 sps:$4 sm:$0xff]  }
 0x6b2   :  { %1035 = vmatpush1.bf16.msra.mxu0 %v3569_v61  ;;  %3033 = vmatpush3.bf16.msra.mxu1 %v3894_v25  ;;  %v4183_v61 = vld [vmem:[#allocation8] ss:$12 sps:$4 sm:$0xff]  }
 0x6b3   :  { %1352 = vmatprep.subr.bf16.mxu0 %v3327_v62  ;;  %3038 = vmatprep.subr.bf16.mxu1 %v3328_v63  ;;  %v4199_v62 = vld [vmem:[#allocation8 + $0x4c] ss:$12 sps:$4 sm:$0xff]  }
 0x768   :  { %v945_v27 = vpop.f32.mrb[24].mxu0  ;;  %v986_v3 = vpop.f32.mrb[24].mxu1 }
 0x769   :  { %v992_v4 = vadd.f32 %v945_v27, %v907_v23  ;;  %v947_v5 = vpop.f32.mrb[25].mxu0  ;;  %v3016_v6 = vpop.f32.mrb[25].mxu1  ;;  %v1006_v16 = vadd.f32 %v3940_v42, %v986_v3  ;;  %v3332_v42 = vld [vmem:[#allocation9 + $0x20] ss:$12 sps:$4 sm:$0xff]   ;;  %v4205_v23 = vld [vmem:[#allocation8 + $0x64] ss:$12 sps:$4 sm:$0xff]  }
 0x76a   :  { %v949_v7 = vpop.f32.mrb[26].mxu0  ;;  %v989_v24 = vpop.f32.mrb[26].mxu1  ;;  %v993_v12 = vadd.f32 %v947_v5, %v908_v11  ;;  %v4207_v27 = vld [vmem:[#allocation8 + $0x60] ss:$12 sps:$4 sm:$0xff]   ;;  %v4211_v3 = vld [vmem:[#allocation8 + $0x7c] ss:$12 sps:$4 sm:$0xff]  }
 0x76b   :  { %v2635_v8 = vmul.f32 -1.442695, %v992_v4  ;;  %v950_v9 = vpop.f32.mrb[27].mxu0  ;;  %v3017_v10 = vpop.f32.mrb[27].mxu1  ;;  %v4213_v4 = vld [vmem:[#allocation8 + $0x78] ss:$12 sps:$4 sm:$0xff]  }
 0x76c   :  { %v2636_v13 = vmul.f32 -1.442695, %v993_v12  ;;  %v4217_v5 = vld [vmem:[#allocation8 + $0x94] ss:$12 sps:$4 sm:$0xff]   ;;  %v4221_v7 = vld [vmem:[#allocation8 + $0x90] ss:$12 sps:$4 sm:$0xff]  }
 0x76d   :  { %3449 = vpow2.f32 %v2635_v8  ;;  %v4219_v6 = vld [vmem:[#allocation8 + $0x8] ss:$12 sps:$4 sm:$0xff]   ;;  %v4223_v24 = vld [vmem:[#allocation8 + $0xac] ss:$12 sps:$4 sm:$0xff]   ;;  %v4241_v11 = vld [vmem:[#allocation8 + $0x50] ss:$12 sps:$4 sm:$0xff]  }
 0x76e   :  { %3451 = vpow2.f32 %v2636_v13  ;;  %v4227_v8 = vld [vmem:[#allocation8 + $0x20] ss:$12 sps:$4 sm:$0xff]   ;;  %v4231_v9 = vld [vmem:[#allocation8 + $0xa8] ss:$12 sps:$4 sm:$0xff]   ;;  %v4237_v10 = vld [vmem:[#allocation8 + $0x38] ss:$12 sps:$4 sm:$0xff]  }
 0x76f   :  { %v4245_v12 = vld [vmem:[#allocation8 + $0x68] ss:$12 sps:$4 sm:$0xff]   ;;  %v4249_v13 = vld [vmem:[#allocation8 + $0x80] ss:$12 sps:$4 sm:$0xff]  }
 0x777   :  { %v3450_v25 = vpop.eup %3449 }
 0x778   :  { %v1000_v14 = vadd.f32 1.0, %v3450_v25  ;;  %v3452_v15 = vpop.eup %3451  ;;  %v4253_v25 = vld [vmem:[#allocation8 + $0x98] ss:$12 sps:$4 sm:$0xff]  }
 0x779   :  { %v1001_v21 = vadd.f32 1.0, %v3452_v15  ;;  %v1016_v15 = vld [vmem:[#allocation4 + $0xa8] sm:$0xff] }
 0x77a   :  { %3453 = vrcp.f32 %v1000_v14  ;;  %v4257_v14 = vld [vmem:[#allocation8 + $0xb0] ss:$12 sps:$4 sm:$0xff]  }
 0x784   :  { %v3454_v17 = vpop.eup %3453 }
 0x785   :  { %v1007_v19 = vmul.f32 %v3454_v17, %v1006_v16 }
 0x787   :  { %v1008_v20 = vadd.f32 %v1007_v19, %v909_v18 }
 0x789   :  { %3455 = vtanh.f32 %v1008_v20 }
 0x78a   :  { %3457 = vrcp.f32 %v1001_v21 }
 0x793   :  { %v3456_v22 = vpop.eup %3455 }
 0x794   :  { %v1010_v28 = vsub.f32 %v4147_v37, %v3456_v22  ;;  %v3458_v29 = vpop.eup %3457  ;;  %v4195_v37 = vld [vmem:[#allocation8 + $0x30] ss:$12 sps:$4 sm:$0xff]  }
 0x796   :  { %v1011_v30 = vmul.f32 %v3458_v29, %v1010_v28 }
 0x798   :  { %v4166_v31 = vadd.f32 %v3456_v22, %v1011_v30 }
 0x79a   :  { %v1019_v34 = vpack.c.bf16 %v4166_v31, %v4166_v31 }
 0x79c   :  { %1053 = vmatmul.mubr.bf16.vlgmr.msra.gmra.mrb[28].mxu0 %v1019_v34  ;;  %3035 = vmatmul.mubr.bf16.vlgmr.msra.gmra.mrb[28].mxu1 %v1019_v34 }
 0x79d   :  { %1353 = vmatpush1.bf16.msra.mxu0 %v3325_v33  ;;  %3039 = vmatpush3.bf16.msra.mxu1 %v3328_v63  ;;  %v4201_v63 = vld [vmem:[#allocation8 + $0x48] ss:$12 sps:$4 sm:$0xff]  }
 0x79e   :  { %3054 = vmatprep.mubr.bf16.mxu1 %v1204_v36  ;;  %1354 = vmatprep.subr.bf16.mxu0 %v3331_v35  ;;  %v1017_v33 = vld [vmem:[#allocation4 + $0xb0] sm:$0xff] }
 0x79f   :  { %3040 = vmatprep.subr.bf16.mxu1 %v3332_v42  ;;  %1384 = vmatprep.mubr.bf16.mxu0 %v4710_v1 }
 0x7a1   :  { %1355 = vmatpush1.bf16.msra.mxu0 %v3329_v39  ;;  %3041 = vmatpush3.bf16.msra.mxu1 %v3332_v42 }
 0x7a2   :  { %1356 = vmatprep.subr.bf16.mxu0 %v3335_v40  ;;  %3042 = vmatprep.subr.bf16.mxu1 %v3336_v41  ;;  %v3570_v40 = vld [vmem:[%s4702_s2] ss:$0 sm:$0xff] }
 0x7a5   :  { %1357 = vmatpush1.bf16.msra.mxu0 %v3333_v43  ;;  %3043 = vmatpush3.bf16.msra.mxu1 %v3336_v41 }
 0x7a6   :  { %1358 = vmatprep.subr.bf16.mxu0 %v3339_v44  ;;  %3044 = vmatprep.subr.bf16.mxu1 %v3340_v45  ;;  %v1018_v44 = vld [vmem:[#allocation4 + $0xb8] sm:$0xff] }
 0x7a9   :  { %1359 = vmatpush1.bf16.msra.mxu0 %v3337_v54  ;;  %3045 = vmatpush3.bf16.msra.mxu1 %v3340_v45 }
 0x7aa   :  { %1360 = vmatprep.subr.bf16.mxu0 %v3343_v46  ;;  %3046 = vmatprep.subr.bf16.mxu1 %v3344_v47 }
 0x7ad   :  { %1361 = vmatpush1.bf16.msra.mxu0 %v3341_v48  ;;  %3047 = vmatpush3.bf16.msra.mxu1 %v3344_v47 }
 0x7ae   :  { %1362 = vmatprep.subr.bf16.mxu0 %v3347_v49  ;;  %3048 = vmatprep.subr.bf16.mxu1 %v3348_v50 }
 0x7b1   :  { %1363 = vmatpush1.bf16.msra.mxu0 %v3345_v51  ;;  %3049 = vmatpush3.bf16.msra.mxu1 %v3348_v50 }
 0x7b2   :  { %1364 = vmatprep.subr.bf16.mxu0 %v3351_v52  ;;  %3050 = vmatprep.subr.bf16.mxu1 %v3352_v2 }
 0x7b5   :  { %1365 = vmatpush1.bf16.msra.mxu0 %v3349_v53  ;;  %3051 = vmatpush3.bf16.msra.mxu1 %v3352_v2 }
 0x7b6   :  { %1366 = vmatprep.subr.bf16.mxu0 %v3355_v55  ;;  %3052 = vmatprep.subr.bf16.mxu1 %v3356_v56 }
 0x7b9   :  { %1367 = vmatpush1.bf16.msra.mxu0 %v3353_v57  ;;  %3053 = vmatpush3.bf16.msra.mxu1 %v3356_v56 }
 0x7ba   :  { %3062 = vmatprep.subr.bf16.mxu1 %v4712_v0  ;;  %1645 = vmatprep.subr.bf16.mxu0 %v4181_v60 }
 0x7bc   :  { %1385 = vmatmul.mubr.bf16.vlgmr.msra.gmra.mrb[32].mxu0 %v1204_v36  ;;  %3055 = vmatmul.mubr.bf16.vlgmr.msra.gmra.mrb[32].mxu1 %v1205_v58 }
 0x7bd   :  { %3058 = vmatprep.mubr.bf16.mxu1 %v1206_v59  ;;  %1394 = vmatprep.mubr.bf16.mxu0 %v4710_v1 }
 0x7be   :  { %1646 = vmatpush1.bf16.msra.mxu0 %v4183_v61  ;;  %3063 = vmatpush3.bf16.msra.mxu1 %v4219_v6 }
 0x7bf   :  { %1647 = vmatprep.subr.bf16.mxu0 %v4187_v38  ;;  %3064 = vmatprep.subr.bf16.mxu1 %v4712_v0 }
 0x7c2   :  { %1648 = vmatpush1.bf16.msra.mxu0 %v4189_v32  ;;  %3065 = vmatpush3.bf16.msra.mxu1 %v4227_v8 }
 0x7c3   :  { %1649 = vmatprep.subr.bf16.mxu0 %v4193_v26  ;;  %3066 = vmatprep.subr.bf16.mxu1 %v4712_v0 }
 0x7c4   :  { %1395 = vmatmul.mubr.bf16.gmra.mrb[36].mxu0 %v1205_v58 }
 0x7c5   :  { %1404 = vmatprep.mubr.bf16.mxu0 %v4710_v1 }
 0x7c6   :  { %1650 = vmatpush1.bf16.msra.mxu0 %v4195_v37  ;;  %3067 = vmatpush3.bf16.msra.mxu1 %v4237_v10 }
 0x7c7   :  { %1651 = vmatprep.subr.bf16.mxu0 %v4199_v62  ;;  %3068 = vmatprep.subr.bf16.mxu1 %v4712_v0 }
 0x7ca   :  { %1652 = vmatpush1.bf16.msra.mxu0 %v4201_v63  ;;  %3069 = vmatpush3.bf16.msra.mxu1 %v4241_v11 }
 0x7cb   :  { %1653 = vmatprep.subr.bf16.mxu0 %v4205_v23  ;;  %3070 = vmatprep.subr.bf16.mxu1 %v4712_v0 }
 0x7cc   :  { %1405 = vmatmul.mubr.bf16.gmra.mrb[40].mxu0 %v1206_v59 }
 0x7cd   :  { %1414 = vmatprep.mubr.bf16.mxu0 %v4710_v1 }
 0x7ce   :  { %1654 = vmatpush1.bf16.msra.mxu0 %v4207_v27  ;;  %3071 = vmatpush3.bf16.msra.mxu1 %v4245_v12 }
 0x7cf   :  { %1655 = vmatprep.subr.bf16.mxu0 %v4211_v3  ;;  %3072 = vmatprep.subr.bf16.mxu1 %v4712_v0 }
 0x7d2   :  { %1656 = vmatpush1.bf16.msra.mxu0 %v4213_v4  ;;  %3073 = vmatpush3.bf16.msra.mxu1 %v4249_v13 }
 0x7d3   :  { %1657 = vmatprep.subr.bf16.mxu0 %v4217_v5  ;;  %3074 = vmatprep.subr.bf16.mxu1 %v4712_v0 }
 0x7d6   :  { %1658 = vmatpush1.bf16.msra.mxu0 %v4221_v7  ;;  %3075 = vmatpush3.bf16.msra.mxu1 %v4253_v25 }
 0x7d7   :  { %1659 = vmatprep.subr.bf16.mxu0 %v4223_v24  ;;  %3076 = vmatprep.subr.bf16.mxu1 %v4712_v0 }
 0x7da   :  { %1660 = vmatpush1.bf16.msra.mxu0 %v4231_v9  ;;  %3077 = vmatpush3.bf16.msra.mxu1 %v4257_v14 }
 0x7db   :  { %1752 = vmatprep.subr.bf16.mxu0 %v4181_v60  ;;  %3082 = vmatprep.subr.bf16.mxu1 %v4712_v0 }
 0x86f   :  { %v1054_v16 = vpop.f32.mrb[28].mxu0  ;;  %v1095_v17 = vpop.f32.mrb[28].mxu1 }
 0x870   :  { %v1101_v18 = vadd.f32 %v1054_v16, %v1016_v15  ;;  %v1056_v19 = vpop.f32.mrb[29].mxu0  ;;  %v3036_v20 = vpop.f32.mrb[29].mxu1  ;;  %v1115_v41 = vadd.f32 %v3570_v40, %v1095_v17 }
 0x871   :  { %v1058_v21 = vpop.f32.mrb[30].mxu0  ;;  %v1098_v22 = vpop.f32.mrb[30].mxu1  ;;  %v1102_v34 = vadd.f32 %v1056_v19, %v1017_v33  ;;  %v1156_v33 = vld [vmem:[%s4706_s6] sm:$0x7] }
 0x872   :  { %v2637_v28 = vmul.f32 -1.442695, %v1101_v18  ;;  %v1059_v29 = vpop.f32.mrb[31].mxu0  ;;  %v3037_v30 = vpop.f32.mrb[31].mxu1 }
 0x873   :  { %v2638_v35 = vmul.f32 -1.442695, %v1102_v34 }
 0x874   :  { %3459 = vpow2.f32 %v2637_v28 }
 0x875   :  { %3461 = vpow2.f32 %v2638_v35 }
 0x87e   :  { %v3460_v42 = vpop.eup %3459 }
 0x87f   :  { %v1109_v36 = vadd.f32 1.0, %v3460_v42  ;;  %v3462_v39 = vpop.eup %3461 }
 0x880   :  { %v1110_v46 = vadd.f32 1.0, %v3462_v39 }
 0x881   :  { %3463 = vrcp.f32 %v1109_v36 }
 0x88b   :  { %v3464_v43 = vpop.eup %3463 }
 0x88c   :  { %v1116_v45 = vmul.f32 %v3464_v43, %v1115_v41 }
 0x88e   :  { %v1117_v54 = vadd.f32 %v1116_v45, %v1018_v44 }
 0x88f   :  { %v4265_v47 = vpop.f32.mrb[32].mxu0  ;;  %v4267_v48 = vpop.f32.mrb[32].mxu1 }
 0x890   :  { %3465 = vtanh.f32 %v1117_v54  ;;  %v4269_v49 = vpop.f32.mrb[33].mxu0  ;;  %v4271_v50 = vpop.f32.mrb[33].mxu1 }
 0x891   :  { %v4273_v51 = vpop.f32.mrb[34].mxu0  ;;  %v4275_v52 = vpop.f32.mrb[34].mxu1  ;;  %3467 = vrcp.f32 %v1110_v46 }
 0x892   :  { %v4277_v2 = vpop.f32.mrb[35].mxu0  ;;  %v4279_v53 = vpop.f32.mrb[35].mxu1 }
 0x897   :  { %v4281_v55 = vpop.f32.mrb[36].mxu0 }
 0x898   :  { %v4283_v56 = vpop.f32.mrb[37].mxu0 }
 0x899   :  { %v4285_v57 = vpop.f32.mrb[38].mxu0 }
 0x89a   :  { %v3466_v58 = vpop.eup %3465  ;;  %v4287_v59 = vpop.f32.mrb[39].mxu0 }
 0x89b   :  { %v1119_v15 = vsub.f32 %v4166_v31, %v3466_v58  ;;  %v3468_v16 = vpop.eup %3467 }
 0x89d   :  { %v1120_v17 = vmul.f32 %v3468_v16, %v1119_v15 }
 0x89f   :  { %v4290_v18 = vpop.f32.mrb[40].mxu0  ;;  %v1121_v19 = vadd.f32 %v3466_v58, %v1120_v17 }
 0x8a0   :  { %v4292_v20 = vpop.f32.mrb[41].mxu0 }
 0x8a1   :  { %v4294_v21 = vpop.f32.mrb[42].mxu0  ;;  %v1207_v22 = vpack.c.bf16 %v1121_v19, %v4166_v31  ;;  %v1209_v31 = vlaneseq }
 0x8a2   :  { %v4297_v28 = vpop.f32.mrb[43].mxu0 }
 0x8a3   :  { %1415 = vmatmul.mubr.bf16.gmra.mrb[44].mxu0 %v1207_v22  ;;  %3059 = vmatmul.mubr.bf16.gmra.mrb[36].mxu1 %v1207_v22  ;;  %v1210_v29 = vshrl.u32 %v1209_v31, 7 }
 0x8a4   :  { %1677 = vmatprep.mubr.bf16.mxu0 %v4710_v1  ;;  %3078 = vmatprep.mubr.msk.bf16.mxu1 %vm3699_vm0, %v4712_v0 }
 0x8a5   :  { %v1211_v30 = vsub.s32 0, %v1210_v29  ;;  %v1215_v34 = vsub.s32 1, %v1210_v29 }
 0x8a7   :  { %v4354_v43 = vrot.slane %v1156_v33, %v1211_v30  ;;  %v4360_v54 = vrot.slane %v1156_v33, %v1215_v34 }
 0x8a9   :  { %v1387_v46 = vadd.f32 %v4265_v47, %v4354_v43  ;;  %v1389_v58 = vadd.f32 %v4269_v49, %v4360_v54  ;;  %v1219_v47 = vsub.s32 2, %v1210_v29  ;;  %v4369_v49 = vld [vmem:[%s4704_s4] ss:$0 sm:$0xff] }
 0x8ab   :  { %1678 = vmatmul.mubr.bf16.vlgmr.msra.gmra.mrb[48].mxu0 %v4710_v1  ;;  %3079 = vmatmul.mubr.bf16.vlgmr.msra.gmra.mrb[40].mxu1 %v4710_v1 }
 0x8ac   :  { %1753 = vmatpush1.bf16.msra.mxu0 %v4183_v61  ;;  %3083 = vmatpush3.bf16.msra.mxu1 %v4219_v6 }
 0x8ad   :  { %1754 = vmatprep.subr.bf16.mxu0 %v4187_v38  ;;  %3084 = vmatprep.subr.bf16.mxu1 %v4712_v0 }
 0x8ae   :  { %1784 = vmatprep.mubr.bf16.mxu0 %v4710_v1  ;;  %3098 = vmatprep.mubr.msk.bf16.mxu1 %vm3699_vm0, %v4712_v0 }
 0x8b0   :  { %1755 = vmatpush1.bf16.msra.mxu0 %v4189_v32  ;;  %3085 = vmatpush3.bf16.msra.mxu1 %v4227_v8 }
 0x8b1   :  { %1756 = vmatprep.subr.bf16.mxu0 %v4193_v26  ;;  %3086 = vmatprep.subr.bf16.mxu1 %v4712_v0 }
 0x8b4   :  { %1757 = vmatpush1.bf16.msra.mxu0 %v4195_v37  ;;  %3087 = vmatpush3.bf16.msra.mxu1 %v4237_v10 }
 0x8b5   :  { %1758 = vmatprep.subr.bf16.mxu0 %v4199_v62  ;;  %3088 = vmatprep.subr.bf16.mxu1 %v4712_v0 }
 0x8b8   :  { %1759 = vmatpush1.bf16.msra.mxu0 %v4201_v63  ;;  %3089 = vmatpush3.bf16.msra.mxu1 %v4241_v11 }
 0x8b9   :  { %1760 = vmatprep.subr.bf16.mxu0 %v4205_v23  ;;  %3090 = vmatprep.subr.bf16.mxu1 %v4712_v0 }
 0x8bc   :  { %1761 = vmatpush1.bf16.msra.mxu0 %v4207_v27  ;;  %3091 = vmatpush3.bf16.msra.mxu1 %v4245_v12 }
 0x8bd   :  { %1762 = vmatprep.subr.bf16.mxu0 %v4211_v3  ;;  %3092 = vmatprep.subr.bf16.mxu1 %v4712_v0 }
 0x8c0   :  { %1763 = vmatpush1.bf16.msra.mxu0 %v4213_v4  ;;  %3093 = vmatpush3.bf16.msra.mxu1 %v4249_v13 }
 0x8c1   :  { %1764 = vmatprep.subr.bf16.mxu0 %v4217_v5  ;;  %3094 = vmatprep.subr.bf16.mxu1 %v4712_v0 }
 0x8c4   :  { %1765 = vmatpush1.bf16.msra.mxu0 %v4221_v7  ;;  %3095 = vmatpush3.bf16.msra.mxu1 %v4253_v25 }
 0x8c5   :  { %1766 = vmatprep.subr.bf16.mxu0 %v4223_v24  ;;  %3096 = vmatprep.subr.bf16.mxu1 %v4712_v0 }
 0x8c8   :  { %1767 = vmatpush1.bf16.msra.mxu0 %v4231_v9  ;;  %3097 = vmatpush3.bf16.msra.mxu1 %v4257_v14 }
 0x8c9   :  { %1859 = vmatprep.subr.bf16.mxu0 %v4181_v60  ;;  %3102 = vmatprep.subr.bf16.mxu1 %v4712_v0 }
 0x976   :  { %v4342_v35 = vpop.f32.mrb[44].mxu0  ;;  %v4344_v42 = vpop.f32.mrb[36].mxu1 }
 0x977   :  { %4714 = vst [vmem:[#allocation14_spill] sm:$0xff] %v4344_v42  ;;  %v4346_v36 = vpop.f32.mrb[45].mxu0  ;;  %v4348_v39 = vpop.f32.mrb[37].mxu1 }
 0x978   :  { %4715 = vst [vmem:[#allocation15_spill] sm:$0xff] %v4346_v36  ;;  %v4350_v40 = vpop.f32.mrb[46].mxu0  ;;  %v4352_v41 = vpop.f32.mrb[38].mxu1 }
 0x979   :  { %4716 = vst [vmem:[#allocation16_spill] sm:$0xff] %v4350_v40  ;;  %4717 = vst [vmem:[#allocation17_spill] sm:$0xff] %v4352_v41  ;;  %v4356_v44 = vpop.f32.mrb[47].mxu0  ;;  %v4358_v45 = vpop.f32.mrb[39].mxu1 }
 0x97a   :  { %4718 = vst [vmem:[#allocation18_spill] sm:$0xff] %v4356_v44 }
 0x97e   :  { %v1679_v15 = vpop.f32.mrb[48].mxu0  ;;  %v1720_v16 = vpop.f32.mrb[40].mxu1 }
 0x97f   :  { %v1726_v17 = vadd.f32 %v1679_v15, %v1387_v46  ;;  %v1681_v19 = vpop.f32.mrb[49].mxu0  ;;  %v3080_v22 = vpop.f32.mrb[41].mxu1  ;;  %v4371_v46 = vrot.slane %v1156_v33, %v1219_v47 }
 0x980   :  { %v1727_v31 = vadd.f32 %v1681_v19, %v1389_v58  ;;  %v1683_v30 = vpop.f32.mrb[50].mxu0  ;;  %v1723_v1 = vpop.f32.mrb[42].mxu1  ;;  %v1740_v58 = vadd.f32 %v4369_v49, %v1720_v16  ;;  %v4720_v16 = vmov 0  }
 0x981   :  { %v2688_v0 = vmul.f32 -1.442695, %v1726_v17  ;;  %v1684_v41 = vpop.f32.mrb[51].mxu0  ;;  %v3081_v44 = vpop.f32.mrb[43].mxu1  ;;  %v1393_v30 = vadd.f32 %v4277_v2, %v4360_v54 }
 0x982   :  { %v2689_v34 = vmul.f32 -1.442695, %v1727_v31  ;;  %v1391_v31 = vadd.f32 %v4273_v51, %v4354_v43 }
 0x983   :  { %3469 = vpow2.f32 %v2688_v0  ;;  %v1460_v0 = vadd.f32 %v4271_v50, %v4371_v46  ;;  %v4719_v50 = vmov 0.0  }
 0x984   :  { %3471 = vpow2.f32 %v2689_v34 }
 0x98d   :  { %v3470_v40 = vpop.eup %3469 }
 0x98e   :  { %v1734_v42 = vadd.f32 1.0, %v3470_v40  ;;  %v3472_v1 = vpop.eup %3471 }
 0x98f   :  { %v1735_v44 = vadd.f32 1.0, %v3472_v1 }
 0x990   :  { %3473 = vrcp.f32 %v1734_v42 }
 0x99a   :  { %v3474_v15 = vpop.eup %3473 }
 0x99b   :  { %v1741_v41 = vmul.f32 %v3474_v15, %v1740_v58 }
 0x99d   :  { %v1742_v40 = vadd.f32 %v1741_v41, %v1460_v0 }
 0x99f   :  { %3475 = vtanh.f32 %v1742_v40 }
 0x9a0   :  { %3477 = vrcp.f32 %v1735_v44 }
 0x9a9   :  { %v3476_v29 = vpop.eup %3475 }
 0x9aa   :  { %v1744_v42 = vsub.f32 0.0, %v3476_v29  ;;  %v3478_v17 = vpop.eup %3477 }
 0x9ac   :  { %v1745_v19 = vmul.f32 %v3478_v17, %v1744_v42 }
 0x9ae   :  { %v4376_v22 = vadd.f32 %v3476_v29, %v1745_v19 }
 0x9b0   :  { %v1751_v33 = vpack.c.bf16 %v4376_v22, %v4376_v22 }
 0x9b2   :  { %1785 = vmatmul.mubr.bf16.vlgmr.msra.gmra.mrb[52].mxu0 %v1751_v33  ;;  %3099 = vmatmul.mubr.bf16.vlgmr.msra.gmra.mrb[44].mxu1 %v1751_v33 }
 0x9b3   :  { %1860 = vmatpush1.bf16.msra.mxu0 %v4183_v61  ;;  %3103 = vmatpush3.bf16.msra.mxu1 %v4219_v6 }
 0x9b4   :  { %1861 = vmatprep.subr.bf16.mxu0 %v4187_v38  ;;  %3104 = vmatprep.subr.bf16.mxu1 %v4719_v50 }
 0x9b5   :  { %1891 = vmatprep.mubr.bf16.mxu0 %v4720_v16  ;;  %3118 = vmatprep.mubr.msk.bf16.mxu1 %vm3699_vm0, %v4719_v50 }
 0x9b7   :  { %1862 = vmatpush1.bf16.msra.mxu0 %v4189_v32  ;;  %3105 = vmatpush3.bf16.msra.mxu1 %v4227_v8 }
 0x9b8   :  { %1863 = vmatprep.subr.bf16.mxu0 %v4193_v26  ;;  %3106 = vmatprep.subr.bf16.mxu1 %v4719_v50 }
 0x9bb   :  { %1864 = vmatpush1.bf16.msra.mxu0 %v4195_v37  ;;  %3107 = vmatpush3.bf16.msra.mxu1 %v4237_v10 }
 0x9bc   :  { %1865 = vmatprep.subr.bf16.mxu0 %v4199_v62  ;;  %3108 = vmatprep.subr.bf16.mxu1 %v4719_v50 }
 0x9bf   :  { %1866 = vmatpush1.bf16.msra.mxu0 %v4201_v63  ;;  %3109 = vmatpush3.bf16.msra.mxu1 %v4241_v11 }
 0x9c0   :  { %1867 = vmatprep.subr.bf16.mxu0 %v4205_v23  ;;  %3110 = vmatprep.subr.bf16.mxu1 %v4719_v50 }
 0x9c3   :  { %1868 = vmatpush1.bf16.msra.mxu0 %v4207_v27  ;;  %3111 = vmatpush3.bf16.msra.mxu1 %v4245_v12 }
 0x9c4   :  { %1869 = vmatprep.subr.bf16.mxu0 %v4211_v3  ;;  %3112 = vmatprep.subr.bf16.mxu1 %v4719_v50 }
 0x9c7   :  { %1870 = vmatpush1.bf16.msra.mxu0 %v4213_v4  ;;  %3113 = vmatpush3.bf16.msra.mxu1 %v4249_v13 }
 0x9c8   :  { %1871 = vmatprep.subr.bf16.mxu0 %v4217_v5  ;;  %3114 = vmatprep.subr.bf16.mxu1 %v4719_v50 }
 0x9cb   :  { %1872 = vmatpush1.bf16.msra.mxu0 %v4221_v7  ;;  %3115 = vmatpush3.bf16.msra.mxu1 %v4253_v25 }
 0x9cc   :  { %1873 = vmatprep.subr.bf16.mxu0 %v4223_v24  ;;  %3116 = vmatprep.subr.bf16.mxu1 %v4719_v50 }
 0x9cf   :  { %1874 = vmatpush1.bf16.msra.mxu0 %v4231_v9  ;;  %3117 = vmatpush3.bf16.msra.mxu1 %v4257_v14 }
 0x9d0   :  { %1966 = vmatprep.subr.bf16.mxu0 %v4181_v60  ;;  %3122 = vmatprep.subr.bf16.mxu1 %v4719_v50 }
 0xa85   :  { %v1786_v34 = vpop.f32.mrb[52].mxu0  ;;  %v1827_v47 = vpop.f32.mrb[44].mxu1 }
 0xa86   :  { %v1833_v58 = vadd.f32 %v1786_v34, %v1391_v31  ;;  %v1788_v1 = vpop.f32.mrb[53].mxu0  ;;  %v3100_v15 = vpop.f32.mrb[45].mxu1  ;;  %v1847_v2 = vadd.f32 %v4369_v49, %v1827_v47  ;;  %v1463_v31 = vadd.f32 %v4279_v53, %v4371_v46  ;;  %v1397_v53 = vadd.f32 %v4281_v55, %v4354_v43 }
 0xa87   :  { %v1834_v0 = vadd.f32 %v1788_v1, %v1393_v30  ;;  %v1790_v41 = vpop.f32.mrb[54].mxu0  ;;  %v1830_v44 = vpop.f32.mrb[46].mxu1 }
 0xa88   :  { %v2690_v40 = vmul.f32 -1.442695, %v1833_v58  ;;  %v1791_v29 = vpop.f32.mrb[55].mxu0  ;;  %v3101_v42 = vpop.f32.mrb[47].mxu1 }
 0xa89   :  { %v2691_v17 = vmul.f32 -1.442695, %v1834_v0 }
 0xa8a   :  { %3479 = vpow2.f32 %v2690_v40 }
 0xa8b   :  { %3481 = vpow2.f32 %v2691_v17 }
 0xa94   :  { %v3480_v19 = vpop.eup %3479 }
 0xa95   :  { %v1841_v33 = vadd.f32 1.0, %v3480_v19  ;;  %v3482_v51 = vpop.eup %3481 }
 0xa96   :  { %v1842_v1 = vadd.f32 1.0, %v3482_v51 }
 0xa97   :  { %3483 = vrcp.f32 %v1841_v33 }
 0xaa1   :  { %v3484_v36 = vpop.eup %3483 }
 0xaa2   :  { %v1848_v34 = vmul.f32 %v3484_v36, %v1847_v2  ;;  %v1399_v36 = vadd.f32 %v4283_v56, %v4360_v54 }
 0xaa4   :  { %v1849_v30 = vadd.f32 %v1848_v34, %v1463_v31 }
 0xaa6   :  { %3485 = vtanh.f32 %v1849_v30 }
 0xaa7   :  { %3487 = vrcp.f32 %v1842_v1 }
 0xab0   :  { %v3486_v58 = vpop.eup %3485 }
 0xab1   :  { %v1851_v15 = vsub.f32 %v4376_v22, %v3486_v58  ;;  %v3488_v0 = vpop.eup %3487 }
 0xab3   :  { %v1852_v41 = vmul.f32 %v3488_v0, %v1851_v15  ;;  %v1468_v0 = vadd.f32 %v4267_v48, %v4371_v46  ;;  %v1401_v48 = vadd.f32 %v4285_v57, %v4354_v43 }
 0xab5   :  { %v4423_v44 = vadd.f32 %v3486_v58, %v1852_v41 }
 0xab7   :  { %v1858_v40 = vpack.c.bf16 %v4423_v44, %v4423_v44 }
 0xab9   :  { %1892 = vmatmul.mubr.bf16.vlgmr.msra.gmra.mrb[56].mxu0 %v1858_v40  ;;  %3119 = vmatmul.mubr.bf16.vlgmr.msra.gmra.mrb[48].mxu1 %v1858_v40 }
 0xaba   :  { %1967 = vmatpush1.bf16.msra.mxu0 %v4183_v61  ;;  %3123 = vmatpush3.bf16.msra.mxu1 %v4219_v6 }
 0xabb   :  { %1968 = vmatprep.subr.bf16.mxu0 %v4187_v38  ;;  %3124 = vmatprep.subr.bf16.mxu1 %v4719_v50 }
 0xabc   :  { %1998 = vmatprep.mubr.bf16.mxu0 %v4720_v16  ;;  %3138 = vmatprep.mubr.msk.bf16.mxu1 %vm3699_vm0, %v4719_v50 }
 0xabe   :  { %1969 = vmatpush1.bf16.msra.mxu0 %v4189_v32  ;;  %3125 = vmatpush3.bf16.msra.mxu1 %v4227_v8 }
 0xabf   :  { %1970 = vmatprep.subr.bf16.mxu0 %v4193_v26  ;;  %3126 = vmatprep.subr.bf16.mxu1 %v4719_v50 }
 0xac2   :  { %1971 = vmatpush1.bf16.msra.mxu0 %v4195_v37  ;;  %3127 = vmatpush3.bf16.msra.mxu1 %v4237_v10 }
 0xac3   :  { %1972 = vmatprep.subr.bf16.mxu0 %v4199_v62  ;;  %3128 = vmatprep.subr.bf16.mxu1 %v4719_v50 }
 0xac6   :  { %1973 = vmatpush1.bf16.msra.mxu0 %v4201_v63  ;;  %3129 = vmatpush3.bf16.msra.mxu1 %v4241_v11 }
 0xac7   :  { %1974 = vmatprep.subr.bf16.mxu0 %v4205_v23  ;;  %3130 = vmatprep.subr.bf16.mxu1 %v4719_v50 }
 0xaca   :  { %1975 = vmatpush1.bf16.msra.mxu0 %v4207_v27  ;;  %3131 = vmatpush3.bf16.msra.mxu1 %v4245_v12 }
 0xacb   :  { %1976 = vmatprep.subr.bf16.mxu0 %v4211_v3  ;;  %3132 = vmatprep.subr.bf16.mxu1 %v4719_v50 }
 0xace   :  { %1977 = vmatpush1.bf16.msra.mxu0 %v4213_v4  ;;  %3133 = vmatpush3.bf16.msra.mxu1 %v4249_v13 }
 0xacf   :  { %1978 = vmatprep.subr.bf16.mxu0 %v4217_v5  ;;  %3134 = vmatprep.subr.bf16.mxu1 %v4719_v50 }
 0xad2   :  { %1979 = vmatpush1.bf16.msra.mxu0 %v4221_v7  ;;  %3135 = vmatpush3.bf16.msra.mxu1 %v4253_v25 }
 0xad3   :  { %1980 = vmatprep.subr.bf16.mxu0 %v4223_v24  ;;  %3136 = vmatprep.subr.bf16.mxu1 %v4719_v50 }
 0xad6   :  { %1981 = vmatpush1.bf16.msra.mxu0 %v4231_v9  ;;  %3137 = vmatpush3.bf16.msra.mxu1 %v4257_v14 }
 0xad7   :  { %2073 = vmatprep.subr.bf16.mxu0 %v4181_v60  ;;  %3142 = vmatprep.subr.bf16.mxu1 %v4719_v50 }
 0xb8c   :  { %v1893_v22 = vpop.f32.mrb[56].mxu0  ;;  %v1934_v47 = vpop.f32.mrb[48].mxu1 }
 0xb8d   :  { %v1940_v29 = vadd.f32 %v1893_v22, %v1397_v53  ;;  %v1895_v42 = vpop.f32.mrb[57].mxu0  ;;  %v3120_v17 = vpop.f32.mrb[49].mxu1  ;;  %v1954_v56 = vadd.f32 %v4369_v49, %v1934_v47 }
 0xb8e   :  { %v1941_v19 = vadd.f32 %v1895_v42, %v1399_v36  ;;  %v1897_v33 = vpop.f32.mrb[58].mxu0  ;;  %v1937_v51 = vpop.f32.mrb[50].mxu1 }
 0xb8f   :  { %v2692_v2 = vmul.f32 -1.442695, %v1940_v29  ;;  %v1898_v31 = vpop.f32.mrb[59].mxu0  ;;  %v3121_v34 = vpop.f32.mrb[51].mxu1 }
 0xb90   :  { %v2693_v30 = vmul.f32 -1.442695, %v1941_v19 }
 0xb91   :  { %3489 = vpow2.f32 %v2692_v2 }
 0xb92   :  { %3491 = vpow2.f32 %v2693_v30 }
 0xb9b   :  { %v3490_v1 = vpop.eup %3489 }
 0xb9c   :  { %v1948_v58 = vadd.f32 1.0, %v3490_v1  ;;  %v3492_v55 = vpop.eup %3491 }
 0xb9d   :  { %v1949_v53 = vadd.f32 1.0, %v3492_v55 }
 0xb9e   :  { %3493 = vrcp.f32 %v1948_v58 }
 0xba8   :  { %v3494_v15 = vpop.eup %3493 }
 0xba9   :  { %v1955_v41 = vmul.f32 %v3494_v15, %v1954_v56 }
 0xbab   :  { %v1956_v40 = vadd.f32 %v1955_v41, %v1468_v0 }
 0xbad   :  { %3495 = vtanh.f32 %v1956_v40 }
 0xbae   :  { %3497 = vrcp.f32 %v1949_v53  ;;  %v1471_v53 = vadd.f32 %v4275_v52, %v4371_v46  ;;  %v1407_v52 = vadd.f32 %v4290_v18, %v4354_v43 }
 0xbb7   :  { %v3496_v36 = vpop.eup %3495 }
 0xbb8   :  { %v1958_v22 = vsub.f32 %v4423_v44, %v3496_v36  ;;  %v3498_v29 = vpop.eup %3497  ;;  %v1403_v44 = vadd.f32 %v4287_v59, %v4360_v54 }
 0xbba   :  { %v1959_v42 = vmul.f32 %v3498_v29, %v1958_v22 }
 0xbbc   :  { %v4470_v17 = vadd.f32 %v3496_v36, %v1959_v42 }
 0xbbe   :  { %v1965_v19 = vpack.c.bf16 %v4470_v17, %v4470_v17 }
 0xbc0   :  { %1999 = vmatmul.mubr.bf16.vlgmr.msra.gmra.mrb[60].mxu0 %v1965_v19  ;;  %3139 = vmatmul.mubr.bf16.vlgmr.msra.gmra.mrb[52].mxu1 %v1965_v19 }
 0xbc1   :  { %2074 = vmatpush1.bf16.msra.mxu0 %v4183_v61  ;;  %3143 = vmatpush3.bf16.msra.mxu1 %v4219_v6 }
 0xbc2   :  { %2075 = vmatprep.subr.bf16.mxu0 %v4187_v38  ;;  %3144 = vmatprep.subr.bf16.mxu1 %v4719_v50 }
 0xbc3   :  { %2105 = vmatprep.mubr.bf16.mxu0 %v4720_v16  ;;  %3158 = vmatprep.mubr.msk.bf16.mxu1 %vm3699_vm0, %v4719_v50 }
 0xbc5   :  { %2076 = vmatpush1.bf16.msra.mxu0 %v4189_v32  ;;  %3145 = vmatpush3.bf16.msra.mxu1 %v4227_v8 }
 0xbc6   :  { %2077 = vmatprep.subr.bf16.mxu0 %v4193_v26  ;;  %3146 = vmatprep.subr.bf16.mxu1 %v4719_v50 }
 0xbc9   :  { %2078 = vmatpush1.bf16.msra.mxu0 %v4195_v37  ;;  %3147 = vmatpush3.bf16.msra.mxu1 %v4237_v10 }
 0xbca   :  { %2079 = vmatprep.subr.bf16.mxu0 %v4199_v62  ;;  %3148 = vmatprep.subr.bf16.mxu1 %v4719_v50 }
 0xbcd   :  { %2080 = vmatpush1.bf16.msra.mxu0 %v4201_v63  ;;  %3149 = vmatpush3.bf16.msra.mxu1 %v4241_v11 }
 0xbce   :  { %2081 = vmatprep.subr.bf16.mxu0 %v4205_v23  ;;  %3150 = vmatprep.subr.bf16.mxu1 %v4719_v50 }
 0xbd1   :  { %2082 = vmatpush1.bf16.msra.mxu0 %v4207_v27  ;;  %3151 = vmatpush3.bf16.msra.mxu1 %v4245_v12 }
 0xbd2   :  { %2083 = vmatprep.subr.bf16.mxu0 %v4211_v3  ;;  %3152 = vmatprep.subr.bf16.mxu1 %v4719_v50 }
 0xbd5   :  { %2084 = vmatpush1.bf16.msra.mxu0 %v4213_v4  ;;  %3153 = vmatpush3.bf16.msra.mxu1 %v4249_v13 }
 0xbd6   :  { %2085 = vmatprep.subr.bf16.mxu0 %v4217_v5  ;;  %3154 = vmatprep.subr.bf16.mxu1 %v4719_v50 }
 0xbd9   :  { %2086 = vmatpush1.bf16.msra.mxu0 %v4221_v7  ;;  %3155 = vmatpush3.bf16.msra.mxu1 %v4253_v25 }
 0xbda   :  { %2087 = vmatprep.subr.bf16.mxu0 %v4223_v24  ;;  %3156 = vmatprep.subr.bf16.mxu1 %v4719_v50 }
 0xbdd   :  { %2088 = vmatpush1.bf16.msra.mxu0 %v4231_v9  ;;  %3157 = vmatpush3.bf16.msra.mxu1 %v4257_v14 }
 0xbde   :  { %2180 = vmatprep.subr.bf16.mxu0 %v4181_v60  ;;  %3162 = vmatprep.subr.bf16.mxu1 %v4719_v50 }
 0xc93   :  { %v2000_v47 = vpop.f32.mrb[60].mxu0  ;;  %v2041_v33 = vpop.f32.mrb[52].mxu1 }
 0xc94   :  { %v2047_v51 = vadd.f32 %v2000_v47, %v1401_v48  ;;  %v2002_v2 = vpop.f32.mrb[61].mxu0  ;;  %v3140_v31 = vpop.f32.mrb[53].mxu1  ;;  %v2061_v59 = vadd.f32 %v4369_v49, %v2041_v33 }
 0xc95   :  { %v2048_v34 = vadd.f32 %v2002_v2, %v1403_v44  ;;  %v2004_v30 = vpop.f32.mrb[62].mxu0  ;;  %v2044_v1 = vpop.f32.mrb[54].mxu1 }
 0xc96   :  { %v2694_v58 = vmul.f32 -1.442695, %v2047_v51  ;;  %v2005_v55 = vpop.f32.mrb[63].mxu0  ;;  %v3141_v56 = vpop.f32.mrb[55].mxu1 }
 0xc97   :  { %v2695_v15 = vmul.f32 -1.442695, %v2048_v34 }
 0xc98   :  { %3499 = vpow2.f32 %v2694_v58 }
 0xc99   :  { %3501 = vpow2.f32 %v2695_v15 }
 0xca2   :  { %v3500_v0 = vpop.eup %3499 }
 0xca3   :  { %v2055_v41 = vadd.f32 1.0, %v3500_v0  ;;  %v3502_v57 = vpop.eup %3501 }
 0xca4   :  { %v2056_v29 = vadd.f32 1.0, %v3502_v57 }
 0xca5   :  { %3503 = vrcp.f32 %v2055_v41 }
 0xcaf   :  { %v3504_v40 = vpop.eup %3503 }
 0xcb0   :  { %v2062_v36 = vmul.f32 %v3504_v40, %v2061_v59  ;;  %v1476_v40 = vadd.f32 %v4348_v39, %v4371_v46 }
 0xcb2   :  { %v2063_v22 = vadd.f32 %v2062_v36, %v1471_v53 }
 0xcb4   :  { %3505 = vtanh.f32 %v2063_v22 }
 0xcb5   :  { %3507 = vrcp.f32 %v2056_v29 }
 0xcbe   :  { %v3506_v42 = vpop.eup %3505 }
 0xcbf   :  { %v2065_v19 = vsub.f32 %v4470_v17, %v3506_v42  ;;  %v3508_v48 = vpop.eup %3507  ;;  %v1409_v17 = vadd.f32 %v4292_v20, %v4360_v54 }
 0xcc1   :  { %v2066_v44 = vmul.f32 %v3508_v48, %v2065_v19 }
 0xcc3   :  { %v4517_v47 = vadd.f32 %v3506_v42, %v2066_v44 }
 0xcc5   :  { %v2072_v51 = vpack.c.bf16 %v4517_v47, %v4517_v47 }
 0xcc7   :  { %2106 = vmatmul.mubr.bf16.vlgmr.msra.gmra.mrb[64].mxu0 %v2072_v51  ;;  %3159 = vmatmul.mubr.bf16.vlgmr.msra.gmra.mrb[56].mxu1 %v2072_v51 }
 0xcc8   :  { %2181 = vmatpush1.bf16.msra.mxu0 %v4183_v61  ;;  %3163 = vmatpush3.bf16.msra.mxu1 %v4219_v6 }
 0xcc9   :  { %2182 = vmatprep.subr.bf16.mxu0 %v4187_v38  ;;  %3164 = vmatprep.subr.bf16.mxu1 %v4719_v50 }
 0xcca   :  { %2212 = vmatprep.mubr.bf16.mxu0 %v4720_v16  ;;  %3178 = vmatprep.mubr.msk.bf16.mxu1 %vm3699_vm0, %v4719_v50 }
 0xccc   :  { %2183 = vmatpush1.bf16.msra.mxu0 %v4189_v32  ;;  %3165 = vmatpush3.bf16.msra.mxu1 %v4227_v8 }
 0xccd   :  { %2184 = vmatprep.subr.bf16.mxu0 %v4193_v26  ;;  %3166 = vmatprep.subr.bf16.mxu1 %v4719_v50 }
 0xcd0   :  { %2185 = vmatpush1.bf16.msra.mxu0 %v4195_v37  ;;  %3167 = vmatpush3.bf16.msra.mxu1 %v4237_v10 }
 0xcd1   :  { %2186 = vmatprep.subr.bf16.mxu0 %v4199_v62  ;;  %3168 = vmatprep.subr.bf16.mxu1 %v4719_v50 }
 0xcd4   :  { %2187 = vmatpush1.bf16.msra.mxu0 %v4201_v63  ;;  %3169 = vmatpush3.bf16.msra.mxu1 %v4241_v11 }
 0xcd5   :  { %2188 = vmatprep.subr.bf16.mxu0 %v4205_v23  ;;  %3170 = vmatprep.subr.bf16.mxu1 %v4719_v50 }
 0xcd8   :  { %2189 = vmatpush1.bf16.msra.mxu0 %v4207_v27  ;;  %3171 = vmatpush3.bf16.msra.mxu1 %v4245_v12 }
 0xcd9   :  { %2190 = vmatprep.subr.bf16.mxu0 %v4211_v3  ;;  %3172 = vmatprep.subr.bf16.mxu1 %v4719_v50 }
 0xcdc   :  { %2191 = vmatpush1.bf16.msra.mxu0 %v4213_v4  ;;  %3173 = vmatpush3.bf16.msra.mxu1 %v4249_v13 }
 0xcdd   :  { %2192 = vmatprep.subr.bf16.mxu0 %v4217_v5  ;;  %3174 = vmatprep.subr.bf16.mxu1 %v4719_v50 }
 0xce0   :  { %2193 = vmatpush1.bf16.msra.mxu0 %v4221_v7  ;;  %3175 = vmatpush3.bf16.msra.mxu1 %v4253_v25 }
 0xce1   :  { %2194 = vmatprep.subr.bf16.mxu0 %v4223_v24  ;;  %3176 = vmatprep.subr.bf16.mxu1 %v4719_v50 }
 0xce4   :  { %2195 = vmatpush1.bf16.msra.mxu0 %v4231_v9  ;;  %3177 = vmatpush3.bf16.msra.mxu1 %v4257_v14 }
 0xce5   :  { %2287 = vmatprep.subr.bf16.mxu0 %v4181_v60  ;;  %3182 = vmatprep.subr.bf16.mxu1 %v4719_v50 }
 0xd9a   :  { %v2107_v33 = vpop.f32.mrb[64].mxu0  ;;  %v2148_v2 = vpop.f32.mrb[56].mxu1 }
 0xd9b   :  { %v2154_v31 = vadd.f32 %v2107_v33, %v1407_v52  ;;  %v2109_v34 = vpop.f32.mrb[65].mxu0  ;;  %v3160_v30 = vpop.f32.mrb[57].mxu1  ;;  %v2168_v20 = vadd.f32 %v4369_v49, %v2148_v2  ;;  %v3572_v2 = vld [vmem:[#allocation8] ss:$12 sps:$4 sm:$0xff]  }
 0xd9c   :  { %v2155_v1 = vadd.f32 %v2109_v34, %v1409_v17  ;;  %v2111_v58 = vpop.f32.mrb[66].mxu0  ;;  %v2151_v55 = vpop.f32.mrb[58].mxu1  ;;  %v3575_v34 = vld [vmem:[#allocation8 + $0x18] ss:$12 sps:$4 sm:$0xff]   ;;  %v3576_v30 = vld [vmem:[#allocation8 + $0x20] ss:$12 sps:$4 sm:$0xff]  }
 0xd9d   :  { %v2696_v56 = vmul.f32 -1.442695, %v2154_v31  ;;  %v2112_v15 = vpop.f32.mrb[67].mxu0  ;;  %v3161_v0 = vpop.f32.mrb[59].mxu1  ;;  %v3574_v31 = vld [vmem:[#allocation8 + $0x1c] ss:$12 sps:$4 sm:$0xff]  }
 0xd9e   :  { %v2697_v60 = vmul.f32 -1.442695, %v2155_v1  ;;  %v3577_v1 = vld [vmem:[#allocation8 + $0x34] ss:$12 sps:$4 sm:$0xff]   ;;  %v3578_v58 = vld [vmem:[#allocation8 + $0x30] ss:$12 sps:$4 sm:$0xff]  }
 0xd9f   :  { %3509 = vpow2.f32 %v2696_v56  ;;  %v3579_v55 = vld [vmem:[#allocation8 + $0x38] ss:$12 sps:$4 sm:$0xff]   ;;  %v3582_v15 = vld [vmem:[#allocation8 + $0x50] ss:$12 sps:$4 sm:$0xff]  }
 0xda0   :  { %3511 = vpow2.f32 %v2697_v60  ;;  %v3580_v56 = vld [vmem:[#allocation8 + $0x4c] ss:$12 sps:$4 sm:$0xff]   ;;  %v3583_v0 = vld [vmem:[#allocation8 + $0x64] ss:$12 sps:$4 sm:$0xff]  }
 0xda1   :  { %v3584_v60 = vld [vmem:[#allocation8 + $0x60] ss:$12 sps:$4 sm:$0xff]  }
 0xda9   :  { %v3510_v41 = vpop.eup %3509 }
 0xdaa   :  { %v2162_v57 = vadd.f32 1.0, %v3510_v41  ;;  %v3512_v18 = vpop.eup %3511  ;;  %v3585_v41 = vld [vmem:[#allocation8 + $0x68] ss:$12 sps:$4 sm:$0xff]  }
 0xdab   :  { %v2163_v22 = vadd.f32 1.0, %v3512_v18  ;;  %v3587_v18 = vld [vmem:[#allocation8 + $0x78] ss:$12 sps:$4 sm:$0xff]  }
 0xdac   :  { %3513 = vrcp.f32 %v2162_v57  ;;  %v3586_v57 = vld [vmem:[#allocation8 + $0x7c] ss:$12 sps:$4 sm:$0xff]  }
 0xdb6   :  { %v3514_v59 = vpop.eup %3513 }
 0xdb7   :  { %v2169_v53 = vmul.f32 %v3514_v59, %v2168_v20  ;;  %v3588_v20 = vld [vmem:[#allocation8 + $0x80] ss:$12 sps:$4 sm:$0xff]  }
 0xdb8   :  { %v3589_v59 = vld [vmem:[#allocation8 + $0x94] ss:$12 sps:$4 sm:$0xff]  }
 0xdb9   :  { %v2170_v36 = vadd.f32 %v2169_v53, %v1476_v40  ;;  %v3590_v40 = vld [vmem:[#allocation8 + $0x90] ss:$12 sps:$4 sm:$0xff]   ;;  %v3591_v53 = vld [vmem:[#allocation8 + $0x98] ss:$12 sps:$4 sm:$0xff]  }
 0xdbb   :  { %3515 = vtanh.f32 %v2170_v36  ;;  %v3592_v36 = vld [vmem:[#allocation8 + $0xac] ss:$12 sps:$4 sm:$0xff]  }
 0xdbc   :  { %3517 = vrcp.f32 %v2163_v22  ;;  %v3593_v22 = vld [vmem:[#allocation8 + $0xa8] ss:$12 sps:$4 sm:$0xff]  }
 0xdc5   :  { %v3516_v29 = vpop.eup %3515 }
 0xdc6   :  { %v2172_v42 = vsub.f32 %v4517_v47, %v3516_v29  ;;  %v3518_v19 = vpop.eup %3517 }
 0xdc8   :  { %v2173_v48 = vmul.f32 %v3518_v19, %v2172_v42  ;;  %v1417_v42 = vadd.f32 %v4342_v35, %v4354_v43  ;;  %v4721_v19 = vld [vmem:[#allocation15_spill] sm:$0xff] }
 0xdca   :  { %v4564_v44 = vadd.f32 %v3516_v29, %v2173_v48  ;;  %v3594_v29 = vld [vmem:[#allocation8 + $0xb0] ss:$12 sps:$4 sm:$0xff]   ;;  %v1419_v48 = vadd.f32 %v4721_v19, %v4360_v54 }
 0xdcc   :  { %v2179_v51 = vpack.c.bf16 %v4564_v44, %v4564_v44 }
 0xdce   :  { %2213 = vmatmul.mubr.bf16.vlgmr.msra.gmra.mrb[68].mxu0 %v2179_v51  ;;  %3179 = vmatmul.mubr.bf16.vlgmr.msra.gmra.mrb[60].mxu1 %v2179_v51 }
 0xdcf   :  { %2288 = vmatpush1.bf16.msra.mxu0 %v4183_v61  ;;  %3183 = vmatpush3.bf16.msra.mxu1 %v4219_v6  ;;  %v3571_v61 = vld [vmem:[#allocation8 + $0x4] ss:$12 sps:$4 sm:$0xff]  }
 0xdd0   :  { %2289 = vmatprep.subr.bf16.mxu0 %v4187_v38  ;;  %3184 = vmatprep.subr.bf16.mxu1 %v4719_v50  ;;  %v1411_v38 = vadd.f32 %v4294_v21, %v4354_v43 }
 0xdd1   :  { %2319 = vmatprep.mubr.bf16.mxu0 %v4720_v16  ;;  %3198 = vmatprep.mubr.msk.bf16.mxu1 %vm3699_vm0, %v4719_v50 }
 0xdd3   :  { %2290 = vmatpush1.bf16.msra.mxu0 %v4189_v32  ;;  %3185 = vmatpush3.bf16.msra.mxu1 %v4227_v8  ;;  %v1413_v32 = vadd.f32 %v4297_v28, %v4360_v54 }
 0xdd4   :  { %2291 = vmatprep.subr.bf16.mxu0 %v4193_v26  ;;  %3186 = vmatprep.subr.bf16.mxu1 %v4719_v50 }
 0xdd7   :  { %2292 = vmatpush1.bf16.msra.mxu0 %v4195_v37  ;;  %3187 = vmatpush3.bf16.msra.mxu1 %v4237_v10 }
 0xdd8   :  { %2293 = vmatprep.subr.bf16.mxu0 %v4199_v62  ;;  %3188 = vmatprep.subr.bf16.mxu1 %v4719_v50 }
 0xddb   :  { %2294 = vmatpush1.bf16.msra.mxu0 %v4201_v63  ;;  %3189 = vmatpush3.bf16.msra.mxu1 %v4241_v11 }
 0xddc   :  { %2295 = vmatprep.subr.bf16.mxu0 %v4205_v23  ;;  %3190 = vmatprep.subr.bf16.mxu1 %v4719_v50 }
 0xddf   :  { %2296 = vmatpush1.bf16.msra.mxu0 %v4207_v27  ;;  %3191 = vmatpush3.bf16.msra.mxu1 %v4245_v12 }
 0xde0   :  { %2297 = vmatprep.subr.bf16.mxu0 %v4211_v3  ;;  %3192 = vmatprep.subr.bf16.mxu1 %v4719_v50 }
 0xde3   :  { %2298 = vmatpush1.bf16.msra.mxu0 %v4213_v4  ;;  %3193 = vmatpush3.bf16.msra.mxu1 %v4249_v13  ;;  %v1479_v13 = vadd.f32 %v4358_v45, %v4371_v46  ;;  %v3573_v45 = vld [vmem:[#allocation8 + $0x8] ss:$12 sps:$4 sm:$0xff]  }
 0xde4   :  { %2299 = vmatprep.subr.bf16.mxu0 %v4217_v5  ;;  %3194 = vmatprep.subr.bf16.mxu1 %v4719_v50 }
 0xde7   :  { %2300 = vmatpush1.bf16.msra.mxu0 %v4221_v7  ;;  %3195 = vmatpush3.bf16.msra.mxu1 %v4253_v25 }
 0xde8   :  { %2301 = vmatprep.subr.bf16.mxu0 %v4223_v24  ;;  %3196 = vmatprep.subr.bf16.mxu1 %v4719_v50 }
 0xdeb   :  { %2302 = vmatpush1.bf16.msra.mxu0 %v4231_v9  ;;  %3197 = vmatpush3.bf16.msra.mxu1 %v4257_v14 }
 0xdec   :  { %2394 = vmatprep.subr.bf16.mxu0 %v3571_v61  ;;  %3202 = vmatprep.subr.bf16.mxu1 %v4719_v50 }
 0xea1   :  { %v2214_v26 = vpop.f32.mrb[68].mxu0  ;;  %v2255_v37 = vpop.f32.mrb[60].mxu1 }
 0xea2   :  { %v2261_v62 = vadd.f32 %v2214_v26, %v1411_v38  ;;  %v2216_v63 = vpop.f32.mrb[69].mxu0  ;;  %v3180_v23 = vpop.f32.mrb[61].mxu1  ;;  %v2275_v11 = vadd.f32 %v4369_v49, %v2255_v37 }
 0xea3   :  { %v2262_v27 = vadd.f32 %v2216_v63, %v1413_v32  ;;  %v2218_v3 = vpop.f32.mrb[70].mxu0  ;;  %v2258_v4 = vpop.f32.mrb[62].mxu1 }
 0xea4   :  { %v2698_v5 = vmul.f32 -1.442695, %v2261_v62  ;;  %v2219_v6 = vpop.f32.mrb[71].mxu0  ;;  %v3181_v7 = vpop.f32.mrb[63].mxu1 }
 0xea5   :  { %v2699_v24 = vmul.f32 -1.442695, %v2262_v27 }
 0xea6   :  { %3519 = vpow2.f32 %v2698_v5 }
 0xea7   :  { %3521 = vpow2.f32 %v2699_v24  ;;  %v4722_v24 = vld [vmem:[#allocation14_spill] sm:$0xff] }
 0xeb0   :  { %v3520_v8 = vpop.eup %3519 }
 0xeb1   :  { %v2269_v9 = vadd.f32 1.0, %v3520_v8  ;;  %v3522_v10 = vpop.eup %3521  ;;  %v1484_v8 = vadd.f32 %v4722_v24, %v4371_v46 }
 0xeb2   :  { %v2270_v21 = vadd.f32 1.0, %v3522_v10 }
 0xeb3   :  { %3523 = vrcp.f32 %v2269_v9 }
 0xebd   :  { %v3524_v12 = vpop.eup %3523 }
 0xebe   :  { %v2276_v25 = vmul.f32 %v3524_v12, %v2275_v11 }
 0xec0   :  { %v2277_v14 = vadd.f32 %v2276_v25, %v1479_v13 }
 0xec2   :  { %3525 = vtanh.f32 %v2277_v14 }
 0xec3   :  { %3527 = vrcp.f32 %v2270_v21 }
 0xecc   :  { %v3526_v28 = vpop.eup %3525 }
 0xecd   :  { %v2279_v39 = vsub.f32 %v4564_v44, %v3526_v28  ;;  %v3528_v47 = vpop.eup %3527 }
 0xecf   :  { %v2280_v52 = vmul.f32 %v3528_v47, %v2279_v39  ;;  %v2496_v39 = vld [vmem:[%s4707_s7] sm:$0xff]  ;;  %v2497_v47 = vld [vmem:[%s4707_s7 + $0x8] sm:$0xff] }
 0xed1   :  { %v4610_v17 = vadd.f32 %v3526_v28, %v2280_v52  ;;  %v3258_v52 = vpack.c.bf16 %v2497_v47, %v2496_v39 }
 0xed3   :  { %v2286_v33 = vpack.c.bf16 %v4610_v17, %v4610_v17 }
 0xed5   :  { %2320 = vmatmul.mubr.bf16.vlgmr.msra.gmra.mrb[72].mxu0 %v2286_v33  ;;  %3199 = vmatmul.mubr.bf16.vlgmr.msra.gmra.mrb[64].mxu1 %v2286_v33  ;;  %v2498_v33 = vld [vmem:[%s4707_s7 + $0x10] sm:$0xff] }
 0xed6   :  { %2395 = vmatpush1.bf16.msra.mxu0 %v3572_v2  ;;  %3203 = vmatpush3.bf16.msra.mxu1 %v3573_v45  ;;  %v2500_v45 = vld [vmem:[%s4707_s7 + $0x20] sm:$0xff] }
 0xed7   :  { %2396 = vmatprep.subr.bf16.mxu0 %v3574_v31  ;;  %3204 = vmatprep.subr.bf16.mxu1 %v4719_v50  ;;  %v2501_v31 = vld [vmem:[%s4707_s7 + $0x28] sm:$0xff] }
 0xed8   :  { %2426 = vmatprep.mubr.bf16.mxu0 %v4720_v16  ;;  %3218 = vmatprep.mubr.msk.bf16.mxu1 %vm3699_vm0, %v4719_v50  ;;  %v3581_v16 = vld [vmem:[#allocation8 + $0x48] ss:$12 sps:$4 sm:$0xff]  }
 0xeda   :  { %2397 = vmatpush1.bf16.msra.mxu0 %v3575_v34  ;;  %3205 = vmatpush3.bf16.msra.mxu1 %v3576_v30  ;;  %v3264_v34 = vpack.c.bf16 %v2501_v31, %v2500_v45  ;;  %v2502_v30 = vld [vmem:[%s4707_s7 + $0x30] sm:$0xff] }
 0xedb   :  { %2398 = vmatprep.subr.bf16.mxu0 %v3577_v1  ;;  %3206 = vmatprep.subr.bf16.mxu1 %v4719_v50  ;;  %v2503_v1 = vld [vmem:[%s4707_s7 + $0x38] sm:$0xff] }
 0xede   :  { %2399 = vmatpush1.bf16.msra.mxu0 %v3578_v58  ;;  %3207 = vmatpush3.bf16.msra.mxu1 %v3579_v55  ;;  %v3267_v58 = vpack.c.bf16 %v2503_v1, %v2502_v30  ;;  %v2504_v55 = vld [vmem:[%s4707_s7 + $0x40] sm:$0xff] }
 0xedf   :  { %2400 = vmatprep.subr.bf16.mxu0 %v3580_v56  ;;  %3208 = vmatprep.subr.bf16.mxu1 %v4719_v50  ;;  %v2505_v56 = vld [vmem:[%s4707_s7 + $0x48] sm:$0xff] }
 0xee2   :  { %2401 = vmatpush1.bf16.msra.mxu0 %v3581_v16  ;;  %3209 = vmatpush3.bf16.msra.mxu1 %v3582_v15  ;;  %v2506_v16 = vld [vmem:[%s4707_s7 + $0x50] sm:$0xff]  ;;  %v3270_v15 = vpack.c.bf16 %v2505_v56, %v2504_v55 }
 0xee3   :  { %2402 = vmatprep.subr.bf16.mxu0 %v3583_v0  ;;  %3210 = vmatprep.subr.bf16.mxu1 %v4719_v50  ;;  %v2507_v0 = vld [vmem:[%s4707_s7 + $0x58] sm:$0xff] }
 0xee6   :  { %2403 = vmatpush1.bf16.msra.mxu0 %v3584_v60  ;;  %3211 = vmatpush3.bf16.msra.mxu1 %v3585_v41  ;;  %v3273_v60 = vpack.c.bf16 %v2507_v0, %v2506_v16  ;;  %v2508_v41 = vld [vmem:[%s4707_s7 + $0x60] sm:$0xff] }
 0xee7   :  { %2404 = vmatprep.subr.bf16.mxu0 %v3586_v57  ;;  %3212 = vmatprep.subr.bf16.mxu1 %v4719_v50  ;;  %v2509_v57 = vld [vmem:[%s4707_s7 + $0x68] sm:$0xff] }
 0xeea   :  { %2405 = vmatpush1.bf16.msra.mxu0 %v3587_v18  ;;  %3213 = vmatpush3.bf16.msra.mxu1 %v3588_v20  ;;  %v3276_v18 = vpack.c.bf16 %v2509_v57, %v2508_v41  ;;  %v2510_v20 = vld [vmem:[%s4707_s7 + $0x70] sm:$0xff] }
 0xeeb   :  { %2406 = vmatprep.subr.bf16.mxu0 %v3589_v59  ;;  %3214 = vmatprep.subr.bf16.mxu1 %v4719_v50  ;;  %v2511_v59 = vld [vmem:[%s4707_s7 + $0x78] sm:$0xff] }
 0xeee   :  { %2407 = vmatpush1.bf16.msra.mxu0 %v3590_v40  ;;  %3215 = vmatpush3.bf16.msra.mxu1 %v3591_v53  ;;  %v3279_v40 = vpack.c.bf16 %v2511_v59, %v2510_v20  ;;  %v4723_v53 = vld [vmem:[#allocation16_spill] sm:$0xff] }
 0xeef   :  { %2408 = vmatprep.subr.bf16.mxu0 %v3592_v36  ;;  %3216 = vmatprep.subr.bf16.mxu1 %v4719_v50  ;;  %v1421_v36 = vadd.f32 %v4723_v53, %v4354_v43 }
 0xef2   :  { %2409 = vmatpush1.bf16.msra.mxu0 %v3593_v22  ;;  %3217 = vmatpush3.bf16.msra.mxu1 %v3594_v29  ;;  %v4724_v22 = vld [vmem:[#allocation18_spill] sm:$0xff] }
 0xef3   :  { %v1423_v29 = vadd.f32 %v4724_v22, %v4360_v54 }
 0xfa8   :  { %v2321_v44 = vpop.f32.mrb[72].mxu0  ;;  %v2362_v51 = vpop.f32.mrb[64].mxu1 }
 0xfa9   :  { %v2368_v61 = vadd.f32 %v2321_v44, %v1417_v42  ;;  %v2323_v38 = vpop.f32.mrb[73].mxu0  ;;  %v3200_v32 = vpop.f32.mrb[65].mxu1  ;;  %v2382_v6 = vadd.f32 %v4369_v49, %v2362_v51 }
 0xfaa   :  { %v2369_v26 = vadd.f32 %v2323_v38, %v1419_v48  ;;  %v2325_v37 = vpop.f32.mrb[74].mxu0  ;;  %v2365_v62 = vpop.f32.mrb[66].mxu1 }
 0xfab   :  { %v2700_v63 = vmul.f32 -1.442695, %v2368_v61  ;;  %v2326_v23 = vpop.f32.mrb[75].mxu0  ;;  %v3201_v27 = vpop.f32.mrb[67].mxu1 }
 0xfac   :  { %v2701_v3 = vmul.f32 -1.442695, %v2369_v26 }
 0xfad   :  { %3529 = vpow2.f32 %v2700_v63 }
 0xfae   :  { %3531 = vpow2.f32 %v2701_v3 }
 0xfb7   :  { %v3530_v4 = vpop.eup %3529 }
 0xfb8   :  { %v2376_v5 = vadd.f32 1.0, %v3530_v4  ;;  %v3532_v35 = vpop.eup %3531  ;;  %v4725_v4 = vld [vmem:[#allocation17_spill] sm:$0xff] }
 0xfb9   :  { %v2377_v11 = vadd.f32 1.0, %v3532_v35 }
 0xfba   :  { %3533 = vrcp.f32 %v2376_v5  ;;  %v1487_v5 = vadd.f32 %v4725_v4, %v4371_v46 }
 0xfc4   :  { %v3534_v7 = vpop.eup %3533 }
 0xfc5   :  { %v2383_v9 = vmul.f32 %v3534_v7, %v2382_v6 }
 0xfc7   :  { %v2384_v10 = vadd.f32 %v2383_v9, %v1484_v8 }
 0xfc9   :  { %3535 = vtanh.f32 %v2384_v10 }
 0xfca   :  { %3537 = vrcp.f32 %v2377_v11 }
 0xfd3   :  { %v3536_v12 = vpop.eup %3535 }
 0xfd4   :  { %v2386_v13 = vsub.f32 %v4610_v17, %v3536_v12  ;;  %v3538_v25 = vpop.eup %3537  ;;  %v3700_v17 = vmov 0.0|0.0  }
 0xfd5   :  { %3257 = vmatprep.subr.bf16.mxu0 %v3700_v17 }
 0xfd6   :  { %v2387_v14 = vmul.f32 %v3538_v25, %v2386_v13 }
 0xfd8   :  { %v4632_v21 = vadd.f32 %v3536_v12, %v2387_v14 }
 0xfda   :  { %v2393_v28 = vpack.c.bf16 %v4632_v21, %v4632_v21 }
 0xfdc   :  { %2427 = vmatmul.mubr.bf16.vlgmr.msra.gmra.mrb[76].mxu0 %v2393_v28  ;;  %3219 = vmatmul.mubr.bf16.vlgmr.msra.gmra.mrb[68].mxu1 %v2393_v28 }
 0xfdd   :  { %3254 = vmatprep.mubr.msk.f32.mxu0 %vm3699_vm0, %v4719_v50  ;;  %3259 = vmatpush3.bf16.msra.mxu0 %v3258_v52  ;;  %v2499_v50 = vld [vmem:[%s4707_s7 + $0x18] sm:$0xff] }
 0xfde   :  { %3260 = vmatprep.subr.bf16.mxu0 %v3700_v17  ;;  %v3261_v2 = vpack.c.bf16 %v2499_v50, %v2498_v33 }
 0xfe1   :  { %3262 = vmatpush3.bf16.msra.mxu0 %v3261_v2 }
 0xfe2   :  { %3263 = vmatprep.subr.bf16.mxu0 %v3700_v17 }
 0xfe5   :  { %3265 = vmatpush3.bf16.msra.mxu0 %v3264_v34 }
 0xfe6   :  { %3266 = vmatprep.subr.bf16.mxu0 %v3700_v17 }
 0xfe9   :  { %3268 = vmatpush3.bf16.msra.mxu0 %v3267_v58 }
 0xfea   :  { %3269 = vmatprep.subr.bf16.mxu0 %v3700_v17 }
 0xfed   :  { %3271 = vmatpush3.bf16.msra.mxu0 %v3270_v15 }
 0xfee   :  { %3272 = vmatprep.subr.bf16.mxu0 %v3700_v17 }
 0xff1   :  { %3274 = vmatpush3.bf16.msra.mxu0 %v3273_v60 }
 0xff2   :  { %3275 = vmatprep.subr.bf16.mxu0 %v3700_v17 }
 0xff5   :  { %3277 = vmatpush3.bf16.msra.mxu0 %v3276_v18 }
 0xff6   :  { %3278 = vmatprep.subr.bf16.mxu0 %v3700_v17 }
 0xff9   :  { %3280 = vmatpush3.bf16.msra.mxu0 %v3279_v40 }
0x10af   :  { %v2428_v42 = vpop.f32.mrb[76].mxu0  ;;  %v2469_v19 = vpop.f32.mrb[68].mxu1 }
0x10b0   :  { %v2475_v48 = vadd.f32 %v2428_v42, %v1421_v36  ;;  %v2430_v44 = vpop.f32.mrb[77].mxu0  ;;  %v3220_v51 = vpop.f32.mrb[69].mxu1  ;;  %v2489_v54 = vadd.f32 %v4369_v49, %v2469_v19  ;;  %v2704_v49 = vld [vmem:[%s4708_s8] ss:$0 sm:$0xff] }
0x10b1   :  { %v2476_v61 = vadd.f32 %v2430_v44, %v1423_v29  ;;  %v2432_v38 = vpop.f32.mrb[78].mxu0  ;;  %v2472_v32 = vpop.f32.mrb[70].mxu1 }
0x10b2   :  { %v2702_v26 = vmul.f32 -1.442695, %v2475_v48  ;;  %v2433_v37 = vpop.f32.mrb[79].mxu0  ;;  %v3221_v62 = vpop.f32.mrb[71].mxu1 }
0x10b3   :  { %v2703_v63 = vmul.f32 -1.442695, %v2476_v61 }
0x10b4   :  { %3539 = vpow2.f32 %v2702_v26 }
0x10b5   :  { %3541 = vpow2.f32 %v2703_v63 }
0x10be   :  { %v3540_v23 = vpop.eup %3539 }
0x10bf   :  { %v2483_v27 = vadd.f32 1.0, %v3540_v23  ;;  %v3542_v43 = vpop.eup %3541 }
0x10c0   :  { %v2484_v7 = vadd.f32 1.0, %v3542_v43 }
0x10c1   :  { %3543 = vrcp.f32 %v2483_v27 }
0x10cb   :  { %v3544_v3 = vpop.eup %3543 }
0x10cc   :  { %v2490_v35 = vmul.f32 %v3544_v3, %v2489_v54 }
0x10ce   :  { %v2491_v6 = vadd.f32 %v2490_v35, %v1487_v5 }
0x10d0   :  { %3545 = vtanh.f32 %v2491_v6 }
0x10d1   :  { %3547 = vrcp.f32 %v2484_v7 }
0x10da   :  { %v3546_v24 = vpop.eup %3545 }
0x10db   :  { %v2493_v8 = vsub.f32 %v4632_v21, %v3546_v24  ;;  %v3548_v9 = vpop.eup %3547 }
0x10dd   :  { %v2494_v10 = vmul.f32 %v3548_v9, %v2493_v8 }
0x10df   :  { %v2495_v11 = vadd.f32 %v3546_v24, %v2494_v10 }
0x10e1   :  { %3255 = vmatmul.mubr.f32.vlgmr.msra.gmra.mrb[80].mxu0 %v2495_v11 }
0x11b4   :  { %v2585_v12 = vpop.f32.mrb[80].mxu0 }
0x11b5   :  { %v2586_v13 = vadd.f32 %v2704_v49, %v2585_v12  ;;  %v3256_v46 = vpop.f32.mrb[81].mxu0 }
0x11b7   :  { %2590 = vst.msk [vmem:[%s4709_s9] sm:$0xff] %vm2589_vm1, %v2586_v13 }
0x11b8   :  { %2595 = vsyncpa [#allocation5], 1 }
0x11b9   :  { %2596 = vsyncpa [#allocation7], 1 }
0x11ba   :  { %2597 = vsyncpa [#allocation10], 1 }

</bundles_post_ra>
